<compile_context>
chip_gen: v7x
topology: tpu7x:2x2x1
jax: 0.10.0
libtpu: 0.0.40
codegen_flags: <defaults>
</compile_context>

<pallas_src>
import jax
import jax.numpy as jnp
from jax.experimental import pallas as pl
from jax.experimental.pallas import tpu as pltpu

# ---- static problem sizes ----------------------------------------------------
B, S = 2, 8                      # batch, spatial extent per axis (D=3)
PLANES = 16
EXP = 4                          # Bottleneck.EXPANSION
COUT = PLANES * EXP              # 64
CIN = COUT                       # inplanes = planes*EXPANSION (downsample=None)
RED = 16                         # SE reduction
CSQ = COUT // RED                # 4
EPS = 1e-5
NPTS = B * S * S * S             # 1024 "sparse" points

ROWS = B * S * S                 # 128 rows: (b, z, y)
L1 = S * PLANES                  # 128 packed lanes: x*PLANES + c
L3 = S * COUT                    # 512 packed lanes: x*COUT + c
KTAPS = 9                        # (dz, dy) taps; dx folded into the weight


def _bn_packed(h, gamma_t, beta_t, ch):
    """Training-mode BatchNorm1d (biased variance) on a lane-packed activation.

    h: (ROWS, S*ch) with lane = x*ch + c.  gamma_t/beta_t are pre-tiled to
    (1, S*ch).  Statistics are per channel c over all ROWS*S points, in f32.
    """
    n = h.shape[0] * S
    lane_sum = jnp.sum(h, axis=0, keepdims=True)              # (1, S*ch)
    ch_sum = lane_sum[:, 0:ch]
    for g in range(1, S):                                     # fold the S x-groups
        ch_sum = ch_sum + lane_sum[:, g * ch:(g + 1) * ch]
    mean_t = jnp.concatenate([ch_sum * (1.0 / n)] * S, axis=1)
    d = h - mean_t
    lane_ssq = jnp.sum(d * d, axis=0, keepdims=True)
    ch_ssq = lane_ssq[:, 0:ch]
    for g in range(1, S):
        ch_ssq = ch_ssq + lane_ssq[:, g * ch:(g + 1) * ch]
    inv_t = jnp.concatenate([jax.lax.rsqrt(ch_ssq * (1.0 / n) + EPS)] * S, axis=1)
    return d * inv_t * gamma_t + beta_t


def se_bottleneck_kernel(
    x_ref,                                   # (ROWS, L3) f32, lane = x*CIN + c
    w1_ref, g1_ref, b1_ref,                  # (L3, L1) bf16, (1, L1) f32 x2
    w2_ref, g2_ref, b2_ref,                  # (KTAPS*L1, L1) bf16, (1, L1) f32 x2
    w3_ref, g3_ref, b3_ref,                  # (L1, L3) bf16, (1, L3) f32 x2
    wfc1_ref, bfc1_ref, wfc2_ref, bfc2_ref,  # SE MLP, f32
    out_ref,                                 # (ROWS, L3) f32
    pz_ref,                                  # VMEM (B, S+2, S+2, L1) bf16: z/y halo
    col_ref,                                 # VMEM (ROWS, KTAPS*L1) bf16: im2col
):
    # ---- conv1 (1x1x1) -> bn1 -> relu : one block-diagonal bf16 matmul -------
    xb = x_ref[...].astype(jnp.bfloat16)
    h1 = jnp.dot(xb, w1_ref[...], preferred_element_type=jnp.float32)   # (ROWS, L1)
    h1 = jnp.maximum(_bn_packed(h1, g1_ref[...], b1_ref[...], PLANES), 0.0)
    h1b = h1.astype(jnp.bfloat16)

    # ---- conv2 (3x3x3) -> bn2 -> relu : ONE im2col bf16 matmul ---------------
    # Small, lane-dense halo buffer; its zeros implement the z/y padding.
    pz_ref[...] = jnp.zeros((B, S + 2, S + 2, L1), jnp.bfloat16)
    pz_ref[:, 1:S + 1, 1:S + 1, :] = h1b.reshape(B, S, S, L1)
    for k in range(KTAPS):                       # 9 aligned, full-width column writes
        dz, dy = divmod(k, 3)
        v = pz_ref[:, dz:dz + S, dy:dy + S, :]   # (B, S, S, L1)
        col_ref[:, k * L1:(k + 1) * L1] = v.reshape(ROWS, L1)
    h2 = jnp.dot(col_ref[...], w2_ref[...], preferred_element_type=jnp.float32)
    h2 = jnp.maximum(_bn_packed(h2, g2_ref[...], b2_ref[...], PLANES), 0.0)

    # ---- conv3 (1x1x1) -> bn3 : one block-diagonal bf16 matmul ---------------
    h3 = jnp.dot(h2.astype(jnp.bfloat16), w3_ref[...],
                 preferred_element_type=jnp.float32)                    # (ROWS, L3)
    h3 = _bn_packed(h3, g3_ref[...], b3_ref[...], COUT)

    # ---- SE: per-sample global average pool -> tiny MLP -> broadcast mul -----
    rows_per_b = ROWS // B
    s = jnp.concatenate(
        [jnp.sum(h3[b * rows_per_b:(b + 1) * rows_per_b, :], axis=0, keepdims=True)
         for b in range(B)], axis=0)                                    # (B, L3)
    pooled = s[:, 0:COUT]
    for g in range(1, S):                                               # fold x groups
        pooled = pooled + s[:, g * COUT:(g + 1) * COUT]
    y = pooled * (1.0 / (S * S * S))                                    # (B, COUT)
    y = jnp.maximum(
        jnp.dot(y, wfc1_ref[...], preferred_element_type=jnp.float32) + bfc1_ref[...],
        0.0)
    y = jax.nn.sigmoid(
        jnp.dot(y, wfc2_ref[...], preferred_element_type=jnp.float32) + bfc2_ref[...])
    y_lane = jnp.concatenate([y] * S, axis=1)                           # (B, L3)
    scale = jnp.concatenate(
        [jnp.broadcast_to(y_lane[b:b + 1, :], (rows_per_b, L3)) for b in range(B)],
        axis=0)                                                         # (ROWS, L3)
    h3 = h3 * scale

    # ---- residual add + relu (full-width lane-dense store) -------------------
    out_ref[...] = jnp.maximum(h3 + x_ref[...], 0.0)


@jax.jit
def se_bottleneck(x, packed_params):
    # Lane-dense 2-D slab at the pallas_call boundary: row=(b,z,y), lane=x*C+c.
    xp = x.reshape(ROWS, L3)
    n_in = 1 + len(packed_params)
    out2d = pl.pallas_call(
        se_bottleneck_kernel,
        out_shape=jax.ShapeDtypeStruct((ROWS, L3), jnp.float32),
        in_specs=[pl.BlockSpec(memory_space=pltpu.MemorySpace.VMEM)] * n_in,
        out_specs=pl.BlockSpec(memory_space=pltpu.MemorySpace.VMEM),
        scratch_shapes=[
            pltpu.VMEM((B, S + 2, S + 2, L1), jnp.bfloat16),   # z/y halo buffer
            pltpu.VMEM((ROWS, KTAPS * L1), jnp.bfloat16),      # im2col columns
        ],
    )(xp, *packed_params)
    return out2d.reshape(B, S, S, S, COUT)


def init_params(key):
    ks = jax.random.split(key, 8)
    scale = 0.1
    w1 = scale * jax.random.normal(ks[0], (CIN, PLANES), jnp.float32)
    w2 = scale * jax.random.normal(ks[1], (27, PLANES, PLANES), jnp.float32)
    w3 = scale * jax.random.normal(ks[2], (PLANES, COUT), jnp.float32)
    g1 = jnp.ones((1, PLANES), jnp.float32)
    b1 = jnp.zeros((1, PLANES), jnp.float32)
    g2 = 1.0 + 0.05 * jax.random.normal(ks[3], (1, PLANES), jnp.float32)
    b2 = 0.05 * jax.random.normal(ks[4], (1, PLANES), jnp.float32)
    g3 = jnp.ones((1, COUT), jnp.float32)
    b3 = jnp.zeros((1, COUT), jnp.float32)
    wfc1 = scale * jax.random.normal(ks[5], (COUT, CSQ), jnp.float32)
    bfc1 = jnp.zeros((1, CSQ), jnp.float32)
    wfc2 = scale * jax.random.normal(ks[6], (CSQ, COUT), jnp.float32)
    bfc2 = jnp.zeros((1, COUT), jnp.float32)
    return (w1, g1, b1, w2, g2, b2, w3, g3, b3, wfc1, bfc1, wfc2, bfc2)


def pack_params(params):
    """Host-side packing into the lane-dense kernel layout (constant plumbing)."""
    (w1, g1, b1, w2, g2, b2, w3, g3, b3, wfc1, bfc1, wfc2, bfc2) = params
    eye = jnp.eye(S, dtype=jnp.float32)
    # conv1 / conv3 -> block-diagonal weights acting on the packed lane layout.
    w1b = jnp.kron(eye, w1).astype(jnp.bfloat16)                  # (S*CIN, S*PLANES)
    w3b = jnp.kron(eye, w3).astype(jnp.bfloat16)                  # (S*PLANES, S*COUT)
    # conv2 -> stacked block-tridiagonal weight: the dx tap is folded into the
    # weight, leaving only the 9 (dz, dy) taps for the in-kernel im2col.
    blocks = w2.reshape(KTAPS, 3, PLANES, PLANES)                 # [dz*3+dy, dx, ci, co]
    xi = jnp.arange(S)[:, None]                                   # source x
    xo = jnp.arange(S)[None, :]                                   # output x
    d = xi - xo + 1
    valid = (d >= 0) & (d <= 2)
    sel = blocks[:, jnp.clip(d, 0, 2), :, :]                      # (9, S, S, P, P)
    sel = jnp.where(valid[None, :, :, None, None], sel, 0.0)
    w2s = jnp.transpose(sel, (0, 1, 3, 2, 4)).reshape(KTAPS * L1, L1)
    w2s = w2s.astype(jnp.bfloat16)                                # (1152, 128)
    # gamma/beta pre-tiled to the packed lane width (lane = x*ch + c).
    g1t, b1t = jnp.tile(g1, (1, S)), jnp.tile(b1, (1, S))         # (1, L1)
    g2t, b2t = jnp.tile(g2, (1, S)), jnp.tile(b2, (1, S))         # (1, L1)
    g3t, b3t = jnp.tile(g3, (1, S)), jnp.tile(b3, (1, S))         # (1, L3)
    return (w1b, g1t, b1t, w2s, g2t, b2t, w3b, g3t, b3t, wfc1, bfc1, wfc2, bfc2)


def se_bottleneck_ref(x, params):
    """Plain-JAX reference with the same bf16-operand / f32-accumulate matmuls."""
    (w1, g1, b1, w2, g2, b2, w3, g3, b3, wfc1, bfc1, wfc2, bfc2) = params
    bf = jnp.bfloat16

    def bn(h, g, bt):
        m = jnp.mean(h, axis=0, keepdims=True)
        v = jnp.mean((h - m) ** 2, axis=0, keepdims=True)
        return (h - m) * jax.lax.rsqrt(v + EPS) * g + bt

    xf = x.reshape(NPTS, CIN)
    h = jnp.dot(xf.astype(bf), w1.astype(bf), preferred_element_type=jnp.float32)
    h = jnp.maximum(bn(h, g1, b1), 0.0)
    hp = jnp.pad(h.reshape(B, S, S, S, PLANES),
                 ((0, 0), (1, 1), (1, 1), (1, 1), (0, 0)))
    acc = jnp.zeros((NPTS, PLANES), jnp.float32)
    k = 0
    for dz in range(3):
        for dy in range(3):
            for dx in range(3):
                sh = hp[:, dz:dz + S, dy:dy + S, dx:dx + S, :].reshape(NPTS, PLANES)
                acc = acc + jnp.dot(sh.astype(bf), w2[k].astype(bf),
                                    preferred_element_type=jnp.float32)
                k += 1
    h = jnp.maximum(bn(acc, g2, b2), 0.0)
    h = jnp.dot(h.astype(bf), w3.astype(bf), preferred_element_type=jnp.float32)
    h = bn(h, g3, b3)
    hb = h.reshape(B, S * S * S, COUT)
    y = jnp.mean(hb, axis=1)
    y = jnp.maximum(jnp.dot(y, wfc1) + bfc1, 0.0)
    y = jax.nn.sigmoid(jnp.dot(y, wfc2) + bfc2)
    h = (hb * y[:, None, :]).reshape(NPTS, COUT)
    return jnp.maximum(h + xf, 0.0).reshape(B, S, S, S, COUT)


if __name__ == "__main__":
    key = jax.random.PRNGKey(0)
    kx, kp = jax.random.split(key)
    x = jax.random.normal(kx, (B, S, S, S, CIN), jnp.float32)
    params = init_params(kp)
    packed = pack_params(params)

    out = jax.block_until_ready(se_bottleneck(x, packed))
    ref = jax.block_until_ready(jax.jit(se_bottleneck_ref)(x, params))

    assert out.shape == (B, S, S, S, COUT)
    assert bool(jnp.all(jnp.isfinite(out)))
    assert bool(jnp.all(out >= 0.0))                       # final ReLU
    assert float(jnp.max(jnp.abs(out - ref))) < 1e-2       # matches plain-JAX forward
    print("KERNEL_OK")
</pallas_src>

<mosaic_0001>
module attributes {stable_mosaic.version = 11 : i64} {
  func.func @se_bottleneck_kernel(%arg0: memref<128x512xf32, #tpu.memory_space<vmem>>, %arg1: memref<512x128xbf16, #tpu.memory_space<vmem>>, %arg2: memref<1x128xf32, #tpu.memory_space<vmem>>, %arg3: memref<1x128xf32, #tpu.memory_space<vmem>>, %arg4: memref<1152x128xbf16, #tpu.memory_space<vmem>>, %arg5: memref<1x128xf32, #tpu.memory_space<vmem>>, %arg6: memref<1x128xf32, #tpu.memory_space<vmem>>, %arg7: memref<128x512xbf16, #tpu.memory_space<vmem>>, %arg8: memref<1x512xf32, #tpu.memory_space<vmem>>, %arg9: memref<1x512xf32, #tpu.memory_space<vmem>>, %arg10: memref<64x4xf32, #tpu.memory_space<vmem>>, %arg11: memref<1x4xf32, #tpu.memory_space<vmem>>, %arg12: memref<4x64xf32, #tpu.memory_space<vmem>>, %arg13: memref<1x64xf32, #tpu.memory_space<vmem>>, %arg14: memref<128x512xf32, #tpu.memory_space<vmem>>, %arg15: memref<2x10x10x128xbf16, #tpu.memory_space<vmem>>, %arg16: memref<128x1152xbf16, #tpu.memory_space<vmem>>) attributes {dimension_semantics = [], scalar_prefetch = 0 : i64, scratch_operands = 2 : i64, tpu.core_type = #tpu.core_type<tc>} {
    %c0 = arith.constant 0 : index
    %c0_0 = arith.constant 0 : index
    %0 = vector.load %arg0[%c0, %c0_0] : memref<128x512xf32, #tpu.memory_space<vmem>>, vector<128x512xf32>
    %1 = arith.truncf %0 : vector<128x512xf32> to vector<128x512xbf16>
    %c0_1 = arith.constant 0 : index
    %c0_2 = arith.constant 0 : index
    %2 = vector.load %arg1[%c0_1, %c0_2] : memref<512x128xbf16, #tpu.memory_space<vmem>>, vector<512x128xbf16>
    %cst = arith.constant dense<0.000000e+00> : vector<128x128xf32>
    %3 = tpu.matmul %1, %2, %cst {dimension_numbers = #tpu.dot_dimension_numbers<[1], [0], [0], [1], [0, 0, 1, 1], [], []>} : vector<128x512xbf16>, vector<512x128xbf16>, vector<128x128xf32> -> vector<128x128xf32>
    %c0_3 = arith.constant 0 : index
    %c0_4 = arith.constant 0 : index
    %4 = vector.load %arg2[%c0_3, %c0_4] : memref<1x128xf32, #tpu.memory_space<vmem>>, vector<1x128xf32>
    %c0_5 = arith.constant 0 : index
    %c0_6 = arith.constant 0 : index
    %5 = vector.load %arg3[%c0_5, %c0_6] : memref<1x128xf32, #tpu.memory_space<vmem>>, vector<1x128xf32>
    %cst_7 = arith.constant dense<0.000000e+00> : vector<128xf32>
    %6 = vector.multi_reduction <add>, %3, %cst_7 [0] : vector<128x128xf32> to vector<128xf32>
    %7 = vector.shape_cast %6 : vector<128xf32> to vector<1x128xf32>
    %8 = vector.extract_strided_slice %7 {offsets = [0, 0], sizes = [1, 16], strides = [1, 1]} : vector<1x128xf32> to vector<1x16xf32>
    %9 = vector.extract_strided_slice %7 {offsets = [0, 16], sizes = [1, 16], strides = [1, 1]} : vector<1x128xf32> to vector<1x16xf32>
    %10 = arith.addf %8, %9 : vector<1x16xf32>
    %11 = vector.extract_strided_slice %7 {offsets = [0, 32], sizes = [1, 16], strides = [1, 1]} : vector<1x128xf32> to vector<1x16xf32>
    %12 = arith.addf %10, %11 : vector<1x16xf32>
    %13 = vector.extract_strided_slice %7 {offsets = [0, 48], sizes = [1, 16], strides = [1, 1]} : vector<1x128xf32> to vector<1x16xf32>
    %14 = arith.addf %12, %13 : vector<1x16xf32>
    %15 = vector.extract_strided_slice %7 {offsets = [0, 64], sizes = [1, 16], strides = [1, 1]} : vector<1x128xf32> to vector<1x16xf32>
    %16 = arith.addf %14, %15 : vector<1x16xf32>
    %17 = vector.extract_strided_slice %7 {offsets = [0, 80], sizes = [1, 16], strides = [1, 1]} : vector<1x128xf32> to vector<1x16xf32>
    %18 = arith.addf %16, %17 : vector<1x16xf32>
    %19 = vector.extract_strided_slice %7 {offsets = [0, 96], sizes = [1, 16], strides = [1, 1]} : vector<1x128xf32> to vector<1x16xf32>
    %20 = arith.addf %18, %19 : vector<1x16xf32>
    %21 = vector.extract_strided_slice %7 {offsets = [0, 112], sizes = [1, 16], strides = [1, 1]} : vector<1x128xf32> to vector<1x16xf32>
    %22 = arith.addf %20, %21 : vector<1x16xf32>
    %cst_8 = arith.constant 9.765625E-4 : f32
    %23 = vector.broadcast %cst_8 : f32 to vector<1x16xf32>
    %24 = arith.mulf %22, %23 : vector<1x16xf32>
    %25 = tpu.concatenate %24, %24, %24, %24, %24, %24, %24, %24 in 1 : vector<1x16xf32>, vector<1x16xf32>, vector<1x16xf32>, vector<1x16xf32>, vector<1x16xf32>, vector<1x16xf32>, vector<1x16xf32>, vector<1x16xf32> -> vector<1x128xf32>
    %26 = vector.broadcast %25 : vector<1x128xf32> to vector<128x128xf32>
    %27 = arith.subf %3, %26 : vector<128x128xf32>
    %28 = arith.mulf %27, %27 : vector<128x128xf32>
    %cst_9 = arith.constant dense<0.000000e+00> : vector<128xf32>
    %29 = vector.multi_reduction <add>, %28, %cst_9 [0] : vector<128x128xf32> to vector<128xf32>
    %30 = vector.shape_cast %29 : vector<128xf32> to vector<1x128xf32>
    %31 = vector.extract_strided_slice %30 {offsets = [0, 0], sizes = [1, 16], strides = [1, 1]} : vector<1x128xf32> to vector<1x16xf32>
    %32 = vector.extract_strided_slice %30 {offsets = [0, 16], sizes = [1, 16], strides = [1, 1]} : vector<1x128xf32> to vector<1x16xf32>
    %33 = arith.addf %31, %32 : vector<1x16xf32>
    %34 = vector.extract_strided_slice %30 {offsets = [0, 32], sizes = [1, 16], strides = [1, 1]} : vector<1x128xf32> to vector<1x16xf32>
    %35 = arith.addf %33, %34 : vector<1x16xf32>
    %36 = vector.extract_strided_slice %30 {offsets = [0, 48], sizes = [1, 16], strides = [1, 1]} : vector<1x128xf32> to vector<1x16xf32>
    %37 = arith.addf %35, %36 : vector<1x16xf32>
    %38 = vector.extract_strided_slice %30 {offsets = [0, 64], sizes = [1, 16], strides = [1, 1]} : vector<1x128xf32> to vector<1x16xf32>
    %39 = arith.addf %37, %38 : vector<1x16xf32>
    %40 = vector.extract_strided_slice %30 {offsets = [0, 80], sizes = [1, 16], strides = [1, 1]} : vector<1x128xf32> to vector<1x16xf32>
    %41 = arith.addf %39, %40 : vector<1x16xf32>
    %42 = vector.extract_strided_slice %30 {offsets = [0, 96], sizes = [1, 16], strides = [1, 1]} : vector<1x128xf32> to vector<1x16xf32>
    %43 = arith.addf %41, %42 : vector<1x16xf32>
    %44 = vector.extract_strided_slice %30 {offsets = [0, 112], sizes = [1, 16], strides = [1, 1]} : vector<1x128xf32> to vector<1x16xf32>
    %45 = arith.addf %43, %44 : vector<1x16xf32>
    %cst_10 = arith.constant 9.765625E-4 : f32
    %46 = vector.broadcast %cst_10 : f32 to vector<1x16xf32>
    %47 = arith.mulf %45, %46 : vector<1x16xf32>
    %cst_11 = arith.constant 9.99999974E-6 : f32
    %48 = vector.broadcast %cst_11 : f32 to vector<1x16xf32>
    %49 = arith.addf %47, %48 : vector<1x16xf32>
    %50 = math.rsqrt %49 : vector<1x16xf32>
    %51 = tpu.concatenate %50, %50, %50, %50, %50, %50, %50, %50 in 1 : vector<1x16xf32>, vector<1x16xf32>, vector<1x16xf32>, vector<1x16xf32>, vector<1x16xf32>, vector<1x16xf32>, vector<1x16xf32>, vector<1x16xf32> -> vector<1x128xf32>
    %52 = vector.broadcast %51 : vector<1x128xf32> to vector<128x128xf32>
    %53 = arith.mulf %27, %52 : vector<128x128xf32>
    %54 = vector.broadcast %4 : vector<1x128xf32> to vector<128x128xf32>
    %55 = arith.mulf %53, %54 : vector<128x128xf32>
    %56 = vector.broadcast %5 : vector<1x128xf32> to vector<128x128xf32>
    %57 = arith.addf %55, %56 : vector<128x128xf32>
    %cst_12 = arith.constant 0.000000e+00 : f32
    %58 = vector.broadcast %cst_12 : f32 to vector<128x128xf32>
    %59 = arith.maximumf %57, %58 : vector<128x128xf32>
    %60 = arith.truncf %59 : vector<128x128xf32> to vector<128x128xbf16>
    %cst_13 = arith.constant 0.000000e+00 : bf16
    %61 = vector.broadcast %cst_13 : bf16 to vector<2x10x10x128xbf16>
    %c0_14 = arith.constant 0 : index
    %c0_15 = arith.constant 0 : index
    %c0_16 = arith.constant 0 : index
    %c0_17 = arith.constant 0 : index
    %62 = vector.load %arg15[%c0_14, %c0_15, %c0_16, %c0_17] : memref<2x10x10x128xbf16, #tpu.memory_space<vmem>>, vector<2x10x10x128xbf16>
    tpu.vector_store %arg15[%c0_14, %c0_15, %c0_16, %c0_17], %61 {strides = array<i32>} : memref<2x10x10x128xbf16, #tpu.memory_space<vmem>>, vector<2x10x10x128xbf16>,
    %63 = vector.shape_cast %60 : vector<128x128xbf16> to vector<2x8x8x128xbf16>
    %c0_18 = arith.constant 0 : index
    %c1 = arith.constant 1 : index
    %c1_19 = arith.constant 1 : index
    %c0_20 = arith.constant 0 : index
    %64 = vector.load %arg15[%c0_18, %c1, %c1_19, %c0_20] : memref<2x10x10x128xbf16, #tpu.memory_space<vmem>>, vector<2x8x8x128xbf16>
    tpu.vector_store %arg15[%c0_18, %c1, %c1_19, %c0_20], %63 {strides = array<i32>} : memref<2x10x10x128xbf16, #tpu.memory_space<vmem>>, vector<2x8x8x128xbf16>,
    %c0_21 = arith.constant 0 : index
    %c0_22 = arith.constant 0 : index
    %c0_23 = arith.constant 0 : index
    %c0_24 = arith.constant 0 : index
    %65 = vector.load %arg15[%c0_21, %c0_22, %c0_23, %c0_24] : memref<2x10x10x128xbf16, #tpu.memory_space<vmem>>, vector<2x8x8x128xbf16>
    %66 = vector.shape_cast %65 : vector<2x8x8x128xbf16> to vector<128x128xbf16>
    %c0_25 = arith.constant 0 : index
    %c0_26 = arith.constant 0 : index
    %67 = vector.load %arg16[%c0_25, %c0_26] : memref<128x1152xbf16, #tpu.memory_space<vmem>>, vector<128x128xbf16>
    tpu.vector_store %arg16[%c0_25, %c0_26], %66 {strides = array<i32>} : memref<128x1152xbf16, #tpu.memory_space<vmem>>, vector<128x128xbf16>,
    %c0_27 = arith.constant 0 : index
    %c0_28 = arith.constant 0 : index
    %c1_29 = arith.constant 1 : index
    %c0_30 = arith.constant 0 : index
    %68 = vector.load %arg15[%c0_27, %c0_28, %c1_29, %c0_30] : memref<2x10x10x128xbf16, #tpu.memory_space<vmem>>, vector<2x8x8x128xbf16>
    %69 = vector.shape_cast %68 : vector<2x8x8x128xbf16> to vector<128x128xbf16>
    %c0_31 = arith.constant 0 : index
    %c128 = arith.constant 128 : index
    %70 = vector.load %arg16[%c0_31, %c128] : memref<128x1152xbf16, #tpu.memory_space<vmem>>, vector<128x128xbf16>
    tpu.vector_store %arg16[%c0_31, %c128], %69 {strides = array<i32>} : memref<128x1152xbf16, #tpu.memory_space<vmem>>, vector<128x128xbf16>,
    %c0_32 = arith.constant 0 : index
    %c0_33 = arith.constant 0 : index
    %c2 = arith.constant 2 : index
    %c0_34 = arith.constant 0 : index
    %71 = vector.load %arg15[%c0_32, %c0_33, %c2, %c0_34] : memref<2x10x10x128xbf16, #tpu.memory_space<vmem>>, vector<2x8x8x128xbf16>
    %72 = vector.shape_cast %71 : vector<2x8x8x128xbf16> to vector<128x128xbf16>
    %c0_35 = arith.constant 0 : index
    %c256 = arith.constant 256 : index
    %73 = vector.load %arg16[%c0_35, %c256] : memref<128x1152xbf16, #tpu.memory_space<vmem>>, vector<128x128xbf16>
    tpu.vector_store %arg16[%c0_35, %c256], %72 {strides = array<i32>} : memref<128x1152xbf16, #tpu.memory_space<vmem>>, vector<128x128xbf16>,
    %c0_36 = arith.constant 0 : index
    %c1_37 = arith.constant 1 : index
    %c0_38 = arith.constant 0 : index
    %c0_39 = arith.constant 0 : index
    %74 = vector.load %arg15[%c0_36, %c1_37, %c0_38, %c0_39] : memref<2x10x10x128xbf16, #tpu.memory_space<vmem>>, vector<2x8x8x128xbf16>
    %75 = vector.shape_cast %74 : vector<2x8x8x128xbf16> to vector<128x128xbf16>
    %c0_40 = arith.constant 0 : index
    %c384 = arith.constant 384 : index
    %76 = vector.load %arg16[%c0_40, %c384] : memref<128x1152xbf16, #tpu.memory_space<vmem>>, vector<128x128xbf16>
    tpu.vector_store %arg16[%c0_40, %c384], %75 {strides = array<i32>} : memref<128x1152xbf16, #tpu.memory_space<vmem>>, vector<128x128xbf16>,
    %c0_41 = arith.constant 0 : index
    %c1_42 = arith.constant 1 : index
    %c1_43 = arith.constant 1 : index
    %c0_44 = arith.constant 0 : index
    %77 = vector.load %arg15[%c0_41, %c1_42, %c1_43, %c0_44] : memref<2x10x10x128xbf16, #tpu.memory_space<vmem>>, vector<2x8x8x128xbf16>
    %78 = vector.shape_cast %77 : vector<2x8x8x128xbf16> to vector<128x128xbf16>
    %c0_45 = arith.constant 0 : index
    %c512 = arith.constant 512 : index
    %79 = vector.load %arg16[%c0_45, %c512] : memref<128x1152xbf16, #tpu.memory_space<vmem>>, vector<128x128xbf16>
    tpu.vector_store %arg16[%c0_45, %c512], %78 {strides = array<i32>} : memref<128x1152xbf16, #tpu.memory_space<vmem>>, vector<128x128xbf16>,
    %c0_46 = arith.constant 0 : index
    %c1_47 = arith.constant 1 : index
    %c2_48 = arith.constant 2 : index
    %c0_49 = arith.constant 0 : index
    %80 = vector.load %arg15[%c0_46, %c1_47, %c2_48, %c0_49] : memref<2x10x10x128xbf16, #tpu.memory_space<vmem>>, vector<2x8x8x128xbf16>
    %81 = vector.shape_cast %80 : vector<2x8x8x128xbf16> to vector<128x128xbf16>
    %c0_50 = arith.constant 0 : index
    %c640 = arith.constant 640 : index
    %82 = vector.load %arg16[%c0_50, %c640] : memref<128x1152xbf16, #tpu.memory_space<vmem>>, vector<128x128xbf16>
    tpu.vector_store %arg16[%c0_50, %c640], %81 {strides = array<i32>} : memref<128x1152xbf16, #tpu.memory_space<vmem>>, vector<128x128xbf16>,
    %c0_51 = arith.constant 0 : index
    %c2_52 = arith.constant 2 : index
    %c0_53 = arith.constant 0 : index
    %c0_54 = arith.constant 0 : index
    %83 = vector.load %arg15[%c0_51, %c2_52, %c0_53, %c0_54] : memref<2x10x10x128xbf16, #tpu.memory_space<vmem>>, vector<2x8x8x128xbf16>
    %84 = vector.shape_cast %83 : vector<2x8x8x128xbf16> to vector<128x128xbf16>
    %c0_55 = arith.constant 0 : index
    %c768 = arith.constant 768 : index
    %85 = vector.load %arg16[%c0_55, %c768] : memref<128x1152xbf16, #tpu.memory_space<vmem>>, vector<128x128xbf16>
    tpu.vector_store %arg16[%c0_55, %c768], %84 {strides = array<i32>} : memref<128x1152xbf16, #tpu.memory_space<vmem>>, vector<128x128xbf16>,
    %c0_56 = arith.constant 0 : index
    %c2_57 = arith.constant 2 : index
    %c1_58 = arith.constant 1 : index
    %c0_59 = arith.constant 0 : index
    %86 = vector.load %arg15[%c0_56, %c2_57, %c1_58, %c0_59] : memref<2x10x10x128xbf16, #tpu.memory_space<vmem>>, vector<2x8x8x128xbf16>
    %87 = vector.shape_cast %86 : vector<2x8x8x128xbf16> to vector<128x128xbf16>
    %c0_60 = arith.constant 0 : index
    %c896 = arith.constant 896 : index
    %88 = vector.load %arg16[%c0_60, %c896] : memref<128x1152xbf16, #tpu.memory_space<vmem>>, vector<128x128xbf16>
    tpu.vector_store %arg16[%c0_60, %c896], %87 {strides = array<i32>} : memref<128x1152xbf16, #tpu.memory_space<vmem>>, vector<128x128xbf16>,
    %c0_61 = arith.constant 0 : index
    %c2_62 = arith.constant 2 : index
    %c2_63 = arith.constant 2 : index
    %c0_64 = arith.constant 0 : index
    %89 = vector.load %arg15[%c0_61, %c2_62, %c2_63, %c0_64] : memref<2x10x10x128xbf16, #tpu.memory_space<vmem>>, vector<2x8x8x128xbf16>
    %90 = vector.shape_cast %89 : vector<2x8x8x128xbf16> to vector<128x128xbf16>
    %c0_65 = arith.constant 0 : index
    %c1024 = arith.constant 1024 : index
    %91 = vector.load %arg16[%c0_65, %c1024] : memref<128x1152xbf16, #tpu.memory_space<vmem>>, vector<128x128xbf16>
    tpu.vector_store %arg16[%c0_65, %c1024], %90 {strides = array<i32>} : memref<128x1152xbf16, #tpu.memory_space<vmem>>, vector<128x128xbf16>,
    %c0_66 = arith.constant 0 : index
    %c0_67 = arith.constant 0 : index
    %92 = vector.load %arg16[%c0_66, %c0_67] : memref<128x1152xbf16, #tpu.memory_space<vmem>>, vector<128x1152xbf16>
    %c0_68 = arith.constant 0 : index
    %c0_69 = arith.constant 0 : index
    %93 = vector.load %arg4[%c0_68, %c0_69] : memref<1152x128xbf16, #tpu.memory_space<vmem>>, vector<1152x128xbf16>
    %cst_70 = arith.constant dense<0.000000e+00> : vector<128x128xf32>
    %94 = tpu.matmul %92, %93, %cst_70 {dimension_numbers = #tpu.dot_dimension_numbers<[1], [0], [0], [1], [0, 0, 1, 1], [], []>} : vector<128x1152xbf16>, vector<1152x128xbf16>, vector<128x128xf32> -> vector<128x128xf32>
    %c0_71 = arith.constant 0 : index
    %c0_72 = arith.constant 0 : index
    %95 = vector.load %arg5[%c0_71, %c0_72] : memref<1x128xf32, #tpu.memory_space<vmem>>, vector<1x128xf32>
    %c0_73 = arith.constant 0 : index
    %c0_74 = arith.constant 0 : index
    %96 = vector.load %arg6[%c0_73, %c0_74] : memref<1x128xf32, #tpu.memory_space<vmem>>, vector<1x128xf32>
    %cst_75 = arith.constant dense<0.000000e+00> : vector<128xf32>
    %97 = vector.multi_reduction <add>, %94, %cst_75 [0] : vector<128x128xf32> to vector<128xf32>
    %98 = vector.shape_cast %97 : vector<128xf32> to vector<1x128xf32>
    %99 = vector.extract_strided_slice %98 {offsets = [0, 0], sizes = [1, 16], strides = [1, 1]} : vector<1x128xf32> to vector<1x16xf32>
    %100 = vector.extract_strided_slice %98 {offsets = [0, 16], sizes = [1, 16], strides = [1, 1]} : vector<1x128xf32> to vector<1x16xf32>
    %101 = arith.addf %99, %100 : vector<1x16xf32>
    %102 = vector.extract_strided_slice %98 {offsets = [0, 32], sizes = [1, 16], strides = [1, 1]} : vector<1x128xf32> to vector<1x16xf32>
    %103 = arith.addf %101, %102 : vector<1x16xf32>
    %104 = vector.extract_strided_slice %98 {offsets = [0, 48], sizes = [1, 16], strides = [1, 1]} : vector<1x128xf32> to vector<1x16xf32>
    %105 = arith.addf %103, %104 : vector<1x16xf32>
    %106 = vector.extract_strided_slice %98 {offsets = [0, 64], sizes = [1, 16], strides = [1, 1]} : vector<1x128xf32> to vector<1x16xf32>
    %107 = arith.addf %105, %106 : vector<1x16xf32>
    %108 = vector.extract_strided_slice %98 {offsets = [0, 80], sizes = [1, 16], strides = [1, 1]} : vector<1x128xf32> to vector<1x16xf32>
    %109 = arith.addf %107, %108 : vector<1x16xf32>
    %110 = vector.extract_strided_slice %98 {offsets = [0, 96], sizes = [1, 16], strides = [1, 1]} : vector<1x128xf32> to vector<1x16xf32>
    %111 = arith.addf %109, %110 : vector<1x16xf32>
    %112 = vector.extract_strided_slice %98 {offsets = [0, 112], sizes = [1, 16], strides = [1, 1]} : vector<1x128xf32> to vector<1x16xf32>
    %113 = arith.addf %111, %112 : vector<1x16xf32>
    %cst_76 = arith.constant 9.765625E-4 : f32
    %114 = vector.broadcast %cst_76 : f32 to vector<1x16xf32>
    %115 = arith.mulf %113, %114 : vector<1x16xf32>
    %116 = tpu.concatenate %115, %115, %115, %115, %115, %115, %115, %115 in 1 : vector<1x16xf32>, vector<1x16xf32>, vector<1x16xf32>, vector<1x16xf32>, vector<1x16xf32>, vector<1x16xf32>, vector<1x16xf32>, vector<1x16xf32> -> vector<1x128xf32>
    %117 = vector.broadcast %116 : vector<1x128xf32> to vector<128x128xf32>
    %118 = arith.subf %94, %117 : vector<128x128xf32>
    %119 = arith.mulf %118, %118 : vector<128x128xf32>
    %cst_77 = arith.constant dense<0.000000e+00> : vector<128xf32>
    %120 = vector.multi_reduction <add>, %119, %cst_77 [0] : vector<128x128xf32> to vector<128xf32>
    %121 = vector.shape_cast %120 : vector<128xf32> to vector<1x128xf32>
    %122 = vector.extract_strided_slice %121 {offsets = [0, 0], sizes = [1, 16], strides = [1, 1]} : vector<1x128xf32> to vector<1x16xf32>
    %123 = vector.extract_strided_slice %121 {offsets = [0, 16], sizes = [1, 16], strides = [1, 1]} : vector<1x128xf32> to vector<1x16xf32>
    %124 = arith.addf %122, %123 : vector<1x16xf32>
    %125 = vector.extract_strided_slice %121 {offsets = [0, 32], sizes = [1, 16], strides = [1, 1]} : vector<1x128xf32> to vector<1x16xf32>
    %126 = arith.addf %124, %125 : vector<1x16xf32>
    %127 = vector.extract_strided_slice %121 {offsets = [0, 48], sizes = [1, 16], strides = [1, 1]} : vector<1x128xf32> to vector<1x16xf32>
    %128 = arith.addf %126, %127 : vector<1x16xf32>
    %129 = vector.extract_strided_slice %121 {offsets = [0, 64], sizes = [1, 16], strides = [1, 1]} : vector<1x128xf32> to vector<1x16xf32>
    %130 = arith.addf %128, %129 : vector<1x16xf32>
    %131 = vector.extract_strided_slice %121 {offsets = [0, 80], sizes = [1, 16], strides = [1, 1]} : vector<1x128xf32> to vector<1x16xf32>
    %132 = arith.addf %130, %131 : vector<1x16xf32>
    %133 = vector.extract_strided_slice %121 {offsets = [0, 96], sizes = [1, 16], strides = [1, 1]} : vector<1x128xf32> to vector<1x16xf32>
    %134 = arith.addf %132, %133 : vector<1x16xf32>
    %135 = vector.extract_strided_slice %121 {offsets = [0, 112], sizes = [1, 16], strides = [1, 1]} : vector<1x128xf32> to vector<1x16xf32>
    %136 = arith.addf %134, %135 : vector<1x16xf32>
    %cst_78 = arith.constant 9.765625E-4 : f32
    %137 = vector.broadcast %cst_78 : f32 to vector<1x16xf32>
    %138 = arith.mulf %136, %137 : vector<1x16xf32>
    %cst_79 = arith.constant 9.99999974E-6 : f32
    %139 = vector.broadcast %cst_79 : f32 to vector<1x16xf32>
    %140 = arith.addf %138, %139 : vector<1x16xf32>
    %141 = math.rsqrt %140 : vector<1x16xf32>
    %142 = tpu.concatenate %141, %141, %141, %141, %141, %141, %141, %141 in 1 : vector<1x16xf32>, vector<1x16xf32>, vector<1x16xf32>, vector<1x16xf32>, vector<1x16xf32>, vector<1x16xf32>, vector<1x16xf32>, vector<1x16xf32> -> vector<1x128xf32>
    %143 = vector.broadcast %142 : vector<1x128xf32> to vector<128x128xf32>
    %144 = arith.mulf %118, %143 : vector<128x128xf32>
    %145 = vector.broadcast %95 : vector<1x128xf32> to vector<128x128xf32>
    %146 = arith.mulf %144, %145 : vector<128x128xf32>
    %147 = vector.broadcast %96 : vector<1x128xf32> to vector<128x128xf32>
    %148 = arith.addf %146, %147 : vector<128x128xf32>
    %cst_80 = arith.constant 0.000000e+00 : f32
    %149 = vector.broadcast %cst_80 : f32 to vector<128x128xf32>
    %150 = arith.maximumf %148, %149 : vector<128x128xf32>
    %151 = arith.truncf %150 : vector<128x128xf32> to vector<128x128xbf16>
    %c0_81 = arith.constant 0 : index
    %c0_82 = arith.constant 0 : index
    %152 = vector.load %arg7[%c0_81, %c0_82] : memref<128x512xbf16, #tpu.memory_space<vmem>>, vector<128x512xbf16>
    %cst_83 = arith.constant dense<0.000000e+00> : vector<128x512xf32>
    %153 = tpu.matmul %151, %152, %cst_83 {dimension_numbers = #tpu.dot_dimension_numbers<[1], [0], [0], [1], [0, 0, 1, 1], [], []>} : vector<128x128xbf16>, vector<128x512xbf16>, vector<128x512xf32> -> vector<128x512xf32>
    %c0_84 = arith.constant 0 : index
    %c0_85 = arith.constant 0 : index
    %154 = vector.load %arg8[%c0_84, %c0_85] : memref<1x512xf32, #tpu.memory_space<vmem>>, vector<1x512xf32>
    %c0_86 = arith.constant 0 : index
    %c0_87 = arith.constant 0 : index
    %155 = vector.load %arg9[%c0_86, %c0_87] : memref<1x512xf32, #tpu.memory_space<vmem>>, vector<1x512xf32>
    %cst_88 = arith.constant dense<0.000000e+00> : vector<512xf32>
    %156 = vector.multi_reduction <add>, %153, %cst_88 [0] : vector<128x512xf32> to vector<512xf32>
    %157 = vector.shape_cast %156 : vector<512xf32> to vector<1x512xf32>
    %158 = vector.extract_strided_slice %157 {offsets = [0, 0], sizes = [1, 64], strides = [1, 1]} : vector<1x512xf32> to vector<1x64xf32>
    %159 = vector.extract_strided_slice %157 {offsets = [0, 64], sizes = [1, 64], strides = [1, 1]} : vector<1x512xf32> to vector<1x64xf32>
    %160 = arith.addf %158, %159 : vector<1x64xf32>
    %161 = vector.extract_strided_slice %157 {offsets = [0, 128], sizes = [1, 64], strides = [1, 1]} : vector<1x512xf32> to vector<1x64xf32>
    %162 = arith.addf %160, %161 : vector<1x64xf32>
    %163 = vector.extract_strided_slice %157 {offsets = [0, 192], sizes = [1, 64], strides = [1, 1]} : vector<1x512xf32> to vector<1x64xf32>
    %164 = arith.addf %162, %163 : vector<1x64xf32>
    %165 = vector.extract_strided_slice %157 {offsets = [0, 256], sizes = [1, 64], strides = [1, 1]} : vector<1x512xf32> to vector<1x64xf32>
    %166 = arith.addf %164, %165 : vector<1x64xf32>
    %167 = vector.extract_strided_slice %157 {offsets = [0, 320], sizes = [1, 64], strides = [1, 1]} : vector<1x512xf32> to vector<1x64xf32>
    %168 = arith.addf %166, %167 : vector<1x64xf32>
    %169 = vector.extract_strided_slice %157 {offsets = [0, 384], sizes = [1, 64], strides = [1, 1]} : vector<1x512xf32> to vector<1x64xf32>
    %170 = arith.addf %168, %169 : vector<1x64xf32>
    %171 = vector.extract_strided_slice %157 {offsets = [0, 448], sizes = [1, 64], strides = [1, 1]} : vector<1x512xf32> to vector<1x64xf32>
    %172 = arith.addf %170, %171 : vector<1x64xf32>
    %cst_89 = arith.constant 9.765625E-4 : f32
    %173 = vector.broadcast %cst_89 : f32 to vector<1x64xf32>
    %174 = arith.mulf %172, %173 : vector<1x64xf32>
    %175 = tpu.concatenate %174, %174, %174, %174, %174, %174, %174, %174 in 1 : vector<1x64xf32>, vector<1x64xf32>, vector<1x64xf32>, vector<1x64xf32>, vector<1x64xf32>, vector<1x64xf32>, vector<1x64xf32>, vector<1x64xf32> -> vector<1x512xf32>
    %176 = vector.broadcast %175 : vector<1x512xf32> to vector<128x512xf32>
    %177 = arith.subf %153, %176 : vector<128x512xf32>
    %178 = arith.mulf %177, %177 : vector<128x512xf32>
    %cst_90 = arith.constant dense<0.000000e+00> : vector<512xf32>
    %179 = vector.multi_reduction <add>, %178, %cst_90 [0] : vector<128x512xf32> to vector<512xf32>
    %180 = vector.shape_cast %179 : vector<512xf32> to vector<1x512xf32>
    %181 = vector.extract_strided_slice %180 {offsets = [0, 0], sizes = [1, 64], strides = [1, 1]} : vector<1x512xf32> to vector<1x64xf32>
    %182 = vector.extract_strided_slice %180 {offsets = [0, 64], sizes = [1, 64], strides = [1, 1]} : vector<1x512xf32> to vector<1x64xf32>
    %183 = arith.addf %181, %182 : vector<1x64xf32>
    %184 = vector.extract_strided_slice %180 {offsets = [0, 128], sizes = [1, 64], strides = [1, 1]} : vector<1x512xf32> to vector<1x64xf32>
    %185 = arith.addf %183, %184 : vector<1x64xf32>
    %186 = vector.extract_strided_slice %180 {offsets = [0, 192], sizes = [1, 64], strides = [1, 1]} : vector<1x512xf32> to vector<1x64xf32>
    %187 = arith.addf %185, %186 : vector<1x64xf32>
    %188 = vector.extract_strided_slice %180 {offsets = [0, 256], sizes = [1, 64], strides = [1, 1]} : vector<1x512xf32> to vector<1x64xf32>
    %189 = arith.addf %187, %188 : vector<1x64xf32>
    %190 = vector.extract_strided_slice %180 {offsets = [0, 320], sizes = [1, 64], strides = [1, 1]} : vector<1x512xf32> to vector<1x64xf32>
    %191 = arith.addf %189, %190 : vector<1x64xf32>
    %192 = vector.extract_strided_slice %180 {offsets = [0, 384], sizes = [1, 64], strides = [1, 1]} : vector<1x512xf32> to vector<1x64xf32>
    %193 = arith.addf %191, %192 : vector<1x64xf32>
    %194 = vector.extract_strided_slice %180 {offsets = [0, 448], sizes = [1, 64], strides = [1, 1]} : vector<1x512xf32> to vector<1x64xf32>
    %195 = arith.addf %193, %194 : vector<1x64xf32>
    %cst_91 = arith.constant 9.765625E-4 : f32
    %196 = vector.broadcast %cst_91 : f32 to vector<1x64xf32>
    %197 = arith.mulf %195, %196 : vector<1x64xf32>
    %cst_92 = arith.constant 9.99999974E-6 : f32
    %198 = vector.broadcast %cst_92 : f32 to vector<1x64xf32>
    %199 = arith.addf %197, %198 : vector<1x64xf32>
    %200 = math.rsqrt %199 : vector<1x64xf32>
    %201 = tpu.concatenate %200, %200, %200, %200, %200, %200, %200, %200 in 1 : vector<1x64xf32>, vector<1x64xf32>, vector<1x64xf32>, vector<1x64xf32>, vector<1x64xf32>, vector<1x64xf32>, vector<1x64xf32>, vector<1x64xf32> -> vector<1x512xf32>
    %202 = vector.broadcast %201 : vector<1x512xf32> to vector<128x512xf32>
    %203 = arith.mulf %177, %202 : vector<128x512xf32>
    %204 = vector.broadcast %154 : vector<1x512xf32> to vector<128x512xf32>
    %205 = arith.mulf %203, %204 : vector<128x512xf32>
    %206 = vector.broadcast %155 : vector<1x512xf32> to vector<128x512xf32>
    %207 = arith.addf %205, %206 : vector<128x512xf32>
    %208 = vector.extract_strided_slice %207 {offsets = [0, 0], sizes = [64, 512], strides = [1, 1]} : vector<128x512xf32> to vector<64x512xf32>
    %cst_93 = arith.constant dense<0.000000e+00> : vector<512xf32>
    %209 = vector.multi_reduction <add>, %208, %cst_93 [0] : vector<64x512xf32> to vector<512xf32>
    %210 = vector.shape_cast %209 : vector<512xf32> to vector<1x512xf32>
    %211 = vector.extract_strided_slice %207 {offsets = [64, 0], sizes = [64, 512], strides = [1, 1]} : vector<128x512xf32> to vector<64x512xf32>
    %cst_94 = arith.constant dense<0.000000e+00> : vector<512xf32>
    %212 = vector.multi_reduction <add>, %211, %cst_94 [0] : vector<64x512xf32> to vector<512xf32>
    %213 = vector.shape_cast %212 : vector<512xf32> to vector<1x512xf32>
    %214 = tpu.concatenate %210, %213 in 0 : vector<1x512xf32>, vector<1x512xf32> -> vector<2x512xf32>
    %215 = vector.extract_strided_slice %214 {offsets = [0, 0], sizes = [2, 64], strides = [1, 1]} : vector<2x512xf32> to vector<2x64xf32>
    %216 = vector.extract_strided_slice %214 {offsets = [0, 64], sizes = [2, 64], strides = [1, 1]} : vector<2x512xf32> to vector<2x64xf32>
    %217 = arith.addf %215, %216 : vector<2x64xf32>
    %218 = vector.extract_strided_slice %214 {offsets = [0, 128], sizes = [2, 64], strides = [1, 1]} : vector<2x512xf32> to vector<2x64xf32>
    %219 = arith.addf %217, %218 : vector<2x64xf32>
    %220 = vector.extract_strided_slice %214 {offsets = [0, 192], sizes = [2, 64], strides = [1, 1]} : vector<2x512xf32> to vector<2x64xf32>
    %221 = arith.addf %219, %220 : vector<2x64xf32>
    %222 = vector.extract_strided_slice %214 {offsets = [0, 256], sizes = [2, 64], strides = [1, 1]} : vector<2x512xf32> to vector<2x64xf32>
    %223 = arith.addf %221, %222 : vector<2x64xf32>
    %224 = vector.extract_strided_slice %214 {offsets = [0, 320], sizes = [2, 64], strides = [1, 1]} : vector<2x512xf32> to vector<2x64xf32>
    %225 = arith.addf %223, %224 : vector<2x64xf32>
    %226 = vector.extract_strided_slice %214 {offsets = [0, 384], sizes = [2, 64], strides = [1, 1]} : vector<2x512xf32> to vector<2x64xf32>
    %227 = arith.addf %225, %226 : vector<2x64xf32>
    %228 = vector.extract_strided_slice %214 {offsets = [0, 448], sizes = [2, 64], strides = [1, 1]} : vector<2x512xf32> to vector<2x64xf32>
    %229 = arith.addf %227, %228 : vector<2x64xf32>
    %cst_95 = arith.constant 0.001953125 : f32
    %230 = vector.broadcast %cst_95 : f32 to vector<2x64xf32>
    %231 = arith.mulf %229, %230 : vector<2x64xf32>
    %c0_96 = arith.constant 0 : index
    %c0_97 = arith.constant 0 : index
    %232 = vector.load %arg10[%c0_96, %c0_97] : memref<64x4xf32, #tpu.memory_space<vmem>>, vector<64x4xf32>
    %cst_98 = arith.constant dense<0.000000e+00> : vector<2x4xf32>
    %233 = tpu.matmul %231, %232, %cst_98 {dimension_numbers = #tpu.dot_dimension_numbers<[1], [0], [0], [1], [0, 0, 1, 1], [], []>} : vector<2x64xf32>, vector<64x4xf32>, vector<2x4xf32> -> vector<2x4xf32>
    %c0_99 = arith.constant 0 : index
    %c0_100 = arith.constant 0 : index
    %234 = vector.load %arg11[%c0_99, %c0_100] : memref<1x4xf32, #tpu.memory_space<vmem>>, vector<1x4xf32>
    %235 = vector.broadcast %234 : vector<1x4xf32> to vector<2x4xf32>
    %236 = arith.addf %233, %235 : vector<2x4xf32>
    %cst_101 = arith.constant 0.000000e+00 : f32
    %237 = vector.broadcast %cst_101 : f32 to vector<2x4xf32>
    %238 = arith.maximumf %236, %237 : vector<2x4xf32>
    %c0_102 = arith.constant 0 : index
    %c0_103 = arith.constant 0 : index
    %239 = vector.load %arg12[%c0_102, %c0_103] : memref<4x64xf32, #tpu.memory_space<vmem>>, vector<4x64xf32>
    %cst_104 = arith.constant dense<0.000000e+00> : vector<2x64xf32>
    %240 = tpu.matmul %238, %239, %cst_104 {dimension_numbers = #tpu.dot_dimension_numbers<[1], [0], [0], [1], [0, 0, 1, 1], [], []>} : vector<2x4xf32>, vector<4x64xf32>, vector<2x64xf32> -> vector<2x64xf32>
    %c0_105 = arith.constant 0 : index
    %c0_106 = arith.constant 0 : index
    %241 = vector.load %arg13[%c0_105, %c0_106] : memref<1x64xf32, #tpu.memory_space<vmem>>, vector<1x64xf32>
    %242 = vector.broadcast %241 : vector<1x64xf32> to vector<2x64xf32>
    %243 = arith.addf %240, %242 : vector<2x64xf32>
    %244 = arith.negf %243 : vector<2x64xf32>
    %245 = math.exp %244 : vector<2x64xf32>
    %cst_107 = arith.constant 1.000000e+00 : f32
    %246 = vector.broadcast %cst_107 : f32 to vector<2x64xf32>
    %247 = arith.addf %246, %245 : vector<2x64xf32>
    %248 = arith.divf %246, %247 : vector<2x64xf32>
    %249 = tpu.concatenate %248, %248, %248, %248, %248, %248, %248, %248 in 1 : vector<2x64xf32>, vector<2x64xf32>, vector<2x64xf32>, vector<2x64xf32>, vector<2x64xf32>, vector<2x64xf32>, vector<2x64xf32>, vector<2x64xf32> -> vector<2x512xf32>
    %250 = vector.extract_strided_slice %249 {offsets = [0, 0], sizes = [1, 512], strides = [1, 1]} : vector<2x512xf32> to vector<1x512xf32>
    %251 = vector.shape_cast %250 : vector<1x512xf32> to vector<1x512xf32>
    %252 = vector.broadcast %251 : vector<1x512xf32> to vector<64x512xf32>
    %253 = vector.extract_strided_slice %249 {offsets = [1, 0], sizes = [1, 512], strides = [1, 1]} : vector<2x512xf32> to vector<1x512xf32>
    %254 = vector.shape_cast %253 : vector<1x512xf32> to vector<1x512xf32>
    %255 = vector.broadcast %254 : vector<1x512xf32> to vector<64x512xf32>
    %256 = tpu.concatenate %252, %255 in 0 : vector<64x512xf32>, vector<64x512xf32> -> vector<128x512xf32>
    %257 = arith.mulf %207, %256 : vector<128x512xf32>
    %c0_108 = arith.constant 0 : index
    %c0_109 = arith.constant 0 : index
    %258 = vector.load %arg0[%c0_108, %c0_109] : memref<128x512xf32, #tpu.memory_space<vmem>>, vector<128x512xf32>
    %259 = arith.addf %257, %258 : vector<128x512xf32>
    %cst_110 = arith.constant 0.000000e+00 : f32
    %260 = vector.broadcast %cst_110 : f32 to vector<128x512xf32>
    %261 = arith.maximumf %259, %260 : vector<128x512xf32>
    %c0_111 = arith.constant 0 : index
    %c0_112 = arith.constant 0 : index
    %262 = vector.load %arg14[%c0_111, %c0_112] : memref<128x512xf32, #tpu.memory_space<vmem>>, vector<128x512xf32>
    tpu.vector_store %arg14[%c0_111, %c0_112], %261 {strides = array<i32>} : memref<128x512xf32, #tpu.memory_space<vmem>>, vector<128x512xf32>,
    return
  }
}

</mosaic_0001>

<bundles_post_ra>
// kernel: se_bottleneck.1
= control target key start
LH: loop header
LB: loop body
LE: loop exit
PB: predicated region body
PF: predicated region fallthrough
CT: control target
= control target key end

     0   :  { %s6911_s21 = smov 80   ;;  %s6912_s22 = smov 112   ;;  %vm669_vm0 = vcmask 130048   ;;  %vm671_vm1 = vcmask 261120   ;;  %vm673_vm2 = vcmask 392192   ;;  %vm675_vm3 = vcmask 523264   ;;  %s10885_s1 = inlined_call_operand.vmem [shape: bf16[512,128], index: 1, kind: input, shape index: {}]   ;;  %s10886_s0 = inlined_call_operand.vmem [shape: f32[128,512], index: 0, kind: input, shape index: {}]   ;;  %s10887_s4 = inlined_call_operand.vmem [shape: bf16[1152,128], index: 4, kind: input, shape index: {}]   ;;  %s10888_s2 = inlined_call_operand.vmem [shape: f32[1,128], index: 2, kind: input, shape index: {}]   ;;  %s10889_s3 = inlined_call_operand.vmem [shape: f32[1,128], index: 3, kind: input, shape index: {}]   ;;  %s10890_s7 = inlined_call_operand.vmem [shape: bf16[128,512], index: 7, kind: input, shape index: {}]   ;;  %s10891_s5 = inlined_call_operand.vmem [shape: f32[1,128], index: 5, kind: input, shape index: {}]   ;;  %s10892_s6 = inlined_call_operand.vmem [shape: f32[1,128], index: 6, kind: input, shape index: {}]   ;;  %s10893_s10 = inlined_call_operand.vmem [shape: f32[64,4], index: 10, kind: input, shape index: {}]   ;;  %s10894_s8 = inlined_call_operand.vmem [shape: f32[1,512], index: 8, kind: input, shape index: {}]   ;;  %s10895_s9 = inlined_call_operand.vmem [shape: f32[1,512], index: 9, kind: input, shape index: {}]   ;;  %s10896_s12 = inlined_call_operand.vmem [shape: f32[4,64], index: 12, kind: input, shape index: {}]   ;;  %s10897_s11 = inlined_call_operand.vmem [shape: f32[1,4], index: 11, kind: input, shape index: {}]   ;;  %s10898_s13 = inlined_call_operand.vmem [shape: f32[1,64], index: 13, kind: input, shape index: {}]   ;;  %s10899_s14 = inlined_call_operand.vmem [shape: f32[128,512], index: 14, kind: output, shape index: {}]  }
   0x1   :  { %v6725_v0 = vld [vmem:[%s10885_s1 + $0x40] sm:$0xff]   ;;  %v6729_v4 = vld [vmem:[%s10885_s1 + $0x48] sm:$0xff]   ;;  %v6733_v8 = vld [vmem:[%s10885_s1 + $0x50] sm:$0xff]   ;;  %s6913_s23 = smov 64   ;;  %s6914_s24 = smov 96   ;;  %vm677_vm4 = vcmask 654336  }
   0x2   :  { %v6726_v1 = vld [vmem:[%s10885_s1 + $0xc0] sm:$0xff]   ;;  %6235 = vmatprep.subr.bf16.mxu0 %v6725_v0  ;;  %v6730_v5 = vld [vmem:[%s10885_s1 + $0xc8] sm:$0xff]   ;;  %v6734_v9 = vld [vmem:[%s10885_s1 + $0xd0] sm:$0xff]   ;;  %s6915_s25 = smov 32   ;;  %s6916_s26 = smov 48   ;;  %vm679_vm5 = vcmask 785408  }
   0x3   :  { %v6727_v2 = vld [vmem:[%s10885_s1] sm:$0xff]   ;;  %6299 = vmatprep.subr.bf16.mxu1 %v6726_v1  ;;  %v6731_v6 = vld [vmem:[%s10885_s1 + $0x8] sm:$0xff]   ;;  %v6735_v10 = vld [vmem:[%s10885_s1 + $0x10] sm:$0xff]   ;;  %s6917_s27 = smov 16   ;;  %vm681_vm6 = vcmask 916480   ;;  %vm1667_vm7 = vcmask 1042432  }
   0x4   :  { %v6728_v3 = vld [vmem:[%s10885_s1 + $0x80] sm:$0xff]   ;;  %6236 = vmatpush3.bf16.msra.mxu0 %v6727_v2  ;;  %v6732_v7 = vld [vmem:[%s10885_s1 + $0x88] sm:$0xff]   ;;  %v6736_v11 = vld [vmem:[%s10885_s1 + $0x90] sm:$0xff]   ;;  %vm1668_vm8 = vcmask 1046532   ;;  %vm1130_vm10 = vcmask 1043456   ;;  %vm1136_vm12 = vcmask 1040384  }
   0x5   :  { %6300 = vmatpush3.bf16.msra.mxu1 %v6728_v3  ;;  %6237 = vmatprep.subr.bf16.mxu0 %v6729_v4  ;;  %v6737_v12 = vld [vmem:[%s10885_s1 + $0x58] sm:$0xff]   ;;  %v6741_v16 = vld [vmem:[%s10885_s1 + $0x60] sm:$0xff]   ;;  %v6745_v20 = vld [vmem:[%s10885_s1 + $0x68] sm:$0xff]   ;;  %vm1131_vm11 = vsmask.f32 7938 }
   0x6   :  { %6301 = vmatprep.subr.bf16.mxu1 %v6730_v5  ;;  %v6738_v13 = vld [vmem:[%s10885_s1 + $0xd8] sm:$0xff]   ;;  %v6742_v17 = vld [vmem:[%s10885_s1 + $0xe0] sm:$0xff]   ;;  %v6746_v21 = vld [vmem:[%s10885_s1 + $0xe8] sm:$0xff]   ;;  %vm1137_vm13 = vsmask.f32 256 }
   0x7   :  { %v6739_v14 = vld [vmem:[%s10885_s1 + $0x18] sm:$0xff]   ;;  %v6743_v18 = vld [vmem:[%s10885_s1 + $0x20] sm:$0xff]   ;;  %v6747_v22 = vld [vmem:[%s10885_s1 + $0x28] sm:$0xff]   ;;  %vm1336_vm14 = vsmask.f32 3328 }
   0x8   :  { %6238 = vmatpush3.bf16.msra.mxu0 %v6731_v6  ;;  %v6740_v15 = vld [vmem:[%s10885_s1 + $0x98] sm:$0xff]   ;;  %v6744_v19 = vld [vmem:[%s10885_s1 + $0xa0] sm:$0xff]   ;;  %v6748_v23 = vld [vmem:[%s10885_s1 + $0xa8] sm:$0xff]   ;;  %vm1337_vm15 = vsmask.f32 7440 }
   0x9   :  { %6302 = vmatpush3.bf16.msra.mxu1 %v6732_v7  ;;  %6239 = vmatprep.subr.bf16.mxu0 %v6733_v8  ;;  %v6749_v24 = vld [vmem:[%s10885_s1 + $0x70] sm:$0xff]   ;;  %v6753_v28 = vld [vmem:[%s10885_s1 + $0x78] sm:$0xff]   ;;  %v49_v32 = vld [vmem:[%s10886_s0 + $0x8] sm:$0xff] }
   0xa   :  { %6303 = vmatprep.subr.bf16.mxu1 %v6734_v9  ;;  %v6750_v25 = vld [vmem:[%s10885_s1 + $0xf0] sm:$0xff]   ;;  %v6754_v29 = vld [vmem:[%s10885_s1 + $0xf8] sm:$0xff]   ;;  %v53_v33 = vld [vmem:[%s10886_s0 + $0x28] sm:$0xff] }
   0xb   :  { %v6751_v26 = vld [vmem:[%s10885_s1 + $0x30] sm:$0xff]   ;;  %v6755_v30 = vld [vmem:[%s10885_s1 + $0x38] sm:$0xff]   ;;  %v113_v35 = vpack.c.bf16 %v53_v33, %v49_v32  ;;  %v48_v37 = vld [vmem:[%s10886_s0] sm:$0xff] }
   0xc   :  { %6240 = vmatpush3.bf16.msra.mxu0 %v6735_v10  ;;  %v6752_v27 = vld [vmem:[%s10885_s1 + $0xb0] sm:$0xff]   ;;  %v6756_v31 = vld [vmem:[%s10885_s1 + $0xb8] sm:$0xff]   ;;  %v52_v38 = vld [vmem:[%s10886_s0 + $0x20] sm:$0xff] }
   0xd   :  { %6304 = vmatpush3.bf16.msra.mxu1 %v6736_v11  ;;  %6241 = vmatprep.subr.bf16.mxu0 %v6737_v12  ;;  %v51_v34 = vld [vmem:[%s10886_s0 + $0x18] sm:$0xff]  ;;  %v112_v40 = vpack.c.bf16 %v52_v38, %v48_v37  ;;  %v50_v41 = vld [vmem:[%s10886_s0 + $0x10] sm:$0xff]  ;;  %v57_v43 = vld [vmem:[%s10886_s0 + $0x48] sm:$0xff] }
   0xe   :  { %6305 = vmatprep.subr.bf16.mxu1 %v6738_v13  ;;  %v55_v36 = vld [vmem:[%s10886_s0 + $0x38] sm:$0xff]  ;;  %v54_v42 = vld [vmem:[%s10886_s0 + $0x30] sm:$0xff]  ;;  %432 = vmatprep.mubr.bf16.mxu0 %v113_v35  ;;  %v61_v45 = vld [vmem:[%s10886_s0 + $0x68] sm:$0xff] }
   0xf   :  { %v115_v39 = vpack.c.bf16 %v55_v36, %v51_v34  ;;  %v114_v44 = vpack.c.bf16 %v54_v42, %v50_v41  ;;  %v59_v46 = vld [vmem:[%s10886_s0 + $0x58] sm:$0xff]  ;;  %v117_v48 = vpack.c.bf16 %v61_v45, %v57_v43  ;;  %v56_v50 = vld [vmem:[%s10886_s0 + $0x40] sm:$0xff]  ;;  %v58_v52 = vld [vmem:[%s10886_s0 + $0x50] sm:$0xff] }
  0x10   :  { %6242 = vmatpush3.bf16.msra.mxu0 %v6739_v14  ;;  %v63_v47 = vld [vmem:[%s10886_s0 + $0x78] sm:$0xff]  ;;  %v60_v51 = vld [vmem:[%s10886_s0 + $0x60] sm:$0xff]  ;;  %v62_v53 = vld [vmem:[%s10886_s0 + $0x70] sm:$0xff] }
  0x11   :  { %6306 = vmatpush3.bf16.msra.mxu1 %v6740_v15  ;;  %6243 = vmatprep.subr.bf16.mxu0 %v6741_v16  ;;  %v119_v49 = vpack.c.bf16 %v63_v47, %v59_v46  ;;  %v65_v54 = vld [vmem:[%s10886_s0 + $0x88] sm:$0xff]  ;;  %v67_v56 = vld [vmem:[%s10886_s0 + $0x98] sm:$0xff]  ;;  %v116_v58 = vpack.c.bf16 %v60_v51, %v56_v50  ;;  %v118_v59 = vpack.c.bf16 %v62_v53, %v58_v52  ;;  %v64_v62 = vld [vmem:[%s10886_s0 + $0x80] sm:$0xff] }
  0x12   :  { %6307 = vmatprep.subr.bf16.mxu1 %v6742_v17  ;;  %529 = vmatprep.mubr.bf16.mxu1 %v115_v39  ;;  %v69_v55 = vld [vmem:[%s10886_s0 + $0xa8] sm:$0xff]  ;;  %v71_v57 = vld [vmem:[%s10886_s0 + $0xb8] sm:$0xff]  ;;  %v68_v63 = vld [vmem:[%s10886_s0 + $0xa0] sm:$0xff] }
  0x13   :  { %v121_v60 = vpack.c.bf16 %v69_v55, %v65_v54  ;;  %v123_v61 = vpack.c.bf16 %v71_v57, %v67_v56  ;;  %v66_v0 = vld [vmem:[%s10886_s0 + $0x90] sm:$0xff]  ;;  %v73_v2 = vld [vmem:[%s10886_s0 + $0xc8] sm:$0xff]  ;;  %v75_v4 = vld [vmem:[%s10886_s0 + $0xd8] sm:$0xff]  ;;  %v120_v6 = vpack.c.bf16 %v68_v63, %v64_v62 }
  0x14   :  { %6244 = vmatpush3.bf16.msra.mxu0 %v6743_v18  ;;  %v70_v1 = vld [vmem:[%s10886_s0 + $0xb0] sm:$0xff]  ;;  %v77_v3 = vld [vmem:[%s10886_s0 + $0xe8] sm:$0xff]  ;;  %v79_v5 = vld [vmem:[%s10886_s0 + $0xf8] sm:$0xff] }
  0x15   :  { %6308 = vmatpush3.bf16.msra.mxu1 %v6744_v19  ;;  %6245 = vmatprep.subr.bf16.mxu0 %v6745_v20  ;;  %v122_v7 = vpack.c.bf16 %v70_v1, %v66_v0  ;;  %v125_v8 = vpack.c.bf16 %v77_v3, %v73_v2  ;;  %v127_v9 = vpack.c.bf16 %v79_v5, %v75_v4  ;;  %v72_v10 = vld [vmem:[%s10886_s0 + $0xc0] sm:$0xff]  ;;  %v74_v12 = vld [vmem:[%s10886_s0 + $0xd0] sm:$0xff]  ;;  %v81_v14 = vld [vmem:[%s10886_s0 + $0x108] sm:$0xff] }
  0x16   :  { %6309 = vmatprep.subr.bf16.mxu1 %v6746_v21  ;;  %v76_v11 = vld [vmem:[%s10886_s0 + $0xe0] sm:$0xff]  ;;  %v78_v13 = vld [vmem:[%s10886_s0 + $0xf0] sm:$0xff]  ;;  %v85_v15 = vld [vmem:[%s10886_s0 + $0x128] sm:$0xff] }
  0x17   :  { %v83_v16 = vld [vmem:[%s10886_s0 + $0x118] sm:$0xff]  ;;  %v124_v18 = vpack.c.bf16 %v76_v11, %v72_v10  ;;  %v126_v19 = vpack.c.bf16 %v78_v13, %v74_v12  ;;  %v129_v20 = vpack.c.bf16 %v85_v15, %v81_v14  ;;  %v88_v34 = vld [vmem:[%s10886_s0 + $0x140] sm:$0xff]  ;;  %v90_v36 = vld [vmem:[%s10886_s0 + $0x150] sm:$0xff] }
  0x18   :  { %6246 = vmatpush3.bf16.msra.mxu0 %v6747_v22  ;;  %v87_v17 = vld [vmem:[%s10886_s0 + $0x138] sm:$0xff]  ;;  %v80_v22 = vld [vmem:[%s10886_s0 + $0x100] sm:$0xff]  ;;  %v94_v37 = vld [vmem:[%s10886_s0 + $0x170] sm:$0xff] }
  0x19   :  { %6310 = vmatpush3.bf16.msra.mxu1 %v6748_v23  ;;  %6247 = vmatprep.subr.bf16.mxu0 %v6749_v24  ;;  %v131_v21 = vpack.c.bf16 %v87_v17, %v83_v16  ;;  %v84_v23 = vld [vmem:[%s10886_s0 + $0x120] sm:$0xff]  ;;  %v82_v24 = vld [vmem:[%s10886_s0 + $0x110] sm:$0xff]  ;;  %v97_v38 = vld [vmem:[%s10886_s0 + $0x188] sm:$0xff]  ;;  %v134_v43 = vpack.c.bf16 %v94_v37, %v90_v36 }
  0x1a   :  { %6311 = vmatprep.subr.bf16.mxu1 %v6750_v25  ;;  %v86_v25 = vld [vmem:[%s10886_s0 + $0x130] sm:$0xff]  ;;  %v92_v35 = vld [vmem:[%s10886_s0 + $0x160] sm:$0xff]  ;;  %v101_v39 = vld [vmem:[%s10886_s0 + $0x1a8] sm:$0xff] }
  0x1b   :  { %v103_v41 = vld [vmem:[%s10886_s0 + $0x1b8] sm:$0xff]  ;;  %v132_v42 = vpack.c.bf16 %v92_v35, %v88_v34  ;;  %v96_v46 = vld [vmem:[%s10886_s0 + $0x180] sm:$0xff]  ;;  %v105_v50 = vld [vmem:[%s10886_s0 + $0x1c8] sm:$0xff] }
  0x1c   :  { %6248 = vmatpush3.bf16.msra.mxu0 %v6751_v26  ;;  %v89_v26 = vld [vmem:[%s10886_s0 + $0x148] sm:$0xff]  ;;  %v100_v47 = vld [vmem:[%s10886_s0 + $0x1a0] sm:$0xff]  ;;  %v107_v52 = vld [vmem:[%s10886_s0 + $0x1d8] sm:$0xff] }
  0x1d   :  { %6312 = vmatpush3.bf16.msra.mxu1 %v6752_v27  ;;  %6249 = vmatprep.subr.bf16.mxu0 %v6753_v28  ;;  %v93_v27 = vld [vmem:[%s10886_s0 + $0x168] sm:$0xff]  ;;  %v91_v28 = vld [vmem:[%s10886_s0 + $0x158] sm:$0xff]  ;;  %v136_v54 = vpack.c.bf16 %v100_v47, %v96_v46  ;;  %vm7611_vm9 = vmor %vm1667_vm7, %vm1668_vm8 }
  0x1e   :  { %6313 = vmatprep.subr.bf16.mxu1 %v6754_v29  ;;  %v95_v29 = vld [vmem:[%s10886_s0 + $0x178] sm:$0xff]  ;;  %v133_v32 = vpack.c.bf16 %v93_v27, %v89_v26  ;;  %v109_v51 = vld [vmem:[%s10886_s0 + $0x1e8] sm:$0xff]  ;;  %vm7693_vm7 = vmand %vm1130_vm10, %vm1131_vm11 }
  0x1f   :  { %v135_v33 = vpack.c.bf16 %v95_v29, %v91_v28  ;;  %v111_v53 = vld [vmem:[%s10886_s0 + $0x1f8] sm:$0xff]  ;;  %v141_v56 = vpack.c.bf16 %v109_v51, %v105_v50  ;;  %vm7701_vm8 = vmand %vm1136_vm12, %vm1137_vm13 }
  0x20   :  { %6250 = vmatpush3.bf16.msra.mxu0 %v6755_v30  ;;  %v128_v30 = vpack.c.bf16 %v84_v23, %v80_v22  ;;  %v143_v57 = vpack.c.bf16 %v111_v53, %v107_v52  ;;  %vm7739_vm11 = vmor %vm1336_vm14, %vm1337_vm15 }
  0x21   :  { %6314 = vmatpush3.bf16.msra.mxu1 %v6756_v31  ;;  %v130_v31 = vpack.c.bf16 %v86_v25, %v82_v24 }
  0x23   :  { %433 = vmatmul.mubr.bf16.vlgmr.msra.gmra.mrb[0].mxu0 %v112_v40  ;;  %v99_v40 = vld [vmem:[%s10886_s0 + $0x198] sm:$0xff] }
  0x24   :  { %530 = vmatmul.mubr.bf16.vlgmr.msra.gmra.mrb[0].mxu1 %v114_v44  ;;  %440 = vmatprep.mubr.bf16.mxu0 %v117_v48  ;;  %v137_v44 = vpack.c.bf16 %v101_v39, %v97_v38  ;;  %v139_v45 = vpack.c.bf16 %v103_v41, %v99_v40  ;;  %v98_v48 = vld [vmem:[%s10886_s0 + $0x190] sm:$0xff] }
  0x25   :  { %537 = vmatprep.mubr.bf16.mxu1 %v119_v49  ;;  %v102_v49 = vld [vmem:[%s10886_s0 + $0x1b0] sm:$0xff] }
  0x26   :  { %v138_v55 = vpack.c.bf16 %v102_v49, %v98_v48 }
  0x2b   :  { %441 = vmatmul.mubr.bf16.gmra.mrb[4].mxu0 %v116_v58  ;;  %v104_v58 = vld [vmem:[%s10886_s0 + $0x1c0] sm:$0xff] }
  0x2c   :  { %538 = vmatmul.mubr.bf16.gmra.mrb[4].mxu1 %v118_v59  ;;  %448 = vmatprep.mubr.bf16.mxu0 %v121_v60  ;;  %v108_v59 = vld [vmem:[%s10886_s0 + $0x1e0] sm:$0xff]  ;;  %v106_v60 = vld [vmem:[%s10886_s0 + $0x1d0] sm:$0xff] }
  0x2d   :  { %545 = vmatprep.mubr.bf16.mxu1 %v123_v61  ;;  %v110_v61 = vld [vmem:[%s10886_s0 + $0x1f0] sm:$0xff]  ;;  %v140_v62 = vpack.c.bf16 %v108_v59, %v104_v58 }
  0x2e   :  { %v142_v63 = vpack.c.bf16 %v110_v61, %v106_v60 }
  0x33   :  { %449 = vmatmul.mubr.bf16.gmra.mrb[8].mxu0 %v120_v6 }
  0x34   :  { %546 = vmatmul.mubr.bf16.gmra.mrb[8].mxu1 %v122_v7  ;;  %456 = vmatprep.mubr.bf16.mxu0 %v125_v8 }
  0x35   :  { %553 = vmatprep.mubr.bf16.mxu1 %v127_v9 }
  0x3b   :  { %457 = vmatmul.mubr.bf16.gmra.mrb[12].mxu0 %v124_v18 }
  0x3c   :  { %554 = vmatmul.mubr.bf16.gmra.mrb[12].mxu1 %v126_v19  ;;  %464 = vmatprep.mubr.bf16.mxu0 %v129_v20 }
  0x3d   :  { %561 = vmatprep.mubr.bf16.mxu1 %v131_v21 }
  0x43   :  { %465 = vmatmul.mubr.bf16.gmra.mrb[16].mxu0 %v128_v30 }
  0x44   :  { %562 = vmatmul.mubr.bf16.gmra.mrb[16].mxu1 %v130_v31  ;;  %472 = vmatprep.mubr.bf16.mxu0 %v133_v32 }
  0x45   :  { %569 = vmatprep.mubr.bf16.mxu1 %v135_v33 }
  0x4b   :  { %473 = vmatmul.mubr.bf16.gmra.mrb[20].mxu0 %v132_v42 }
  0x4c   :  { %570 = vmatmul.mubr.bf16.gmra.mrb[20].mxu1 %v134_v43  ;;  %480 = vmatprep.mubr.bf16.mxu0 %v137_v44 }
  0x4d   :  { %577 = vmatprep.mubr.bf16.mxu1 %v139_v45 }
  0x53   :  { %481 = vmatmul.mubr.bf16.gmra.mrb[24].mxu0 %v136_v54 }
  0x54   :  { %578 = vmatmul.mubr.bf16.gmra.mrb[24].mxu1 %v138_v55  ;;  %488 = vmatprep.mubr.bf16.mxu0 %v141_v56 }
  0x55   :  { %585 = vmatprep.mubr.bf16.mxu1 %v143_v57 }
  0x5b   :  { %489 = vmatmul.mubr.bf16.gmra.mrb[28].mxu0 %v140_v62 }
  0x5c   :  { %586 = vmatmul.mubr.bf16.gmra.mrb[28].mxu1 %v142_v63 }
  0xf6   :  { %v6251_v0 = vpop.f32.mrb[0].mxu0 }
  0xf7   :  { %v6315_v1 = vpop.f32.mrb[0].mxu1  ;;  %v6252_v2 = vpop.f32.mrb[1].mxu0 }
  0xf8   :  { %v6253_v3 = vadd.f32 %v6252_v2, %v6251_v0  ;;  %v6316_v4 = vpop.f32.mrb[1].mxu1  ;;  %v6254_v5 = vpop.f32.mrb[2].mxu0 }
  0xf9   :  { %v6317_v6 = vadd.f32 %v6316_v4, %v6315_v1  ;;  %v6318_v7 = vpop.f32.mrb[2].mxu1  ;;  %v6255_v8 = vpop.f32.mrb[3].mxu0 }
  0xfa   :  { %v6256_v9 = vadd.f32 %v6255_v8, %v6254_v5  ;;  %v6319_v10 = vpop.f32.mrb[3].mxu1 }
  0xfb   :  { %v7285_v11 = vadd.f32 %v6317_v6, %v6253_v3  ;;  %v6320_v12 = vadd.f32 %v6319_v10, %v6318_v7 }
  0xfd   :  { %v7287_v13 = vadd.f32 %v6320_v12, %v6256_v9 }
  0xfe   :  { %v6257_v14 = vpop.f32.mrb[4].mxu0 }
  0xff   :  { %v6321_v15 = vpop.f32.mrb[4].mxu1  ;;  %v6258_v16 = vpop.f32.mrb[5].mxu0  ;;  %v596_v43 = vadd.f32 %v7287_v13, %v7285_v11 }
 0x100   :  { %v6259_v17 = vadd.f32 %v6258_v16, %v6257_v14  ;;  %v6322_v18 = vpop.f32.mrb[5].mxu1  ;;  %v6260_v19 = vpop.f32.mrb[6].mxu0 }
 0x101   :  { %v6323_v20 = vadd.f32 %v6322_v18, %v6321_v15  ;;  %v6324_v21 = vpop.f32.mrb[6].mxu1  ;;  %v6261_v22 = vpop.f32.mrb[7].mxu0 }
 0x102   :  { %v6262_v23 = vadd.f32 %v6261_v22, %v6260_v19  ;;  %v6325_v24 = vpop.f32.mrb[7].mxu1 }
 0x103   :  { %v7289_v25 = vadd.f32 %v6323_v20, %v6259_v17  ;;  %v6326_v26 = vadd.f32 %v6325_v24, %v6324_v21 }
 0x105   :  { %v7291_v27 = vadd.f32 %v6326_v26, %v6262_v23  ;;  %v597_v49 = vadd.f32 %v596_v43, %v7289_v25 }
 0x106   :  { %v6263_v28 = vpop.f32.mrb[8].mxu0 }
 0x107   :  { %v6327_v29 = vpop.f32.mrb[8].mxu1  ;;  %v6264_v30 = vpop.f32.mrb[9].mxu0  ;;  %v598_v57 = vadd.f32 %v597_v49, %v7291_v27 }
 0x108   :  { %v6265_v31 = vadd.f32 %v6264_v30, %v6263_v28  ;;  %v6328_v32 = vpop.f32.mrb[9].mxu1  ;;  %v6266_v33 = vpop.f32.mrb[10].mxu0 }
 0x109   :  { %v6329_v34 = vadd.f32 %v6328_v32, %v6327_v29  ;;  %v6330_v35 = vpop.f32.mrb[10].mxu1  ;;  %v6267_v36 = vpop.f32.mrb[11].mxu0 }
 0x10a   :  { %v6268_v37 = vadd.f32 %v6267_v36, %v6266_v33  ;;  %v6331_v38 = vpop.f32.mrb[11].mxu1 }
 0x10b   :  { %v7293_v39 = vadd.f32 %v6329_v34, %v6265_v31  ;;  %v6332_v40 = vadd.f32 %v6331_v38, %v6330_v35 }
 0x10d   :  { %v7295_v41 = vadd.f32 %v6332_v40, %v6268_v37  ;;  %v599_v60 = vadd.f32 %v598_v57, %v7293_v39 }
 0x10e   :  { %v6269_v42 = vpop.f32.mrb[12].mxu0 }
 0x10f   :  { %v6333_v44 = vpop.f32.mrb[12].mxu1  ;;  %v6270_v45 = vpop.f32.mrb[13].mxu0  ;;  %v600_v7 = vadd.f32 %v599_v60, %v7295_v41 }
 0x110   :  { %v6271_v46 = vadd.f32 %v6270_v45, %v6269_v42  ;;  %v6334_v47 = vpop.f32.mrb[13].mxu1  ;;  %v6272_v48 = vpop.f32.mrb[14].mxu0 }
 0x111   :  { %v6335_v50 = vadd.f32 %v6334_v47, %v6333_v44  ;;  %v6336_v51 = vpop.f32.mrb[14].mxu1  ;;  %v6273_v52 = vpop.f32.mrb[15].mxu0 }
 0x112   :  { %v6274_v53 = vadd.f32 %v6273_v52, %v6272_v48  ;;  %v6337_v54 = vpop.f32.mrb[15].mxu1 }
 0x113   :  { %v7300_v55 = vadd.f32 %v6335_v50, %v6271_v46  ;;  %v6338_v56 = vadd.f32 %v6337_v54, %v6336_v51 }
 0x115   :  { %v7303_v58 = vadd.f32 %v6338_v56, %v6274_v53  ;;  %v601_v10 = vadd.f32 %v600_v7, %v7300_v55 }
 0x116   :  { %v6275_v59 = vpop.f32.mrb[16].mxu0 }
 0x117   :  { %v6339_v61 = vpop.f32.mrb[16].mxu1  ;;  %v6276_v62 = vpop.f32.mrb[17].mxu0  ;;  %v602_v20 = vadd.f32 %v601_v10, %v7303_v58 }
 0x118   :  { %v6277_v63 = vadd.f32 %v6276_v62, %v6275_v59  ;;  %v6340_v0 = vpop.f32.mrb[17].mxu1  ;;  %v6278_v1 = vpop.f32.mrb[18].mxu0 }
 0x119   :  { %v6341_v2 = vadd.f32 %v6340_v0, %v6339_v61  ;;  %v6342_v3 = vpop.f32.mrb[18].mxu1  ;;  %v6279_v4 = vpop.f32.mrb[19].mxu0 }
 0x11a   :  { %v6280_v5 = vadd.f32 %v6279_v4, %v6278_v1  ;;  %v6343_v6 = vpop.f32.mrb[19].mxu1 }
 0x11b   :  { %v7307_v8 = vadd.f32 %v6341_v2, %v6277_v63  ;;  %v6344_v9 = vadd.f32 %v6343_v6, %v6342_v3 }
 0x11d   :  { %v7310_v12 = vadd.f32 %v6344_v9, %v6280_v5  ;;  %v603_v28 = vadd.f32 %v602_v20, %v7307_v8 }
 0x11e   :  { %v6281_v14 = vpop.f32.mrb[20].mxu0 }
 0x11f   :  { %v6345_v15 = vpop.f32.mrb[20].mxu1  ;;  %v6282_v16 = vpop.f32.mrb[21].mxu0  ;;  %v604_v33 = vadd.f32 %v603_v28, %v7310_v12 }
 0x120   :  { %v6283_v17 = vadd.f32 %v6282_v16, %v6281_v14  ;;  %v6346_v18 = vpop.f32.mrb[21].mxu1  ;;  %v6284_v19 = vpop.f32.mrb[22].mxu0 }
 0x121   :  { %v6347_v21 = vadd.f32 %v6346_v18, %v6345_v15  ;;  %v6348_v22 = vpop.f32.mrb[22].mxu1  ;;  %v6285_v23 = vpop.f32.mrb[23].mxu0 }
 0x122   :  { %v6286_v24 = vadd.f32 %v6285_v23, %v6284_v19  ;;  %v6349_v26 = vpop.f32.mrb[23].mxu1 }
 0x123   :  { %v7314_v29 = vadd.f32 %v6347_v21, %v6283_v17  ;;  %v6350_v30 = vadd.f32 %v6349_v26, %v6348_v22 }
 0x125   :  { %v7316_v31 = vadd.f32 %v6350_v30, %v6286_v24  ;;  %v605_v40 = vadd.f32 %v604_v33, %v7314_v29 }
 0x126   :  { %v6287_v32 = vpop.f32.mrb[24].mxu0 }
 0x127   :  { %v6351_v34 = vpop.f32.mrb[24].mxu1  ;;  %v6288_v35 = vpop.f32.mrb[25].mxu0  ;;  %v606_v49 = vadd.f32 %v605_v40, %v7316_v31  ;;  %v683_v40 = vlaneseq }
 0x128   :  { %v6289_v36 = vadd.f32 %v6288_v35, %v6287_v32  ;;  %v6352_v37 = vpop.f32.mrb[25].mxu1  ;;  %v6290_v38 = vpop.f32.mrb[26].mxu0 }
 0x129   :  { %v6353_v42 = vadd.f32 %v6352_v37, %v6351_v34  ;;  %v6354_v43 = vpop.f32.mrb[26].mxu1  ;;  %v6291_v44 = vpop.f32.mrb[27].mxu0 }
 0x12a   :  { %v6292_v45 = vadd.f32 %v6291_v44, %v6290_v38  ;;  %v6355_v46 = vpop.f32.mrb[27].mxu1 }
 0x12b   :  { %v7320_v47 = vadd.f32 %v6353_v42, %v6289_v36  ;;  %v6356_v48 = vadd.f32 %v6355_v46, %v6354_v43  ;;  %v7350_v46 = vshrl.u32 %v683_v40, 7 }
 0x12d   :  { %v7323_v50 = vadd.f32 %v6356_v48, %v6292_v45  ;;  %v607_v52 = vadd.f32 %v606_v49, %v7320_v47  ;;  %10989 = vst [vmem:[#allocation4_spill] sm:$0xff] %v7350_v46 }
 0x12e   :  { %v6293_v51 = vpop.f32.mrb[28].mxu0 }
 0x12f   :  { %v6357_v53 = vpop.f32.mrb[28].mxu1  ;;  %v6294_v54 = vpop.f32.mrb[29].mxu0  ;;  %v608_v1 = vadd.f32 %v607_v52, %v7323_v50 }
 0x130   :  { %v6295_v56 = vadd.f32 %v6294_v54, %v6293_v51  ;;  %v6358_v57 = vpop.f32.mrb[29].mxu1  ;;  %v6296_v59 = vpop.f32.mrb[30].mxu0 }
 0x131   :  { %v6359_v60 = vadd.f32 %v6358_v57, %v6357_v53  ;;  %v6360_v61 = vpop.f32.mrb[30].mxu1  ;;  %v6297_v62 = vpop.f32.mrb[31].mxu0  ;;  %v7355_v53 = vsub.s32 0, %v7350_v46 }
 0x132   :  { %v6298_v63 = vadd.f32 %v6297_v62, %v6296_v59  ;;  %v6361_v0 = vpop.f32.mrb[31].mxu1 }
 0x133   :  { %v7327_v2 = vadd.f32 %v6359_v60, %v6295_v56  ;;  %v6362_v3 = vadd.f32 %v6361_v0, %v6360_v61  ;;  %10990 = vst [vmem:[#allocation5_spill] sm:$0xff] %v7355_v53 }
 0x135   :  { %v609_v4 = vadd.f32 %v608_v1, %v7327_v2  ;;  %v7330_v5 = vadd.f32 %v6362_v3, %v6298_v63 }
 0x137   :  { %v610_v6 = vadd.f32 %v609_v4, %v7330_v5 }
 0x139   :  { %v611_v7 = vrot.slane %v610_v6, 4 }
 0x13b   :  { %v612_v9 = vadd.f32 %v611_v7, %v610_v6 }
 0x13d   :  { %v613_v10 = vrot.slane %v612_v9, 2 }
 0x13f   :  { %v614_v14 = vadd.f32 %v613_v10, %v612_v9 }
 0x141   :  { %v615_v15 = vrot.slane %v614_v14, 1 }
 0x143   :  { %v616_v16 = vadd.f32 %v615_v15, %v614_v14 }
 0x145   :  { %626 = vrot.lane.b32.xlu1 %v616_v16, %s6911_s21  ;;  %618 = vrot.lane.b32.xlu0 %v616_v16, %s6912_s22 }
 0x149   :  { %630 = vrot.lane.b32.xlu1 %v616_v16, %s6913_s23  ;;  %622 = vrot.lane.b32.xlu0 %v616_v16, %s6914_s24 }
 0x14d   :  { %638 = vrot.lane.b32.xlu1 %v616_v16, %s6915_s25  ;;  %634 = vrot.lane.b32.xlu0 %v616_v16, %s6916_s26 }
 0x151   :  { %642 = vrot.lane.b32.xlu0 %v616_v16, %s6917_s27 }
 0x1b7   :  { %v627_v17 = vpop.permute.xlu1 %626  ;;  %v619_v18 = vpop.permute.xlu0 %618 }
 0x1b8   :  { %v621_v19 = vadd.f32 %v619_v18, %v616_v16 }
 0x1bb   :  { %v623_v20 = vpop.permute.xlu0 %622  ;;  %v631_v22 = vpop.permute.xlu1 %630 }
 0x1bc   :  { %v625_v21 = vadd.f32 %v623_v20, %v621_v19 }
 0x1be   :  { %v629_v23 = vadd.f32 %v627_v17, %v625_v21 }
 0x1bf   :  { %v635_v24 = vpop.permute.xlu0 %634  ;;  %v639_v30 = vpop.permute.xlu1 %638 }
 0x1c0   :  { %v633_v26 = vadd.f32 %v631_v22, %v629_v23 }
 0x1c2   :  { %v637_v28 = vadd.f32 %v635_v24, %v633_v26 }
 0x1c3   :  { %v643_v33 = vpop.permute.xlu0 %642 }
 0x1c4   :  { %v641_v32 = vadd.f32 %v639_v30, %v637_v28 }
 0x1c6   :  { %v645_v34 = vadd.f32 %v643_v33, %v641_v32 }
 0x1c8   :  { %v646_v35 = vmul.f32 0.0009765625, %v645_v34 }
 0x1ca   :  { %651 = vrot.lane.b32.xlu0 %v646_v35, %s6915_s25  ;;  %648 = vrot.lane.b32.xlu1 %v646_v35, %s6917_s27 }
 0x1ce   :  { %657 = vrot.lane.b32.xlu0 %v646_v35, %s6913_s23  ;;  %654 = vrot.lane.b32.xlu1 %v646_v35, %s6916_s26 }
 0x1d2   :  { %663 = vrot.lane.b32.xlu0 %v646_v35, %s6914_s24  ;;  %660 = vrot.lane.b32.xlu1 %v646_v35, %s6911_s21 }
 0x1d6   :  { %666 = vrot.lane.b32.xlu1 %v646_v35, %s6912_s22 }
 0x23c   :  { %v652_v36 = vpop.permute.xlu0 %651  ;;  %v649_v37 = vpop.permute.xlu1 %648 }
 0x23d   :  { %v670_v38 = vsel %vm669_vm0, %v646_v35, %v649_v37 }
 0x23e   :  { %v672_v43 = vsel %vm671_vm1, %v670_v38, %v652_v36 }
 0x240   :  { %v658_v42 = vpop.permute.xlu0 %657  ;;  %v655_v44 = vpop.permute.xlu1 %654 }
 0x241   :  { %v674_v45 = vsel %vm673_vm2, %v672_v43, %v655_v44 }
 0x242   :  { %v676_v48 = vsel %vm675_vm3, %v674_v45, %v658_v42  ;;  %v6757_v45 = vld [vmem:[%s10887_s4 + $0x40] sm:$0xff]  }
 0x243   :  { %6363 = vmatprep.subr.bf16.mxu0 %v6757_v45  ;;  %v6785_v45 = vld [vmem:[%s10887_s4 + $0xf8] sm:$0xff]  }
 0x244   :  { %v661_v49 = vpop.permute.xlu1 %660  ;;  %v664_v51 = vpop.permute.xlu0 %663 }
 0x245   :  { %v678_v52 = vsel %vm677_vm4, %v676_v48, %v661_v49  ;;  %v6758_v48 = vld [vmem:[%s10887_s4] sm:$0xff]   ;;  %v6759_v49 = vld [vmem:[%s10887_s4 + $0x48] sm:$0xff]  }
 0x246   :  { %v680_v54 = vsel %vm679_vm5, %v678_v52, %v664_v51  ;;  %6364 = vmatpush3.bf16.msra.mxu0 %v6758_v48  ;;  %v6760_v51 = vld [vmem:[%s10887_s4 + $0x8] sm:$0xff]   ;;  %v6786_v48 = vld [vmem:[%s10887_s4 + $0xb8] sm:$0xff]  }
 0x247   :  { %6365 = vmatprep.subr.bf16.mxu0 %v6759_v49  ;;  %v6788_v49 = vld [vmem:[%s10887_s4 + $0x78] sm:$0xff]  }
 0x248   :  { %v667_v56 = vpop.permute.xlu1 %666 }
 0x249   :  { %v682_v57 = vsel %vm681_vm6, %v680_v54, %v667_v56 }
 0x24a   :  { %v686_v59 = vrot.slane %v682_v57, %v7355_v53  ;;  %6366 = vmatpush3.bf16.msra.mxu0 %v6760_v51  ;;  %v6789_v51 = vld [vmem:[%s10887_s4 + $0x38] sm:$0xff]  }
 0x24c   :  { %v7361_v60 = vsub.f32 %v7285_v11, %v686_v59  ;;  %v7364_v61 = vsub.f32 %v7287_v13, %v686_v59  ;;  %v7367_v62 = vsub.f32 %v7289_v25, %v686_v59  ;;  %v7374_v1 = vsub.f32 %v7291_v27, %v686_v59 }
 0x24d   :  { %v7377_v3 = vsub.f32 %v7293_v39, %v686_v59  ;;  %v7382_v4 = vsub.f32 %v7295_v41, %v686_v59  ;;  %v7387_v7 = vsub.f32 %v7300_v55, %v686_v59  ;;  %v7392_v39 = vsub.f32 %v7303_v58, %v686_v59 }
 0x24e   :  { %v703_v63 = vmul.f32 %v7361_v60, %v7361_v60  ;;  %v704_v0 = vmul.f32 %v7364_v61, %v7364_v61  ;;  %v705_v11 = vmul.f32 %v7367_v62, %v7367_v62  ;;  %v706_v25 = vmul.f32 %v7374_v1, %v7374_v1 }
 0x24f   :  { %v707_v27 = vmul.f32 %v7377_v3, %v7377_v3  ;;  %v708_v10 = vmul.f32 %v7382_v4, %v7382_v4  ;;  %v7397_v41 = vsub.f32 %v7307_v8, %v686_v59  ;;  %v709_v15 = vmul.f32 %v7387_v7, %v7387_v7 }
 0x250   :  { %v719_v13 = vadd.f32 %v704_v0, %v703_v63  ;;  %v7402_v55 = vsub.f32 %v7310_v12, %v686_v59  ;;  %v710_v17 = vmul.f32 %v7392_v39, %v7392_v39  ;;  %v7407_v58 = vsub.f32 %v7314_v29, %v686_v59 }
 0x251   :  { %v711_v19 = vmul.f32 %v7397_v41, %v7397_v41  ;;  %v7412_v8 = vsub.f32 %v7316_v31, %v686_v59  ;;  %v7417_v12 = vsub.f32 %v7320_v47, %v686_v59  ;;  %v7422_v29 = vsub.f32 %v7323_v50, %v686_v59 }
 0x252   :  { %v720_v6 = vadd.f32 %v719_v13, %v705_v11  ;;  %v712_v21 = vmul.f32 %v7402_v55, %v7402_v55  ;;  %v713_v23 = vmul.f32 %v7407_v58, %v7407_v58  ;;  %v7427_v31 = vsub.f32 %v7327_v2, %v686_v59 }
 0x253   :  { %v714_v26 = vmul.f32 %v7412_v8, %v7412_v8  ;;  %v715_v30 = vmul.f32 %v7417_v12, %v7417_v12  ;;  %v7432_v47 = vsub.f32 %v7330_v5, %v686_v59  ;;  %v716_v33 = vmul.f32 %v7422_v29, %v7422_v29 }
 0x254   :  { %v721_v9 = vadd.f32 %v720_v6, %v706_v25  ;;  %v717_v50 = vmul.f32 %v7427_v31, %v7427_v31 }
 0x255   :  { %v718_v36 = vmul.f32 %v7432_v47, %v7432_v47 }
 0x256   :  { %v722_v14 = vadd.f32 %v721_v9, %v707_v27 }
 0x258   :  { %v723_v16 = vadd.f32 %v722_v14, %v708_v10 }
 0x25a   :  { %v724_v18 = vadd.f32 %v723_v16, %v709_v15  ;;  %v6761_v16 = vld [vmem:[%s10887_s4 + $0x50] sm:$0xff]  }
 0x25b   :  { %6367 = vmatprep.subr.bf16.mxu0 %v6761_v16 }
 0x25c   :  { %v725_v20 = vadd.f32 %v724_v18, %v710_v17  ;;  %v6762_v17 = vld [vmem:[%s10887_s4 + $0x10] sm:$0xff]   ;;  %v6763_v18 = vld [vmem:[%s10887_s4 + $0x58] sm:$0xff]  }
 0x25d   :  { %6368 = vmatpush3.bf16.msra.mxu0 %v6762_v17 }
 0x25e   :  { %v726_v22 = vadd.f32 %v725_v20, %v711_v19  ;;  %6369 = vmatprep.subr.bf16.mxu0 %v6763_v18  ;;  %v6765_v20 = vld [vmem:[%s10887_s4 + $0xc0] sm:$0xff]  }
 0x25f   :  { %6427 = vmatprep.subr.bf16.mxu1 %v6765_v20 }
 0x260   :  { %v727_v24 = vadd.f32 %v726_v22, %v712_v21  ;;  %v6764_v21 = vld [vmem:[%s10887_s4 + $0x18] sm:$0xff]   ;;  %v6766_v22 = vld [vmem:[%s10887_s4 + $0x80] sm:$0xff]  }
 0x261   :  { %6370 = vmatpush3.bf16.msra.mxu0 %v6764_v21  ;;  %6428 = vmatpush3.bf16.msra.mxu1 %v6766_v22 }
 0x262   :  { %v728_v28 = vadd.f32 %v727_v24, %v713_v23  ;;  %v6767_v23 = vld [vmem:[%s10887_s4 + $0xc8] sm:$0xff]   ;;  %v6769_v24 = vld [vmem:[%s10887_s4 + $0x60] sm:$0xff]  }
 0x263   :  { %6429 = vmatprep.subr.bf16.mxu1 %v6767_v23  ;;  %6371 = vmatprep.subr.bf16.mxu0 %v6769_v24 }
 0x264   :  { %v729_v32 = vadd.f32 %v728_v28, %v714_v26  ;;  %v6768_v26 = vld [vmem:[%s10887_s4 + $0x88] sm:$0xff]   ;;  %v6770_v28 = vld [vmem:[%s10887_s4 + $0x20] sm:$0xff]  }
 0x265   :  { %6430 = vmatpush3.bf16.msra.mxu1 %v6768_v26  ;;  %6372 = vmatpush3.bf16.msra.mxu0 %v6770_v28 }
 0x266   :  { %v730_v34 = vadd.f32 %v729_v32, %v715_v30  ;;  %v6771_v30 = vld [vmem:[%s10887_s4 + $0xd0] sm:$0xff]   ;;  %v6775_v32 = vld [vmem:[%s10887_s4 + $0x68] sm:$0xff]  }
 0x267   :  { %6431 = vmatprep.subr.bf16.mxu1 %v6771_v30  ;;  %6373 = vmatprep.subr.bf16.mxu0 %v6775_v32 }
 0x268   :  { %v731_v35 = vadd.f32 %v730_v34, %v716_v33  ;;  %v6772_v33 = vld [vmem:[%s10887_s4 + $0x90] sm:$0xff]   ;;  %v6776_v34 = vld [vmem:[%s10887_s4 + $0x28] sm:$0xff]  }
 0x269   :  { %6432 = vmatpush3.bf16.msra.mxu1 %v6772_v33  ;;  %6374 = vmatpush3.bf16.msra.mxu0 %v6776_v34 }
 0x26a   :  { %v732_v2 = vadd.f32 %v731_v35, %v717_v50  ;;  %v6773_v50 = vld [vmem:[%s10887_s4 + $0xd8] sm:$0xff]   ;;  %v6781_v35 = vld [vmem:[%s10887_s4 + $0x70] sm:$0xff]  }
 0x26b   :  { %6433 = vmatprep.subr.bf16.mxu1 %v6773_v50  ;;  %6375 = vmatprep.subr.bf16.mxu0 %v6781_v35 }
 0x26c   :  { %v733_v37 = vadd.f32 %v732_v2, %v718_v36  ;;  %v6918_v36 = vmov 0   ;;  %v6774_v2 = vld [vmem:[%s10887_s4 + $0x98] sm:$0xff]  }
 0x26d   :  { %891 = vst [vmem:[#allocation2 + $0x8] sm:$0xf] %v6918_v36  ;;  %893 = vst [vmem:[#allocation2 + $0x10] sm:$0xf] %v6918_v36  ;;  %6434 = vmatpush3.bf16.msra.mxu1 %v6774_v2 }
 0x26e   :  { %v734_v38 = vrot.slane %v733_v37, 4  ;;  %889 = vst [vmem:[#allocation2] sm:$0xf] %v6918_v36  ;;  %890 = vst [vmem:[#allocation2 + $0x4] sm:$0x1] %v6918_v36 }
 0x26f   :  { %892 = vst [vmem:[#allocation2 + $0xc] sm:$0x1] %v6918_v36  ;;  %894 = vst [vmem:[#allocation2 + $0x14] sm:$0x1] %v6918_v36 }
 0x270   :  { %v735_v40 = vadd.f32 %v734_v38, %v733_v37  ;;  %895 = vst [vmem:[#allocation2 + $0x18] sm:$0xf] %v6918_v36  ;;  %896 = vst [vmem:[#allocation2 + $0x1c] sm:$0x1] %v6918_v36  ;;  %v6782_v37 = vld [vmem:[%s10887_s4 + $0x30] sm:$0xff]   ;;  %v6777_v38 = vld [vmem:[%s10887_s4 + $0xe0] sm:$0xff]  }
 0x271   :  { %897 = vst [vmem:[#allocation2 + $0x20] sm:$0xf] %v6918_v36  ;;  %898 = vst [vmem:[#allocation2 + $0x24] sm:$0x1] %v6918_v36  ;;  %6376 = vmatpush3.bf16.msra.mxu0 %v6782_v37  ;;  %6435 = vmatprep.subr.bf16.mxu1 %v6777_v38 }
 0x272   :  { %v736_v42 = vrot.slane %v735_v40, 2  ;;  %899 = vst [vmem:[#allocation2 + $0x28] sm:$0xf] %v6918_v36  ;;  %900 = vst [vmem:[#allocation2 + $0x2c] sm:$0x1] %v6918_v36  ;;  %6377 = vmatprep.subr.bf16.mxu0 %v6788_v49 }
 0x273   :  { %901 = vst [vmem:[#allocation2 + $0x30] sm:$0xf] %v6918_v36  ;;  %902 = vst [vmem:[#allocation2 + $0x34] sm:$0x1] %v6918_v36 }
 0x274   :  { %v737_v43 = vadd.f32 %v736_v42, %v735_v40  ;;  %903 = vst [vmem:[#allocation2 + $0x38] sm:$0xf] %v6918_v36  ;;  %904 = vst [vmem:[#allocation2 + $0x3c] sm:$0x1] %v6918_v36  ;;  %v6778_v40 = vld [vmem:[%s10887_s4 + $0xa0] sm:$0xff]   ;;  %v6779_v42 = vld [vmem:[%s10887_s4 + $0xe8] sm:$0xff]  }
 0x275   :  { %905 = vst [vmem:[#allocation2 + $0x40] sm:$0xf] %v6918_v36  ;;  %906 = vst [vmem:[#allocation2 + $0x44] sm:$0x1] %v6918_v36  ;;  %6436 = vmatpush3.bf16.msra.mxu1 %v6778_v40  ;;  %6378 = vmatpush3.bf16.msra.mxu0 %v6789_v51  ;;  %v1305_v16 = vld [vmem:[#allocation2 + $0x4] sm:$0x1] }
 0x276   :  { %v738_v44 = vrot.slane %v737_v43, 1  ;;  %907 = vst [vmem:[#allocation2 + $0x48] sm:$0xf] %v6918_v36  ;;  %908 = vst [vmem:[#allocation2 + $0x4c] sm:$0x1] %v6918_v36  ;;  %6437 = vmatprep.subr.bf16.mxu1 %v6779_v42  ;;  %v1349_v28 = vshll.u32 %v1305_v16, 16 }
 0x277   :  { %909 = vst [vmem:[#allocation2 + $0x50] sm:$0xf] %v6918_v36  ;;  %910 = vst [vmem:[#allocation2 + $0x54] sm:$0x1] %v6918_v36 }
 0x278   :  { %v739_v5 = vadd.f32 %v738_v44, %v737_v43  ;;  %911 = vst [vmem:[#allocation2 + $0x58] sm:$0xf] %v6918_v36  ;;  %912 = vst [vmem:[#allocation2 + $0x5c] sm:$0x1] %v6918_v36  ;;  %v6780_v43 = vld [vmem:[%s10887_s4 + $0xa8] sm:$0xff]   ;;  %v6783_v44 = vld [vmem:[%s10887_s4 + $0xf0] sm:$0xff]  }
 0x279   :  { %913 = vst [vmem:[#allocation2 + $0x60] sm:$0xf] %v6918_v36  ;;  %914 = vst [vmem:[#allocation2 + $0x64] sm:$0x1] %v6918_v36  ;;  %6438 = vmatpush3.bf16.msra.mxu1 %v6780_v43  ;;  %v7632_v43 = vrot.slane %v1349_v28, 5 }
 0x27a   :  { %745 = vrot.lane.b32.xlu1 %v739_v5, %s6914_s24  ;;  %741 = vrot.lane.b32.xlu0 %v739_v5, %s6912_s22  ;;  %915 = vst [vmem:[#allocation2 + $0x68] sm:$0xf] %v6918_v36  ;;  %916 = vst [vmem:[#allocation2 + $0x6c] sm:$0x1] %v6918_v36 }
 0x27b   :  { %917 = vst [vmem:[#allocation2 + $0x70] sm:$0xf] %v6918_v36  ;;  %918 = vst [vmem:[#allocation2 + $0x74] sm:$0x1] %v6918_v36  ;;  %6439 = vmatprep.subr.bf16.mxu1 %v6783_v44 }
 0x27c   :  { %919 = vst [vmem:[#allocation2 + $0x78] sm:$0xf] %v6918_v36  ;;  %920 = vst [vmem:[#allocation2 + $0x7c] sm:$0x1] %v6918_v36 }
 0x27d   :  { %921 = vst [vmem:[#allocation2 + $0x80] sm:$0xf] %v6918_v36  ;;  %922 = vst [vmem:[#allocation2 + $0x84] sm:$0x1] %v6918_v36 }
 0x27e   :  { %753 = vrot.lane.b32.xlu1 %v739_v5, %s6913_s23  ;;  %749 = vrot.lane.b32.xlu0 %v739_v5, %s6911_s21  ;;  %923 = vst [vmem:[#allocation2 + $0x88] sm:$0xf] %v6918_v36  ;;  %924 = vst [vmem:[#allocation2 + $0x8c] sm:$0x1] %v6918_v36  ;;  %v1320_v20 = vld [vmem:[#allocation2 + $0x50] sm:$0xf] }
 0x27f   :  { %925 = vst [vmem:[#allocation2 + $0x90] sm:$0xf] %v6918_v36  ;;  %926 = vst [vmem:[#allocation2 + $0x94] sm:$0x1] %v6918_v36  ;;  %v1452_v30 = vshrl.u32 %v1320_v20, 16  ;;  %v1455_v32 = vshll.u32 %v1320_v20, 16 }
 0x280   :  { %927 = vst [vmem:[#allocation2 + $0x98] sm:$0xf] %v6918_v36  ;;  %928 = vst [vmem:[#allocation2 + $0x9c] sm:$0x1] %v6918_v36  ;;  %v7615_v33 = vld [vmem:[#allocation2 + $0x50] sm:$0xe] }
 0x281   :  { %v7618_v35 = vld [vmem:[#allocation2 + $0x54] sm:$0x1]  ;;  %v6011_v44 = vrot.slane %v7615_v33, 9 }
 0x282   :  { %761 = vrot.lane.b32.xlu1 %v739_v5, %s6915_s25  ;;  %757 = vrot.lane.b32.xlu0 %v739_v5, %s6916_s26  ;;  %v7620_v2 = vld [vmem:[#allocation2 + $0x54] sm:$0x1]  ;;  %v1461_v49 = vshll.u32 %v7618_v35, 16 }
 0x283   :  { %v1704_v51 = vrot.slane %v7620_v2, 5 }
 0x286   :  { %765 = vrot.lane.b32.xlu0 %v739_v5, %s6917_s27 }
 0x2ec   :  { %v746_v52 = vpop.permute.xlu1 %745  ;;  %v742_v54 = vpop.permute.xlu0 %741 }
 0x2ed   :  { %v744_v56 = vadd.f32 %v742_v54, %v739_v5  ;;  %v6784_v5 = vld [vmem:[%s10887_s4 + $0xb0] sm:$0xff]   ;;  %v6806_v54 = vld [vmem:[%s10887_s4 + $0x1c0] sm:$0xff]  }
 0x2ee   :  { %6440 = vmatpush3.bf16.msra.mxu1 %v6784_v5  ;;  %v7638_v5 = vld [vmem:[%s10888_s2] ss:$0 sm:$0xff] }
 0x2ef   :  { %v748_v57 = vadd.f32 %v746_v52, %v744_v56  ;;  %6441 = vmatprep.subr.bf16.mxu1 %v6785_v45  ;;  %v6791_v52 = vld [vmem:[%s10887_s4 + $0x140] sm:$0xff]   ;;  %v7640_v45 = vrot.slane %v1452_v30, 4 }
 0x2f0   :  { %v754_v59 = vpop.permute.xlu1 %753  ;;  %v750_v63 = vpop.permute.xlu0 %749  ;;  %6491 = vmatprep.subr.bf16.mxu0 %v6791_v52  ;;  %v1304_v56 = vld [vmem:[#allocation2] sm:$0xf] }
 0x2f1   :  { %v752_v0 = vadd.f32 %v750_v63, %v748_v57 }
 0x2f2   :  { %6442 = vmatpush3.bf16.msra.mxu1 %v6786_v48  ;;  %v7642_v48 = vrot.slane %v1455_v32, 5 }
 0x2f3   :  { %v756_v11 = vadd.f32 %v754_v59, %v752_v0  ;;  %6555 = vmatprep.subr.bf16.mxu1 %v6806_v54  ;;  %v1340_v0 = vshrl.u32 %v1304_v56, 16 }
 0x2f4   :  { %v758_v13 = vpop.permute.xlu0 %757  ;;  %v762_v6 = vpop.permute.xlu1 %761 }
 0x2f5   :  { %v760_v25 = vadd.f32 %v758_v13, %v756_v11  ;;  %v1343_v11 = vshll.u32 %v1304_v56, 16 }
 0x2f7   :  { %v764_v27 = vadd.f32 %v762_v6, %v760_v25 }
 0x2f8   :  { %v766_v9 = vpop.permute.xlu0 %765 }
 0x2f9   :  { %v768_v10 = vadd.f32 %v766_v9, %v764_v27  ;;  %v1603_v9 = vld [vmem:[#allocation2] sm:$0xe] }
 0x2fa   :  { %v6003_v22 = vrot.slane %v1603_v9, 9 }
 0x2fb   :  { %v769_v14 = vmul.f32 0.0009765625, %v768_v10  ;;  %v1604_v10 = vld [vmem:[#allocation2 + $0x4] sm:$0x1] }
 0x2fc   :  { %v1672_v23 = vrot.slane %v1604_v10, 5 }
 0x2fd   :  { %v770_v15 = vadd.f32 1e-05, %v769_v14  ;;  %v1342_v14 = vrot.slane %v1340_v0, 4 }
 0x2fe   :  { %v7625_v38 = vsel %vm7611_vm9, %v6003_v22, %v1672_v23 }
 0x2ff   :  { %6901 = vrsqrt.f32 %v770_v15  ;;  %v1345_v15 = vrot.slane %v1343_v11, 5 }
 0x301   :  { %v1346_v26 = vor.u32 %v1345_v15, %v1342_v14 }
 0x303   :  { %v7630_v42 = vrot.slane %v1346_v26, 4 }
 0x305   :  { %v1352_v35 = vsel %vm7739_vm11, %v7630_v42, %v7632_v43 }
 0x309   :  { %v7468_v19 = vpop.eup %6901 }
 0x30a   :  { %776 = vrot.lane.b32.xlu0 %v7468_v19, %s6915_s25  ;;  %773 = vrot.lane.b32.xlu1 %v7468_v19, %s6917_s27 }
 0x30e   :  { %782 = vrot.lane.b32.xlu0 %v7468_v19, %s6913_s23  ;;  %779 = vrot.lane.b32.xlu1 %v7468_v19, %s6916_s26 }
 0x312   :  { %788 = vrot.lane.b32.xlu0 %v7468_v19, %s6914_s24  ;;  %785 = vrot.lane.b32.xlu1 %v7468_v19, %s6911_s21 }
 0x316   :  { %791 = vrot.lane.b32.xlu1 %v7468_v19, %s6912_s22 }
 0x37c   :  { %v777_v57 = vpop.permute.xlu0 %776  ;;  %v774_v59 = vpop.permute.xlu1 %773 }
 0x37d   :  { %v794_v63 = vsel %vm669_vm0, %v7468_v19, %v774_v59  ;;  %v7657_v59 = vld [vmem:[%s10889_s3] ss:$0 sm:$0xff] }
 0x37e   :  { %v795_v25 = vsel %vm671_vm1, %v794_v63, %v777_v57 }
 0x380   :  { %v783_v13 = vpop.permute.xlu0 %782  ;;  %v780_v6 = vpop.permute.xlu1 %779 }
 0x381   :  { %v796_v27 = vsel %vm673_vm2, %v795_v25, %v780_v6 }
 0x382   :  { %v797_v17 = vsel %vm675_vm3, %v796_v27, %v783_v13 }
 0x384   :  { %v786_v18 = vpop.permute.xlu1 %785  ;;  %v789_v19 = vpop.permute.xlu0 %788 }
 0x385   :  { %v798_v21 = vsel %vm677_vm4, %v797_v17, %v786_v18 }
 0x386   :  { %v799_v34 = vsel %vm679_vm5, %v798_v21, %v789_v19 }
 0x388   :  { %v792_v50 = vpop.permute.xlu1 %791 }
 0x389   :  { %v800_v37 = vsel %vm681_vm6, %v799_v34, %v792_v50 }
 0x38a   :  { %v7628_v40 = vrot.slane %v800_v37, %v7355_v53 }
 0x38c   :  { %v805_v52 = vmul.f32 %v7628_v40, %v7361_v60  ;;  %v806_v54 = vmul.f32 %v7628_v40, %v7364_v61  ;;  %v807_v56 = vmul.f32 %v7628_v40, %v7367_v62  ;;  %v808_v57 = vmul.f32 %v7628_v40, %v7374_v1 }
 0x38d   :  { %v809_v63 = vmul.f32 %v7628_v40, %v7377_v3  ;;  %v810_v60 = vmul.f32 %v7628_v40, %v7382_v4  ;;  %v811_v61 = vmul.f32 %v7628_v40, %v7387_v7  ;;  %v812_v62 = vmul.f32 %v7628_v40, %v7392_v39 }
 0x38e   :  { %v827_v1 = vmul.f32 %v7638_v5, %v805_v52  ;;  %v828_v0 = vmul.f32 %v7638_v5, %v806_v54  ;;  %v829_v11 = vmul.f32 %v7638_v5, %v807_v56  ;;  %v830_v13 = vmul.f32 %v7638_v5, %v808_v57 }
 0x38f   :  { %v831_v3 = vmul.f32 %v7638_v5, %v809_v63  ;;  %v832_v4 = vmul.f32 %v7638_v5, %v810_v60  ;;  %v833_v25 = vmul.f32 %v7638_v5, %v811_v61  ;;  %v834_v7 = vmul.f32 %v7638_v5, %v812_v62  ;;  %v1133_v61 = vld [vmem:[#allocation2 + $0x8] sm:$0xf]  ;;  %v1142_v62 = vld [vmem:[#allocation2 + $0x10] sm:$0xf] }
 0x390   :  { %v849_v39 = vadd.f32 %v7657_v59, %v827_v1  ;;  %v850_v6 = vadd.f32 %v7657_v59, %v828_v0  ;;  %v851_v27 = vadd.f32 %v7657_v59, %v829_v11  ;;  %v852_v9 = vadd.f32 %v7657_v59, %v830_v13  ;;  %v1139_v1 = vld [vmem:[#allocation2 + $0xc] sm:$0x1] }
 0x391   :  { %v853_v10 = vadd.f32 %v7657_v59, %v831_v3  ;;  %v854_v14 = vadd.f32 %v7657_v59, %v832_v4  ;;  %v855_v15 = vadd.f32 %v7657_v59, %v833_v25  ;;  %v856_v16 = vadd.f32 %v7657_v59, %v834_v7 }
 0x392   :  { %v865_v17 = vmax.f32 %v849_v39, 0.0  ;;  %v866_v18 = vmax.f32 %v850_v6, 0.0  ;;  %v867_v20 = vmax.f32 %v851_v27, 0.0  ;;  %v868_v19 = vmax.f32 %v852_v9, 0.0  ;;  %v1148_v39 = vld [vmem:[#allocation2 + $0x18] sm:$0xf] }
 0x393   :  { %v869_v21 = vmax.f32 %v853_v10, 0.0  ;;  %v870_v22 = vmax.f32 %v854_v14, 0.0  ;;  %v871_v23 = vmax.f32 %v855_v15, 0.0  ;;  %v872_v26 = vmax.f32 %v856_v16, 0.0  ;;  %v1145_v15 = vld [vmem:[#allocation2 + $0x14] sm:$0x1] }
 0x394   :  { %v6219_v28 = vpack.c.bf16 %v865_v17, %v865_v17  ;;  %v6220_v30 = vpack.c.bf16 %v866_v18, %v866_v18  ;;  %v6221_v32 = vpack.c.bf16 %v867_v20, %v867_v20  ;;  %v6222_v34 = vpack.c.bf16 %v868_v19, %v868_v19 }
 0x395   :  { %v7683_v50 = vpack.c.bf16 %v869_v21, %v869_v21  ;;  %v7685_v37 = vpack.c.bf16 %v870_v22, %v870_v22  ;;  %v7687_v52 = vpack.c.bf16 %v871_v23, %v871_v23  ;;  %v7689_v54 = vpack.c.bf16 %v872_v26, %v872_v26  ;;  %v1154_v22 = vld [vmem:[#allocation2 + $0x20] sm:$0xf]  ;;  %v1151_v23 = vld [vmem:[#allocation2 + $0x1c] sm:$0x1] }
 0x396   :  { %v970_v56 = vshrl.u32 %v6219_v28, 16  ;;  %v973_v57 = vshll.u32 %v6219_v28, 16  ;;  %v978_v63 = vshrl.u32 %v6220_v30, 16  ;;  %v981_v60 = vshll.u32 %v6220_v30, 16 }
 0x397   :  { %v986_v0 = vshrl.u32 %v6221_v32, 16  ;;  %v989_v11 = vshll.u32 %v6221_v32, 16  ;;  %v994_v13 = vshrl.u32 %v6222_v34, 16  ;;  %v997_v3 = vshll.u32 %v6222_v34, 16  ;;  %v1157_v34 = vld [vmem:[#allocation2 + $0x24] sm:$0x1] }
 0x398   :  { %v972_v4 = vrot.slane %v970_v56, 7  ;;  %v980_v25 = vrot.slane %v978_v63, 7  ;;  %v1002_v6 = vshrl.u32 %v7683_v50, 16  ;;  %v1005_v27 = vshll.u32 %v7683_v50, 16 }
 0x399   :  { %v988_v10 = vrot.slane %v986_v0, 7  ;;  %v996_v14 = vrot.slane %v994_v13, 7  ;;  %v1010_v16 = vshrl.u32 %v7685_v37, 16  ;;  %v1013_v17 = vshll.u32 %v7685_v37, 16  ;;  %v1160_v0 = vld [vmem:[#allocation2 + $0x28] sm:$0xf] }
 0x39a   :  { %v975_v18 = vor.u32 %v973_v57, %v972_v4  ;;  %v976_v20 = vrot.slane %v972_v4, 4  ;;  %v983_v19 = vor.u32 %v981_v60, %v980_v25  ;;  %v984_v21 = vrot.slane %v980_v25, 4 }
 0x39b   :  { %v991_v26 = vor.u32 %v989_v11, %v988_v10  ;;  %v992_v28 = vrot.slane %v988_v10, 4  ;;  %v999_v30 = vor.u32 %v997_v3, %v996_v14  ;;  %v1000_v32 = vrot.slane %v996_v14, 4  ;;  %v1166_v11 = vld [vmem:[#allocation2 + $0x30] sm:$0xf]  ;;  %v1163_v3 = vld [vmem:[#allocation2 + $0x2c] sm:$0x1] }
 0x39c   :  { %v1134_v50 = vsel %vm7693_vm7, %v975_v18, %v1133_v61  ;;  %v1143_v56 = vsel %vm7693_vm7, %v983_v19, %v1142_v62  ;;  %v1140_v37 = vsel %vm7701_vm8, %v976_v20, %v1139_v1  ;;  %v1146_v57 = vsel %vm7701_vm8, %v984_v21, %v1145_v15  ;;  %v1169_v15 = vld [vmem:[#allocation2 + $0x34] sm:$0x1] }
 0x39d   :  { %1135 = vst [vmem:[#allocation2 + $0x8] sm:$0xf] %v1134_v50  ;;  %1144 = vst [vmem:[#allocation2 + $0x10] sm:$0xf] %v1143_v56  ;;  %v1149_v63 = vsel %vm7693_vm7, %v991_v26, %v1148_v39  ;;  %v1155_v60 = vsel %vm7693_vm7, %v999_v30, %v1154_v22  ;;  %v1152_v61 = vsel %vm7701_vm8, %v992_v28, %v1151_v23  ;;  %v1004_v62 = vrot.slane %v1002_v6, 7 }
 0x39e   :  { %1141 = vst [vmem:[#allocation2 + $0xc] sm:$0x1] %v1140_v37  ;;  %1147 = vst [vmem:[#allocation2 + $0x14] sm:$0x1] %v1146_v57  ;;  %v1012_v1 = vrot.slane %v1010_v16, 7  ;;  %v1158_v13 = vsel %vm7701_vm8, %v1000_v32, %v1157_v34  ;;  %v1018_v4 = vshrl.u32 %v7687_v52, 16  ;;  %v813_v16 = vmul.f32 %v7628_v40, %v7397_v41 }
 0x39f   :  { %1150 = vst [vmem:[#allocation2 + $0x18] sm:$0xf] %v1149_v63  ;;  %1156 = vst [vmem:[#allocation2 + $0x20] sm:$0xf] %v1155_v60  ;;  %v1021_v25 = vshll.u32 %v7687_v52, 16  ;;  %v1007_v39 = vor.u32 %v1005_v27, %v1004_v62  ;;  %v1008_v10 = vrot.slane %v1004_v62, 4  ;;  %v815_v60 = vmul.f32 %v7628_v40, %v7407_v58 }
 0x3a0   :  { %1153 = vst [vmem:[#allocation2 + $0x1c] sm:$0x1] %v1152_v61  ;;  %1159 = vst [vmem:[#allocation2 + $0x24] sm:$0x1] %v1158_v13  ;;  %v1026_v14 = vshrl.u32 %v7689_v54, 16  ;;  %v1029_v6 = vshll.u32 %v7689_v54, 16  ;;  %v1015_v18 = vor.u32 %v1013_v17, %v1012_v1  ;;  %v814_v54 = vmul.f32 %v7628_v40, %v7402_v55 }
 0x3a1   :  { %v1016_v20 = vrot.slane %v1012_v1, 4  ;;  %v1020_v19 = vrot.slane %v1018_v4, 7  ;;  %v1161_v21 = vsel %vm7693_vm7, %v1007_v39, %v1160_v0  ;;  %v1164_v52 = vsel %vm7701_vm8, %v1008_v10, %v1163_v3  ;;  %v1172_v22 = vld [vmem:[#allocation2 + $0x38] sm:$0xf]  ;;  %v1175_v23 = vld [vmem:[#allocation2 + $0x3c] sm:$0x1] }
 0x3a2   :  { %v7733_v27 = vrot.slane %v1026_v14, 7  ;;  %1162 = vst [vmem:[#allocation2 + $0x28] sm:$0xf] %v1161_v21  ;;  %v1167_v41 = vsel %vm7693_vm7, %v1015_v18, %v1166_v11  ;;  %1165 = vst [vmem:[#allocation2 + $0x2c] sm:$0x1] %v1164_v52  ;;  %v835_v34 = vmul.f32 %v7638_v5, %v813_v16  ;;  %v836_v50 = vmul.f32 %v7638_v5, %v814_v54  ;;  %v6808_v4 = vld [vmem:[%s10887_s4 + $0x180] sm:$0xff]  }
 0x3a3   :  { %v1023_v26 = vor.u32 %v1021_v25, %v1020_v19  ;;  %v1024_v28 = vrot.slane %v1020_v19, 4  ;;  %v1178_v30 = vld [vmem:[#allocation2 + $0x40] sm:$0xf]  ;;  %v1170_v32 = vsel %vm7701_vm8, %v1016_v20, %v1169_v15  ;;  %1168 = vst [vmem:[#allocation2 + $0x30] sm:$0xf] %v1167_v41  ;;  %v7752_v56 = vrot.slane %v1461_v49, 5 }
 0x3a4   :  { %v1031_v55 = vor.u32 %v1029_v6, %v7733_v27  ;;  %1171 = vst [vmem:[#allocation2 + $0x34] sm:$0x1] %v1170_v32  ;;  %v6787_v37 = vld [vmem:[#allocation2 + $0x8] ss:$8 sps:$4 sm:$0xff]   ;;  %v816_v61 = vmul.f32 %v7628_v40, %v7412_v8  ;;  %v1458_v11 = vor.u32 %v7642_v48, %v7640_v45  ;;  %v817_v58 = vmul.f32 %v7628_v40, %v7417_v12 }
 0x3a5   :  { %v1173_v57 = vsel %vm7693_vm7, %v1023_v26, %v1172_v22  ;;  %v1176_v63 = vsel %vm7701_vm8, %v1024_v28, %v1175_v23  ;;  %v1605_v62 = vld [vmem:[#allocation2 + $0x8] sm:$0xe]  ;;  %v1606_v0 = vld [vmem:[#allocation2 + $0xc] sm:$0x1]  ;;  %3624 = vmatprep.mubr.bf16.mxu1 %v6787_v37  ;;  %v1032_v13 = vrot.slane %v7733_v27, 4  ;;  %v837_v3 = vmul.f32 %v7638_v5, %v815_v60 }
 0x3a6   :  { %1174 = vst [vmem:[#allocation2 + $0x38] sm:$0xf] %v1173_v57  ;;  %v1179_v49 = vsel %vm7693_vm7, %v1031_v55, %v1178_v30  ;;  %1177 = vst [vmem:[#allocation2 + $0x3c] sm:$0x1] %v1176_v63  ;;  %v6004_v8 = vrot.slane %v1605_v62, 9  ;;  %v1676_v1 = vrot.slane %v1606_v0, 5  ;;  %v7778_v10 = vadd.f32 %v7657_v59, %v835_v34 }
 0x3a7   :  { %1180 = vst [vmem:[#allocation2 + $0x40] sm:$0xf] %v1179_v49  ;;  %v1306_v25 = vld [vmem:[#allocation2 + $0x8] sm:$0xf]  ;;  %v1307_v39 = vld [vmem:[#allocation2 + $0xc] sm:$0x1]  ;;  %v7781_v14 = vadd.f32 %v7657_v59, %v836_v50  ;;  %v838_v12 = vmul.f32 %v7638_v5, %v816_v61  ;;  %v7786_v6 = vmul.f32 %v7628_v40, %v7422_v29  ;;  %v7795_v41 = vmul.f32 %v7638_v5, %v817_v58 }
 0x3a8   :  { %v1677_v15 = vsel %vm7611_vm9, %v6004_v8, %v1676_v1  ;;  %v6790_v18 = vld [vmem:[#allocation2 + $0x18] ss:$8 sps:$4 sm:$0xff]   ;;  %v1354_v20 = vshrl.u32 %v1306_v25, 16  ;;  %v1357_v19 = vshll.u32 %v1306_v25, 16  ;;  %v1363_v16 = vshll.u32 %v1307_v39, 16  ;;  %v6809_v21 = vld [vmem:[%s10887_s4 + $0x1c8] sm:$0xff]  }
 0x3a9   :  { %v6019_v52 = vcombine.low %v7625_v38, %v1677_v15  ;;  %v1308_v22 = vld [vmem:[#allocation2 + $0x10] sm:$0xf]  ;;  %v1309_v23 = vld [vmem:[#allocation2 + $0x14] sm:$0x1]  ;;  %v1310_v54 = vld [vmem:[#allocation2 + $0x18] sm:$0xf]  ;;  %v819_v29 = vmul.f32 %v7628_v40, %v7427_v31  ;;  %v820_v26 = vmul.f32 %v7628_v40, %v7432_v47  ;;  %v7802_v34 = vadd.f32 %v7657_v59, %v837_v3 }
 0x3aa   :  { %v1356_v28 = vrot.slane %v1354_v20, 4  ;;  %v1359_v30 = vrot.slane %v1357_v19, 5  ;;  %v1311_v32 = vld [vmem:[#allocation2 + $0x1c] sm:$0x1]  ;;  %v1368_v55 = vshrl.u32 %v1308_v22, 16  ;;  %v6810_v38 = vld [vmem:[%s10887_s4 + $0x188] sm:$0xff]   ;;  %v7811_v49 = vadd.f32 %v7657_v59, %v838_v12 }
 0x3ab   :  { %3625 = vmatmul.mubr.bf16.vlgmr.msra.gmra.mrb[32].mxu1 %v6019_v52  ;;  %v1371_v50 = vshll.u32 %v1308_v22, 16  ;;  %v1377_v37 = vshll.u32 %v1309_v23, 16  ;;  %v1382_v57 = vshrl.u32 %v1310_v54, 16  ;;  %v1385_v63 = vshll.u32 %v1310_v54, 16  ;;  %v1607_v31 = vld [vmem:[#allocation2 + $0x10] sm:$0xe] }
 0x3ac   :  { %v6814_v47 = vld [vmem:[%s10887_s4 + $0x1d0] sm:$0xff]   ;;  %3632 = vmatprep.mubr.bf16.mxu1 %v6790_v18  ;;  %v1360_v40 = vor.u32 %v1359_v30, %v1356_v28  ;;  %v1370_v60 = vrot.slane %v1368_v55, 4  ;;  %v1391_v61 = vshll.u32 %v1311_v32, 16  ;;  %v1609_v0 = vld [vmem:[#allocation2 + $0x18] sm:$0xe]  ;;  %6556 = vmatpush3.bf16.msra.mxu1 %v6808_v4  ;;  %v1365_v58 = vrot.slane %v1363_v16, 5 }
 0x3ad   :  { %v1608_v62 = vld [vmem:[#allocation2 + $0x14] sm:$0x1]  ;;  %v1373_v8 = vrot.slane %v1371_v50, 5  ;;  %v1384_v1 = vrot.slane %v1382_v57, 4  ;;  %v1387_v3 = vrot.slane %v1385_v63, 5  ;;  %6557 = vmatprep.subr.bf16.mxu1 %v6809_v21  ;;  %v1379_v15 = vrot.slane %v1377_v37, 5 }
 0x3ae   :  { %v1610_v25 = vld [vmem:[#allocation2 + $0x1c] sm:$0x1]  ;;  %v1361_v39 = vrot.slane %v1360_v40, 4  ;;  %v6005_v20 = vrot.slane %v1607_v31, 9  ;;  %v1680_v19 = vrot.slane %v1608_v62, 5  ;;  %v6793_v18 = vld [vmem:[%s10887_s4 + $0x100] sm:$0xff]   ;;  %v841_v30 = vmul.f32 %v7638_v5, %v819_v29 }
 0x3af   :  { %v1374_v52 = vor.u32 %v1373_v8, %v1370_v60  ;;  %v1388_v22 = vor.u32 %v1387_v3, %v1384_v1  ;;  %v6006_v23 = vrot.slane %v1609_v0, 9  ;;  %v1684_v12 = vrot.slane %v1610_v25, 5  ;;  %v6792_v16 = vld [vmem:[#allocation2] ss:$8 sps:$4 sm:$0xff]   ;;  %v1313_v31 = vld [vmem:[#allocation2 + $0x24] sm:$0x1] }
 0x3b0   :  { %v1366_v4 = vsel %vm7739_vm11, %v1361_v39, %v1365_v58  ;;  %v1393_v54 = vrot.slane %v1391_v61, 5  ;;  %v1681_v21 = vsel %vm7611_vm9, %v6005_v20, %v1680_v19  ;;  %v6795_v28 = vld [vmem:[%s10887_s4 + $0x148] sm:$0xff]   ;;  %6558 = vmatpush3.bf16.msra.mxu1 %v6810_v38  ;;  %v1312_v63 = vld [vmem:[#allocation2 + $0x20] sm:$0xf]  ;;  %v6816_v38 = vld [vmem:[%s10887_s4 + $0x190] sm:$0xff]   ;;  %v842_v42 = vmul.f32 %v7638_v5, %v820_v26 }
 0x3b1   :  { %v5995_v32 = vcombine.low %v1352_v35, %v1366_v4  ;;  %v1375_v55 = vrot.slane %v1374_v52, 4  ;;  %v1389_v50 = vrot.slane %v1388_v22, 4  ;;  %v1685_v37 = vsel %vm7611_vm9, %v6006_v23, %v1684_v12  ;;  %v6794_v57 = vld [vmem:[#allocation2 + $0x28] ss:$8 sps:$4 sm:$0xff]   ;;  %6559 = vmatprep.subr.bf16.mxu1 %v6814_v47  ;;  %v1315_v60 = vld [vmem:[#allocation2 + $0x2c] sm:$0x1] }
 0x3b2   :  { %v6020_v29 = vcombine.low %v1681_v21, %v1685_v37  ;;  %v1314_v40 = vld [vmem:[#allocation2 + $0x28] sm:$0xf]  ;;  %v1396_v61 = vshrl.u32 %v1312_v63, 16  ;;  %v1399_v62 = vshll.u32 %v1312_v63, 16  ;;  %v1405_v0 = vshll.u32 %v1313_v31, 16 }
 0x3b3   :  { %3527 = vmatprep.mubr.bf16.mxu0 %v5995_v32  ;;  %v1380_v43 = vsel %vm7739_vm11, %v1375_v55, %v1379_v15  ;;  %v1394_v35 = vsel %vm7739_vm11, %v1389_v50, %v1393_v54  ;;  %v6797_v47 = vld [vmem:[%s10887_s4 + $0x108] sm:$0xff]   ;;  %v1410_v58 = vshrl.u32 %v1314_v40, 16  ;;  %v1611_v8 = vld [vmem:[#allocation2 + $0x20] sm:$0xe]  ;;  %v1612_v1 = vld [vmem:[#allocation2 + $0x24] sm:$0x1]  ;;  %v7858_v63 = vadd.f32 %v7657_v59, %v842_v42 }
 0x3b4   :  { %3528 = vmatmul.mubr.bf16.vlgmr.msra.gmra.mrb[32].mxu0 %v6792_v16  ;;  %v5996_v3 = vcombine.low %v1380_v43, %v1394_v35  ;;  %3633 = vmatmul.mubr.bf16.gmra.mrb[36].mxu1 %v6020_v29  ;;  %v1398_v25 = vrot.slane %v1396_v61, 4  ;;  %v1401_v26 = vrot.slane %v1399_v62, 5  ;;  %v1413_v39 = vshll.u32 %v1314_v40, 16  ;;  %v1613_v20 = vld [vmem:[#allocation2 + $0x28] sm:$0xe]  ;;  %v6817_v15 = vld [vmem:[%s10887_s4 + $0x1d8] sm:$0xff]  }
 0x3b5   :  { %v1181_v19 = vld [vmem:[#allocation2 + $0x44] sm:$0x1]  ;;  %6492 = vmatpush3.bf16.msra.mxu0 %v6793_v18  ;;  %3640 = vmatprep.mubr.bf16.mxu1 %v6794_v57  ;;  %v1407_v52 = vrot.slane %v1405_v0, 5  ;;  %v1412_v22 = vrot.slane %v1410_v58, 4  ;;  %v1419_v23 = vshll.u32 %v1315_v60, 16  ;;  %v6007_v4 = vrot.slane %v1611_v8, 9 }
 0x3b6   :  { %v1614_v12 = vld [vmem:[#allocation2 + $0x2c] sm:$0x1]  ;;  %3535 = vmatprep.mubr.bf16.mxu0 %v5996_v3  ;;  %6493 = vmatprep.subr.bf16.mxu0 %v6795_v28  ;;  %v1402_v16 = vor.u32 %v1401_v26, %v1398_v25  ;;  %v1415_v54 = vrot.slane %v1413_v39, 5  ;;  %v1688_v21 = vrot.slane %v1612_v1, 5  ;;  %v6008_v32 = vrot.slane %v1613_v20, 9  ;;  %v6799_v55 = vld [vmem:[%s10887_s4 + $0x150] sm:$0xff]  }
 0x3b7   :  { %v1421_v50 = vrot.slane %v1419_v23, 5  ;;  %v1692_v37 = vrot.slane %v1614_v12, 5  ;;  %v6801_v18 = vld [vmem:[%s10887_s4 + $0x110] sm:$0xff]   ;;  %6560 = vmatpush3.bf16.msra.mxu1 %v6816_v38  ;;  %v6818_v57 = vld [vmem:[%s10887_s4 + $0x198] sm:$0xff]   ;;  %v7855_v28 = vadd.f32 %v7657_v59, %v841_v30  ;;  %v873_v61 = vmax.f32 %v7778_v10, 0.0  ;;  %v6822_v30 = vld [vmem:[%s10887_s4 + $0x1e0] sm:$0xff]  }
 0x3b8   :  { %v6796_v31 = vld [vmem:[#allocation2 + $0x10] ss:$8 sps:$4 sm:$0xff]   ;;  %v1403_v29 = vrot.slane %v1402_v16, 4  ;;  %v1416_v40 = vor.u32 %v1415_v54, %v1412_v22  ;;  %v1689_v60 = vsel %vm7611_vm9, %v6007_v4, %v1688_v21  ;;  %6561 = vmatprep.subr.bf16.mxu1 %v6817_v15  ;;  %v1317_v35 = vld [vmem:[#allocation2 + $0x34] sm:$0x1]  ;;  %v7873_v0 = vmul.f32 %v7638_v5, %v7786_v6  ;;  %v6824_v58 = vld [vmem:[%s10887_s4 + $0x1a0] sm:$0xff]  }
 0x3b9   :  { %v6803_v38 = vld [vmem:[%s10887_s4 + $0x158] sm:$0xff]   ;;  %6494 = vmatpush3.bf16.msra.mxu0 %v6797_v47  ;;  %v1693_v62 = vsel %vm7611_vm9, %v6008_v32, %v1692_v37  ;;  %v1316_v43 = vld [vmem:[#allocation2 + $0x30] sm:$0xf]  ;;  %v7877_v10 = vadd.f32 %v7657_v59, %v7795_v41  ;;  %v1182_v47 = vsel %vm7701_vm8, %v1032_v13, %v1181_v19  ;;  %v6825_v41 = vld [vmem:[%s10887_s4 + $0x1e8] sm:$0xff]   ;;  %v1433_v39 = vshll.u32 %v1317_v35, 16 }
 0x3ba   :  { %v6798_v42 = vld [vmem:[#allocation2 + $0x38] ss:$8 sps:$4 sm:$0xff]   ;;  %v1408_v8 = vsel %vm7739_vm11, %v1403_v29, %v1407_v52  ;;  %v1417_v1 = vrot.slane %v1416_v40, 4  ;;  %v6021_v3 = vcombine.low %v1689_v60, %v1693_v62  ;;  %6495 = vmatprep.subr.bf16.mxu0 %v6799_v55  ;;  %v1319_v6 = vld [vmem:[#allocation2 + $0x3c] sm:$0x1]  ;;  %v1424_v25 = vshrl.u32 %v1316_v43, 16 }
 0x3bb   :  { %v1318_v5 = vld [vmem:[#allocation2 + $0x38] sm:$0xf]  ;;  %1183 = vst [vmem:[#allocation2 + $0x44] sm:$0x1] %v1182_v47  ;;  %v1427_v26 = vshll.u32 %v1316_v43, 16  ;;  %6562 = vmatpush3.bf16.msra.mxu1 %v6818_v57  ;;  %v1447_v22 = vshll.u32 %v1319_v6, 16  ;;  %v6227_v4 = vpack.c.bf16 %v873_v61, %v873_v61 }
 0x3bc   :  { %v1438_v27 = vshrl.u32 %v1318_v5, 16  ;;  %v1441_v20 = vshll.u32 %v1318_v5, 16  ;;  %v1615_v15 = vld [vmem:[#allocation2 + $0x30] sm:$0xe]  ;;  %v6805_v13 = vld [vmem:[%s10887_s4 + $0x118] sm:$0xff]   ;;  %3536 = vmatmul.mubr.bf16.gmra.mrb[36].mxu0 %v6796_v31  ;;  %v1422_v19 = vsel %vm7739_vm11, %v1417_v1, %v1421_v50  ;;  %3641 = vmatmul.mubr.bf16.gmra.mrb[40].mxu1 %v6021_v3  ;;  %v1426_v52 = vrot.slane %v1424_v25, 4 }
 0x3bd   :  { %v1616_v23 = vld [vmem:[#allocation2 + $0x34] sm:$0x1]  ;;  %v1617_v12 = vld [vmem:[#allocation2 + $0x38] sm:$0xe]  ;;  %v5997_v16 = vcombine.low %v1408_v8, %v1422_v19  ;;  %3648 = vmatprep.mubr.bf16.mxu1 %v6798_v42  ;;  %6496 = vmatpush3.bf16.msra.mxu0 %v6801_v18  ;;  %v1429_v54 = vrot.slane %v1427_v26, 5  ;;  %v1435_v21 = vrot.slane %v1433_v39, 5 }
 0x3be   :  { %v1440_v32 = vrot.slane %v1438_v27, 4  ;;  %v1618_v55 = vld [vmem:[#allocation2 + $0x3c] sm:$0x1]  ;;  %v6811_v37 = vld [vmem:[%s10887_s4 + $0x160] sm:$0xff]   ;;  %v1443_v57 = vrot.slane %v1441_v20, 5  ;;  %v1449_v31 = vrot.slane %v1447_v22, 5  ;;  %6497 = vmatprep.subr.bf16.mxu0 %v6803_v38  ;;  %6563 = vmatprep.subr.bf16.mxu1 %v6822_v30 }
 0x3bf   :  { %v6009_v50 = vrot.slane %v1615_v15, 9  ;;  %v1696_v29 = vrot.slane %v1616_v23, 5  ;;  %3543 = vmatprep.mubr.bf16.mxu0 %v5997_v16  ;;  %v1430_v40 = vor.u32 %v1429_v54, %v1426_v52  ;;  %v6010_v60 = vrot.slane %v1617_v12, 9  ;;  %6564 = vmatpush3.bf16.msra.mxu1 %v6824_v58  ;;  %v6826_v62 = vld [vmem:[%s10887_s4 + $0x1a8] sm:$0xff]   ;;  %v6813_v58 = vld [vmem:[%s10887_s4 + $0x120] sm:$0xff]   ;;  %v6830_v1 = vld [vmem:[%s10887_s4 + $0x1f0] sm:$0xff]  }
 0x3c0   :  { %v1700_v61 = vrot.slane %v1618_v55, 5  ;;  %v874_v18 = vmax.f32 %v7781_v14, 0.0  ;;  %v1444_v42 = vor.u32 %v1443_v57, %v1440_v32  ;;  %v1034_v35 = vshrl.u32 %v6227_v4, 16  ;;  %6565 = vmatprep.subr.bf16.mxu1 %v6825_v41  ;;  %v6800_v3 = vld [vmem:[#allocation2 + $0x20] ss:$8 sps:$4 sm:$0xff]   ;;  %v6832_v16 = vld [vmem:[%s10887_s4 + $0x1f8] sm:$0xff]  }
 0x3c1   :  { %v1697_v43 = vsel %vm7611_vm9, %v6009_v50, %v1696_v29  ;;  %v1037_v47 = vshll.u32 %v6227_v4, 16  ;;  %v1431_v38 = vrot.slane %v1430_v40, 4  ;;  %6498 = vmatpush3.bf16.msra.mxu0 %v6805_v13  ;;  %v875_v14 = vmax.f32 %v7802_v34, 0.0  ;;  %v6819_v26 = vld [vmem:[%s10887_s4 + $0x168] sm:$0xff]   ;;  %v1184_v27 = vld [vmem:[#allocation2 + $0x58] sm:$0xf] }
 0x3c2   :  { %v1701_v30 = vsel %vm7611_vm9, %v6010_v60, %v1700_v61  ;;  %v6228_v8 = vpack.c.bf16 %v874_v18, %v874_v18  ;;  %v1445_v5 = vrot.slane %v1444_v42, 4  ;;  %v1036_v25 = vrot.slane %v1034_v35, 7  ;;  %6499 = vmatprep.subr.bf16.mxu0 %v6811_v37  ;;  %v1187_v20 = vld [vmem:[#allocation2 + $0x5c] sm:$0x1]  ;;  %v1190_v23 = vld [vmem:[#allocation2 + $0x60] sm:$0xf] }
 0x3c3   :  { %v6022_v6 = vcombine.low %v1697_v43, %v1701_v30  ;;  %v876_v41 = vmax.f32 %v7811_v49, 0.0  ;;  %v1436_v34 = vsel %vm7739_vm11, %v1431_v38, %v1435_v21  ;;  %v6229_v15 = vpack.c.bf16 %v875_v14, %v875_v14  ;;  %6566 = vmatpush3.bf16.msra.mxu1 %v6826_v62  ;;  %v6831_v49 = vld [vmem:[%s10887_s4 + $0x1b0] sm:$0xff]   ;;  %v1193_v4 = vld [vmem:[#allocation2 + $0x64] sm:$0x1]  ;;  %v6821_v32 = vld [vmem:[%s10887_s4 + $0x128] sm:$0xff]  }
 0x3c4   :  { %v1042_v39 = vshrl.u32 %v6228_v8, 16  ;;  %v862_v13 = vadd.f32 %v7657_v59, %v7873_v0  ;;  %3544 = vmatmul.mubr.bf16.gmra.mrb[40].mxu0 %v6800_v3  ;;  %v1450_v19 = vsel %vm7739_vm11, %v1445_v5, %v1449_v31  ;;  %v1039_v52 = vor.u32 %v1037_v47, %v1036_v25  ;;  %6567 = vmatprep.subr.bf16.mxu1 %v6830_v1  ;;  %v6827_v50 = vld [vmem:[%s10887_s4 + $0x170] sm:$0xff]   ;;  %v1196_v61 = vld [vmem:[#allocation2 + $0x68] sm:$0xf]  ;;  %v6833_v62 = vld [vmem:[%s10887_s4 + $0x1b8] sm:$0xff]  }
 0x3c5   :  { %3649 = vmatmul.mubr.bf16.gmra.mrb[44].mxu1 %v6022_v6  ;;  %v1040_v22 = vrot.slane %v1036_v25, 4  ;;  %v6230_v12 = vpack.c.bf16 %v876_v41, %v876_v41  ;;  %v5998_v59 = vcombine.low %v1436_v34, %v1450_v19  ;;  %v1045_v54 = vshll.u32 %v6228_v8, 16  ;;  %6500 = vmatpush3.bf16.msra.mxu0 %v6813_v58  ;;  %v1199_v35 = vld [vmem:[#allocation2 + $0x6c] sm:$0x1]  ;;  %v1202_v58 = vld [vmem:[#allocation2 + $0x70] sm:$0xf] }
 0x3c6   :  { %v1044_v0 = vrot.slane %v1042_v39, 7  ;;  %v1050_v21 = vshrl.u32 %v6229_v15, 16  ;;  %v1185_v55 = vsel %vm7693_vm7, %v1039_v52, %v1184_v27  ;;  %v1053_v57 = vshll.u32 %v6229_v15, 16  ;;  %6501 = vmatprep.subr.bf16.mxu0 %v6819_v26  ;;  %v6829_v1 = vld [vmem:[%s10887_s4 + $0x130] sm:$0xff]   ;;  %v6834_v26 = vld [vmem:[%s10887_s4 + $0x178] sm:$0xff]  }
 0x3c7   :  { %v1188_v37 = vsel %vm7701_vm8, %v1040_v22, %v1187_v20  ;;  %v1058_v31 = vshrl.u32 %v6230_v12, 16  ;;  %3551 = vmatprep.mubr.bf16.mxu0 %v5998_v59  ;;  %1186 = vst [vmem:[#allocation2 + $0x58] sm:$0xf] %v1185_v55  ;;  %v877_v18 = vmax.f32 %v7877_v10, 0.0  ;;  %6568 = vmatpush3.bf16.msra.mxu1 %v6831_v49  ;;  %v1061_v43 = vshll.u32 %v6230_v12, 16  ;;  %v6836_v22 = vld [vmem:[%s10887_s4 + $0x138] sm:$0xff]  }
 0x3c8   :  { %v1047_v29 = vor.u32 %v1045_v54, %v1044_v0  ;;  %v1048_v40 = vrot.slane %v1044_v0, 4  ;;  %1189 = vst [vmem:[#allocation2 + $0x5c] sm:$0x1] %v1188_v37  ;;  %v1052_v60 = vrot.slane %v1050_v21, 7  ;;  %v878_v47 = vmax.f32 %v862_v13, 0.0  ;;  %6569 = vmatprep.subr.bf16.mxu1 %v6832_v16 }
 0x3c9   :  { %v1060_v42 = vrot.slane %v1058_v31, 7  ;;  %v879_v38 = vmax.f32 %v7855_v28, 0.0  ;;  %6502 = vmatpush3.bf16.msra.mxu0 %v6821_v32  ;;  %v6804_v3 = vld [vmem:[#allocation2 + $0x30] ss:$8 sps:$4 sm:$0xff]   ;;  %v6231_v28 = vpack.c.bf16 %v877_v18, %v877_v18  ;;  %v1205_v41 = vld [vmem:[#allocation2 + $0x74] sm:$0x1] }
 0x3ca   :  { %v1191_v30 = vsel %vm7693_vm7, %v1047_v29, %v1190_v23  ;;  %v1055_v8 = vor.u32 %v1053_v57, %v1052_v60  ;;  %v1056_v14 = vrot.slane %v1052_v60, 4  ;;  %v1194_v10 = vsel %vm7701_vm8, %v1048_v40, %v1193_v4  ;;  %6503 = vmatprep.subr.bf16.mxu0 %v6827_v50  ;;  %v7978_v23 = vld [vmem:[%s10887_s4 + $0x200] sm:$0xff]   ;;  %v1208_v16 = vld [vmem:[#allocation2 + $0x78] sm:$0xf] }
 0x3cb   :  { %1192 = vst [vmem:[#allocation2 + $0x60] sm:$0xf] %v1191_v30  ;;  %v1063_v5 = vor.u32 %v1061_v43, %v1060_v42  ;;  %v1064_v6 = vrot.slane %v1060_v42, 4  ;;  %1195 = vst [vmem:[#allocation2 + $0x64] sm:$0x1] %v1194_v10  ;;  %v6232_v25 = vpack.c.bf16 %v878_v47, %v878_v47  ;;  %v7958_v34 = vrot.slane %v1458_v11, 4  ;;  %6570 = vmatpush3.bf16.msra.mxu1 %v6833_v62 }
 0x3cc   :  { %v1197_v39 = vsel %vm7693_vm7, %v1055_v8, %v1196_v61  ;;  %v1200_v27 = vsel %vm7701_vm8, %v1056_v14, %v1199_v35  ;;  %v7964_v20 = vpack.c.bf16 %v879_v38, %v879_v38  ;;  %3552 = vmatmul.mubr.bf16.gmra.mrb[44].mxu0 %v6804_v3  ;;  %v1066_v13 = vshrl.u32 %v6231_v28, 16  ;;  %v1214_v55 = vld [vmem:[#allocation2 + $0x80] sm:$0xf] }
 0x3cd   :  { %1198 = vst [vmem:[#allocation2 + $0x68] sm:$0xf] %v1197_v39  ;;  %v1203_v15 = vsel %vm7693_vm7, %v1063_v5, %v1202_v58  ;;  %1201 = vst [vmem:[#allocation2 + $0x6c] sm:$0x1] %v1200_v27  ;;  %v1074_v49 = vshrl.u32 %v6232_v25, 16  ;;  %v880_v45 = vmax.f32 %v7858_v63, 0.0  ;;  %v1206_v19 = vsel %vm7701_vm8, %v1064_v6, %v1205_v41  ;;  %6504 = vmatpush3.bf16.msra.mxu0 %v6829_v1 }
 0x3ce   :  { %1204 = vst [vmem:[#allocation2 + $0x70] sm:$0xf] %v1203_v15  ;;  %v1069_v48 = vshll.u32 %v6231_v28, 16  ;;  %v1077_v11 = vshll.u32 %v6232_v25, 16  ;;  %v1082_v52 = vshrl.u32 %v7964_v20, 16  ;;  %6505 = vmatprep.subr.bf16.mxu0 %v6834_v26  ;;  %v7980_v32 = vrot.slane %v1066_v13, 7 }
 0x3cf   :  { %v1322_v12 = vld [vmem:[#allocation2 + $0x58] sm:$0xf]  ;;  %v1323_v4 = vld [vmem:[#allocation2 + $0x5c] sm:$0x1]  ;;  %1207 = vst [vmem:[#allocation2 + $0x74] sm:$0x1] %v1206_v19  ;;  %v1705_v60 = vsel %vm7611_vm9, %v6011_v44, %v1704_v51  ;;  %v1464_v44 = vsel %vm7739_vm11, %v7958_v34, %v7752_v56 }
 0x3d0   :  { %v1466_v59 = vshrl.u32 %v1322_v12, 16  ;;  %v1469_v0 = vshll.u32 %v1322_v12, 16  ;;  %v1475_v54 = vshll.u32 %v1323_v4, 16  ;;  %v1621_v21 = vld [vmem:[#allocation2 + $0x58] sm:$0xe]  ;;  %v7982_v31 = vrot.slane %v1074_v49, 7 }
 0x3d1   :  { %v1622_v37 = vld [vmem:[#allocation2 + $0x5c] sm:$0x1]  ;;  %v6012_v57 = vrot.slane %v1621_v21, 9  ;;  %v1071_v61 = vor.u32 %v1069_v48, %v7980_v32  ;;  %6506 = vmatpush3.bf16.msra.mxu0 %v6836_v22  ;;  %v1085_v35 = vshll.u32 %v7964_v20, 16  ;;  %v6812_v34 = vld [vmem:[#allocation2 + $0x50] ss:$8 sps:$4 sm:$0xff]  }
 0x3d2   :  { %v6802_v50 = vld [vmem:[#allocation2 + $0x58] ss:$8 sps:$4 sm:$0xff]   ;;  %v1468_v29 = vrot.slane %v1466_v59, 4  ;;  %v1471_v40 = vrot.slane %v1469_v0, 5  ;;  %v1477_v18 = vrot.slane %v1475_v54, 5  ;;  %v1708_v62 = vrot.slane %v1622_v37, 5  ;;  %6646 = vmatprep.subr.bf16.mxu0 %v7978_v23 }
 0x3d3   :  { %v1324_v42 = vld [vmem:[#allocation2 + $0x60] sm:$0xf]  ;;  %v1079_v43 = vor.u32 %v1077_v11, %v7982_v31  ;;  %3656 = vmatprep.mubr.bf16.mxu1 %v6802_v50  ;;  %v1325_v2 = vld [vmem:[#allocation2 + $0x64] sm:$0x1]  ;;  %v1209_v33 = vsel %vm7693_vm7, %v1071_v61, %v1208_v16  ;;  %v1211_v49 = vld [vmem:[#allocation2 + $0x7c] sm:$0x1] }
 0x3d4   :  { %v1472_v47 = vor.u32 %v1471_v40, %v1468_v29  ;;  %v1326_v38 = vld [vmem:[#allocation2 + $0x68] sm:$0xf]  ;;  %v1709_v51 = vsel %vm7611_vm9, %v6012_v57, %v1708_v62  ;;  %v1327_v8 = vld [vmem:[#allocation2 + $0x6c] sm:$0x1]  ;;  %1210 = vst [vmem:[#allocation2 + $0x78] sm:$0xf] %v1209_v33  ;;  %v8013_v40 = vpack.c.bf16 %v880_v45, %v880_v45 }
 0x3d5   :  { %v6807_v30 = vld [vmem:[#allocation2 + $0x68] ss:$8 sps:$4 sm:$0xff]   ;;  %v1215_v14 = vsel %vm7693_vm7, %v1079_v43, %v1214_v55  ;;  %v6023_v10 = vcombine.low %v1705_v60, %v1709_v51  ;;  %v1480_v1 = vshrl.u32 %v1324_v42, 16  ;;  %v1483_v3 = vshll.u32 %v1324_v42, 16  ;;  %v1623_v5 = vld [vmem:[#allocation2 + $0x60] sm:$0xe] }
 0x3d6   :  { %v1473_v58 = vrot.slane %v1472_v47, 4  ;;  %1216 = vst [vmem:[#allocation2 + $0x80] sm:$0xf] %v1215_v14  ;;  %v1489_v6 = vshll.u32 %v1325_v2, 16  ;;  %v1494_v28 = vshrl.u32 %v1326_v38, 16  ;;  %v1497_v25 = vshll.u32 %v1326_v38, 16 }
 0x3d7   :  { %v1503_v41 = vshll.u32 %v1327_v8, 16  ;;  %v1624_v56 = vld [vmem:[#allocation2 + $0x64] sm:$0x1]  ;;  %3657 = vmatmul.mubr.bf16.gmra.mrb[48].mxu1 %v6023_v10  ;;  %v1482_v39 = vrot.slane %v1480_v1, 4  ;;  %v1485_v27 = vrot.slane %v1483_v3, 5  ;;  %v6013_v16 = vrot.slane %v1623_v5, 9 }
 0x3d8   :  { %v1478_v26 = vsel %vm7739_vm11, %v1473_v58, %v1477_v18  ;;  %v1625_v15 = vld [vmem:[#allocation2 + $0x68] sm:$0xe]  ;;  %v1626_v13 = vld [vmem:[#allocation2 + $0x6c] sm:$0x1]  ;;  %3664 = vmatprep.mubr.bf16.mxu1 %v6807_v30  ;;  %v1491_v11 = vrot.slane %v1489_v6, 5  ;;  %v1496_v19 = vrot.slane %v1494_v28, 4 }
 0x3d9   :  { %v5999_v48 = vcombine.low %v1464_v44, %v1478_v26  ;;  %v1499_v22 = vrot.slane %v1497_v25, 5  ;;  %v1486_v12 = vor.u32 %v1485_v27, %v1482_v39  ;;  %v1505_v4 = vrot.slane %v1503_v41, 5  ;;  %v1328_v29 = vld [vmem:[#allocation2 + $0x70] sm:$0xf]  ;;  %v1220_v2 = vld [vmem:[#allocation2 + $0x88] sm:$0xf] }
 0x3da   :  { %v1712_v59 = vrot.slane %v1624_v56, 5  ;;  %v6014_v54 = vrot.slane %v1625_v15, 9  ;;  %v1716_v21 = vrot.slane %v1626_v13, 5  ;;  %v1072_v55 = vrot.slane %v7980_v32, 4  ;;  %v1627_v30 = vld [vmem:[#allocation2 + $0x70] sm:$0xe] }
 0x3db   :  { %3559 = vmatprep.mubr.bf16.mxu0 %v5999_v48  ;;  %v1500_v0 = vor.u32 %v1499_v22, %v1496_v19  ;;  %v1487_v37 = vrot.slane %v1486_v12, 4  ;;  %v1080_v50 = vrot.slane %v7982_v31, 4  ;;  %v1508_v62 = vshrl.u32 %v1328_v29, 16  ;;  %v1329_v31 = vld [vmem:[#allocation2 + $0x74] sm:$0x1] }
 0x3dc   :  { %3560 = vmatmul.mubr.bf16.gmra.mrb[48].mxu0 %v6812_v34  ;;  %v1713_v57 = vsel %vm7611_vm9, %v6013_v16, %v1712_v59  ;;  %v1717_v61 = vsel %vm7611_vm9, %v6014_v54, %v1716_v21  ;;  %v1212_v32 = vsel %vm7701_vm8, %v1072_v55, %v1211_v49  ;;  %v1330_v47 = vld [vmem:[#allocation2 + $0x78] sm:$0xf]  ;;  %v1511_v63 = vshll.u32 %v1328_v29, 16  ;;  %v1217_v8 = vld [vmem:[#allocation2 + $0x84] sm:$0x1] }
 0x3dd   :  { %v1501_v60 = vrot.slane %v1500_v0, 4  ;;  %v6815_v18 = vld [vmem:[#allocation2 + $0x78] ss:$8 sps:$4 sm:$0xff]   ;;  %v1492_v42 = vsel %vm7739_vm11, %v1487_v37, %v1491_v11  ;;  %v6024_v43 = vcombine.low %v1713_v57, %v1717_v61  ;;  %1213 = vst [vmem:[#allocation2 + $0x7c] sm:$0x1] %v1212_v32  ;;  %v1084_v45 = vrot.slane %v1082_v52, 7 }
 0x3de   :  { %v1510_v33 = vrot.slane %v1508_v62, 4  ;;  %v1517_v44 = vshll.u32 %v1329_v31, 16  ;;  %v1522_v51 = vshrl.u32 %v1330_v47, 16  ;;  %v1223_v14 = vld [vmem:[#allocation2 + $0x8c] sm:$0x1]  ;;  %v1513_v1 = vrot.slane %v1511_v63, 5 }
 0x3df   :  { %v1506_v38 = vsel %vm7739_vm11, %v1501_v60, %v1505_v4  ;;  %3665 = vmatmul.mubr.bf16.gmra.mrb[52].mxu1 %v6024_v43  ;;  %v6820_v10 = vld [vmem:[#allocation2 + $0x60] ss:$8 sps:$4 sm:$0xff]   ;;  %v1525_v3 = vshll.u32 %v1330_v47, 16  ;;  %v1628_v5 = vld [vmem:[#allocation2 + $0x74] sm:$0x1]  ;;  %v1087_v52 = vor.u32 %v1085_v35, %v1084_v45  ;;  %v6015_v41 = vrot.slane %v1627_v30, 9 }
 0x3e0   :  { %v6000_v58 = vcombine.low %v1492_v42, %v1506_v38  ;;  %v1629_v6 = vld [vmem:[#allocation2 + $0x78] sm:$0xe]  ;;  %3672 = vmatprep.mubr.bf16.mxu1 %v6815_v18  ;;  %v1519_v28 = vrot.slane %v1517_v44, 5  ;;  %v1524_v25 = vrot.slane %v1522_v51, 4  ;;  %v1514_v56 = vor.u32 %v1513_v1, %v1510_v33  ;;  %v1332_v48 = vld [vmem:[#allocation2 + $0x80] sm:$0xf] }
 0x3e1   :  { %v1527_v26 = vrot.slane %v1525_v3, 5  ;;  %v1720_v34 = vrot.slane %v1628_v5, 5  ;;  %v1088_v39 = vrot.slane %v1084_v45, 4  ;;  %v6016_v27 = vrot.slane %v1629_v6, 9  ;;  %v2383_v20 = vld [vmem:[#allocation2 + $0x10] sm:$0xf] }
 0x3e2   :  { %3567 = vmatprep.mubr.bf16.mxu0 %v6000_v58  ;;  %v1090_v15 = vshrl.u32 %v8013_v40, 16  ;;  %v1093_v13 = vshll.u32 %v8013_v40, 16  ;;  %v1221_v49 = vsel %vm7693_vm7, %v1087_v52, %v1220_v2  ;;  %v1515_v35 = vrot.slane %v1514_v56, 4  ;;  %v1226_v19 = vld [vmem:[#allocation2 + $0x90] sm:$0xf] }
 0x3e3   :  { %v1528_v11 = vor.u32 %v1527_v26, %v1524_v25  ;;  %1222 = vst [vmem:[#allocation2 + $0x88] sm:$0xf] %v1221_v49  ;;  %v1218_v22 = vsel %vm7701_vm8, %v1080_v50, %v1217_v8  ;;  %v1224_v12 = vsel %vm7701_vm8, %v1088_v39, %v1223_v14  ;;  %v8035_v4 = vld [vmem:[#allocation2 + $0x80] sm:$0xe]  ;;  %v1536_v54 = vshrl.u32 %v1332_v48, 16 }
 0x3e4   :  { %3568 = vmatmul.mubr.bf16.gmra.mrb[52].mxu0 %v6820_v10  ;;  %v1331_v16 = vld [vmem:[#allocation2 + $0x7c] sm:$0x1]  ;;  %v8037_v0 = vrot.slane %v1090_v15, 7  ;;  %1219 = vst [vmem:[#allocation2 + $0x84] sm:$0x1] %v1218_v22  ;;  %v1721_v37 = vsel %vm7611_vm9, %v6015_v41, %v1720_v34  ;;  %v1520_v50 = vsel %vm7739_vm11, %v1515_v35, %v1519_v28  ;;  %v1539_v61 = vshll.u32 %v1332_v48, 16 }
 0x3e5   :  { %v1630_v59 = vld [vmem:[#allocation2 + $0x7c] sm:$0x1]  ;;  %1225 = vst [vmem:[#allocation2 + $0x8c] sm:$0x1] %v1224_v12  ;;  %v1529_v21 = vrot.slane %v1528_v11, 4  ;;  %v1531_v55 = vshll.u32 %v1331_v16, 16 }
 0x3e6   :  { %v1724_v57 = vrot.slane %v1630_v59, 5  ;;  %v2384_v29 = vld [vmem:[#allocation2 + $0x14] sm:$0x1]  ;;  %v1095_v40 = vor.u32 %v1093_v13, %v8037_v0  ;;  %v1538_v60 = vrot.slane %v1536_v54, 4  ;;  %v2385_v18 = vld [vmem:[#allocation2 + $0x18] sm:$0xf] }
 0x3e7   :  { %v1533_v32 = vrot.slane %v1531_v55, 5  ;;  %v6017_v42 = vrot.slane %v8035_v4, 9  ;;  %v2416_v43 = vshrl.u32 %v2383_v20, 16  ;;  %v1541_v63 = vrot.slane %v1539_v61, 5  ;;  %v6828_v38 = vld [vmem:[#allocation2 + $0x70] ss:$8 sps:$4 sm:$0xff]  }
 0x3e8   :  { %v1725_v62 = vsel %vm7611_vm9, %v6016_v27, %v1724_v57  ;;  %v1227_v47 = vsel %vm7693_vm7, %v1095_v40, %v1226_v19  ;;  %v2419_v45 = vshll.u32 %v2383_v20, 16  ;;  %v2425_v44 = vshll.u32 %v2384_v29, 16  ;;  %v2386_v5 = vld [vmem:[#allocation2 + $0x1c] sm:$0x1]  ;;  %v2142_v56 = vld [vmem:[#allocation2 + $0x8] sm:$0xe] }
 0x3e9   :  { %v6025_v31 = vcombine.low %v1721_v37, %v1725_v62  ;;  %v1534_v2 = vsel %vm7739_vm11, %v1529_v21, %v1533_v32  ;;  %1228 = vst [vmem:[#allocation2 + $0x90] sm:$0xf] %v1227_v47  ;;  %v2418_v33 = vrot.slane %v2416_v43, 4  ;;  %v2430_v51 = vshrl.u32 %v2385_v18, 16  ;;  %v2143_v13 = vld [vmem:[#allocation2 + $0xc] sm:$0x1] }
 0x3ea   :  { %v6001_v30 = vcombine.low %v1520_v50, %v1534_v2  ;;  %v1334_v8 = vld [vmem:[#allocation2 + $0x88] sm:$0xf]  ;;  %v1542_v14 = vor.u32 %v1541_v63, %v1538_v60  ;;  %v2421_v15 = vrot.slane %v2419_v45, 5  ;;  %v2144_v49 = vld [vmem:[#allocation2 + $0x10] sm:$0xe]  ;;  %v2427_v11 = vrot.slane %v2425_v44, 5 }
 0x3eb   :  { %3673 = vmatmul.mubr.bf16.gmra.mrb[56].mxu1 %v6025_v31  ;;  %v1633_v58 = vld [vmem:[#allocation2 + $0x88] sm:$0xe]  ;;  %v1333_v10 = vld [vmem:[#allocation2 + $0x84] sm:$0x1]  ;;  %v1550_v3 = vshrl.u32 %v1334_v8, 16  ;;  %v1553_v7 = vshll.u32 %v1334_v8, 16 }
 0x3ec   :  { %v1335_v1 = vld [vmem:[#allocation2 + $0x8c] sm:$0x1]  ;;  %3575 = vmatprep.mubr.bf16.mxu0 %v6001_v30  ;;  %v1543_v6 = vrot.slane %v1542_v14, 4  ;;  %v1545_v52 = vshll.u32 %v1333_v10, 16  ;;  %v1632_v25 = vld [vmem:[#allocation2 + $0x84] sm:$0x1]  ;;  %v2422_v12 = vor.u32 %v2421_v15, %v2418_v33 }
 0x3ed   :  { %v1559_v28 = vshll.u32 %v1335_v1, 16  ;;  %v6018_v41 = vrot.slane %v1633_v58, 9  ;;  %3576 = vmatmul.mubr.bf16.gmra.mrb[56].mxu0 %v6828_v38  ;;  %v1552_v26 = vrot.slane %v1550_v3, 4  ;;  %v1555_v34 = vrot.slane %v1553_v7, 5  ;;  %v1634_v39 = vld [vmem:[#allocation2 + $0x8c] sm:$0x1] }
 0x3ee   :  { %v1728_v27 = vrot.slane %v1632_v25, 5  ;;  %v1547_v48 = vrot.slane %v1545_v52, 5  ;;  %v1732_v35 = vrot.slane %v1634_v39, 5  ;;  %v2432_v4 = vrot.slane %v2430_v51, 4  ;;  %v2145_v16 = vld [vmem:[#allocation2 + $0x14] sm:$0x1] }
 0x3ef   :  { %v1561_v20 = vrot.slane %v1559_v28, 5  ;;  %v1556_v19 = vor.u32 %v1555_v34, %v1552_v26  ;;  %v2387_v59 = vld [vmem:[#allocation2 + $0x20] sm:$0xf]  ;;  %v2433_v37 = vshll.u32 %v2385_v18, 16  ;;  %v2439_v57 = vshll.u32 %v2386_v5, 16 }
 0x3f0   :  { %v1729_v22 = vsel %vm7611_vm9, %v6017_v42, %v1728_v27  ;;  %v6823_v54 = vld [vmem:[#allocation2 + $0x88] ss:$8 sps:$4 sm:$0xff]   ;;  %v1548_v21 = vsel %vm7739_vm11, %v1543_v6, %v1547_v48  ;;  %v1733_v55 = vsel %vm7611_vm9, %v6018_v41, %v1732_v35  ;;  %v2423_v40 = vrot.slane %v2422_v12, 4  ;;  %v2388_v61 = vld [vmem:[#allocation2 + $0x24] sm:$0x1] }
 0x3f1   :  { %v1557_v29 = vrot.slane %v1556_v19, 4  ;;  %v6026_v50 = vcombine.low %v1729_v22, %v1733_v55  ;;  %v6043_v60 = vrot.slane %v2142_v56, 9  ;;  %3680 = vmatprep.mubr.bf16.mxu1 %v6823_v54  ;;  %v2435_v32 = vrot.slane %v2433_v37, 5  ;;  %v2389_v31 = vld [vmem:[#allocation2 + $0x28] sm:$0xf] }
 0x3f2   :  { %v2441_v62 = vrot.slane %v2439_v57, 5  ;;  %v2208_v42 = vrot.slane %v2143_v13, 5  ;;  %v6044_v43 = vrot.slane %v2144_v49, 9  ;;  %v2428_v63 = vsel %vm7739_vm11, %v2423_v40, %v2427_v11  ;;  %v2390_v45 = vld [vmem:[#allocation2 + $0x2c] sm:$0x1] }
 0x3f3   :  { %v1562_v47 = vsel %vm7739_vm11, %v1557_v29, %v1561_v20  ;;  %3681 = vmatmul.mubr.bf16.gmra.mrb[60].mxu1 %v6026_v50  ;;  %v2212_v18 = vrot.slane %v2145_v16, 5  ;;  %v2444_v2 = vshrl.u32 %v2387_v59, 16  ;;  %v2436_v33 = vor.u32 %v2435_v32, %v2432_v4  ;;  %v1846_v30 = vld [vmem:[#allocation2 + $0x8] sm:$0xf]  ;;  %v1847_v8 = vld [vmem:[#allocation2 + $0xc] sm:$0x1] }
 0x3f4   :  { %v6002_v38 = vcombine.low %v1548_v21, %v1562_v47  ;;  %v2209_v44 = vsel %vm7611_vm9, %v6043_v60, %v2208_v42  ;;  %v2447_v51 = vshll.u32 %v2387_v59, 16  ;;  %v6835_v14 = vld [vmem:[#allocation2 + $0x80] ss:$8 sps:$4 sm:$0xff]   ;;  %v2453_v1 = vshll.u32 %v2388_v61, 16  ;;  %v1848_v7 = vld [vmem:[#allocation2 + $0x10] sm:$0xf] }
 0x3f5   :  { %v2213_v58 = vsel %vm7611_vm9, %v6044_v43, %v2212_v18  ;;  %v2446_v10 = vrot.slane %v2444_v2, 4  ;;  %v2458_v3 = vshrl.u32 %v2389_v31, 16  ;;  %v2437_v5 = vrot.slane %v2436_v33, 4  ;;  %v1849_v25 = vld [vmem:[#allocation2 + $0x14] sm:$0x1] }
 0x3f6   :  { %3583 = vmatprep.mubr.bf16.mxu0 %v6002_v38  ;;  %v6059_v6 = vcombine.low %v2209_v44, %v2213_v58  ;;  %v2449_v52 = vrot.slane %v2447_v51, 5  ;;  %v2461_v28 = vshll.u32 %v2389_v31, 16  ;;  %v2455_v41 = vrot.slane %v2453_v1, 5  ;;  %v2146_v39 = vld [vmem:[#allocation2 + $0x18] sm:$0xe] }
 0x3f7   :  { %3584 = vmatmul.mubr.bf16.gmra.mrb[60].mxu0 %v6835_v14  ;;  %v2460_v56 = vrot.slane %v2458_v3, 4  ;;  %v2467_v26 = vshll.u32 %v2390_v45, 16  ;;  %v1879_v34 = vshrl.u32 %v1846_v30, 16  ;;  %v2442_v27 = vsel %vm7739_vm11, %v2437_v5, %v2441_v62  ;;  %v6837_v15 = vld [vmem:[#allocation2 + $0x10] ss:$8 sps:$4 sm:$0xff]  }
 0x3f8   :  { %3721 = vmatprep.mubr.bf16.mxu0 %v6059_v6  ;;  %v2450_v13 = vor.u32 %v2449_v52, %v2446_v10  ;;  %v2463_v49 = vrot.slane %v2461_v28, 5  ;;  %v1882_v48 = vshll.u32 %v1846_v30, 16  ;;  %v2147_v20 = vld [vmem:[#allocation2 + $0x1c] sm:$0x1]  ;;  %v6075_v35 = vcombine.low %v2428_v63, %v2442_v27  ;;  %v2148_v12 = vld [vmem:[#allocation2 + $0x20] sm:$0xe] }
 0x3f9   :  { %v2469_v11 = vrot.slane %v2467_v26, 5  ;;  %v1881_v19 = vrot.slane %v1879_v34, 4  ;;  %v1888_v22 = vshll.u32 %v1847_v8, 16  ;;  %v1893_v54 = vshrl.u32 %v1848_v7, 16  ;;  %v2149_v21 = vld [vmem:[#allocation2 + $0x24] sm:$0x1] }
 0x3fa   :  { %v2451_v4 = vrot.slane %v2450_v13, 4  ;;  %v2464_v16 = vor.u32 %v2463_v49, %v2460_v56  ;;  %v1884_v59 = vrot.slane %v1882_v48, 5  ;;  %3818 = vmatprep.mubr.bf16.mxu1 %v6075_v35  ;;  %v1896_v37 = vshll.u32 %v1848_v7, 16  ;;  %v2391_v50 = vld [vmem:[#allocation2 + $0x30] sm:$0xf] }
 0x3fb   :  { %v1890_v55 = vrot.slane %v1888_v22, 5  ;;  %v1902_v57 = vshll.u32 %v1849_v25, 16  ;;  %v6045_v29 = vrot.slane %v2146_v39, 9  ;;  %3819 = vmatmul.mubr.bf16.vlgmr.msra.gmra.mrb[64].mxu1 %v6837_v15  ;;  %v1895_v32 = vrot.slane %v1893_v54, 4  ;;  %v2392_v47 = vld [vmem:[#allocation2 + $0x34] sm:$0x1] }
 0x3fc   :  { %v2456_v40 = vsel %vm7739_vm11, %v2451_v4, %v2455_v41  ;;  %v2465_v60 = vrot.slane %v2464_v16, 4  ;;  %v1885_v61 = vor.u32 %v1884_v59, %v1881_v19  ;;  %v1898_v62 = vrot.slane %v1896_v37, 5  ;;  %v2393_v2 = vld [vmem:[#allocation2 + $0x38] sm:$0xf]  ;;  %v2394_v30 = vld [vmem:[#allocation2 + $0x3c] sm:$0x1] }
 0x3fd   :  { %v1904_v42 = vrot.slane %v1902_v57, 5  ;;  %v2216_v43 = vrot.slane %v2147_v20, 5  ;;  %v6046_v31 = vrot.slane %v2148_v12, 9  ;;  %v2220_v45 = vrot.slane %v2149_v21, 5  ;;  %v1850_v14 = vld [vmem:[#allocation2 + $0x18] sm:$0xf] }
 0x3fe   :  { %v2470_v63 = vsel %vm7739_vm11, %v2465_v60, %v2469_v11  ;;  %v1886_v18 = vrot.slane %v1885_v61, 4  ;;  %v2472_v38 = vshrl.u32 %v2391_v50, 16  ;;  %v1899_v44 = vor.u32 %v1898_v62, %v1895_v32  ;;  %v6839_v1 = vld [vmem:[#allocation2 + $0x20] ss:$8 sps:$4 sm:$0xff]   ;;  %v1851_v5 = vld [vmem:[#allocation2 + $0x1c] sm:$0x1] }
 0x3ff   :  { %v6076_v33 = vcombine.low %v2456_v40, %v2470_v63  ;;  %v2217_v51 = vsel %vm7611_vm9, %v6045_v29, %v2216_v43  ;;  %v2475_v8 = vshll.u32 %v2391_v50, 16  ;;  %v2221_v10 = vsel %vm7611_vm9, %v6046_v31, %v2220_v45  ;;  %v1852_v6 = vld [vmem:[#allocation2 + $0x20] sm:$0xf]  ;;  %v1853_v39 = vld [vmem:[#allocation2 + $0x24] sm:$0x1]  ;;  %v6840_v12 = vld [vmem:[%s10887_s4 + $0x208] sm:$0xff]  }
 0x400   :  { %v1891_v58 = vsel %vm7739_vm11, %v1886_v18, %v1890_v55  ;;  %v2474_v3 = vrot.slane %v2472_v38, 4  ;;  %v2481_v7 = vshll.u32 %v2392_v47, 16  ;;  %v1900_v52 = vrot.slane %v1899_v44, 4  ;;  %v2150_v20 = vld [vmem:[#allocation2 + $0x28] sm:$0xe] }
 0x401   :  { %3826 = vmatprep.mubr.bf16.mxu1 %v6076_v33  ;;  %v6060_v28 = vcombine.low %v2217_v51, %v2221_v10  ;;  %v2477_v25 = vrot.slane %v2475_v8, 5  ;;  %v2486_v41 = vshrl.u32 %v2393_v2, 16  ;;  %v2489_v26 = vshll.u32 %v2393_v2, 16  ;;  %v2151_v35 = vld [vmem:[#allocation2 + $0x2c] sm:$0x1]  ;;  %v6842_v2 = vld [vmem:[%s10887_s4 + $0x210] sm:$0xff]  }
 0x402   :  { %v2483_v56 = vrot.slane %v2481_v7, 5  ;;  %v2495_v34 = vshll.u32 %v2394_v30, 16  ;;  %v1907_v27 = vshrl.u32 %v1850_v14, 16  ;;  %v1905_v15 = vsel %vm7739_vm11, %v1900_v52, %v1904_v42  ;;  %v2152_v16 = vld [vmem:[#allocation2 + $0x30] sm:$0xe] }
 0x403   :  { %v2478_v13 = vor.u32 %v2477_v25, %v2474_v3  ;;  %v2488_v49 = vrot.slane %v2486_v41, 4  ;;  %v1910_v48 = vshll.u32 %v1850_v14, 16  ;;  %v6035_v11 = vcombine.low %v1891_v58, %v1905_v15  ;;  %3827 = vmatmul.mubr.bf16.gmra.mrb[68].mxu1 %v6839_v1  ;;  %v2153_v37 = vld [vmem:[#allocation2 + $0x34] sm:$0x1]  ;;  %v2395_v60 = vld [vmem:[#allocation2 + $0x40] sm:$0xf] }
 0x404   :  { %v2491_v19 = vrot.slane %v2489_v26, 5  ;;  %v2497_v22 = vrot.slane %v2495_v34, 5  ;;  %v1909_v4 = vrot.slane %v1907_v27, 4  ;;  %v1916_v21 = vshll.u32 %v1851_v5, 16  ;;  %v2397_v18 = vld [vmem:[#allocation2 + $0x48] sm:$0xf] }
 0x405   :  { %v2479_v59 = vrot.slane %v2478_v13, 4  ;;  %v1912_v54 = vrot.slane %v1910_v48, 5  ;;  %v1921_v55 = vshrl.u32 %v1852_v6, 16  ;;  %3722 = vmatmul.mubr.bf16.vlgmr.msra.gmra.mrb[64].mxu0 %v6035_v11  ;;  %v1924_v29 = vshll.u32 %v1852_v6, 16  ;;  %v2398_v45 = vld [vmem:[#allocation2 + $0x4c] sm:$0x1] }
 0x406   :  { %v2492_v57 = vor.u32 %v2491_v19, %v2488_v49  ;;  %v1930_v50 = vshll.u32 %v1853_v39, 16  ;;  %v6047_v40 = vrot.slane %v2150_v20, 9  ;;  %6647 = vmatpush3.bf16.msra.mxu0 %v7978_v23  ;;  %3729 = vmatprep.mubr.bf16.mxu0 %v6060_v28  ;;  %v1918_v62 = vrot.slane %v1916_v21, 5  ;;  %v2396_v44 = vld [vmem:[#allocation2 + $0x44] sm:$0x1]  ;;  %v6844_v26 = vld [vmem:[%s10887_s4 + $0x218] sm:$0xff]  }
 0x407   :  { %v2484_v61 = vsel %vm7739_vm11, %v2479_v59, %v2483_v56  ;;  %v1913_v32 = vor.u32 %v1912_v54, %v1909_v4  ;;  %v1923_v42 = vrot.slane %v1921_v55, 4  ;;  %6648 = vmatprep.subr.bf16.mxu0 %v6840_v12  ;;  %v1926_v31 = vrot.slane %v1924_v29, 5  ;;  %v6841_v58 = vld [vmem:[#allocation2 + $0x30] ss:$8 sps:$4 sm:$0xff]   ;;  %v1854_v1 = vld [vmem:[#allocation2 + $0x28] sm:$0xf] }
 0x408   :  { %v2493_v43 = vrot.slane %v2492_v57, 4  ;;  %v1932_v47 = vrot.slane %v1930_v50, 5  ;;  %v2224_v63 = vrot.slane %v2151_v35, 5  ;;  %v6048_v23 = vrot.slane %v2152_v16, 9  ;;  %v1855_v52 = vld [vmem:[#allocation2 + $0x2c] sm:$0x1] }
 0x409   :  { %v1914_v38 = vrot.slane %v1913_v32, 4  ;;  %v2228_v33 = vrot.slane %v2153_v37, 5  ;;  %v2500_v51 = vshrl.u32 %v2395_v60, 16  ;;  %v1927_v8 = vor.u32 %v1926_v31, %v1923_v42  ;;  %v1856_v15 = vld [vmem:[#allocation2 + $0x30] sm:$0xf]  ;;  %v6846_v54 = vld [vmem:[%s10887_s4 + $0x220] sm:$0xff]  }
 0x40a   :  { %v2498_v30 = vsel %vm7739_vm11, %v2493_v43, %v2497_v22  ;;  %v2225_v14 = vsel %vm7611_vm9, %v6047_v40, %v2224_v63  ;;  %v2503_v10 = vshll.u32 %v2395_v60, 16  ;;  %6649 = vmatpush3.bf16.msra.mxu0 %v6840_v12  ;;  %v2509_v56 = vshll.u32 %v2396_v44, 16  ;;  %v1857_v35 = vld [vmem:[#allocation2 + $0x34] sm:$0x1]  ;;  %v2154_v19 = vld [vmem:[#allocation2 + $0x38] sm:$0xe] }
 0x40b   :  { %v6077_v3 = vcombine.low %v2484_v61, %v2498_v30  ;;  %v1919_v7 = vsel %vm7739_vm11, %v1914_v38, %v1918_v62  ;;  %v2229_v5 = vsel %vm7611_vm9, %v6048_v23, %v2228_v33  ;;  %v2502_v6 = vrot.slane %v2500_v51, 4  ;;  %6650 = vmatprep.subr.bf16.mxu0 %v6842_v2  ;;  %v2155_v59 = vld [vmem:[#allocation2 + $0x3c] sm:$0x1]  ;;  %v2156_v29 = vld [vmem:[#allocation2 + $0x40] sm:$0xe]  ;;  %v6848_v38 = vld [vmem:[%s10887_s4 + $0x228] sm:$0xff]  }
 0x40c   :  { %v1928_v28 = vrot.slane %v1927_v8, 4  ;;  %v6061_v25 = vcombine.low %v2225_v14, %v2229_v5  ;;  %v2505_v41 = vrot.slane %v2503_v10, 5  ;;  %v2514_v34 = vshrl.u32 %v2397_v18, 16  ;;  %v2157_v32 = vld [vmem:[#allocation2 + $0x44] sm:$0x1] }
 0x40d   :  { %3834 = vmatprep.mubr.bf16.mxu1 %v6077_v3  ;;  %v2517_v39 = vshll.u32 %v2397_v18, 16  ;;  %v2523_v27 = vshll.u32 %v2398_v45, 16  ;;  %v1935_v13 = vshrl.u32 %v1854_v1, 16  ;;  %v2511_v20 = vrot.slane %v2509_v56, 5  ;;  %v2400_v30 = vld [vmem:[#allocation2 + $0x64] sm:$0x1] }
 0x40e   :  { %v1933_v49 = vsel %vm7739_vm11, %v1928_v28, %v1932_v47  ;;  %3835 = vmatmul.mubr.bf16.gmra.mrb[72].mxu1 %v6841_v58  ;;  %v2506_v48 = vor.u32 %v2505_v41, %v2502_v6  ;;  %v1938_v11 = vshll.u32 %v1854_v1, 16  ;;  %v2516_v12 = vrot.slane %v2514_v34, 4  ;;  %6651 = vmatpush3.bf16.msra.mxu0 %v6842_v2  ;;  %v2399_v47 = vld [vmem:[#allocation2 + $0x60] sm:$0xf]  ;;  %v2401_v58 = vld [vmem:[#allocation2 + $0x68] sm:$0xf] }
 0x40f   :  { %v6036_v22 = vcombine.low %v1919_v7, %v1933_v49  ;;  %v2519_v4 = vrot.slane %v2517_v39, 5  ;;  %v2525_v16 = vrot.slane %v2523_v27, 5  ;;  %v1937_v55 = vrot.slane %v1935_v13, 4  ;;  %6652 = vmatprep.subr.bf16.mxu0 %v6844_v26  ;;  %v2402_v10 = vld [vmem:[#allocation2 + $0x6c] sm:$0x1]  ;;  %v6850_v39 = vld [vmem:[%s10887_s4 + $0x230] sm:$0xff]  }
 0x410   :  { %v2507_v21 = vrot.slane %v2506_v48, 4  ;;  %v1940_v37 = vrot.slane %v1938_v11, 5  ;;  %v1944_v57 = vshll.u32 %v1855_v52, 16  ;;  %v1949_v40 = vshrl.u32 %v1856_v15, 16  ;;  %v1858_v28 = vld [vmem:[#allocation2 + $0x38] sm:$0xf] }
 0x411   :  { %3730 = vmatmul.mubr.bf16.gmra.mrb[68].mxu0 %v6036_v22  ;;  %v2520_v50 = vor.u32 %v2519_v4, %v2516_v12  ;;  %v1952_v60 = vshll.u32 %v1856_v15, 16  ;;  %v1958_v61 = vshll.u32 %v1857_v35, 16  ;;  %v6049_v31 = vrot.slane %v2154_v19, 9  ;;  %v6843_v56 = vld [vmem:[#allocation2 + $0x40] ss:$8 sps:$4 sm:$0xff]  }
 0x412   :  { %3737 = vmatprep.mubr.bf16.mxu0 %v6061_v25  ;;  %v2512_v62 = vsel %vm7739_vm11, %v2507_v21, %v2511_v20  ;;  %v1941_v42 = vor.u32 %v1940_v37, %v1937_v55  ;;  %v1946_v43 = vrot.slane %v1944_v57, 5  ;;  %v1951_v18 = vrot.slane %v1949_v40, 4  ;;  %6653 = vmatpush3.bf16.msra.mxu0 %v6844_v26  ;;  %v1859_v48 = vld [vmem:[#allocation2 + $0x3c] sm:$0x1]  ;;  %v1860_v11 = vld [vmem:[#allocation2 + $0x40] sm:$0xf] }
 0x413   :  { %v2521_v63 = vrot.slane %v2520_v50, 4  ;;  %v1954_v45 = vrot.slane %v1952_v60, 5  ;;  %v1960_v2 = vrot.slane %v1958_v61, 5  ;;  %v2232_v33 = vrot.slane %v2155_v59, 5  ;;  %6654 = vmatprep.subr.bf16.mxu0 %v6846_v54  ;;  %v1861_v19 = vld [vmem:[#allocation2 + $0x44] sm:$0x1] }
 0x414   :  { %v1942_v23 = vrot.slane %v1941_v42, 4  ;;  %v6050_v44 = vrot.slane %v2156_v29, 9  ;;  %v2236_v51 = vrot.slane %v2157_v32, 5  ;;  %v2528_v1 = vshrl.u32 %v2399_v47, 16  ;;  %v2158_v21 = vld [vmem:[#allocation2 + $0x58] sm:$0xe] }
 0x415   :  { %v2526_v8 = vsel %vm7739_vm11, %v2521_v63, %v2525_v16  ;;  %v1955_v14 = vor.u32 %v1954_v45, %v1951_v18  ;;  %v2531_v3 = vshll.u32 %v2399_v47, 16  ;;  %v2233_v6 = vsel %vm7611_vm9, %v6049_v31, %v2232_v33  ;;  %v2159_v50 = vld [vmem:[#allocation2 + $0x5c] sm:$0x1]  ;;  %v2161_v63 = vld [vmem:[#allocation2 + $0x64] sm:$0x1] }
 0x416   :  { %v6078_v7 = vcombine.low %v2512_v62, %v2526_v8  ;;  %v1947_v5 = vsel %vm7739_vm11, %v1942_v23, %v1946_v43  ;;  %v2237_v52 = vsel %vm7611_vm9, %v6050_v44, %v2236_v51  ;;  %v2530_v26 = vrot.slane %v2528_v1, 4  ;;  %6655 = vmatpush3.bf16.msra.mxu0 %v6846_v54  ;;  %v2160_v62 = vld [vmem:[#allocation2 + $0x60] sm:$0xe]  ;;  %v6852_v42 = vld [vmem:[%s10887_s4 + $0x238] sm:$0xff]   ;;  %v2403_v45 = vld [vmem:[#allocation2 + $0x70] sm:$0xf] }
 0x417   :  { %v1956_v25 = vrot.slane %v1955_v14, 4  ;;  %v6062_v41 = vcombine.low %v2233_v6, %v2237_v52  ;;  %v2533_v34 = vrot.slane %v2531_v3, 5  ;;  %v2537_v27 = vshll.u32 %v2400_v30, 16  ;;  %6656 = vmatprep.subr.bf16.mxu0 %v6848_v38  ;;  %v2404_v44 = vld [vmem:[#allocation2 + $0x74] sm:$0x1] }
 0x418   :  { %3842 = vmatprep.mubr.bf16.mxu1 %v6078_v7  ;;  %v2542_v15 = vshrl.u32 %v2401_v58, 16  ;;  %v2545_v13 = vshll.u32 %v2401_v58, 16  ;;  %v2551_v49 = vshll.u32 %v2402_v10, 16  ;;  %v1963_v22 = vshrl.u32 %v1858_v28, 16  ;;  %v2405_v58 = vld [vmem:[#allocation2 + $0x78] sm:$0xf] }
 0x419   :  { %v1961_v20 = vsel %vm7739_vm11, %v1956_v25, %v1960_v2  ;;  %3843 = vmatmul.mubr.bf16.gmra.mrb[76].mxu1 %v6843_v56  ;;  %v2534_v35 = vor.u32 %v2533_v34, %v2530_v26  ;;  %v1966_v12 = vshll.u32 %v1858_v28, 16  ;;  %v2539_v16 = vrot.slane %v2537_v27, 5  ;;  %v6845_v7 = vld [vmem:[#allocation2 + $0x60] ss:$8 sps:$4 sm:$0xff]   ;;  %v1862_v52 = vld [vmem:[#allocation2 + $0x58] sm:$0xf] }
 0x41a   :  { %v6037_v4 = vcombine.low %v1947_v5, %v1961_v20  ;;  %v2544_v59 = vrot.slane %v2542_v15, 4  ;;  %v2547_v54 = vrot.slane %v2545_v13, 5  ;;  %v2553_v37 = vrot.slane %v2551_v49, 5  ;;  %6657 = vmatpush3.bf16.msra.mxu0 %v6848_v38  ;;  %v2406_v5 = vld [vmem:[#allocation2 + $0x7c] sm:$0x1] }
 0x41b   :  { %v2535_v55 = vrot.slane %v2534_v35, 4  ;;  %v1965_v57 = vrot.slane %v1963_v22, 4  ;;  %v1968_v29 = vrot.slane %v1966_v12, 5  ;;  %v1972_v60 = vshll.u32 %v1859_v48, 16  ;;  %6658 = vmatprep.subr.bf16.mxu0 %v6850_v39  ;;  %v1863_v15 = vld [vmem:[#allocation2 + $0x5c] sm:$0x1] }
 0x41c   :  { %3738 = vmatmul.mubr.bf16.gmra.mrb[72].mxu0 %v6037_v4  ;;  %v2548_v40 = vor.u32 %v2547_v54, %v2544_v59  ;;  %v1977_v61 = vshrl.u32 %v1860_v11, 16  ;;  %v1980_v32 = vshll.u32 %v1860_v11, 16  ;;  %v1986_v47 = vshll.u32 %v1861_v19, 16  ;;  %v1864_v35 = vld [vmem:[#allocation2 + $0x60] sm:$0xf] }
 0x41d   :  { %3745 = vmatprep.mubr.bf16.mxu0 %v6062_v41  ;;  %v2540_v43 = vsel %vm7739_vm11, %v2535_v55, %v2539_v16  ;;  %v1969_v31 = vor.u32 %v1968_v29, %v1965_v57  ;;  %v6051_v18 = vrot.slane %v2158_v21, 9  ;;  %v1974_v38 = vrot.slane %v1972_v60, 5  ;;  %v1865_v12 = vld [vmem:[#allocation2 + $0x64] sm:$0x1]  ;;  %v2162_v55 = vld [vmem:[#allocation2 + $0x68] sm:$0xe] }
 0x41e   :  { %v2549_v2 = vrot.slane %v2548_v40, 4  ;;  %v1979_v23 = vrot.slane %v1977_v61, 4  ;;  %v1982_v33 = vrot.slane %v1980_v32, 5  ;;  %v1988_v30 = vrot.slane %v1986_v47, 5  ;;  %6659 = vmatpush3.bf16.msra.mxu0 %v6850_v39  ;;  %v2164_v60 = vld [vmem:[#allocation2 + $0x70] sm:$0xe] }
 0x41f   :  { %v1970_v51 = vrot.slane %v1969_v31, 4  ;;  %v2240_v8 = vrot.slane %v2159_v50, 5  ;;  %v6052_v14 = vrot.slane %v2160_v62, 9  ;;  %v2244_v3 = vrot.slane %v2161_v63, 5  ;;  %6660 = vmatprep.subr.bf16.mxu0 %v6852_v42 }
 0x420   :  { %v2554_v10 = vsel %vm7739_vm11, %v2549_v2, %v2553_v37  ;;  %v1983_v1 = vor.u32 %v1982_v33, %v1979_v23  ;;  %v2556_v6 = vshrl.u32 %v2403_v45, 16  ;;  %v2559_v56 = vshll.u32 %v2403_v45, 16  ;;  %v2163_v37 = vld [vmem:[#allocation2 + $0x6c] sm:$0x1]  ;;  %v2407_v45 = vld [vmem:[#allocation2 + $0x80] sm:$0xf] }
 0x421   :  { %v6079_v28 = vcombine.low %v2540_v43, %v2554_v10  ;;  %v1975_v25 = vsel %vm7739_vm11, %v1970_v51, %v1974_v38  ;;  %v2241_v41 = vsel %vm7611_vm9, %v6051_v18, %v2240_v8  ;;  %v2245_v34 = vsel %vm7611_vm9, %v6052_v14, %v2244_v3  ;;  %v2165_v43 = vld [vmem:[#allocation2 + $0x74] sm:$0x1]  ;;  %v2408_v14 = vld [vmem:[#allocation2 + $0x84] sm:$0x1]  ;;  %v6847_v3 = vld [vmem:[#allocation2 + $0x70] ss:$8 sps:$4 sm:$0xff]  }
 0x422   :  { %v1984_v26 = vrot.slane %v1983_v1, 4  ;;  %v2558_v39 = vrot.slane %v2556_v6, 4  ;;  %v2565_v27 = vshll.u32 %v2404_v44, 16  ;;  %v6063_v13 = vcombine.low %v2241_v41, %v2245_v34  ;;  %6661 = vmatpush3.bf16.msra.mxu0 %v6852_v42 }
 0x423   :  { %3850 = vmatprep.mubr.bf16.mxu1 %v6079_v28  ;;  %v2561_v49 = vrot.slane %v2559_v56, 5  ;;  %v2570_v48 = vshrl.u32 %v2405_v58, 16  ;;  %v2573_v20 = vshll.u32 %v2405_v58, 16  ;;  %v2579_v22 = vshll.u32 %v2406_v5, 16 }
 0x424   :  { %v1989_v11 = vsel %vm7739_vm11, %v1984_v26, %v1988_v30  ;;  %3851 = vmatmul.mubr.bf16.gmra.mrb[80].mxu1 %v6845_v7  ;;  %v2567_v19 = vrot.slane %v2565_v27, 5  ;;  %v1991_v4 = vshrl.u32 %v1862_v52, 16  ;;  %v1994_v50 = vshll.u32 %v1862_v52, 16  ;;  %v2409_v7 = vld [vmem:[#allocation2 + $0x88] sm:$0xf] }
 0x425   :  { %v6038_v16 = vcombine.low %v1975_v25, %v1989_v11  ;;  %v2562_v59 = vor.u32 %v2561_v49, %v2558_v39  ;;  %v2572_v54 = vrot.slane %v2570_v48, 4  ;;  %v2575_v21 = vrot.slane %v2573_v20, 5  ;;  %v2410_v25 = vld [vmem:[#allocation2 + $0x8c] sm:$0x1]  ;;  %v1866_v27 = vld [vmem:[#allocation2 + $0x68] sm:$0xf] }
 0x426   :  { %v2581_v57 = vrot.slane %v2579_v22, 5  ;;  %v1993_v29 = vrot.slane %v1991_v4, 4  ;;  %v2000_v40 = vshll.u32 %v1863_v15, 16  ;;  %v2005_v62 = vshrl.u32 %v1864_v35, 16  ;;  %v1867_v20 = vld [vmem:[#allocation2 + $0x6c] sm:$0x1] }
 0x427   :  { %3746 = vmatmul.mubr.bf16.gmra.mrb[76].mxu0 %v6038_v16  ;;  %v2563_v61 = vrot.slane %v2562_v59, 4  ;;  %v2576_v32 = vor.u32 %v2575_v21, %v2572_v54  ;;  %v2008_v42 = vshll.u32 %v1864_v35, 16  ;;  %v1996_v31 = vrot.slane %v1994_v50, 5  ;;  %v1869_v4 = vld [vmem:[#allocation2 + $0x74] sm:$0x1] }
 0x428   :  { %3753 = vmatprep.mubr.bf16.mxu0 %v6063_v13  ;;  %v2002_v47 = vrot.slane %v2000_v40, 5  ;;  %v2014_v63 = vshll.u32 %v1865_v12, 16  ;;  %v6053_v18 = vrot.slane %v2162_v55, 9  ;;  %v2007_v23 = vrot.slane %v2005_v62, 4  ;;  %v1868_v12 = vld [vmem:[#allocation2 + $0x70] sm:$0xf] }
 0x429   :  { %v2568_v2 = vsel %vm7739_vm11, %v2563_v61, %v2567_v19  ;;  %v2577_v38 = vrot.slane %v2576_v32, 4  ;;  %v2010_v33 = vrot.slane %v2008_v42, 5  ;;  %v1997_v44 = vor.u32 %v1996_v31, %v1993_v29  ;;  %v2166_v21 = vld [vmem:[#allocation2 + $0x78] sm:$0xe]  ;;  %v2167_v55 = vld [vmem:[#allocation2 + $0x7c] sm:$0x1] }
 0x42a   :  { %v2016_v51 = vrot.slane %v2014_v63, 5  ;;  %v2248_v30 = vrot.slane %v2163_v37, 5  ;;  %v6054_v8 = vrot.slane %v2164_v60, 9  ;;  %v2252_v1 = vrot.slane %v2165_v43, 5  ;;  %v2168_v40 = vld [vmem:[#allocation2 + $0x80] sm:$0xe] }
 0x42b   :  { %v2582_v58 = vsel %vm7739_vm11, %v2577_v38, %v2581_v57  ;;  %v2011_v10 = vor.u32 %v2010_v33, %v2007_v23  ;;  %v2584_v5 = vshrl.u32 %v2407_v45, 16  ;;  %v1998_v52 = vrot.slane %v1997_v44, 4  ;;  %v2169_v42 = vld [vmem:[#allocation2 + $0x84] sm:$0x1]  ;;  %v2411_v33 = vld [vmem:[#allocation2 + $0x90] sm:$0xf] }
 0x42c   :  { %v6080_v6 = vcombine.low %v2568_v2, %v2582_v58  ;;  %v2249_v28 = vsel %vm7611_vm9, %v6053_v18, %v2248_v30  ;;  %v2587_v41 = vshll.u32 %v2407_v45, 16  ;;  %v2253_v26 = vsel %vm7611_vm9, %v6054_v8, %v2252_v1  ;;  %v1229_v18 = vld [vmem:[#allocation2 + $0x94] sm:$0x1] }
 0x42d   :  { %v2012_v56 = vrot.slane %v2011_v10, 4  ;;  %v2586_v34 = vrot.slane %v2584_v5, 4  ;;  %v2593_v39 = vshll.u32 %v2408_v14, 16  ;;  %v1096_v15 = vrot.slane %v8037_v0, 4 }
 0x42e   :  { %3858 = vmatprep.mubr.bf16.mxu1 %v6080_v6  ;;  %v2003_v13 = vsel %vm7739_vm11, %v1998_v52, %v2002_v47  ;;  %v2589_v49 = vrot.slane %v2587_v41, 5  ;;  %v2598_v48 = vshrl.u32 %v2409_v7, 16  ;;  %v6064_v11 = vcombine.low %v2249_v28, %v2253_v26  ;;  %v2414_v52 = vld [vmem:[#allocation2 + $0x9c] sm:$0x1]  ;;  %v6849_v26 = vld [vmem:[#allocation2 + $0x80] ss:$8 sps:$4 sm:$0xff]  }
 0x42f   :  { %v2017_v35 = vsel %vm7739_vm11, %v2012_v56, %v2016_v51  ;;  %3859 = vmatmul.mubr.bf16.gmra.mrb[84].mxu1 %v6847_v3  ;;  %v2601_v19 = vshll.u32 %v2409_v7, 16  ;;  %v2607_v22 = vshll.u32 %v2410_v25, 16  ;;  %v2019_v0 = vshrl.u32 %v1866_v27, 16  ;;  %v2413_v3 = vld [vmem:[#allocation2 + $0x98] sm:$0xf] }
 0x430   :  { %v6039_v16 = vcombine.low %v2003_v13, %v2017_v35  ;;  %v2590_v59 = vor.u32 %v2589_v49, %v2586_v34  ;;  %v2600_v54 = vrot.slane %v2598_v48, 4  ;;  %v2595_v37 = vrot.slane %v2593_v39, 5  ;;  %v1870_v39 = vld [vmem:[#allocation2 + $0x78] sm:$0xf]  ;;  %v1871_v49 = vld [vmem:[#allocation2 + $0x7c] sm:$0x1] }
 0x431   :  { %v2603_v57 = vrot.slane %v2601_v19, 5  ;;  %v2022_v29 = vshll.u32 %v1866_v27, 16  ;;  %v2028_v50 = vshll.u32 %v1867_v20, 16  ;;  %v2021_v61 = vrot.slane %v2019_v0, 4  ;;  %v1872_v48 = vld [vmem:[#allocation2 + $0x80] sm:$0xf] }
 0x432   :  { %3754 = vmatmul.mubr.bf16.gmra.mrb[80].mxu0 %v6039_v16  ;;  %v2591_v60 = vrot.slane %v2590_v59, 4  ;;  %v2033_v32 = vshrl.u32 %v1868_v12, 16  ;;  %v2036_v62 = vshll.u32 %v1868_v12, 16  ;;  %v2609_v31 = vrot.slane %v2607_v22, 5  ;;  %v1873_v22 = vld [vmem:[#allocation2 + $0x84] sm:$0x1] }
 0x433   :  { %3761 = vmatprep.mubr.bf16.mxu0 %v6064_v11  ;;  %v2604_v43 = vor.u32 %v2603_v57, %v2600_v54  ;;  %v2024_v47 = vrot.slane %v2022_v29, 5  ;;  %v2042_v63 = vshll.u32 %v1869_v4, 16  ;;  %v2030_v45 = vrot.slane %v2028_v50, 5  ;;  %v2170_v54 = vld [vmem:[#allocation2 + $0x88] sm:$0xe] }
 0x434   :  { %v2035_v2 = vrot.slane %v2033_v32, 4  ;;  %v2038_v38 = vrot.slane %v2036_v62, 5  ;;  %v6055_v23 = vrot.slane %v2166_v21, 9  ;;  %v2596_v44 = vsel %vm7739_vm11, %v2591_v60, %v2595_v37  ;;  %v2171_v57 = vld [vmem:[#allocation2 + $0x8c] sm:$0x1] }
 0x435   :  { %v2605_v51 = vrot.slane %v2604_v43, 4  ;;  %v2025_v30 = vor.u32 %v2024_v47, %v2021_v61  ;;  %v2256_v8 = vrot.slane %v2167_v55, 5  ;;  %v6056_v58 = vrot.slane %v2168_v40, 9  ;;  %v2172_v29 = vld [vmem:[#allocation2 + $0x90] sm:$0xe] }
 0x436   :  { %v2039_v14 = vor.u32 %v2038_v38, %v2035_v2  ;;  %v2260_v10 = vrot.slane %v2169_v42, 5  ;;  %v1230_v1 = vsel %vm7701_vm8, %v1096_v15, %v1229_v18  ;;  %v2044_v6 = vrot.slane %v2042_v63, 5  ;;  %v1874_v32 = vld [vmem:[#allocation2 + $0x88] sm:$0xf] }
 0x437   :  { %v2610_v7 = vsel %vm7739_vm11, %v2605_v51, %v2609_v31  ;;  %v2026_v5 = vrot.slane %v2025_v30, 4  ;;  %1231 = vst [vmem:[#allocation2 + $0x94] sm:$0x1] %v1230_v1  ;;  %v2612_v28 = vshrl.u32 %v2411_v33, 16  ;;  %v2257_v56 = vsel %vm7611_vm9, %v6055_v23, %v2256_v8 }
 0x438   :  { %v6081_v25 = vcombine.low %v2596_v44, %v2610_v7  ;;  %v2040_v41 = vrot.slane %v2039_v14, 4  ;;  %v2615_v34 = vshll.u32 %v2411_v33, 16  ;;  %v2261_v27 = vsel %vm7611_vm9, %v6056_v58, %v2260_v10  ;;  %v1876_v7 = vld [vmem:[#allocation2 + $0x90] sm:$0xf] }
 0x439   :  { %v2031_v9 = vsel %vm7739_vm11, %v2026_v5, %v2030_v45  ;;  %v2614_v15 = vrot.slane %v2612_v28, 4  ;;  %v2626_v13 = vshrl.u32 %v2413_v3, 16  ;;  %v2629_v11 = vshll.u32 %v2413_v3, 16 }
 0x43a   :  { %3866 = vmatprep.mubr.bf16.mxu1 %v6081_v25  ;;  %v2045_v20 = vsel %vm7739_vm11, %v2040_v41, %v2044_v6  ;;  %v2617_v35 = vrot.slane %v2615_v34, 5  ;;  %v2635_v19 = vshll.u32 %v2414_v52, 16  ;;  %v2047_v16 = vshrl.u32 %v1870_v39, 16  ;;  %v1875_v25 = vld [vmem:[#allocation2 + $0x8c] sm:$0x1] }
 0x43b   :  { %v6040_v12 = vcombine.low %v2031_v9, %v2045_v20  ;;  %3867 = vmatmul.mubr.bf16.gmra.mrb[88].mxu1 %v6849_v26  ;;  %v2628_v4 = vrot.slane %v2626_v13, 4  ;;  %v2050_v59 = vshll.u32 %v1870_v39, 16  ;;  %v6065_v0 = vcombine.low %v2257_v56, %v2261_v27  ;;  %v6851_v39 = vld [vmem:[#allocation2 + $0x90] ss:$8 sps:$4 sm:$0xff]   ;;  %v2680_v20 = vld [vmem:[#allocation2 + $0x14] sm:$0x1] }
 0x43c   :  { %v2618_v21 = vor.u32 %v2617_v35, %v2614_v15  ;;  %v2631_v55 = vrot.slane %v2629_v11, 5  ;;  %v2056_v37 = vshll.u32 %v1871_v49, 16  ;;  %v2049_v50 = vrot.slane %v2047_v16, 4  ;;  %v2679_v27 = vld [vmem:[#allocation2 + $0x10] sm:$0xe] }
 0x43d   :  { %3762 = vmatmul.mubr.bf16.gmra.mrb[84].mxu0 %v6040_v12  ;;  %v2052_v40 = vrot.slane %v2050_v59, 5  ;;  %v2061_v60 = vshrl.u32 %v1872_v48, 16  ;;  %v2064_v61 = vshll.u32 %v1872_v48, 16  ;;  %v2637_v31 = vrot.slane %v2635_v19, 5  ;;  %v2682_v12 = vld [vmem:[#allocation2 + $0x1c] sm:$0x1] }
 0x43e   :  { %3769 = vmatprep.mubr.bf16.mxu0 %v6065_v0  ;;  %v2412_v62 = vld [vmem:[#allocation2 + $0x94] sm:$0x1]  ;;  %v2619_v42 = vrot.slane %v2618_v21, 4  ;;  %v2632_v43 = vor.u32 %v2631_v55, %v2628_v4  ;;  %v2070_v47 = vshll.u32 %v1873_v22, 16  ;;  %v2058_v33 = vrot.slane %v2056_v37, 5 }
 0x43f   :  { %v2621_v63 = vshll.u32 %v2412_v62, 16  ;;  %v2053_v18 = vor.u32 %v2052_v40, %v2049_v50  ;;  %v2063_v45 = vrot.slane %v2061_v60, 4  ;;  %v2066_v2 = vrot.slane %v2064_v61, 5  ;;  %v2173_v38 = vld [vmem:[#allocation2 + $0x94] sm:$0x1] }
 0x440   :  { %v2633_v23 = vrot.slane %v2632_v43, 4  ;;  %v6057_v44 = vrot.slane %v2170_v54, 9  ;;  %v2264_v51 = vrot.slane %v2171_v57, 5  ;;  %v6058_v58 = vrot.slane %v2172_v29, 9  ;;  %v1877_v13 = vld [vmem:[#allocation2 + $0x94] sm:$0x1] }
 0x441   :  { %v2623_v30 = vrot.slane %v2621_v63, 5  ;;  %v2054_v8 = vrot.slane %v2053_v18, 4  ;;  %v2067_v14 = vor.u32 %v2066_v2, %v2063_v45  ;;  %v2072_v1 = vrot.slane %v2070_v47, 5  ;;  %v2681_v22 = vld [vmem:[#allocation2 + $0x18] sm:$0xe] }
 0x442   :  { %v2638_v10 = vsel %vm7739_vm11, %v2633_v23, %v2637_v31  ;;  %v2268_v3 = vrot.slane %v2173_v38, 5  ;;  %v2075_v5 = vshrl.u32 %v1874_v32, 16  ;;  %v2078_v41 = vshll.u32 %v1874_v32, 16  ;;  %v2683_v62 = vld [vmem:[#allocation2 + $0x20] sm:$0xe] }
 0x443   :  { %v2624_v6 = vsel %vm7739_vm11, %v2619_v42, %v2623_v30  ;;  %v2059_v52 = vsel %vm7739_vm11, %v2054_v8, %v2058_v33  ;;  %v2068_v28 = vrot.slane %v2067_v14, 4  ;;  %v2265_v26 = vsel %vm7611_vm9, %v6057_v44, %v2264_v51  ;;  %v2684_v42 = vld [vmem:[#allocation2 + $0x24] sm:$0x1]  ;;  %v2685_v47 = vld [vmem:[#allocation2 + $0x28] sm:$0xe] }
 0x444   :  { %v6082_v56 = vcombine.low %v2624_v6, %v2638_v10  ;;  %v2269_v34 = vsel %vm7611_vm9, %v6058_v58, %v2268_v3  ;;  %v2077_v9 = vrot.slane %v2075_v5, 4  ;;  %v2080_v49 = vrot.slane %v2078_v41, 5  ;;  %v2686_v63 = vld [vmem:[#allocation2 + $0x2c] sm:$0x1]  ;;  %v2687_v18 = vld [vmem:[#allocation2 + $0x30] sm:$0xe] }
 0x445   :  { %v2073_v15 = vsel %vm7739_vm11, %v2068_v28, %v2072_v1  ;;  %v2089_v48 = vshrl.u32 %v1876_v7, 16  ;;  %v2084_v11 = vshll.u32 %v1875_v25, 16  ;;  %v2092_v19 = vshll.u32 %v1876_v7, 16  ;;  %v2688_v2 = vld [vmem:[#allocation2 + $0x34] sm:$0x1] }
 0x446   :  { %3874 = vmatprep.mubr.bf16.mxu1 %v6082_v56  ;;  %v6041_v35 = vcombine.low %v2059_v52, %v2073_v15  ;;  %v6066_v4 = vcombine.low %v2265_v26, %v2269_v34  ;;  %v2081_v16 = vor.u32 %v2080_v49, %v2077_v9  ;;  %v2098_v0 = vshll.u32 %v1877_v13, 16  ;;  %v2689_v38 = vld [vmem:[#allocation2 + $0x38] sm:$0xe]  ;;  %v2690_v23 = vld [vmem:[#allocation2 + $0x3c] sm:$0x1] }
 0x447   :  { %3875 = vmatmul.mubr.bf16.gmra.mrb[92].mxu1 %v6851_v39  ;;  %v2091_v59 = vrot.slane %v2089_v48, 4  ;;  %v2094_v54 = vrot.slane %v2092_v19, 5  ;;  %v6083_v21 = vrot.slane %v2679_v27, 9  ;;  %v2745_v37 = vrot.slane %v2680_v20, 5  ;;  %v2691_v5 = vld [vmem:[#allocation2 + $0x40] sm:$0xe] }
 0x448   :  { %3770 = vmatmul.mubr.bf16.gmra.mrb[88].mxu0 %v6041_v35  ;;  %4492 = vmatprep.mubr.bf16.mxu1 %v6918_v36  ;;  %v2082_v55 = vrot.slane %v2081_v16, 4  ;;  %v6084_v57 = vrot.slane %v2681_v22, 9  ;;  %v2749_v29 = vrot.slane %v2682_v12, 5  ;;  %v2086_v50 = vrot.slane %v2084_v11, 5  ;;  %v2692_v6 = vld [vmem:[#allocation2 + $0x44] sm:$0x1] }
 0x449   :  { %3777 = vmatprep.mubr.bf16.mxu0 %v6066_v4  ;;  %v2095_v40 = vor.u32 %v2094_v54, %v2091_v59  ;;  %v2100_v32 = vrot.slane %v2098_v0, 5  ;;  %v2746_v43 = vsel %vm7611_vm9, %v6083_v21, %v2745_v37  ;;  %v6085_v44 = vrot.slane %v2683_v62, 9  ;;  %v2693_v25 = vld [vmem:[#allocation2 + $0x48] sm:$0xe]  ;;  %v2694_v41 = vld [vmem:[#allocation2 + $0x4c] sm:$0x1] }
 0x44a   :  { %v2087_v60 = vsel %vm7739_vm11, %v2082_v55, %v2086_v50  ;;  %v2750_v31 = vsel %vm7611_vm9, %v6084_v57, %v2749_v29  ;;  %v2753_v30 = vrot.slane %v2684_v42, 5  ;;  %v6086_v8 = vrot.slane %v2685_v47, 9  ;;  %v2695_v56 = vld [vmem:[#allocation2 + $0x60] sm:$0xe]  ;;  %v2696_v26 = vld [vmem:[#allocation2 + $0x64] sm:$0x1] }
 0x44b   :  { %v2096_v61 = vrot.slane %v2095_v40, 4  ;;  %v6099_v51 = vcombine.low %v2746_v43, %v2750_v31  ;;  %v2757_v14 = vrot.slane %v2686_v63, 5  ;;  %v6087_v58 = vrot.slane %v2687_v18, 9  ;;  %v2697_v34 = vld [vmem:[#allocation2 + $0x68] sm:$0xe] }
 0x44c   :  { %v2761_v10 = vrot.slane %v2688_v2, 5  ;;  %v6088_v1 = vrot.slane %v2689_v38, 9  ;;  %v2765_v3 = vrot.slane %v2690_v23, 5  ;;  %v2754_v7 = vsel %vm7611_vm9, %v6085_v44, %v2753_v30  ;;  %v2698_v39 = vld [vmem:[#allocation2 + $0x6c] sm:$0x1] }
 0x44d   :  { %v2101_v45 = vsel %vm7739_vm11, %v2096_v61, %v2100_v32  ;;  %v2758_v17 = vsel %vm7611_vm9, %v6086_v8, %v2757_v14  ;;  %v6089_v27 = vrot.slane %v2691_v5, 9  ;;  %v2769_v13 = vrot.slane %v2692_v6, 5  ;;  %v2699_v4 = vld [vmem:[#allocation2 + $0x70] sm:$0xe]  ;;  %v2700_v16 = vld [vmem:[#allocation2 + $0x74] sm:$0x1] }
 0x44e   :  { %v6042_v33 = vcombine.low %v2087_v60, %v2101_v45  ;;  %v2762_v52 = vsel %vm7611_vm9, %v6087_v58, %v2761_v10  ;;  %v2766_v28 = vsel %vm7611_vm9, %v6088_v1, %v2765_v3  ;;  %v6100_v9 = vcombine.low %v2754_v7, %v2758_v17  ;;  %v2701_v0 = vld [vmem:[#allocation2 + $0x78] sm:$0xe]  ;;  %v2702_v21 = vld [vmem:[#allocation2 + $0x7c] sm:$0x1]  ;;  %v2703_v55 = vld [vmem:[#allocation2 + $0x80] sm:$0xe] }
 0x44f   :  { %v6101_v15 = vcombine.low %v2762_v52, %v2766_v28  ;;  %v6090_v49 = vrot.slane %v2693_v25, 9  ;;  %v2773_v48 = vrot.slane %v2694_v41, 5  ;;  %v6091_v20 = vrot.slane %v2695_v56, 9  ;;  %v2704_v37 = vld [vmem:[#allocation2 + $0x84] sm:$0x1] }
 0x450   :  { %3778 = vmatmul.mubr.bf16.gmra.mrb[92].mxu0 %v6042_v33  ;;  %v2777_v35 = vrot.slane %v2696_v26, 5  ;;  %v6092_v11 = vrot.slane %v2697_v34, 9  ;;  %v2781_v19 = vrot.slane %v2698_v39, 5  ;;  %v2770_v22 = vsel %vm7611_vm9, %v6089_v27, %v2769_v13  ;;  %v2705_v57 = vld [vmem:[#allocation2 + $0x88] sm:$0xe] }
 0x451   :  { %6662 = vmatprep.mubr.bf16.mxu0 %v6099_v51  ;;  %v2774_v12 = vsel %vm7611_vm9, %v6090_v49, %v2773_v48  ;;  %v2706_v29 = vld [vmem:[#allocation2 + $0x8c] sm:$0x1]  ;;  %v6093_v40 = vrot.slane %v2699_v4, 9  ;;  %v2785_v61 = vrot.slane %v2700_v16, 5  ;;  %v6094_v32 = vrot.slane %v2701_v0, 9 }
 0x452   :  { %v2778_v59 = vsel %vm7611_vm9, %v6091_v20, %v2777_v35  ;;  %v2782_v54 = vsel %vm7611_vm9, %v6092_v11, %v2781_v19  ;;  %v6102_v50 = vcombine.low %v2770_v22, %v2774_v12  ;;  %v2789_v62 = vrot.slane %v2702_v21, 5  ;;  %v2707_v45 = vld [vmem:[#allocation2 + $0x90] sm:$0xe]  ;;  %v2708_v23 = vld [vmem:[#allocation2 + $0x94] sm:$0x1] }
 0x453   :  { %v6103_v60 = vcombine.low %v2778_v59, %v2782_v54  ;;  %v6095_v42 = vrot.slane %v2703_v55, 9  ;;  %v2793_v43 = vrot.slane %v2704_v37, 5  ;;  %v6096_v31 = vrot.slane %v2705_v57, 9  ;;  %v2709_v33 = vld [vmem:[#allocation2 + $0x98] sm:$0xe] }
 0x454   :  { %v2797_v47 = vrot.slane %v2706_v29, 5  ;;  %v2786_v63 = vsel %vm7611_vm9, %v6093_v40, %v2785_v61  ;;  %v2790_v18 = vsel %vm7611_vm9, %v6094_v32, %v2789_v62  ;;  %v2710_v44 = vld [vmem:[#allocation2 + $0x9c] sm:$0x1]  ;;  %v6097_v30 = vrot.slane %v2707_v45, 9 }
 0x455   :  { %v2794_v2 = vsel %vm7611_vm9, %v6095_v42, %v2793_v43  ;;  %v6104_v51 = vcombine.low %v2786_v63, %v2790_v18  ;;  %v2801_v14 = vrot.slane %v2708_v23, 5  ;;  %v6098_v58 = vrot.slane %v2709_v33, 9 }
 0x456   :  { %v2798_v38 = vsel %vm7611_vm9, %v6096_v31, %v2797_v47  ;;  %v2805_v10 = vrot.slane %v2710_v44, 5 }
 0x457   :  { %v6105_v8 = vcombine.low %v2794_v2, %v2798_v38  ;;  %v2802_v1 = vsel %vm7611_vm9, %v6097_v30, %v2801_v14 }
 0x458   :  { %6663 = vmatmul.mubr.bf16.vlgmr.msra.gmra.mrb[96].mxu0 %v6100_v9  ;;  %v2806_v3 = vsel %vm7611_vm9, %v6098_v58, %v2805_v10 }
 0x459   :  { %6666 = vmatprep.mubr.bf16.mxu0 %v6101_v15  ;;  %v6106_v7 = vcombine.low %v2802_v1, %v2806_v3 }
 0x460   :  { %6667 = vmatmul.mubr.bf16.gmra.mrb[100].mxu0 %v6102_v50 }
 0x461   :  { %6670 = vmatprep.mubr.bf16.mxu0 %v6103_v60 }
 0x468   :  { %6671 = vmatmul.mubr.bf16.gmra.mrb[104].mxu0 %v6104_v51 }
 0x469   :  { %6674 = vmatprep.mubr.bf16.mxu0 %v6105_v8 }
 0x470   :  { %6675 = vmatmul.mubr.bf16.gmra.mrb[108].mxu0 %v6106_v7 }
 0x471   :  { %4605 = vmatprep.mubr.bf16.mxu0 %v6918_v36 }
 0x47e   :  { %v6443_v17 = vpop.f32.mrb[32].mxu1 }
 0x47f   :  { %v6444_v5 = vpop.f32.mrb[33].mxu1 }
 0x480   :  { %v6445_v6 = vadd.f32 %v6444_v5, %v6443_v17  ;;  %v6446_v52 = vpop.f32.mrb[34].mxu1 }
 0x481   :  { %v6447_v28 = vpop.f32.mrb[35].mxu1 }
 0x482   :  { %v6448_v25 = vadd.f32 %v6447_v28, %v6446_v52 }
 0x487   :  { %v6379_v41 = vpop.f32.mrb[32].mxu0  ;;  %v6449_v56 = vpop.f32.mrb[36].mxu1 }
 0x488   :  { %v6380_v26 = vpop.f32.mrb[33].mxu0  ;;  %v6450_v34 = vpop.f32.mrb[37].mxu1 }
 0x489   :  { %v6381_v39 = vadd.f32 %v6380_v26, %v6379_v41  ;;  %v6382_v9 = vpop.f32.mrb[34].mxu0  ;;  %v6451_v27 = vadd.f32 %v6450_v34, %v6449_v56  ;;  %v6452_v15 = vpop.f32.mrb[38].mxu1 }
 0x48a   :  { %v6383_v24 = vpop.f32.mrb[35].mxu0  ;;  %v6453_v13 = vpop.f32.mrb[39].mxu1 }
 0x48b   :  { %v8214_v49 = vadd.f32 %v6445_v6, %v6381_v39  ;;  %v6384_v48 = vadd.f32 %v6383_v24, %v6382_v9  ;;  %v6454_v20 = vadd.f32 %v6453_v13, %v6452_v15 }
 0x48d   :  { %v8216_v35 = vadd.f32 %v6448_v25, %v6384_v48 }
 0x48f   :  { %v6385_v11 = vpop.f32.mrb[36].mxu0  ;;  %v6455_v19 = vpop.f32.mrb[40].mxu1 }
 0x490   :  { %v6386_v22 = vpop.f32.mrb[37].mxu0  ;;  %v6456_v12 = vpop.f32.mrb[41].mxu1 }
 0x491   :  { %v6387_v4 = vadd.f32 %v6386_v22, %v6385_v11  ;;  %v6388_v16 = vpop.f32.mrb[38].mxu0  ;;  %v6457_v59 = vadd.f32 %v6456_v12, %v6455_v19  ;;  %v6458_v54 = vpop.f32.mrb[42].mxu1 }
 0x492   :  { %v6389_v0 = vpop.f32.mrb[39].mxu0  ;;  %v6459_v21 = vpop.f32.mrb[43].mxu1 }
 0x493   :  { %v8218_v55 = vadd.f32 %v6451_v27, %v6387_v4  ;;  %v6390_v37 = vadd.f32 %v6389_v0, %v6388_v16  ;;  %v6460_v57 = vadd.f32 %v6459_v21, %v6458_v54 }
 0x495   :  { %v8220_v29 = vadd.f32 %v6454_v20, %v6390_v37 }
 0x497   :  { %v6391_v50 = vpop.f32.mrb[40].mxu0 }
 0x498   :  { %v6461_v40 = vpop.f32.mrb[44].mxu1  ;;  %v6392_v60 = vpop.f32.mrb[41].mxu0 }
 0x499   :  { %v6462_v61 = vpop.f32.mrb[45].mxu1  ;;  %v6393_v32 = vadd.f32 %v6392_v60, %v6391_v50  ;;  %v6394_v62 = vpop.f32.mrb[42].mxu0 }
 0x49a   :  { %v6463_v42 = vadd.f32 %v6462_v61, %v6461_v40  ;;  %v6464_v43 = vpop.f32.mrb[46].mxu1  ;;  %v6395_v31 = vpop.f32.mrb[43].mxu0 }
 0x49b   :  { %v6465_v47 = vpop.f32.mrb[47].mxu1  ;;  %v8222_v63 = vadd.f32 %v6457_v59, %v6393_v32  ;;  %v6396_v18 = vadd.f32 %v6395_v31, %v6394_v62 }
 0x49c   :  { %v6466_v45 = vadd.f32 %v6465_v47, %v6464_v43 }
 0x49d   :  { %v8224_v2 = vadd.f32 %v6460_v57, %v6396_v18 }
 0x49f   :  { %v6397_v38 = vpop.f32.mrb[44].mxu0 }
 0x4a0   :  { %v6398_v23 = vpop.f32.mrb[45].mxu0 }
 0x4a1   :  { %v6399_v33 = vadd.f32 %v6398_v23, %v6397_v38  ;;  %v6400_v44 = vpop.f32.mrb[46].mxu0 }
 0x4a2   :  { %v6401_v51 = vpop.f32.mrb[47].mxu0 }
 0x4a3   :  { %v8226_v30 = vadd.f32 %v6463_v42, %v6399_v33  ;;  %v6402_v8 = vadd.f32 %v6401_v51, %v6400_v44 }
 0x4a5   :  { %v8228_v14 = vadd.f32 %v6466_v45, %v6402_v8 }
 0x4aa   :  { %v6467_v58 = vpop.f32.mrb[48].mxu1 }
 0x4ab   :  { %v6468_v10 = vpop.f32.mrb[49].mxu1 }
 0x4ac   :  { %v6469_v1 = vadd.f32 %v6468_v10, %v6467_v58  ;;  %v6470_v3 = vpop.f32.mrb[50].mxu1 }
 0x4ad   :  { %v6471_v7 = vpop.f32.mrb[51].mxu1 }
 0x4ae   :  { %v6472_v17 = vadd.f32 %v6471_v7, %v6470_v3 }
 0x4af   :  { %v6403_v5 = vpop.f32.mrb[48].mxu0 }
 0x4b0   :  { %v6404_v6 = vpop.f32.mrb[49].mxu0 }
 0x4b1   :  { %v6405_v52 = vadd.f32 %v6404_v6, %v6403_v5  ;;  %v6406_v28 = vpop.f32.mrb[50].mxu0 }
 0x4b2   :  { %v6407_v25 = vpop.f32.mrb[51].mxu0  ;;  %v6473_v56 = vpop.f32.mrb[52].mxu1 }
 0x4b3   :  { %v8230_v41 = vadd.f32 %v6469_v1, %v6405_v52  ;;  %v6408_v26 = vadd.f32 %v6407_v25, %v6406_v28  ;;  %v6474_v34 = vpop.f32.mrb[53].mxu1 }
 0x4b4   :  { %v6475_v39 = vadd.f32 %v6474_v34, %v6473_v56  ;;  %v6476_v27 = vpop.f32.mrb[54].mxu1 }
 0x4b5   :  { %v8232_v9 = vadd.f32 %v6472_v17, %v6408_v26  ;;  %v6477_v15 = vpop.f32.mrb[55].mxu1 }
 0x4b6   :  { %v6478_v24 = vadd.f32 %v6477_v15, %v6476_v27 }
 0x4b7   :  { %v6409_v13 = vpop.f32.mrb[52].mxu0 }
 0x4b8   :  { %v6410_v48 = vpop.f32.mrb[53].mxu0 }
 0x4b9   :  { %v6411_v20 = vadd.f32 %v6410_v48, %v6409_v13  ;;  %v6412_v11 = vpop.f32.mrb[54].mxu0 }
 0x4ba   :  { %v6413_v19 = vpop.f32.mrb[55].mxu0 }
 0x4bb   :  { %v8234_v22 = vadd.f32 %v6475_v39, %v6411_v20  ;;  %v6414_v12 = vadd.f32 %v6413_v19, %v6412_v11 }
 0x4bd   :  { %v8236_v4 = vadd.f32 %v6478_v24, %v6414_v12 }
 0x4be   :  { %v6479_v16 = vpop.f32.mrb[56].mxu1 }
 0x4bf   :  { %v6480_v59 = vpop.f32.mrb[57].mxu1 }
 0x4c0   :  { %v6481_v54 = vadd.f32 %v6480_v59, %v6479_v16  ;;  %v6482_v0 = vpop.f32.mrb[58].mxu1  ;;  %v6415_v37 = vpop.f32.mrb[56].mxu0 }
 0x4c1   :  { %v6483_v21 = vpop.f32.mrb[59].mxu1  ;;  %v6416_v50 = vpop.f32.mrb[57].mxu0 }
 0x4c2   :  { %v6484_v57 = vadd.f32 %v6483_v21, %v6482_v0  ;;  %v6417_v40 = vadd.f32 %v6416_v50, %v6415_v37  ;;  %v6418_v60 = vpop.f32.mrb[58].mxu0 }
 0x4c3   :  { %v6419_v61 = vpop.f32.mrb[59].mxu0 }
 0x4c4   :  { %v8238_v32 = vadd.f32 %v6481_v54, %v6417_v40  ;;  %v6420_v62 = vadd.f32 %v6419_v61, %v6418_v60 }
 0x4c6   :  { %v6485_v42 = vpop.f32.mrb[60].mxu1  ;;  %v8240_v43 = vadd.f32 %v6484_v57, %v6420_v62 }
 0x4c7   :  { %v6486_v31 = vpop.f32.mrb[61].mxu1 }
 0x4c8   :  { %v6487_v47 = vadd.f32 %v6486_v31, %v6485_v42  ;;  %v6488_v18 = vpop.f32.mrb[62].mxu1 }
 0x4c9   :  { %v6489_v45 = vpop.f32.mrb[63].mxu1 }
 0x4ca   :  { %v6490_v38 = vadd.f32 %v6489_v45, %v6488_v18  ;;  %v6421_v23 = vpop.f32.mrb[60].mxu0 }
 0x4cb   :  { %v6422_v33 = vpop.f32.mrb[61].mxu0 }
 0x4cc   :  { %v6423_v44 = vadd.f32 %v6422_v33, %v6421_v23  ;;  %v6424_v51 = vpop.f32.mrb[62].mxu0 }
 0x4cd   :  { %v6425_v8 = vpop.f32.mrb[63].mxu0 }
 0x4ce   :  { %v8242_v58 = vadd.f32 %v6487_v47, %v6423_v44  ;;  %v6426_v10 = vadd.f32 %v6425_v8, %v6424_v51  ;;  %v6571_v1 = vpop.f32.mrb[64].mxu1 }
 0x4cf   :  { %v6572_v3 = vpop.f32.mrb[65].mxu1 }
 0x4d0   :  { %v8244_v7 = vadd.f32 %v6490_v38, %v6426_v10  ;;  %v6573_v17 = vadd.f32 %v6572_v3, %v6571_v1  ;;  %v6574_v5 = vpop.f32.mrb[66].mxu1 }
 0x4d1   :  { %v6575_v6 = vpop.f32.mrb[67].mxu1 }
 0x4d2   :  { %v6576_v52 = vadd.f32 %v6575_v6, %v6574_v5 }
 0x4d6   :  { %v6577_v28 = vpop.f32.mrb[68].mxu1 }
 0x4d7   :  { %v6578_v25 = vpop.f32.mrb[69].mxu1 }
 0x4d8   :  { %v6507_v56 = vpop.f32.mrb[64].mxu0  ;;  %v6579_v26 = vadd.f32 %v6578_v25, %v6577_v28  ;;  %v6580_v34 = vpop.f32.mrb[70].mxu1 }
 0x4d9   :  { %v6508_v39 = vpop.f32.mrb[65].mxu0  ;;  %v6581_v27 = vpop.f32.mrb[71].mxu1 }
 0x4da   :  { %v6509_v15 = vadd.f32 %v6508_v39, %v6507_v56  ;;  %v6510_v24 = vpop.f32.mrb[66].mxu0  ;;  %v6582_v13 = vadd.f32 %v6581_v27, %v6580_v34 }
 0x4db   :  { %v6511_v48 = vpop.f32.mrb[67].mxu0 }
 0x4dc   :  { %v3724_v20 = vadd.f32 %v6509_v15, %v8214_v49  ;;  %v6512_v11 = vadd.f32 %v6511_v48, %v6510_v24 }
 0x4de   :  { %v3727_v19 = vadd.f32 %v6512_v11, %v8216_v35  ;;  %v8248_v12 = vadd.f32 %v6573_v17, %v3724_v20 }
 0x4e0   :  { %v8250_v59 = vadd.f32 %v6576_v52, %v3727_v19 }
 0x4e1   :  { %v6583_v16 = vpop.f32.mrb[72].mxu1 }
 0x4e2   :  { %v6584_v54 = vpop.f32.mrb[73].mxu1 }
 0x4e3   :  { %v6585_v0 = vadd.f32 %v6584_v54, %v6583_v16  ;;  %v6586_v21 = vpop.f32.mrb[74].mxu1 }
 0x4e4   :  { %v6513_v37 = vpop.f32.mrb[68].mxu0  ;;  %v6587_v57 = vpop.f32.mrb[75].mxu1 }
 0x4e5   :  { %v6514_v50 = vpop.f32.mrb[69].mxu0  ;;  %v6588_v40 = vadd.f32 %v6587_v57, %v6586_v21 }
 0x4e6   :  { %v6515_v60 = vadd.f32 %v6514_v50, %v6513_v37  ;;  %v6516_v61 = vpop.f32.mrb[70].mxu0 }
 0x4e7   :  { %v6517_v62 = vpop.f32.mrb[71].mxu0 }
 0x4e8   :  { %v3732_v49 = vadd.f32 %v6515_v60, %v8218_v55  ;;  %v6518_v42 = vadd.f32 %v6517_v62, %v6516_v61 }
 0x4ea   :  { %v3735_v35 = vadd.f32 %v6518_v42, %v8220_v29  ;;  %v8254_v31 = vadd.f32 %v6579_v26, %v3732_v49 }
 0x4ec   :  { %v6589_v47 = vpop.f32.mrb[76].mxu1  ;;  %v8256_v18 = vadd.f32 %v6582_v13, %v3735_v35 }
 0x4ed   :  { %v6590_v45 = vpop.f32.mrb[77].mxu1 }
 0x4ee   :  { %v6591_v38 = vadd.f32 %v6590_v45, %v6589_v47  ;;  %v6592_v23 = vpop.f32.mrb[78].mxu1 }
 0x4ef   :  { %v6519_v33 = vpop.f32.mrb[72].mxu0  ;;  %v6593_v44 = vpop.f32.mrb[79].mxu1 }
 0x4f0   :  { %v6520_v51 = vpop.f32.mrb[73].mxu0  ;;  %v6594_v8 = vadd.f32 %v6593_v44, %v6592_v23 }
 0x4f1   :  { %v6521_v10 = vadd.f32 %v6520_v51, %v6519_v33  ;;  %v6522_v1 = vpop.f32.mrb[74].mxu0 }
 0x4f2   :  { %v6523_v3 = vpop.f32.mrb[75].mxu0 }
 0x4f3   :  { %v3740_v55 = vadd.f32 %v6521_v10, %v8222_v63  ;;  %v6524_v17 = vadd.f32 %v6523_v3, %v6522_v1 }
 0x4f5   :  { %v3743_v29 = vadd.f32 %v6524_v17, %v8224_v2  ;;  %v8260_v5 = vadd.f32 %v6585_v0, %v3740_v55 }
 0x4f7   :  { %v6595_v6 = vpop.f32.mrb[80].mxu1  ;;  %v8262_v52 = vadd.f32 %v6588_v40, %v3743_v29 }
 0x4f8   :  { %v6596_v28 = vpop.f32.mrb[81].mxu1 }
 0x4f9   :  { %v6597_v25 = vadd.f32 %v6596_v28, %v6595_v6  ;;  %v6598_v56 = vpop.f32.mrb[82].mxu1 }
 0x4fa   :  { %v6525_v26 = vpop.f32.mrb[76].mxu0  ;;  %v6599_v34 = vpop.f32.mrb[83].mxu1 }
 0x4fb   :  { %v6526_v39 = vpop.f32.mrb[77].mxu0  ;;  %v6600_v27 = vadd.f32 %v6599_v34, %v6598_v56 }
 0x4fc   :  { %v6527_v15 = vadd.f32 %v6526_v39, %v6525_v26  ;;  %v6528_v24 = vpop.f32.mrb[78].mxu0 }
 0x4fd   :  { %v6529_v13 = vpop.f32.mrb[79].mxu0 }
 0x4fe   :  { %v3748_v63 = vadd.f32 %v6527_v15, %v8226_v30  ;;  %v6530_v48 = vadd.f32 %v6529_v13, %v6528_v24 }
 0x500   :  { %v3751_v2 = vadd.f32 %v6530_v48, %v8228_v14  ;;  %v8266_v20 = vadd.f32 %v6591_v38, %v3748_v63 }
 0x502   :  { %v6601_v11 = vpop.f32.mrb[84].mxu1  ;;  %v8268_v19 = vadd.f32 %v6594_v8, %v3751_v2 }
 0x503   :  { %v6602_v16 = vpop.f32.mrb[85].mxu1 }
 0x504   :  { %v6603_v54 = vadd.f32 %v6602_v16, %v6601_v11  ;;  %v6604_v0 = vpop.f32.mrb[86].mxu1 }
 0x505   :  { %v6531_v21 = vpop.f32.mrb[80].mxu0  ;;  %v6605_v37 = vpop.f32.mrb[87].mxu1 }
 0x506   :  { %v6532_v57 = vpop.f32.mrb[81].mxu0  ;;  %v6606_v50 = vadd.f32 %v6605_v37, %v6604_v0 }
 0x507   :  { %v6533_v40 = vadd.f32 %v6532_v57, %v6531_v21  ;;  %v6534_v60 = vpop.f32.mrb[82].mxu0 }
 0x508   :  { %v6535_v61 = vpop.f32.mrb[83].mxu0 }
 0x509   :  { %v3756_v30 = vadd.f32 %v6533_v40, %v8230_v41  ;;  %v6536_v62 = vadd.f32 %v6535_v61, %v6534_v60 }
 0x50b   :  { %v3759_v14 = vadd.f32 %v6536_v62, %v8232_v9  ;;  %v8272_v49 = vadd.f32 %v6597_v25, %v3756_v30 }
 0x50d   :  { %v8274_v42 = vadd.f32 %v6600_v27, %v3759_v14 }
 0x50e   :  { %v6607_v35 = vpop.f32.mrb[88].mxu1 }
 0x50f   :  { %v6608_v47 = vpop.f32.mrb[89].mxu1 }
 0x510   :  { %v6537_v45 = vpop.f32.mrb[84].mxu0  ;;  %v6609_v38 = vadd.f32 %v6608_v47, %v6607_v35  ;;  %v6610_v23 = vpop.f32.mrb[90].mxu1 }
 0x511   :  { %v6538_v33 = vpop.f32.mrb[85].mxu0  ;;  %v6611_v44 = vpop.f32.mrb[91].mxu1 }
 0x512   :  { %v6539_v51 = vadd.f32 %v6538_v33, %v6537_v45  ;;  %v6540_v8 = vpop.f32.mrb[86].mxu0  ;;  %v6612_v10 = vadd.f32 %v6611_v44, %v6610_v23 }
 0x513   :  { %v6541_v1 = vpop.f32.mrb[87].mxu0 }
 0x514   :  { %v3764_v41 = vadd.f32 %v6539_v51, %v8234_v22  ;;  %v6542_v3 = vadd.f32 %v6541_v1, %v6540_v8 }
 0x516   :  { %v3767_v9 = vadd.f32 %v6542_v3, %v8236_v4  ;;  %v3861_v55 = vadd.f32 %v6603_v54, %v3764_v41 }
 0x518   :  { %v3864_v17 = vadd.f32 %v6606_v50, %v3767_v9 }
 0x51a   :  { %v6613_v29 = vpop.f32.mrb[92].mxu1 }
 0x51b   :  { %v6543_v6 = vpop.f32.mrb[88].mxu0  ;;  %v6614_v28 = vpop.f32.mrb[93].mxu1 }
 0x51c   :  { %v6544_v25 = vpop.f32.mrb[89].mxu0  ;;  %v6615_v56 = vadd.f32 %v6614_v28, %v6613_v29  ;;  %v6616_v26 = vpop.f32.mrb[94].mxu1 }
 0x51d   :  { %v6545_v34 = vadd.f32 %v6544_v25, %v6543_v6  ;;  %v6546_v39 = vpop.f32.mrb[90].mxu0  ;;  %v6617_v27 = vpop.f32.mrb[95].mxu1 }
 0x51e   :  { %v6547_v15 = vpop.f32.mrb[91].mxu0  ;;  %v6618_v24 = vadd.f32 %v6617_v27, %v6616_v26 }
 0x51f   :  { %v3772_v13 = vadd.f32 %v6545_v34, %v8238_v32  ;;  %v6548_v63 = vadd.f32 %v6547_v15, %v6546_v39 }
 0x521   :  { %v3775_v22 = vadd.f32 %v6548_v63, %v8240_v43  ;;  %v3869_v48 = vadd.f32 %v6609_v38, %v3772_v13 }
 0x523   :  { %v3872_v4 = vadd.f32 %v6612_v10, %v3775_v22  ;;  %v6549_v2 = vpop.f32.mrb[92].mxu0 }
 0x524   :  { %v6550_v11 = vpop.f32.mrb[93].mxu0 }
 0x525   :  { %v6551_v16 = vadd.f32 %v6550_v11, %v6549_v2  ;;  %v6552_v54 = vpop.f32.mrb[94].mxu0 }
 0x526   :  { %v6553_v0 = vpop.f32.mrb[95].mxu0 }
 0x527   :  { %v3780_v21 = vadd.f32 %v6551_v16, %v8242_v58  ;;  %v6554_v37 = vadd.f32 %v6553_v0, %v6552_v54 }
 0x529   :  { %v3783_v57 = vadd.f32 %v6554_v37, %v8244_v7  ;;  %v3877_v50 = vadd.f32 %v6615_v56, %v3780_v21 }
 0x52b   :  { %v6664_v40 = vpop.f32.mrb[96].mxu0  ;;  %v3880_v60 = vadd.f32 %v6618_v24, %v3783_v57 }
 0x52c   :  { %v8283_v32 = vadd.f32 %v6664_v40, %v8254_v31  ;;  %v3917_v61 = vpop.f32.mrb[97].mxu0 }
 0x52d   :  { %v8286_v43 = vadd.f32 %v3917_v61, %v8248_v12  ;;  %v6665_v30 = vpop.f32.mrb[98].mxu0 }
 0x52e   :  { %v8289_v62 = vadd.f32 %v6665_v30, %v8256_v18  ;;  %v3920_v14 = vpop.f32.mrb[99].mxu0 }
 0x52f   :  { %v8292_v58 = vadd.f32 %v3920_v14, %v8250_v59 }
 0x531   :  { %v3982_v7 = vadd.f32 %v8292_v58, %v8286_v43 }
 0x533   :  { %v3983_v35 = vadd.f32 %v3982_v7, %v8283_v32  ;;  %v6668_v47 = vpop.f32.mrb[100].mxu0 }
 0x534   :  { %v8298_v31 = vadd.f32 %v6668_v47, %v8266_v20  ;;  %v3933_v45 = vpop.f32.mrb[101].mxu0 }
 0x535   :  { %v8301_v12 = vadd.f32 %v3933_v45, %v8260_v5  ;;  %v3984_v18 = vadd.f32 %v3983_v35, %v8289_v62  ;;  %v6669_v38 = vpop.f32.mrb[102].mxu0 }
 0x536   :  { %v8305_v23 = vadd.f32 %v6669_v38, %v8268_v19  ;;  %v3936_v59 = vpop.f32.mrb[103].mxu0 }
 0x537   :  { %v3985_v33 = vadd.f32 %v3984_v18, %v8301_v12  ;;  %v8309_v44 = vadd.f32 %v3936_v59, %v8262_v52 }
 0x539   :  { %v3986_v51 = vadd.f32 %v3985_v33, %v8309_v44 }
 0x53b   :  { %v3987_v20 = vadd.f32 %v3986_v51, %v8298_v31  ;;  %v6672_v8 = vpop.f32.mrb[104].mxu0 }
 0x53c   :  { %v8313_v10 = vadd.f32 %v6672_v8, %v3861_v55  ;;  %v3949_v5 = vpop.f32.mrb[105].mxu0 }
 0x53d   :  { %v8316_v1 = vadd.f32 %v3949_v5, %v8272_v49  ;;  %v3988_v19 = vadd.f32 %v3987_v20, %v8305_v23  ;;  %v6673_v41 = vpop.f32.mrb[106].mxu0 }
 0x53e   :  { %v8319_v3 = vadd.f32 %v6673_v41, %v3864_v17  ;;  %v3952_v9 = vpop.f32.mrb[107].mxu0 }
 0x53f   :  { %v3989_v52 = vadd.f32 %v3988_v19, %v8316_v1  ;;  %v8323_v29 = vadd.f32 %v3952_v9, %v8274_v42 }
 0x541   :  { %v3990_v6 = vadd.f32 %v3989_v52, %v8323_v29 }
 0x543   :  { %v3991_v55 = vadd.f32 %v3990_v6, %v8313_v10  ;;  %v6676_v28 = vpop.f32.mrb[108].mxu0 }
 0x544   :  { %v8327_v25 = vadd.f32 %v6676_v28, %v3877_v50  ;;  %v3965_v49 = vpop.f32.mrb[109].mxu0 }
 0x545   :  { %v8329_v56 = vadd.f32 %v3965_v49, %v3869_v48  ;;  %v3992_v26 = vadd.f32 %v3991_v55, %v8319_v3  ;;  %v6677_v17 = vpop.f32.mrb[110].mxu0 }
 0x546   :  { %v8332_v34 = vadd.f32 %v6677_v17, %v3880_v60  ;;  %v3968_v39 = vpop.f32.mrb[111].mxu0 }
 0x547   :  { %v3993_v27 = vadd.f32 %v3992_v26, %v8329_v56  ;;  %v8335_v42 = vadd.f32 %v3968_v39, %v3872_v4 }
 0x549   :  { %v3994_v15 = vadd.f32 %v3993_v27, %v8335_v42 }
 0x54b   :  { %v3995_v24 = vadd.f32 %v3994_v15, %v8327_v25 }
 0x54d   :  { %v3996_v13 = vadd.f32 %v3995_v24, %v8332_v34 }
 0x54f   :  { %v3997_v63 = vrot.slane %v3996_v13, 4 }
 0x551   :  { %v3998_v22 = vadd.f32 %v3997_v63, %v3996_v13 }
 0x553   :  { %v3999_v48 = vrot.slane %v3998_v22, 2 }
 0x555   :  { %v4000_v2 = vadd.f32 %v3999_v48, %v3998_v22 }
 0x557   :  { %v4001_v11 = vrot.slane %v4000_v2, 1 }
 0x559   :  { %v4002_v16 = vadd.f32 %v4001_v11, %v4000_v2 }
 0x55b   :  { %4008 = vrot.lane.b32.xlu1 %v4002_v16, %s6914_s24  ;;  %4004 = vrot.lane.b32.xlu0 %v4002_v16, %s6912_s22 }
 0x55f   :  { %4016 = vrot.lane.b32.xlu1 %v4002_v16, %s6913_s23  ;;  %4012 = vrot.lane.b32.xlu0 %v4002_v16, %s6911_s21 }
 0x563   :  { %4024 = vrot.lane.b32.xlu1 %v4002_v16, %s6915_s25  ;;  %4020 = vrot.lane.b32.xlu0 %v4002_v16, %s6916_s26 }
 0x567   :  { %4028 = vrot.lane.b32.xlu0 %v4002_v16, %s6917_s27 }
 0x5cd   :  { %v4009_v4 = vpop.permute.xlu1 %4008  ;;  %v4005_v54 = vpop.permute.xlu0 %4004 }
 0x5ce   :  { %v4007_v0 = vadd.f32 %v4005_v54, %v4002_v16 }
 0x5d0   :  { %v4011_v21 = vadd.f32 %v4009_v4, %v4007_v0 }
 0x5d1   :  { %v4017_v37 = vpop.permute.xlu1 %4016  ;;  %v4013_v57 = vpop.permute.xlu0 %4012 }
 0x5d2   :  { %v4015_v50 = vadd.f32 %v4013_v57, %v4011_v21 }
 0x5d4   :  { %v4019_v40 = vadd.f32 %v4017_v37, %v4015_v50 }
 0x5d5   :  { %v4021_v60 = vpop.permute.xlu0 %4020  ;;  %v4025_v30 = vpop.permute.xlu1 %4024 }
 0x5d6   :  { %v4023_v61 = vadd.f32 %v4021_v60, %v4019_v40 }
 0x5d8   :  { %v4027_v14 = vadd.f32 %v4025_v30, %v4023_v61 }
 0x5d9   :  { %v4029_v7 = vpop.permute.xlu0 %4028 }
 0x5da   :  { %v4031_v35 = vadd.f32 %v4029_v7, %v4027_v14 }
 0x5dc   :  { %v4032_v47 = vmul.f32 0.0009765625, %v4031_v35 }
 0x5de   :  { %4037 = vrot.lane.b32.xlu0 %v4032_v47, %s6915_s25  ;;  %4034 = vrot.lane.b32.xlu1 %v4032_v47, %s6917_s27 }
 0x5e2   :  { %4043 = vrot.lane.b32.xlu0 %v4032_v47, %s6913_s23  ;;  %4040 = vrot.lane.b32.xlu1 %v4032_v47, %s6916_s26 }
 0x5e6   :  { %4049 = vrot.lane.b32.xlu0 %v4032_v47, %s6914_s24  ;;  %4046 = vrot.lane.b32.xlu1 %v4032_v47, %s6911_s21 }
 0x5ea   :  { %4052 = vrot.lane.b32.xlu1 %v4032_v47, %s6912_s22 }
 0x650   :  { %v4038_v45 = vpop.permute.xlu0 %4037  ;;  %v4035_v18 = vpop.permute.xlu1 %4034 }
 0x651   :  { %v4055_v38 = vsel %vm669_vm0, %v4032_v47, %v4035_v18 }
 0x652   :  { %v4056_v33 = vsel %vm671_vm1, %v4055_v38, %v4038_v45 }
 0x654   :  { %v4044_v59 = vpop.permute.xlu0 %4043  ;;  %v4041_v51 = vpop.permute.xlu1 %4040 }
 0x655   :  { %v4057_v20 = vsel %vm673_vm2, %v4056_v33, %v4041_v51 }
 0x656   :  { %v4058_v8 = vsel %vm675_vm3, %v4057_v20, %v4044_v59 }
 0x658   :  { %v4047_v5 = vpop.permute.xlu1 %4046  ;;  %v4050_v19 = vpop.permute.xlu0 %4049 }
 0x659   :  { %v4059_v41 = vsel %vm677_vm4, %v4058_v8, %v4047_v5  ;;  %v6853_v8 = vld [vmem:[%s10890_s7] ss:$16 sps:$4 sm:$0xff]   ;;  %v6855_v5 = vld [vmem:[%s10890_s7 + $0x4] ss:$16 sps:$4 sm:$0xff]  }
 0x65a   :  { %v4060_v9 = vsel %vm679_vm5, %v4059_v41, %v4050_v19  ;;  %v6858_v19 = vld [vmem:[%s10890_s7 + $0x24] ss:$16 sps:$4 sm:$0xff]   ;;  %4460 = vmatprep.subr.bf16.mxu1 %v6855_v5  ;;  %v6856_v41 = vld [vmem:[%s10890_s7 + $0x20] ss:$16 sps:$4 sm:$0xff]   ;;  %v6895_v5 = vld [vmem:[%s10890_s7 + $0xc8] ss:$16 sps:$4 sm:$0xff]  }
 0x65b   :  { %4461 = vmatpush1.bf16.msra.mxu1 %v6853_v8  ;;  %v6897_v8 = vld [vmem:[%s10890_s7 + $0xcc] ss:$16 sps:$4 sm:$0xff]  }
 0x65c   :  { %v4053_v52 = vpop.permute.xlu1 %4052  ;;  %4462 = vmatprep.subr.bf16.mxu1 %v6858_v19  ;;  %v6900_v19 = vld [vmem:[%s10890_s7 + $0xec] ss:$16 sps:$4 sm:$0xff]  }
 0x65d   :  { %v4061_v6 = vsel %vm681_vm6, %v4060_v9, %v4053_v52  ;;  %v6861_v9 = vld [vmem:[%s10890_s7 + $0x44] ss:$16 sps:$4 sm:$0xff]   ;;  %v6859_v52 = vld [vmem:[%s10890_s7 + $0x40] ss:$16 sps:$4 sm:$0xff]  }
 0x65e   :  { %v4065_v55 = vrot.slane %v4061_v6, %v7355_v53  ;;  %v6864_v6 = vld [vmem:[%s10890_s7 + $0x64] ss:$16 sps:$4 sm:$0xff]  }
 0x65f   :  { %4463 = vmatpush1.bf16.msra.mxu1 %v6856_v41  ;;  %v6898_v41 = vld [vmem:[%s10890_s7 + $0xe8] ss:$16 sps:$4 sm:$0xff]  }
 0x660   :  { %v8363_v28 = vsub.f32 %v8286_v43, %v4065_v55  ;;  %v8366_v49 = vsub.f32 %v8292_v58, %v4065_v55  ;;  %v8369_v26 = vsub.f32 %v8283_v32, %v4065_v55  ;;  %v8376_v27 = vsub.f32 %v8289_v62, %v4065_v55  ;;  %4464 = vmatprep.subr.bf16.mxu1 %v6861_v9 }
 0x661   :  { %v8379_v15 = vsub.f32 %v8301_v12, %v4065_v55  ;;  %v8384_v24 = vsub.f32 %v8309_v44, %v4065_v55  ;;  %v8389_v63 = vsub.f32 %v8298_v31, %v4065_v55  ;;  %v8394_v12 = vsub.f32 %v8305_v23, %v4065_v55 }
 0x662   :  { %v4082_v17 = vmul.f32 %v8363_v28, %v8363_v28  ;;  %v4083_v39 = vmul.f32 %v8366_v49, %v8366_v49  ;;  %v4084_v43 = vmul.f32 %v8369_v26, %v8369_v26  ;;  %v4085_v32 = vmul.f32 %v8376_v27, %v8376_v27 }
 0x663   :  { %v4086_v62 = vmul.f32 %v8379_v15, %v8379_v15  ;;  %v4087_v48 = vmul.f32 %v8384_v24, %v8384_v24  ;;  %v8399_v44 = vsub.f32 %v8316_v1, %v4065_v55  ;;  %v4088_v11 = vmul.f32 %v8389_v63, %v8389_v63  ;;  %4465 = vmatpush1.bf16.msra.mxu1 %v6859_v52 }
 0x664   :  { %v4098_v58 = vadd.f32 %v4083_v39, %v4082_v17  ;;  %v8404_v31 = vsub.f32 %v8323_v29, %v4065_v55  ;;  %v4089_v4 = vmul.f32 %v8394_v12, %v8394_v12  ;;  %v8409_v23 = vsub.f32 %v8313_v10, %v4065_v55  ;;  %v6870_v17 = vld [vmem:[%s10890_s7 + $0xc] ss:$16 sps:$4 sm:$0xff]   ;;  %v6871_v39 = vld [vmem:[%s10890_s7 + $0x28] ss:$16 sps:$4 sm:$0xff]   ;;  %4466 = vmatprep.subr.bf16.mxu1 %v6864_v6 }
 0x665   :  { %v4090_v0 = vmul.f32 %v8399_v44, %v8399_v44  ;;  %v8414_v1 = vsub.f32 %v8319_v3, %v4065_v55  ;;  %v8419_v29 = vsub.f32 %v8329_v56, %v4065_v55  ;;  %v8424_v10 = vsub.f32 %v8335_v42, %v4065_v55  ;;  %4573 = vmatprep.subr.bf16.mxu0 %v6870_v17 }
 0x666   :  { %v4099_v13 = vadd.f32 %v4098_v58, %v4084_v43  ;;  %v4091_v37 = vmul.f32 %v8404_v31, %v8404_v31  ;;  %v4092_v50 = vmul.f32 %v8409_v23, %v8409_v23  ;;  %v8429_v3 = vsub.f32 %v8327_v25, %v4065_v55  ;;  %v6873_v43 = vld [vmem:[%s10890_s7 + $0x2c] ss:$16 sps:$4 sm:$0xff]   ;;  %v6862_v58 = vld [vmem:[%s10890_s7 + $0x60] ss:$16 sps:$4 sm:$0xff]  }
 0x667   :  { %v4093_v60 = vmul.f32 %v8414_v1, %v8414_v1  ;;  %v4094_v30 = vmul.f32 %v8419_v29, %v8419_v29  ;;  %v8434_v56 = vsub.f32 %v8332_v34, %v4065_v55  ;;  %v4095_v7 = vmul.f32 %v8424_v10, %v8424_v10  ;;  %v6868_v55 = vld [vmem:[%s10890_s7 + $0x8] ss:$16 sps:$4 sm:$0xff]   ;;  %4467 = vmatpush1.bf16.msra.mxu1 %v6862_v58 }
 0x668   :  { %v4100_v22 = vadd.f32 %v4099_v13, %v4085_v32  ;;  %v4096_v42 = vmul.f32 %v8429_v3, %v8429_v3  ;;  %4574 = vmatpush1.bf16.msra.mxu0 %v6868_v55  ;;  %v6867_v32 = vld [vmem:[%s10890_s7 + $0x84] ss:$16 sps:$4 sm:$0xff]   ;;  %v6865_v13 = vld [vmem:[%s10890_s7 + $0x80] ss:$16 sps:$4 sm:$0xff]  }
 0x669   :  { %v4097_v45 = vmul.f32 %v8434_v56, %v8434_v56  ;;  %4575 = vmatprep.subr.bf16.mxu0 %v6873_v43  ;;  %4468 = vmatprep.subr.bf16.mxu1 %v6867_v32 }
 0x66a   :  { %v4101_v2 = vadd.f32 %v4100_v22, %v4086_v62 }
 0x66b   :  { %4469 = vmatpush1.bf16.msra.mxu1 %v6865_v13 }
 0x66c   :  { %v4102_v16 = vadd.f32 %v4101_v2, %v4087_v48  ;;  %4576 = vmatpush1.bf16.msra.mxu0 %v6871_v39 }
 0x66e   :  { %v4103_v54 = vadd.f32 %v4102_v16, %v4088_v11 }
 0x670   :  { %v4104_v21 = vadd.f32 %v4103_v54, %v4089_v4 }
 0x672   :  { %v4105_v57 = vadd.f32 %v4104_v21, %v4090_v0 }
 0x674   :  { %v4106_v40 = vadd.f32 %v4105_v57, %v4091_v37 }
 0x676   :  { %v4107_v61 = vadd.f32 %v4106_v40, %v4092_v50 }
 0x678   :  { %v4108_v14 = vadd.f32 %v4107_v61, %v4093_v60 }
 0x67a   :  { %v4109_v35 = vadd.f32 %v4108_v14, %v4094_v30  ;;  %v6874_v30 = vld [vmem:[%s10890_s7 + $0xa0] ss:$16 sps:$4 sm:$0xff]   ;;  %v6876_v14 = vld [vmem:[%s10890_s7 + $0xa4] ss:$16 sps:$4 sm:$0xff]  }
 0x67b   :  { %4470 = vmatprep.subr.bf16.mxu1 %v6876_v14 }
 0x67c   :  { %v4110_v47 = vadd.f32 %v4109_v35, %v4095_v7  ;;  %v6877_v7 = vld [vmem:[%s10890_s7 + $0x48] ss:$16 sps:$4 sm:$0xff]   ;;  %v6879_v35 = vld [vmem:[%s10890_s7 + $0x4c] ss:$16 sps:$4 sm:$0xff]   ;;  %4471 = vmatpush1.bf16.msra.mxu1 %v6874_v30 }
 0x67d   :  { %4577 = vmatprep.subr.bf16.mxu0 %v6879_v35 }
 0x67e   :  { %v4111_v25 = vadd.f32 %v4110_v47, %v4096_v42  ;;  %4578 = vmatpush1.bf16.msra.mxu0 %v6877_v7  ;;  %v6880_v42 = vld [vmem:[%s10890_s7 + $0x68] ss:$16 sps:$4 sm:$0xff]   ;;  %v6882_v47 = vld [vmem:[%s10890_s7 + $0x6c] ss:$16 sps:$4 sm:$0xff]  }
 0x67f   :  { %4579 = vmatprep.subr.bf16.mxu0 %v6882_v47 }
 0x680   :  { %v4112_v18 = vadd.f32 %v4111_v25, %v4097_v45  ;;  %v6883_v45 = vld [vmem:[%s10890_s7 + $0xc0] ss:$16 sps:$4 sm:$0xff]   ;;  %v6885_v25 = vld [vmem:[%s10890_s7 + $0xc4] ss:$16 sps:$4 sm:$0xff]  }
 0x681   :  { %4472 = vmatprep.subr.bf16.mxu1 %v6885_v25 }
 0x682   :  { %v4113_v38 = vrot.slane %v4112_v18, 4  ;;  %4580 = vmatpush1.bf16.msra.mxu0 %v6880_v42  ;;  %4473 = vmatpush1.bf16.msra.mxu1 %v6883_v45 }
 0x684   :  { %v4114_v59 = vadd.f32 %v4113_v38, %v4112_v18  ;;  %v6886_v18 = vld [vmem:[%s10890_s7 + $0x88] ss:$16 sps:$4 sm:$0xff]   ;;  %v6888_v38 = vld [vmem:[%s10890_s7 + $0x8c] ss:$16 sps:$4 sm:$0xff]  }
 0x685   :  { %4581 = vmatprep.subr.bf16.mxu0 %v6888_v38 }
 0x686   :  { %v4115_v33 = vrot.slane %v4114_v59, 2  ;;  %4582 = vmatpush1.bf16.msra.mxu0 %v6886_v18 }
 0x688   :  { %v4116_v51 = vadd.f32 %v4115_v33, %v4114_v59  ;;  %v6889_v33 = vld [vmem:[%s10890_s7 + $0xa8] ss:$16 sps:$4 sm:$0xff]  }
 0x68a   :  { %v4117_v20 = vrot.slane %v4116_v51, 1 }
 0x68c   :  { %v4118_v34 = vadd.f32 %v4117_v20, %v4116_v51  ;;  %v6891_v51 = vld [vmem:[%s10890_s7 + $0xac] ss:$16 sps:$4 sm:$0xff]   ;;  %v6892_v20 = vld [vmem:[%s10890_s7 + $0xe0] ss:$16 sps:$4 sm:$0xff]  }
 0x68d   :  { %4583 = vmatprep.subr.bf16.mxu0 %v6891_v51 }
 0x68e   :  { %4124 = vrot.lane.b32.xlu1 %v4118_v34, %s6914_s24  ;;  %4120 = vrot.lane.b32.xlu0 %v4118_v34, %s6912_s22 }
 0x68f   :  { %4584 = vmatpush1.bf16.msra.mxu0 %v6889_v33 }
 0x690   :  { %4585 = vmatprep.subr.bf16.mxu0 %v6897_v8 }
 0x692   :  { %4132 = vrot.lane.b32.xlu1 %v4118_v34, %s6913_s23  ;;  %4128 = vrot.lane.b32.xlu0 %v4118_v34, %s6911_s21 }
 0x693   :  { %4586 = vmatpush1.bf16.msra.mxu0 %v6895_v5 }
 0x694   :  { %4587 = vmatprep.subr.bf16.mxu0 %v6900_v19 }
 0x696   :  { %4140 = vrot.lane.b32.xlu1 %v4118_v34, %s6915_s25  ;;  %4136 = vrot.lane.b32.xlu0 %v4118_v34, %s6916_s26 }
 0x697   :  { %4588 = vmatpush1.bf16.msra.mxu0 %v6898_v41 }
 0x69a   :  { %4144 = vrot.lane.b32.xlu0 %v4118_v34, %s6917_s27 }
 0x700   :  { %v4125_v62 = vpop.permute.xlu1 %4124  ;;  %v4121_v22 = vpop.permute.xlu0 %4120 }
 0x701   :  { %v4123_v48 = vadd.f32 %v4121_v22, %v4118_v34  ;;  %v6894_v34 = vld [vmem:[%s10890_s7 + $0xe4] ss:$16 sps:$4 sm:$0xff]  }
 0x702   :  { %4474 = vmatprep.subr.bf16.mxu1 %v6894_v34 }
 0x703   :  { %v4127_v2 = vadd.f32 %v4125_v62, %v4123_v48  ;;  %4475 = vmatpush1.bf16.msra.mxu1 %v6892_v20 }
 0x704   :  { %v4133_v11 = vpop.permute.xlu1 %4132  ;;  %v4129_v16 = vpop.permute.xlu0 %4128 }
 0x705   :  { %v4131_v4 = vadd.f32 %v4129_v16, %v4127_v2  ;;  %v8565_v16 = vld [vmem:[%s10891_s5] ss:$0 sm:$0xff] }
 0x707   :  { %v4135_v54 = vadd.f32 %v4133_v11, %v4131_v4 }
 0x708   :  { %v4137_v0 = vpop.permute.xlu0 %4136  ;;  %v4141_v37 = vpop.permute.xlu1 %4140 }
 0x709   :  { %v4139_v21 = vadd.f32 %v4137_v0, %v4135_v54 }
 0x70b   :  { %v4143_v57 = vadd.f32 %v4141_v37, %v4139_v21  ;;  %v8578_v37 = vld [vmem:[%s10892_s6] ss:$0 sm:$0xff] }
 0x70c   :  { %v4145_v50 = vpop.permute.xlu0 %4144 }
 0x70d   :  { %v4147_v40 = vadd.f32 %v4145_v50, %v4143_v57 }
 0x70f   :  { %v4148_v60 = vmul.f32 0.0009765625, %v4147_v40 }
 0x711   :  { %v4149_v61 = vadd.f32 1e-05, %v4148_v60 }
 0x713   :  { %6903 = vrsqrt.f32 %v4149_v61 }
 0x71d   :  { %v6904_v59 = vpop.eup %6903 }
 0x71e   :  { %4155 = vrot.lane.b32.xlu0 %v6904_v59, %s6915_s25  ;;  %4152 = vrot.lane.b32.xlu1 %v6904_v59, %s6917_s27 }
 0x722   :  { %4161 = vrot.lane.b32.xlu0 %v6904_v59, %s6913_s23  ;;  %4158 = vrot.lane.b32.xlu1 %v6904_v59, %s6916_s26 }
 0x726   :  { %4167 = vrot.lane.b32.xlu0 %v6904_v59, %s6914_s24  ;;  %4164 = vrot.lane.b32.xlu1 %v6904_v59, %s6911_s21 }
 0x72a   :  { %4170 = vrot.lane.b32.xlu1 %v6904_v59, %s6912_s22 }
 0x790   :  { %v4156_v9 = vpop.permute.xlu0 %4155  ;;  %v4153_v52 = vpop.permute.xlu1 %4152 }
 0x791   :  { %v4173_v6 = vsel %vm669_vm0, %v6904_v59, %v4153_v52  ;;  %vm6920_vm0 = vmmov 0  }
 0x792   :  { %v4174_v17 = vsel %vm671_vm1, %v4173_v6, %v4156_v9  ;;  %vm5516_vm1 = vcmask 31744  }
 0x794   :  { %v4162_v55 = vpop.permute.xlu0 %4161  ;;  %v4159_v39 = vpop.permute.xlu1 %4158 }
 0x795   :  { %v4175_v43 = vsel %vm673_vm2, %v4174_v17, %v4159_v39 }
 0x796   :  { %v4176_v58 = vsel %vm675_vm3, %v4175_v43, %v4162_v55 }
 0x798   :  { %v4165_v32 = vpop.permute.xlu1 %4164  ;;  %v4168_v13 = vpop.permute.xlu0 %4167 }
 0x799   :  { %v4177_v62 = vsel %vm677_vm4, %v4176_v58, %v4165_v32 }
 0x79a   :  { %v4178_v22 = vsel %vm679_vm5, %v4177_v62, %v4168_v13 }
 0x79c   :  { %v4171_v48 = vpop.permute.xlu1 %4170 }
 0x79d   :  { %v4179_v2 = vsel %vm681_vm6, %v4178_v22, %v4171_v48 }
 0x79e   :  { %v8560_v11 = vrot.slane %v4179_v2, %v7355_v53 }
 0x7a0   :  { %v4184_v4 = vmul.f32 %v8560_v11, %v8363_v28  ;;  %v4185_v54 = vmul.f32 %v8560_v11, %v8366_v49  ;;  %v4186_v0 = vmul.f32 %v8560_v11, %v8369_v26  ;;  %v4187_v21 = vmul.f32 %v8560_v11, %v8376_v27 }
 0x7a1   :  { %v4188_v27 = vmul.f32 %v8560_v11, %v8379_v15  ;;  %v4189_v35 = vmul.f32 %v8560_v11, %v8384_v24  ;;  %v4190_v25 = vmul.f32 %v8560_v11, %v8389_v63  ;;  %v4191_v18 = vmul.f32 %v8560_v11, %v8394_v12 }
 0x7a2   :  { %v4206_v57 = vmul.f32 %v8565_v16, %v4184_v4  ;;  %v4207_v50 = vmul.f32 %v8565_v16, %v4185_v54  ;;  %v4208_v49 = vmul.f32 %v8565_v16, %v4186_v0  ;;  %v4209_v26 = vmul.f32 %v8565_v16, %v4187_v21 }
 0x7a3   :  { %v4210_v45 = vmul.f32 %v8565_v16, %v4188_v27  ;;  %v4211_v15 = vmul.f32 %v8565_v16, %v4189_v35  ;;  %v4212_v33 = vmul.f32 %v8565_v16, %v4190_v25  ;;  %v4213_v51 = vmul.f32 %v8565_v16, %v4191_v18 }
 0x7a4   :  { %v4228_v28 = vadd.f32 %v8578_v37, %v4206_v57  ;;  %v4229_v40 = vadd.f32 %v8578_v37, %v4207_v50  ;;  %v4230_v14 = vadd.f32 %v8578_v37, %v4208_v49  ;;  %v4231_v7 = vadd.f32 %v8578_v37, %v4209_v26 }
 0x7a5   :  { %v4232_v24 = vadd.f32 %v8578_v37, %v4210_v45  ;;  %v4233_v59 = vadd.f32 %v8578_v37, %v4211_v15  ;;  %v4234_v34 = vadd.f32 %v8578_v37, %v4212_v33  ;;  %v4235_v12 = vadd.f32 %v8578_v37, %v4213_v51 }
 0x7a6   :  { %v4244_v60 = vmax.f32 %v4228_v28, 0.0  ;;  %v4245_v61 = vmax.f32 %v4229_v40, 0.0  ;;  %v4246_v42 = vmax.f32 %v4230_v14, 0.0  ;;  %v4247_v47 = vmax.f32 %v4231_v7, 0.0 }
 0x7a7   :  { %v4248_v20 = vmax.f32 %v4232_v24, 0.0  ;;  %v4249_v63 = vmax.f32 %v4233_v59, 0.0  ;;  %v4192_v5 = vmul.f32 %v8560_v11, %v8399_v44  ;;  %v4193_v19 = vmul.f32 %v8560_v11, %v8404_v31 }
 0x7a8   :  { %v4260_v30 = vpack.c.bf16 %v4245_v61, %v4244_v60  ;;  %v4261_v38 = vpack.c.bf16 %v4247_v47, %v4246_v42  ;;  %v4250_v41 = vmax.f32 %v4234_v34, 0.0  ;;  %v4251_v9 = vmax.f32 %v4235_v12, 0.0 }
 0x7a9   :  { %v4262_v8 = vpack.c.bf16 %v4249_v63, %v4248_v20  ;;  %v4214_v52 = vmul.f32 %v8565_v16, %v4192_v5  ;;  %v4215_v6 = vmul.f32 %v8565_v16, %v4193_v19  ;;  %v4194_v31 = vmul.f32 %v8560_v11, %v8409_v23 }
 0x7aa   :  { %4493 = vmatmul.mubr.bf16.vlgmr.msra.gmra.mrb[96].mxu1 %v4260_v30  ;;  %4606 = vmatmul.mubr.bf16.vlgmr.msra.gmra.mrb[112].mxu0 %v4260_v30  ;;  %v4263_v55 = vpack.c.bf16 %v4251_v9, %v4250_v41  ;;  %v4195_v39 = vmul.f32 %v8560_v11, %v8414_v1  ;;  %v4196_v62 = vmul.f32 %v8560_v11, %v8419_v29 }
 0x7ab   :  { %4502 = vmatprep.mubr.bf16.mxu1 %v6918_v36  ;;  %4615 = vmatprep.mubr.bf16.mxu0 %v6918_v36  ;;  %v4236_v17 = vadd.f32 %v8578_v37, %v4214_v52  ;;  %v4237_v44 = vadd.f32 %v8578_v37, %v4215_v6  ;;  %v4216_v32 = vmul.f32 %v8565_v16, %v4194_v31 }
 0x7ac   :  { %v4217_v13 = vmul.f32 %v8565_v16, %v4195_v39  ;;  %v4197_v48 = vmul.f32 %v8560_v11, %v8424_v10  ;;  %v4218_v54 = vmul.f32 %v8565_v16, %v4196_v62  ;;  %v4198_v0 = vmul.f32 %v8560_v11, %v8429_v3 }
 0x7ad   :  { %v4252_v43 = vmax.f32 %v4236_v17, 0.0  ;;  %v4253_v58 = vmax.f32 %v4237_v44, 0.0  ;;  %v4238_v23 = vadd.f32 %v8578_v37, %v4216_v32  ;;  %v4199_v50 = vmul.f32 %v8560_v11, %v8434_v56 }
 0x7ae   :  { %v4239_v1 = vadd.f32 %v8578_v37, %v4217_v13  ;;  %v4219_v29 = vmul.f32 %v8565_v16, %v4197_v48  ;;  %v4240_v57 = vadd.f32 %v8578_v37, %v4218_v54  ;;  %v4220_v49 = vmul.f32 %v8565_v16, %v4198_v0 }
 0x7af   :  { %v4264_v22 = vpack.c.bf16 %v4253_v58, %v4252_v43  ;;  %v4254_v2 = vmax.f32 %v4238_v23, 0.0  ;;  %v4221_v3 = vmul.f32 %v8565_v16, %v4199_v50 }
 0x7b0   :  { %v4255_v4 = vmax.f32 %v4239_v1, 0.0  ;;  %v4241_v10 = vadd.f32 %v8578_v37, %v4219_v29  ;;  %v4256_v28 = vmax.f32 %v4240_v57, 0.0  ;;  %v4242_v60 = vadd.f32 %v8578_v37, %v4220_v49 }
 0x7b1   :  { %v4243_v61 = vadd.f32 %v8578_v37, %v4221_v3 }
 0x7b2   :  { %4503 = vmatmul.mubr.bf16.gmra.mrb[100].mxu1 %v4261_v38  ;;  %4616 = vmatmul.mubr.bf16.gmra.mrb[116].mxu0 %v4261_v38  ;;  %v4265_v21 = vpack.c.bf16 %v4255_v4, %v4254_v2  ;;  %v4257_v40 = vmax.f32 %v4241_v10, 0.0  ;;  %v4258_v56 = vmax.f32 %v4242_v60, 0.0 }
 0x7b3   :  { %4512 = vmatprep.mubr.bf16.mxu1 %v6918_v36  ;;  %4625 = vmatprep.mubr.bf16.mxu0 %v6918_v36  ;;  %v4259_v11 = vmax.f32 %v4243_v61, 0.0 }
 0x7b4   :  { %v4266_v26 = vpack.c.bf16 %v4257_v40, %v4256_v28 }
 0x7b5   :  { %v4267_v27 = vpack.c.bf16 %v4259_v11, %v4258_v56 }
 0x7ba   :  { %4513 = vmatmul.mubr.bf16.gmra.mrb[104].mxu1 %v4262_v8  ;;  %4626 = vmatmul.mubr.bf16.gmra.mrb[120].mxu0 %v4262_v8 }
 0x7bb   :  { %4522 = vmatprep.mubr.bf16.mxu1 %v6918_v36  ;;  %4635 = vmatprep.mubr.bf16.mxu0 %v6918_v36 }
 0x7c2   :  { %4523 = vmatmul.mubr.bf16.gmra.mrb[108].mxu1 %v4263_v55  ;;  %4636 = vmatmul.mubr.bf16.gmra.mrb[124].mxu0 %v4263_v55 }
 0x7c3   :  { %4532 = vmatprep.mubr.bf16.mxu1 %v6918_v36  ;;  %4645 = vmatprep.mubr.bf16.mxu0 %v6918_v36 }
 0x7ca   :  { %4533 = vmatmul.mubr.bf16.gmra.mrb[112].mxu1 %v4264_v22  ;;  %4646 = vmatmul.mubr.bf16.gmra.mrb[128].mxu0 %v4264_v22 }
 0x7cb   :  { %4542 = vmatprep.mubr.bf16.mxu1 %v6918_v36  ;;  %4655 = vmatprep.mubr.bf16.mxu0 %v6918_v36 }
 0x7d2   :  { %4543 = vmatmul.mubr.bf16.gmra.mrb[116].mxu1 %v4265_v21  ;;  %4656 = vmatmul.mubr.bf16.gmra.mrb[132].mxu0 %v4265_v21 }
 0x7d3   :  { %4552 = vmatprep.mubr.bf16.mxu1 %v6918_v36  ;;  %4665 = vmatprep.mubr.bf16.mxu0 %v6918_v36 }
 0x7da   :  { %4553 = vmatmul.mubr.bf16.gmra.mrb[120].mxu1 %v4266_v26  ;;  %4666 = vmatmul.mubr.bf16.gmra.mrb[136].mxu0 %v4266_v26 }
 0x7db   :  { %4562 = vmatprep.mubr.bf16.mxu1 %v6918_v36  ;;  %4675 = vmatprep.mubr.bf16.mxu0 %v6918_v36 }
 0x7e2   :  { %4563 = vmatmul.mubr.bf16.gmra.mrb[124].mxu1 %v4267_v27  ;;  %4676 = vmatmul.mubr.bf16.gmra.mrb[140].mxu0 %v4267_v27 }
 0x87d   :  { %v8650_v30 = vpop.f32.mrb[96].mxu1  ;;  %v8652_v14 = vpop.f32.mrb[112].mxu0 }
 0x87e   :  { %v8654_v16 = vpop.f32.mrb[97].mxu1  ;;  %v8656_v7 = vpop.f32.mrb[113].mxu0 }
 0x87f   :  { %v8658_v37 = vpop.f32.mrb[98].mxu1  ;;  %v8660_v35 = vpop.f32.mrb[114].mxu0 }
 0x880   :  { %v4688_v36 = vadd.f32 %v8658_v37, %v8650_v30  ;;  %v4730_v42 = vadd.f32 %v8660_v35, %v8652_v14  ;;  %v8666_v47 = vpop.f32.mrb[99].mxu1  ;;  %v8668_v45 = vpop.f32.mrb[115].mxu0 }
 0x881   :  { %v4709_v15 = vadd.f32 %v8666_v47, %v8654_v16  ;;  %v4751_v25 = vadd.f32 %v8668_v45, %v8656_v7 }
 0x885   :  { %v8674_v18 = vpop.f32.mrb[100].mxu1  ;;  %v8676_v38 = vpop.f32.mrb[116].mxu0 }
 0x886   :  { %v4689_v24 = vadd.f32 %v4688_v36, %v8674_v18  ;;  %v4731_v59 = vadd.f32 %v4730_v42, %v8676_v38  ;;  %v8680_v33 = vpop.f32.mrb[101].mxu1  ;;  %v8682_v51 = vpop.f32.mrb[117].mxu0 }
 0x887   :  { %v4710_v20 = vadd.f32 %v4709_v15, %v8680_v33  ;;  %v4752_v63 = vadd.f32 %v4751_v25, %v8682_v51  ;;  %v8686_v34 = vpop.f32.mrb[102].mxu1  ;;  %v8688_v12 = vpop.f32.mrb[118].mxu0 }
 0x888   :  { %v4690_v8 = vadd.f32 %v4689_v24, %v8686_v34  ;;  %v4732_v5 = vadd.f32 %v4731_v59, %v8688_v12  ;;  %v8692_v19 = vpop.f32.mrb[103].mxu1  ;;  %v8694_v41 = vpop.f32.mrb[119].mxu0 }
 0x889   :  { %v4711_v9 = vadd.f32 %v4710_v20, %v8692_v19  ;;  %v4753_v52 = vadd.f32 %v4752_v63, %v8694_v41 }
 0x88d   :  { %v8698_v6 = vpop.f32.mrb[104].mxu1  ;;  %v8700_v55 = vpop.f32.mrb[120].mxu0 }
 0x88e   :  { %v4691_v17 = vadd.f32 %v4690_v8, %v8698_v6  ;;  %v4733_v44 = vadd.f32 %v4732_v5, %v8700_v55  ;;  %v8704_v31 = vpop.f32.mrb[105].mxu1  ;;  %v8706_v39 = vpop.f32.mrb[121].mxu0 }
 0x88f   :  { %v4712_v43 = vadd.f32 %v4711_v9, %v8704_v31  ;;  %v4754_v58 = vadd.f32 %v4753_v52, %v8706_v39  ;;  %v8710_v32 = vpop.f32.mrb[106].mxu1  ;;  %v8712_v13 = vpop.f32.mrb[122].mxu0 }
 0x890   :  { %v4692_v62 = vadd.f32 %v4691_v17, %v8710_v32  ;;  %v4734_v22 = vadd.f32 %v4733_v44, %v8712_v13  ;;  %v8716_v23 = vpop.f32.mrb[107].mxu1  ;;  %v8718_v1 = vpop.f32.mrb[123].mxu0 }
 0x891   :  { %v4713_v48 = vadd.f32 %v4712_v43, %v8716_v23  ;;  %v4755_v2 = vadd.f32 %v4754_v58, %v8718_v1 }
 0x895   :  { %v8722_v4 = vpop.f32.mrb[108].mxu1  ;;  %v8724_v54 = vpop.f32.mrb[124].mxu0 }
 0x896   :  { %v4693_v29 = vadd.f32 %v4692_v62, %v8722_v4  ;;  %v4735_v0 = vadd.f32 %v4734_v22, %v8724_v54  ;;  %v8728_v21 = vpop.f32.mrb[109].mxu1  ;;  %v8730_v57 = vpop.f32.mrb[125].mxu0 }
 0x897   :  { %v4714_v10 = vadd.f32 %v4713_v48, %v8728_v21  ;;  %v4756_v50 = vadd.f32 %v4755_v2, %v8730_v57  ;;  %v8734_v28 = vpop.f32.mrb[110].mxu1  ;;  %v8736_v40 = vpop.f32.mrb[126].mxu0 }
 0x898   :  { %v4694_v49 = vadd.f32 %v4693_v29, %v8734_v28  ;;  %v4736_v3 = vadd.f32 %v4735_v0, %v8736_v40  ;;  %v8740_v26 = vpop.f32.mrb[111].mxu1  ;;  %v8742_v60 = vpop.f32.mrb[127].mxu0 }
 0x899   :  { %v4715_v61 = vadd.f32 %v4714_v10, %v8740_v26  ;;  %v4757_v56 = vadd.f32 %v4756_v50, %v8742_v60 }
 0x89d   :  { %v8746_v11 = vpop.f32.mrb[112].mxu1  ;;  %v8748_v27 = vpop.f32.mrb[128].mxu0 }
 0x89e   :  { %v4695_v36 = vadd.f32 %v4694_v49, %v8746_v11  ;;  %v4737_v42 = vadd.f32 %v4736_v3, %v8748_v27  ;;  %v8752_v15 = vpop.f32.mrb[113].mxu1  ;;  %v8754_v25 = vpop.f32.mrb[129].mxu0 }
 0x89f   :  { %v4716_v24 = vadd.f32 %v4715_v61, %v8752_v15  ;;  %v4758_v59 = vadd.f32 %v4757_v56, %v8754_v25  ;;  %v8758_v20 = vpop.f32.mrb[114].mxu1  ;;  %v8760_v63 = vpop.f32.mrb[130].mxu0 }
 0x8a0   :  { %10999 = vst [vmem:[#allocation6_spill] sm:$0xff] %v8760_v63  ;;  %v4696_v8 = vadd.f32 %v4695_v36, %v8758_v20  ;;  %v4738_v5 = vadd.f32 %v4737_v42, %v8760_v63  ;;  %v8764_v9 = vpop.f32.mrb[115].mxu1  ;;  %v8766_v52 = vpop.f32.mrb[131].mxu0 }
 0x8a1   :  { %11000 = vst [vmem:[#allocation7_spill] sm:$0xff] %v8764_v9  ;;  %11001 = vst [vmem:[#allocation8_spill] sm:$0xff] %v8766_v52  ;;  %v4717_v17 = vadd.f32 %v4716_v24, %v8764_v9  ;;  %v4759_v44 = vadd.f32 %v4758_v59, %v8766_v52 }
 0x8a5   :  { %v8770_v43 = vpop.f32.mrb[116].mxu1  ;;  %v8772_v58 = vpop.f32.mrb[132].mxu0 }
 0x8a6   :  { %11002 = vst [vmem:[#allocation9_spill] sm:$0xff] %v8770_v43  ;;  %11003 = vst [vmem:[#allocation10_spill] sm:$0xff] %v8772_v58  ;;  %v4697_v62 = vadd.f32 %v4696_v8, %v8770_v43  ;;  %v4739_v22 = vadd.f32 %v4738_v5, %v8772_v58  ;;  %v8776_v48 = vpop.f32.mrb[117].mxu1  ;;  %v8778_v2 = vpop.f32.mrb[133].mxu0 }
 0x8a7   :  { %11004 = vst [vmem:[#allocation11_spill] sm:$0xff] %v8776_v48  ;;  %11005 = vst [vmem:[#allocation12_spill] sm:$0xff] %v8778_v2  ;;  %v4718_v29 = vadd.f32 %v4717_v17, %v8776_v48  ;;  %v4760_v0 = vadd.f32 %v4759_v44, %v8778_v2  ;;  %v8782_v10 = vpop.f32.mrb[118].mxu1  ;;  %v8784_v50 = vpop.f32.mrb[134].mxu0 }
 0x8a8   :  { %11006 = vst [vmem:[#allocation13_spill] sm:$0xff] %v8782_v10  ;;  %11007 = vst [vmem:[#allocation14_spill] sm:$0xff] %v8784_v50  ;;  %v4698_v49 = vadd.f32 %v4697_v62, %v8782_v10  ;;  %v4740_v3 = vadd.f32 %v4739_v22, %v8784_v50  ;;  %v8788_v61 = vpop.f32.mrb[119].mxu1  ;;  %v8790_v56 = vpop.f32.mrb[135].mxu0 }
 0x8a9   :  { %11008 = vst [vmem:[#allocation15_spill] sm:$0xff] %v8788_v61  ;;  %11009 = vst [vmem:[#allocation16_spill] sm:$0xff] %v8790_v56  ;;  %v4719_v36 = vadd.f32 %v4718_v29, %v8788_v61  ;;  %v4761_v42 = vadd.f32 %v4760_v0, %v8790_v56 }
 0x8ad   :  { %v8794_v24 = vpop.f32.mrb[120].mxu1  ;;  %v8796_v59 = vpop.f32.mrb[136].mxu0 }
 0x8ae   :  { %11010 = vst [vmem:[#allocation17_spill] sm:$0xff] %v8794_v24  ;;  %11011 = vst [vmem:[#allocation18_spill] sm:$0xff] %v8796_v59  ;;  %v4699_v8 = vadd.f32 %v4698_v49, %v8794_v24  ;;  %v4741_v5 = vadd.f32 %v4740_v3, %v8796_v59  ;;  %v8800_v17 = vpop.f32.mrb[121].mxu1  ;;  %v8802_v44 = vpop.f32.mrb[137].mxu0 }
 0x8af   :  { %11012 = vst [vmem:[#allocation19_spill] sm:$0xff] %v8800_v17  ;;  %11013 = vst [vmem:[#allocation20_spill] sm:$0xff] %v8802_v44  ;;  %v4720_v62 = vadd.f32 %v4719_v36, %v8800_v17  ;;  %v4762_v22 = vadd.f32 %v4761_v42, %v8802_v44  ;;  %v8806_v46 = vpop.f32.mrb[122].mxu1  ;;  %v8808_v29 = vpop.f32.mrb[138].mxu0 }
 0x8b0   :  { %11014 = vst [vmem:[#allocation21_spill] sm:$0xff] %v8806_v46  ;;  %11015 = vst [vmem:[#allocation22_spill] sm:$0xff] %v8808_v29  ;;  %v4700_v0 = vadd.f32 %v4699_v8, %v8806_v46  ;;  %v4742_v56 = vadd.f32 %v4741_v5, %v8808_v29  ;;  %v8812_v50 = vpop.f32.mrb[123].mxu1  ;;  %v8814_v49 = vpop.f32.mrb[139].mxu0 }
 0x8b1   :  { %11016 = vst [vmem:[#allocation23_spill] sm:$0xff] %v8812_v50  ;;  %11017 = vst [vmem:[#allocation24_spill] sm:$0xff] %v8814_v49  ;;  %v4721_v3 = vadd.f32 %v4720_v62, %v8812_v50  ;;  %v4763_v59 = vadd.f32 %v4762_v22, %v8814_v49 }
 0x8b5   :  { %v8818_v24 = vpop.f32.mrb[124].mxu1  ;;  %v8820_v36 = vpop.f32.mrb[140].mxu0 }
 0x8b6   :  { %11018 = vst [vmem:[#allocation25_spill] sm:$0xff] %v8818_v24  ;;  %11019 = vst [vmem:[#allocation26_spill] sm:$0xff] %v8820_v36  ;;  %v4701_v42 = vadd.f32 %v4700_v0, %v8818_v24  ;;  %v4743_v44 = vadd.f32 %v4742_v56, %v8820_v36  ;;  %v8824_v17 = vpop.f32.mrb[125].mxu1  ;;  %v8826_v8 = vpop.f32.mrb[141].mxu0 }
 0x8b7   :  { %11020 = vst [vmem:[#allocation27_spill] sm:$0xff] %v8824_v17  ;;  %11021 = vst [vmem:[#allocation28_spill] sm:$0xff] %v8826_v8  ;;  %v4722_v5 = vadd.f32 %v4721_v3, %v8824_v17  ;;  %v4764_v29 = vadd.f32 %v4763_v59, %v8826_v8  ;;  %v8830_v46 = vpop.f32.mrb[126].mxu1  ;;  %v8832_v62 = vpop.f32.mrb[142].mxu0 }
 0x8b8   :  { %11022 = vst [vmem:[#allocation29_spill] sm:$0xff] %v8830_v46  ;;  %11023 = vst [vmem:[#allocation30_spill] sm:$0xff] %v8832_v62  ;;  %v4702_v22 = vadd.f32 %v4701_v42, %v8830_v46  ;;  %v4744_v49 = vadd.f32 %v4743_v44, %v8832_v62  ;;  %v8836_v50 = vpop.f32.mrb[127].mxu1  ;;  %v8838_v0 = vpop.f32.mrb[143].mxu0 }
 0x8b9   :  { %11024 = vst [vmem:[#allocation31_spill] sm:$0xff] %v8836_v50  ;;  %11025 = vst [vmem:[#allocation32_spill] sm:$0xff] %v8838_v0  ;;  %v4723_v56 = vadd.f32 %v4722_v5, %v8836_v50  ;;  %v4765_v36 = vadd.f32 %v4764_v29, %v8838_v0 }
 0x8ba   :  { %v4703_v24 = vrot.slane %v4702_v22, 4  ;;  %v4745_v3 = vrot.slane %v4744_v49, 4 }
 0x8bb   :  { %v4724_v17 = vrot.slane %v4723_v56, 4  ;;  %v4766_v59 = vrot.slane %v4765_v36, 4 }
 0x8bc   :  { %v4704_v8 = vadd.f32 %v4703_v24, %v4702_v22  ;;  %v4746_v61 = vadd.f32 %v4745_v3, %v4744_v49 }
 0x8bd   :  { %v4725_v10 = vadd.f32 %v4724_v17, %v4723_v56  ;;  %v4767_v2 = vadd.f32 %v4766_v59, %v4765_v36 }
 0x8be   :  { %v4705_v58 = vrot.slane %v4704_v8, 2  ;;  %v4747_v42 = vrot.slane %v4746_v61, 2 }
 0x8bf   :  { %v4726_v46 = vrot.slane %v4725_v10, 2  ;;  %v4768_v44 = vrot.slane %v4767_v2, 2 }
 0x8c0   :  { %v4706_v62 = vadd.f32 %v4705_v58, %v4704_v8  ;;  %v4748_v48 = vadd.f32 %v4747_v42, %v4746_v61 }
 0x8c1   :  { %v4727_v43 = vadd.f32 %v4726_v46, %v4725_v10  ;;  %v4769_v52 = vadd.f32 %v4768_v44, %v4767_v2 }
 0x8c2   :  { %v4707_v63 = vrot.slane %v4706_v62, 1  ;;  %v4749_v29 = vrot.slane %v4748_v48, 1 }
 0x8c3   :  { %v4728_v5 = vrot.slane %v4727_v43, 1  ;;  %v4770_v9 = vrot.slane %v4769_v52, 1 }
 0x8c4   :  { %v4708_v50 = vadd.f32 %v4707_v63, %v4706_v62  ;;  %v4750_v24 = vadd.f32 %v4749_v29, %v4748_v48 }
 0x8c5   :  { %v4729_v0 = vadd.f32 %v4728_v5, %v4727_v43  ;;  %v4771_v17 = vadd.f32 %v4770_v9, %v4769_v52 }
 0x8c6   :  { %4773 = vrot.lane.b32.xlu0 %v4708_v50, %s6913_s23 }
 0x8c7   :  { %4779 = vrot.lane.b32.xlu1 %v4729_v0, %s6913_s23 }
 0x8ca   :  { %4785 = vrot.lane.b32.xlu0 %v4750_v24, %s6913_s23 }
 0x8cb   :  { %4791 = vrot.lane.b32.xlu1 %v4771_v17, %s6913_s23 }
 0x938   :  { %v4774_v58 = vpop.permute.xlu0 %4773 }
 0x939   :  { %v4776_v61 = vadd.f32 %v4774_v58, %v4708_v50  ;;  %v4780_v2 = vpop.permute.xlu1 %4779  ;;  %v11044_v58 = vld [vmem:[#allocation6_spill] sm:$0xff] }
 0x93b   :  { %v4777_v46 = vadd.f32 %v4776_v61, %v4729_v0  ;;  %v11045_v61 = vld [vmem:[#allocation8_spill] sm:$0xff] }
 0x93c   :  { %v4786_v63 = vpop.permute.xlu0 %4785 }
 0x93d   :  { %v4782_v10 = vadd.f32 %v4780_v2, %v4777_v46  ;;  %v4792_v8 = vpop.permute.xlu1 %4791  ;;  %v11046_v2 = vld [vmem:[#allocation9_spill] sm:$0xff] }
 0x93f   :  { %v4783_v49 = vadd.f32 %v4782_v10, %v4750_v24 }
 0x941   :  { %v4788_v36 = vadd.f32 %v4786_v63, %v4783_v49  ;;  %v11047_v49 = vld [vmem:[#allocation11_spill] sm:$0xff] }
 0x943   :  { %v4789_v43 = vadd.f32 %v4788_v36, %v4771_v17  ;;  %v11042_v17 = vld [vmem:[#allocation7_spill] sm:$0xff]  ;;  %v11048_v36 = vld [vmem:[#allocation10_spill] sm:$0xff] }
 0x945   :  { %v4794_v62 = vadd.f32 %v4792_v8, %v4789_v43  ;;  %v11049_v8 = vld [vmem:[#allocation12_spill] sm:$0xff] }
 0x947   :  { %v4795_v22 = vmul.f32 0.0009765625, %v4794_v62 }
 0x949   :  { %4797 = vrot.lane.b32.xlu0 %v4795_v22, %s6913_s23 }
 0x9bb   :  { %v4798_v48 = vpop.permute.xlu0 %4797 }
 0x9bc   :  { %v4800_v9 = vsel %vm675_vm3, %v4795_v22, %v4798_v48  ;;  %v11050_v22 = vld [vmem:[#allocation13_spill] sm:$0xff] }
 0x9bd   :  { %v8849_v52 = vrot.slane %v4800_v9, %v7355_v53  ;;  %v11051_v9 = vld [vmem:[#allocation15_spill] sm:$0xff] }
 0x9bf   :  { %v8853_v50 = vsub.f32 %v8654_v16, %v8849_v52  ;;  %v8857_v0 = vsub.f32 %v8666_v47, %v8849_v52  ;;  %v8861_v56 = vsub.f32 %v8650_v30, %v8849_v52  ;;  %v8865_v3 = vsub.f32 %v8652_v14, %v8849_v52 }
 0x9c0   :  { %v8869_v59 = vsub.f32 %v8656_v7, %v8849_v52  ;;  %v8873_v16 = vsub.f32 %v8658_v37, %v8849_v52  ;;  %v8877_v47 = vsub.f32 %v8660_v35, %v8849_v52  ;;  %v8881_v30 = vsub.f32 %v8668_v45, %v8849_v52 }
 0x9c1   :  { %11026 = vst [vmem:[#allocation33_spill] sm:$0xff] %v8853_v50  ;;  %11027 = vst [vmem:[#allocation34_spill] sm:$0xff] %v8857_v0  ;;  %v8885_v14 = vsub.f32 %v8674_v18, %v8849_v52  ;;  %v8889_v7 = vsub.f32 %v8680_v33, %v8849_v52  ;;  %v8893_v37 = vsub.f32 %v8676_v38, %v8849_v52 }
 0x9c2   :  { %11028 = vst [vmem:[#allocation35_spill] sm:$0xff] %v8861_v56  ;;  %11029 = vst [vmem:[#allocation36_spill] sm:$0xff] %v8865_v3  ;;  %v8897_v35 = vsub.f32 %v8682_v51, %v8849_v52  ;;  %v8901_v45 = vsub.f32 %v8686_v34, %v8849_v52  ;;  %v8905_v18 = vsub.f32 %v8692_v19, %v8849_v52 }
 0x9c3   :  { %11030 = vst [vmem:[#allocation37_spill] sm:$0xff] %v8869_v59  ;;  %11031 = vst [vmem:[#allocation38_spill] sm:$0xff] %v8873_v16  ;;  %v8909_v33 = vsub.f32 %v8688_v12, %v8849_v52  ;;  %v4870_v38 = vmul.f32 %v8853_v50, %v8853_v50  ;;  %v4874_v42 = vmul.f32 %v8857_v0, %v8857_v0 }
 0x9c4   :  { %11032 = vst [vmem:[#allocation39_spill] sm:$0xff] %v8877_v47  ;;  %11033 = vst [vmem:[#allocation40_spill] sm:$0xff] %v8881_v30  ;;  %v8917_v51 = vsub.f32 %v8694_v41, %v8849_v52  ;;  %v8921_v34 = vsub.f32 %v8698_v6, %v8849_v52  ;;  %v8925_v19 = vsub.f32 %v8704_v31, %v8849_v52 }
 0x9c5   :  { %11034 = vst [vmem:[#allocation41_spill] sm:$0xff] %v8885_v14  ;;  %11035 = vst [vmem:[#allocation42_spill] sm:$0xff] %v8889_v7  ;;  %v8929_v12 = vsub.f32 %v8700_v55, %v8849_v52  ;;  %v8933_v44 = vsub.f32 %v8706_v39, %v8849_v52  ;;  %v8937_v41 = vsub.f32 %v8710_v32, %v8849_v52 }
 0x9c6   :  { %11036 = vst [vmem:[#allocation43_spill] sm:$0xff] %v8905_v18  ;;  %11037 = vst [vmem:[#allocation44_spill] sm:$0xff] %v8925_v19  ;;  %v8941_v6 = vsub.f32 %v8716_v23, %v8849_v52  ;;  %v8945_v31 = vsub.f32 %v8712_v13, %v8849_v52  ;;  %v8949_v55 = vsub.f32 %v8718_v1, %v8849_v52 }
 0x9c7   :  { %v8953_v39 = vsub.f32 %v8722_v4, %v8849_v52  ;;  %v8957_v32 = vsub.f32 %v8728_v21, %v8849_v52  ;;  %v8961_v23 = vsub.f32 %v8724_v54, %v8849_v52  ;;  %v8965_v13 = vsub.f32 %v8730_v57, %v8849_v52 }
 0x9c8   :  { %11038 = vst [vmem:[#allocation45_spill] sm:$0xff] %v8941_v6  ;;  %v8969_v1 = vsub.f32 %v8734_v28, %v8849_v52  ;;  %v4878_v4 = vmul.f32 %v8889_v7, %v8889_v7  ;;  %v4954_v5 = vadd.f32 %v4874_v42, %v4870_v38  ;;  %v8975_v21 = vsub.f32 %v8740_v26, %v8849_v52  ;;  %v11052_v42 = vld [vmem:[#allocation14_spill] sm:$0xff]  ;;  %v11064_v7 = vld [vmem:[#allocation24_spill] sm:$0xff] }
 0x9c9   :  { %11039 = vst [vmem:[#allocation46_spill] sm:$0xff] %v8957_v32  ;;  %v8979_v54 = vsub.f32 %v8736_v40, %v8849_v52  ;;  %v8983_v57 = vsub.f32 %v8742_v60, %v8849_v52  ;;  %v8987_v28 = vsub.f32 %v8746_v11, %v8849_v52  ;;  %v8991_v29 = vsub.f32 %v8752_v15, %v8849_v52 }
 0x9ca   :  { %11040 = vst [vmem:[#allocation47_spill] sm:$0xff] %v8975_v21  ;;  %v8995_v26 = vsub.f32 %v8748_v27, %v8849_v52  ;;  %v4882_v40 = vmul.f32 %v8905_v18, %v8905_v18  ;;  %v4955_v24 = vadd.f32 %v4954_v5, %v4878_v4  ;;  %v9001_v60 = vsub.f32 %v8754_v25, %v8849_v52 }
 0x9cb   :  { %11041 = vst [vmem:[#allocation48_spill] sm:$0xff] %v8991_v29  ;;  %v9005_v11 = vsub.f32 %v8758_v20, %v8849_v52  ;;  %v9009_v15 = vsub.f32 %v11042_v17, %v8849_v52  ;;  %v9013_v27 = vsub.f32 %v11044_v58, %v8849_v52  ;;  %v9017_v46 = vsub.f32 %v11045_v61, %v8849_v52  ;;  %v11054_v58 = vld [vmem:[#allocation17_spill] sm:$0xff] }
 0x9cc   :  { %v9021_v25 = vsub.f32 %v11046_v2, %v8849_v52  ;;  %v4886_v20 = vmul.f32 %v8925_v19, %v8925_v19  ;;  %v4956_v10 = vadd.f32 %v4955_v24, %v4882_v40  ;;  %v9027_v63 = vsub.f32 %v11047_v49, %v8849_v52  ;;  %v11053_v24 = vld [vmem:[#allocation16_spill] sm:$0xff]  ;;  %v11055_v2 = vld [vmem:[#allocation19_spill] sm:$0xff]  ;;  %v11062_v19 = vld [vmem:[#allocation22_spill] sm:$0xff] }
 0x9cd   :  { %11043 = vst [vmem:[#allocation7_spill] sm:$0xff] %v9009_v15  ;;  %v9031_v43 = vsub.f32 %v11048_v36, %v8849_v52  ;;  %v9035_v62 = vsub.f32 %v11049_v8, %v8849_v52  ;;  %v9039_v48 = vsub.f32 %v11050_v22, %v8849_v52  ;;  %v9043_v38 = vsub.f32 %v11051_v9, %v8849_v52  ;;  %v11056_v36 = vld [vmem:[#allocation18_spill] sm:$0xff]  ;;  %v11058_v22 = vld [vmem:[#allocation20_spill] sm:$0xff] }
 0x9ce   :  { %v9047_v4 = vsub.f32 %v11052_v42, %v8849_v52  ;;  %v4890_v5 = vmul.f32 %v8941_v6, %v8941_v6  ;;  %v4957_v40 = vadd.f32 %v4956_v10, %v4886_v20  ;;  %v9053_v17 = vsub.f32 %v11053_v24, %v8849_v52  ;;  %v11059_v20 = vld [vmem:[#allocation21_spill] sm:$0xff] }
 0x9cf   :  { %v9057_v61 = vsub.f32 %v11054_v58, %v8849_v52  ;;  %v9061_v49 = vsub.f32 %v11055_v2, %v8849_v52  ;;  %v9065_v8 = vsub.f32 %v11056_v36, %v8849_v52  ;;  %v9069_v9 = vsub.f32 %v11058_v22, %v8849_v52 }
 0x9d0   :  { %v9073_v10 = vsub.f32 %v11059_v20, %v8849_v52  ;;  %v4894_v42 = vmul.f32 %v8957_v32, %v8957_v32  ;;  %v4958_v24 = vadd.f32 %v4957_v40, %v4890_v5  ;;  %v4898_v58 = vmul.f32 %v8975_v21, %v8975_v21  ;;  %v11060_v40 = vld [vmem:[#allocation23_spill] sm:$0xff] }
 0x9d1   :  { %11057 = vst [vmem:[#allocation6_spill] sm:$0xff] %v9065_v8  ;;  %v4869_v2 = vmul.f32 %v8861_v56, %v8861_v56  ;;  %v4871_v36 = vmul.f32 %v8865_v3, %v8865_v3  ;;  %v4873_v22 = vmul.f32 %v8873_v16, %v8873_v16  ;;  %v4872_v20 = vmul.f32 %v8869_v59, %v8869_v59 }
 0x9d2   :  { %v4959_v6 = vadd.f32 %v4958_v24, %v4894_v42  ;;  %v4875_v32 = vmul.f32 %v8877_v47, %v8877_v47  ;;  %v4876_v5 = vmul.f32 %v8881_v30, %v8881_v30  ;;  %v9093_v21 = vsub.f32 %v11060_v40, %v8849_v52  ;;  %v11065_v24 = vld [vmem:[#allocation25_spill] sm:$0xff]  ;;  %v11066_v47 = vld [vmem:[#allocation27_spill] sm:$0xff] }
 0x9d3   :  { %v9097_v18 = vsub.f32 %v11062_v19, %v8849_v52  ;;  %v9101_v42 = vsub.f32 %v11064_v7, %v8849_v52  ;;  %v9105_v0 = vsub.f32 %v11065_v24, %v8849_v52  ;;  %v9109_v16 = vsub.f32 %v11066_v47, %v8849_v52  ;;  %v11068_v30 = vld [vmem:[#allocation31_spill] sm:$0xff] }
 0x9d4   :  { %11061 = vst [vmem:[#allocation8_spill] sm:$0xff] %v9093_v21  ;;  %v9113_v40 = vsub.f32 %v11068_v30, %v8849_v52  ;;  %v4902_v19 = vmul.f32 %v8991_v29, %v8991_v29  ;;  %v4960_v59 = vadd.f32 %v4959_v6, %v4898_v58  ;;  %v4906_v7 = vmul.f32 %v9009_v15, %v9009_v15 }
 0x9d5   :  { %11063 = vst [vmem:[#allocation9_spill] sm:$0xff] %v9097_v18  ;;  %11067 = vst [vmem:[#allocation11_spill] sm:$0xff] %v9109_v16  ;;  %v4877_v3 = vmul.f32 %v8885_v14, %v8885_v14  ;;  %v4879_v24 = vmul.f32 %v8893_v37, %v8893_v37  ;;  %v4933_v50 = vadd.f32 %v4873_v22, %v4869_v2 }
 0x9d6   :  { %11069 = vst [vmem:[#allocation10_spill] sm:$0xff] %v9113_v40  ;;  %v4961_v47 = vadd.f32 %v4960_v59, %v4902_v19  ;;  %v4880_v56 = vmul.f32 %v8897_v35, %v8897_v35  ;;  %v4975_v30 = vadd.f32 %v4875_v32, %v4871_v36  ;;  %v4996_v53 = vadd.f32 %v4876_v5, %v4872_v20 }
 0x9d7   :  { %v4910_v29 = vmul.f32 %v9027_v63, %v9027_v63  ;;  %v4881_v6 = vmul.f32 %v8901_v45, %v8901_v45  ;;  %v4883_v58 = vmul.f32 %v8909_v33, %v8909_v33  ;;  %v4934_v15 = vadd.f32 %v4933_v50, %v4877_v3 }
 0x9d8   :  { %v4962_v14 = vadd.f32 %v4961_v47, %v4906_v7  ;;  %v4884_v2 = vmul.f32 %v8917_v51, %v8917_v51  ;;  %v4997_v59 = vadd.f32 %v4996_v53, %v4880_v56  ;;  %v4976_v22 = vadd.f32 %v4975_v30, %v4879_v24 }
 0x9d9   :  { %v4914_v32 = vmul.f32 %v9043_v38, %v9043_v38  ;;  %v4885_v36 = vmul.f32 %v8921_v34, %v8921_v34  ;;  %v4887_v20 = vmul.f32 %v8929_v12, %v8929_v12  ;;  %v4935_v5 = vadd.f32 %v4934_v15, %v4881_v6 }
 0x9da   :  { %v4963_v19 = vadd.f32 %v4962_v14, %v4910_v29  ;;  %v4888_v50 = vmul.f32 %v8933_v44, %v8933_v44  ;;  %v4998_v3 = vadd.f32 %v4997_v59, %v4884_v2  ;;  %v4977_v7 = vadd.f32 %v4976_v22, %v4883_v58 }
 0x9db   :  { %v4918_v53 = vmul.f32 %v9061_v49, %v9061_v49  ;;  %v4889_v56 = vmul.f32 %v8937_v41, %v8937_v41  ;;  %v4891_v24 = vmul.f32 %v8945_v31, %v8945_v31  ;;  %v4936_v47 = vadd.f32 %v4935_v5, %v4885_v36 }
 0x9dc   :  { %v4964_v30 = vadd.f32 %v4963_v19, %v4914_v32  ;;  %v4892_v15 = vmul.f32 %v8949_v55, %v8949_v55  ;;  %v4999_v14 = vadd.f32 %v4998_v3, %v4888_v50  ;;  %v4978_v29 = vadd.f32 %v4977_v7, %v4887_v20 }
 0x9dd   :  { %v4922_v6 = vmul.f32 %v9093_v21, %v9093_v21  ;;  %v4893_v58 = vmul.f32 %v8953_v39, %v8953_v39  ;;  %v4895_v2 = vmul.f32 %v8961_v23, %v8961_v23  ;;  %v4937_v59 = vadd.f32 %v4936_v47, %v4889_v56 }
 0x9de   :  { %v4965_v22 = vadd.f32 %v4964_v30, %v4918_v53  ;;  %v4896_v36 = vmul.f32 %v8965_v13, %v8965_v13  ;;  %v5000_v32 = vadd.f32 %v4999_v14, %v4892_v15  ;;  %v4979_v5 = vadd.f32 %v4978_v29, %v4891_v24 }
 0x9df   :  { %v4926_v19 = vmul.f32 %v9109_v16, %v9109_v16  ;;  %v4897_v20 = vmul.f32 %v8969_v1, %v8969_v1  ;;  %v4899_v50 = vmul.f32 %v8979_v54, %v8979_v54  ;;  %v4938_v3 = vadd.f32 %v4937_v59, %v4893_v58 }
 0x9e0   :  { %v4966_v7 = vadd.f32 %v4965_v22, %v4922_v6  ;;  %v4900_v56 = vmul.f32 %v8983_v57, %v8983_v57  ;;  %v5001_v53 = vadd.f32 %v5000_v32, %v4896_v36  ;;  %v4980_v47 = vadd.f32 %v4979_v5, %v4895_v2  ;;  %v11070_v22 = vld [vmem:[#allocation26_spill] sm:$0xff] }
 0x9e1   :  { %v4930_v30 = vmul.f32 %v9113_v40, %v9113_v40  ;;  %v4901_v24 = vmul.f32 %v8987_v28, %v8987_v28  ;;  %v4903_v15 = vmul.f32 %v8995_v26, %v8995_v26  ;;  %v4939_v14 = vadd.f32 %v4938_v3, %v4897_v20 }
 0x9e2   :  { %v4967_v29 = vadd.f32 %v4966_v7, %v4926_v19  ;;  %v4904_v58 = vmul.f32 %v9001_v60, %v9001_v60  ;;  %v5002_v6 = vadd.f32 %v5001_v53, %v4900_v56  ;;  %v4981_v59 = vadd.f32 %v4980_v47, %v4899_v50  ;;  %v11072_v7 = vld [vmem:[#allocation28_spill] sm:$0xff] }
 0x9e3   :  { %v9175_v36 = vsub.f32 %v11070_v22, %v8849_v52  ;;  %v4905_v2 = vmul.f32 %v9005_v11, %v9005_v11  ;;  %v4907_v32 = vmul.f32 %v9013_v27, %v9013_v27  ;;  %v4940_v5 = vadd.f32 %v4939_v14, %v4901_v24 }
 0x9e4   :  { %v4968_v40 = vadd.f32 %v4967_v29, %v4930_v30  ;;  %v4908_v19 = vmul.f32 %v9017_v46, %v9017_v46  ;;  %v5003_v20 = vadd.f32 %v5002_v6, %v4904_v58  ;;  %v4982_v3 = vadd.f32 %v4981_v59, %v4903_v15  ;;  %v11074_v29 = vld [vmem:[#allocation29_spill] sm:$0xff] }
 0x9e5   :  { %11071 = vst [vmem:[#allocation12_spill] sm:$0xff] %v9175_v36  ;;  %v9185_v50 = vsub.f32 %v11072_v7, %v8849_v52  ;;  %v4909_v56 = vmul.f32 %v9021_v25, %v9021_v25  ;;  %v4911_v53 = vmul.f32 %v9031_v43, %v9031_v43  ;;  %v4941_v47 = vadd.f32 %v4940_v5, %v4905_v2 }
 0x9e6   :  { %v4969_v22 = vrot.slane %v4968_v40, 4  ;;  %v4912_v30 = vmul.f32 %v9035_v62, %v9035_v62  ;;  %v5004_v24 = vadd.f32 %v5003_v20, %v4908_v19  ;;  %v4983_v14 = vadd.f32 %v4982_v3, %v4907_v32  ;;  %v11076_v19 = vld [vmem:[#allocation30_spill] sm:$0xff] }
 0x9e7   :  { %11073 = vst [vmem:[#allocation13_spill] sm:$0xff] %v9185_v50  ;;  %v9195_v15 = vsub.f32 %v11074_v29, %v8849_v52  ;;  %v4913_v58 = vmul.f32 %v9039_v48, %v9039_v48  ;;  %v4915_v6 = vmul.f32 %v9047_v4, %v9047_v4  ;;  %v4942_v59 = vadd.f32 %v4941_v47, %v4909_v56 }
 0x9e8   :  { %v4970_v7 = vadd.f32 %v4969_v22, %v4968_v40  ;;  %v4916_v2 = vmul.f32 %v9053_v17, %v9053_v17  ;;  %v5005_v5 = vadd.f32 %v5004_v24, %v4912_v30  ;;  %v4984_v16 = vadd.f32 %v4983_v14, %v4911_v53  ;;  %v11078_v22 = vld [vmem:[#allocation32_spill] sm:$0xff] }
 0x9e9   :  { %11075 = vst [vmem:[#allocation15_spill] sm:$0xff] %v9195_v15  ;;  %v9205_v32 = vsub.f32 %v11076_v19, %v8849_v52  ;;  %v4917_v20 = vmul.f32 %v9057_v61, %v9057_v61  ;;  %v4919_v3 = vmul.f32 %v9065_v8, %v9065_v8  ;;  %v4943_v29 = vadd.f32 %v4942_v59, %v4913_v58 }
 0x9ea   :  { %v4971_v21 = vrot.slane %v4970_v7, 2  ;;  %v4920_v40 = vmul.f32 %v9069_v9, %v9069_v9  ;;  %v5006_v56 = vadd.f32 %v5005_v5, %v4916_v2  ;;  %v4985_v47 = vadd.f32 %v4984_v16, %v4915_v6 }
 0x9eb   :  { %11077 = vst [vmem:[#allocation14_spill] sm:$0xff] %v9205_v32  ;;  %v9215_v53 = vsub.f32 %v11078_v22, %v8849_v52  ;;  %v4921_v30 = vmul.f32 %v9073_v10, %v9073_v10  ;;  %v4923_v24 = vmul.f32 %v9097_v18, %v9097_v18  ;;  %v4944_v14 = vadd.f32 %v4943_v29, %v4917_v20 }
 0x9ec   :  { %v4972_v19 = vadd.f32 %v4971_v21, %v4970_v7  ;;  %v4924_v58 = vmul.f32 %v9101_v42, %v9101_v42  ;;  %v5007_v59 = vadd.f32 %v5006_v56, %v4920_v40  ;;  %v4986_v8 = vadd.f32 %v4985_v47, %v4919_v3 }
 0x9ed   :  { %11079 = vst [vmem:[#allocation16_spill] sm:$0xff] %v9215_v53  ;;  %v4925_v16 = vmul.f32 %v9105_v0, %v9105_v0  ;;  %v4927_v52 = vmul.f32 %v9175_v36, %v9175_v36  ;;  %v4945_v6 = vadd.f32 %v4944_v14, %v4921_v30  ;;  %v4928_v5 = vmul.f32 %v9185_v50, %v9185_v50 }
 0x9ee   :  { %v4973_v2 = vrot.slane %v4972_v19, 1  ;;  %v5008_v22 = vadd.f32 %v5007_v59, %v4924_v58  ;;  %v4987_v18 = vadd.f32 %v4986_v8, %v4923_v24  ;;  %v4929_v21 = vmul.f32 %v9195_v15, %v9195_v15 }
 0x9ef   :  { %v4931_v7 = vmul.f32 %v9205_v32, %v9205_v32  ;;  %v4946_v20 = vadd.f32 %v4945_v6, %v4925_v16  ;;  %v4932_v29 = vmul.f32 %v9215_v53, %v9215_v53 }
 0x9f0   :  { %v4974_v3 = vadd.f32 %v4973_v2, %v4972_v19  ;;  %v5009_v40 = vadd.f32 %v5008_v22, %v4928_v5  ;;  %v4988_v56 = vadd.f32 %v4987_v18, %v4927_v52 }
 0x9f1   :  { %v4947_v47 = vadd.f32 %v4946_v20, %v4929_v21 }
 0x9f2   :  { %5024 = vrot.lane.b32.xlu0 %v4974_v3, %s6913_s23  ;;  %v5010_v30 = vadd.f32 %v5009_v40, %v4932_v29  ;;  %v4989_v14 = vadd.f32 %v4988_v56, %v4931_v7 }
 0x9f3   :  { %v4948_v58 = vrot.slane %v4947_v47, 4 }
 0x9f4   :  { %v5011_v8 = vrot.slane %v5010_v30, 4  ;;  %v4990_v24 = vrot.slane %v4989_v14, 4 }
 0x9f5   :  { %v4949_v59 = vadd.f32 %v4948_v58, %v4947_v47 }
 0x9f6   :  { %v5012_v15 = vadd.f32 %v5011_v8, %v5010_v30  ;;  %v4991_v50 = vadd.f32 %v4990_v24, %v4989_v14  ;;  %v6919_v8 = vmov 0.0|0.0   ;;  %v5420_v24 = vld [vmem:[%s10893_s10 + $0x8] sm:$0xff] }
 0x9f7   :  { %v4950_v36 = vrot.slane %v4949_v59, 2  ;;  %6702 = vmatprep.subr.bf16.mxu1 %v6919_v8 }
 0x9f8   :  { %v5013_v32 = vrot.slane %v5012_v15, 2  ;;  %v4992_v16 = vrot.slane %v4991_v50, 2 }
 0x9f9   :  { %v4951_v19 = vadd.f32 %v4950_v36, %v4949_v59  ;;  %v5421_v59 = vld [vmem:[%s10893_s10 + $0x10] sm:$0xff] }
 0x9fa   :  { %v5014_v6 = vadd.f32 %v5013_v32, %v5012_v15  ;;  %v4993_v2 = vadd.f32 %v4992_v16, %v4991_v50 }
 0x9fb   :  { %v4952_v53 = vrot.slane %v4951_v19, 1 }
 0x9fc   :  { %v5015_v5 = vrot.slane %v5014_v6, 1  ;;  %v4994_v52 = vrot.slane %v4993_v2, 1 }
 0x9fd   :  { %v4953_v18 = vadd.f32 %v4952_v53, %v4951_v19  ;;  %v5422_v19 = vld [vmem:[%s10893_s10 + $0x18] sm:$0xff] }
 0x9fe   :  { %v5016_v22 = vadd.f32 %v5015_v5, %v5014_v6  ;;  %v4995_v21 = vadd.f32 %v4994_v52, %v4993_v2  ;;  %v6706_v6 = vpack.c.bf16 %v5422_v19, %v5421_v59  ;;  %v5423_v2 = vld [vmem:[%s10893_s10 + $0x20] sm:$0xff]  ;;  %v5424_v5 = vld [vmem:[%s10893_s10 + $0x28] sm:$0xff] }
 0x9ff   :  { %5018 = vrot.lane.b32.xlu1 %v4953_v18, %s6913_s23  ;;  %v11087_v59 = vld [vmem:[#allocation33_spill] sm:$0xff]  ;;  %v11088_v19 = vld [vmem:[#allocation36_spill] sm:$0xff] }
 0xa00   :  { %5036 = vrot.lane.b32.xlu0 %v5016_v22, %s6913_s23 }
 0xa03   :  { %5030 = vrot.lane.b32.xlu1 %v4995_v21, %s6913_s23 }
 0xa64   :  { %v5025_v40 = vpop.permute.xlu0 %5024 }
 0xa71   :  { %v5019_v7 = vpop.permute.xlu1 %5018 }
 0xa72   :  { %v5021_v20 = vadd.f32 %v5019_v7, %v4953_v18  ;;  %v5037_v47 = vpop.permute.xlu0 %5036  ;;  %v6709_v18 = vpack.c.bf16 %v5424_v5, %v5423_v2  ;;  %v11080_v7 = vld [vmem:[#allocation4_spill] sm:$0xff]  ;;  %v11089_v2 = vld [vmem:[#allocation37_spill] sm:$0xff] }
 0xa74   :  { %v5022_v29 = vadd.f32 %v5021_v20, %v4974_v3  ;;  %v5419_v3 = vld [vmem:[%s10893_s10] sm:$0xff]  ;;  %v5127_v20 = vsub.s32 2, %v11080_v7 }
 0xa75   :  { %v5031_v15 = vpop.permute.xlu1 %5030  ;;  %v6703_v16 = vpack.c.bf16 %v5420_v24, %v5419_v3  ;;  %v11086_v3 = vld [vmem:[#allocation35_spill] sm:$0xff] }
 0xa76   :  { %v5027_v56 = vadd.f32 %v5025_v40, %v5022_v29  ;;  %v9266_v29 = vsub.s32 1, %v11080_v7 }
 0xa77   :  { %6704 = vmatpush3.bf16.msra.mxu1 %v6703_v16 }
 0xa78   :  { %v5028_v36 = vadd.f32 %v5027_v56, %v4995_v21  ;;  %6705 = vmatprep.subr.bf16.mxu1 %v6919_v8  ;;  %v4687_v21 = vld [vmem:[%s10895_s9] sm:$0xf]  ;;  %11081 = vst [vmem:[#allocation17_spill] sm:$0xff] %v9266_v29  ;;  %v5131_v56 = vsub.s32 3, %v11080_v7  ;;  %v11092_v7 = vld [vmem:[#allocation39_spill] sm:$0xff] }
 0xa7a   :  { %v5033_v50 = vadd.f32 %v5031_v15, %v5028_v36  ;;  %v11082_v36 = vld [vmem:[#allocation5_spill] sm:$0xff] }
 0xa7b   :  { %6707 = vmatpush3.bf16.msra.mxu1 %v6706_v6 }
 0xa7c   :  { %v5034_v32 = vadd.f32 %v5033_v50, %v5016_v22  ;;  %6708 = vmatprep.subr.bf16.mxu1 %v6919_v8  ;;  %v4686_v22 = vld [vmem:[%s10894_s8] sm:$0xf] }
 0xa7d   :  { %v9274_v50 = vrot.slane %v4686_v22, %v11082_v36 }
 0xa7e   :  { %v5039_v53 = vadd.f32 %v5037_v47, %v5034_v32  ;;  %v9277_v32 = vrot.slane %v4687_v21, %v11082_v36  ;;  %v9279_v47 = vrot.slane %v4686_v22, %v5127_v20 }
 0xa7f   :  { %6710 = vmatpush3.bf16.msra.mxu1 %v6709_v18  ;;  %v11090_v18 = vld [vmem:[#allocation38_spill] sm:$0xff] }
 0xa80   :  { %v5040_v30 = vmul.f32 0.0009765625, %v5039_v53  ;;  %6711 = vmatprep.subr.bf16.mxu1 %v6919_v8  ;;  %11083 = vst [vmem:[#allocation19_spill] sm:$0xff] %v9277_v32  ;;  %v9281_v53 = vrot.slane %v4687_v21, %v5127_v20  ;;  %v9291_v8 = vrot.slane %v4687_v21, %v5131_v56 }
 0xa82   :  { %v5041_v14 = vadd.f32 1e-05, %v5040_v30  ;;  %11084 = vst [vmem:[#allocation18_spill] sm:$0xff] %v9281_v53  ;;  %v9284_v30 = vrot.slane %v4686_v22, %v9266_v29  ;;  %11085 = vst [vmem:[#allocation20_spill] sm:$0xff] %v9291_v8 }
 0xa84   :  { %6905 = vrsqrt.f32 %v5041_v14  ;;  %v9287_v14 = vrot.slane %v4687_v21, %v9266_v29 }
 0xa8e   :  { %v6906_v58 = vpop.eup %6905 }
 0xa8f   :  { %5044 = vrot.lane.b32.xlu1 %v6906_v58, %s6913_s23 }
 0xb01   :  { %v5045_v52 = vpop.permute.xlu1 %5044 }
 0xb02   :  { %v5047_v40 = vsel %vm675_vm3, %v6906_v58, %v5045_v52  ;;  %v9289_v58 = vrot.slane %v4686_v22, %v5131_v56  ;;  %v11091_v22 = vld [vmem:[#allocation34_spill] sm:$0xff] }
 0xb03   :  { %v9271_v15 = vrot.slane %v5047_v40, %v11082_v36  ;;  %v11093_v40 = vld [vmem:[#allocation40_spill] sm:$0xff] }
 0xb05   :  { %v9295_v24 = vmul.f32 %v9271_v15, %v11086_v3  ;;  %v5053_v16 = vmul.f32 %v9271_v15, %v11087_v59  ;;  %v9301_v6 = vmul.f32 %v9271_v15, %v11088_v19  ;;  %v9305_v5 = vmul.f32 %v9271_v15, %v11089_v2  ;;  %v11094_v3 = vld [vmem:[#allocation41_spill] sm:$0xff]  ;;  %v11095_v19 = vld [vmem:[#allocation42_spill] sm:$0xff] }
 0xb06   :  { %v9309_v52 = vmul.f32 %v9271_v15, %v11090_v18  ;;  %v5057_v21 = vmul.f32 %v9271_v15, %v11091_v22  ;;  %v9315_v20 = vmul.f32 %v9271_v15, %v11092_v7  ;;  %v9319_v56 = vmul.f32 %v9271_v15, %v11093_v40  ;;  %v11096_v40 = vld [vmem:[#allocation43_spill] sm:$0xff] }
 0xb07   :  { %v9323_v59 = vmul.f32 %v9271_v15, %v11094_v3  ;;  %v5061_v2 = vmul.f32 %v9271_v15, %v11095_v19  ;;  %v9329_v18 = vmul.f32 %v9271_v15, %v8893_v37  ;;  %v9333_v22 = vmul.f32 %v9271_v15, %v8897_v35  ;;  %v11097_v35 = vld [vmem:[#allocation44_spill] sm:$0xff] }
 0xb08   :  { %v9337_v7 = vmul.f32 %v9271_v15, %v8901_v45  ;;  %v5065_v29 = vmul.f32 %v9271_v15, %v11096_v40  ;;  %v9343_v3 = vmul.f32 %v9271_v15, %v8909_v33  ;;  %v9347_v19 = vmul.f32 %v9271_v15, %v8917_v51  ;;  %v11098_v51 = vld [vmem:[#allocation45_spill] sm:$0xff] }
 0xb09   :  { %v9351_v37 = vmul.f32 %v9271_v15, %v8921_v34  ;;  %v5069_v36 = vmul.f32 %v9271_v15, %v11097_v35  ;;  %v9357_v45 = vmul.f32 %v9271_v15, %v8929_v12  ;;  %v9361_v40 = vmul.f32 %v9271_v15, %v8933_v44  ;;  %v11099_v44 = vld [vmem:[#allocation46_spill] sm:$0xff] }
 0xb0a   :  { %v9365_v33 = vmul.f32 %v9271_v15, %v8937_v41  ;;  %v5073_v8 = vmul.f32 %v9271_v15, %v11098_v51  ;;  %v9371_v34 = vmul.f32 %v9271_v15, %v8945_v31  ;;  %v9375_v35 = vmul.f32 %v9271_v15, %v8949_v55  ;;  %v11101_v55 = vld [vmem:[#allocation47_spill] sm:$0xff] }
 0xb0b   :  { %v9379_v12 = vmul.f32 %v9271_v15, %v8953_v39  ;;  %v5077_v53 = vmul.f32 %v9271_v15, %v11099_v44  ;;  %v9385_v41 = vmul.f32 %v9271_v15, %v8961_v23  ;;  %v9389_v51 = vmul.f32 %v9271_v15, %v8965_v13  ;;  %v11103_v13 = vld [vmem:[#allocation48_spill] sm:$0xff] }
 0xb0c   :  { %v9393_v31 = vmul.f32 %v9271_v15, %v8969_v1  ;;  %v5081_v32 = vmul.f32 %v9271_v15, %v11101_v55  ;;  %v9399_v39 = vmul.f32 %v9271_v15, %v8979_v54  ;;  %v9403_v44 = vmul.f32 %v9271_v15, %v8983_v57  ;;  %v11104_v57 = vld [vmem:[#allocation7_spill] sm:$0xff] }
 0xb0d   :  { %11100 = vst [vmem:[#allocation21_spill] sm:$0xff] %v9389_v51  ;;  %v9407_v23 = vmul.f32 %v9271_v15, %v8987_v28  ;;  %v5085_v51 = vmul.f32 %v9271_v15, %v11103_v13  ;;  %v9413_v1 = vmul.f32 %v9271_v15, %v8995_v26  ;;  %v9417_v55 = vmul.f32 %v9271_v15, %v9001_v60 }
 0xb0e   :  { %11102 = vst [vmem:[#allocation23_spill] sm:$0xff] %v9403_v44  ;;  %v9421_v54 = vmul.f32 %v9271_v15, %v9005_v11  ;;  %v5089_v44 = vmul.f32 %v9271_v15, %v11104_v57  ;;  %v9427_v28 = vmul.f32 %v9271_v15, %v9013_v27  ;;  %v9431_v13 = vmul.f32 %v9271_v15, %v9017_v46 }
 0xb0f   :  { %v9435_v26 = vmul.f32 %v9271_v15, %v9021_v25  ;;  %v5093_v60 = vmul.f32 %v9271_v15, %v9027_v63  ;;  %v9441_v11 = vmul.f32 %v9271_v15, %v9031_v43  ;;  %v9445_v57 = vmul.f32 %v9271_v15, %v9035_v62 }
 0xb10   :  { %v9449_v27 = vmul.f32 %v9271_v15, %v9039_v48  ;;  %v5097_v46 = vmul.f32 %v9271_v15, %v9043_v38  ;;  %v9455_v25 = vmul.f32 %v9271_v15, %v9047_v4  ;;  %v9459_v63 = vmul.f32 %v9271_v15, %v9053_v17  ;;  %v11109_v48 = vld [vmem:[#allocation6_spill] sm:$0xff]  ;;  %v11113_v17 = vld [vmem:[#allocation8_spill] sm:$0xff] }
 0xb11   :  { %v9463_v43 = vmul.f32 %v9271_v15, %v9057_v61  ;;  %v5101_v62 = vmul.f32 %v9271_v15, %v9061_v49  ;;  %v9473_v38 = vmul.f32 %v9271_v15, %v9069_v9  ;;  %v9477_v4 = vmul.f32 %v9271_v15, %v9073_v10  ;;  %v11114_v61 = vld [vmem:[#allocation9_spill] sm:$0xff]  ;;  %v11118_v10 = vld [vmem:[#allocation11_spill] sm:$0xff] }
 0xb12   :  { %11105 = vst [vmem:[#allocation22_spill] sm:$0xff] %v9449_v27  ;;  %11106 = vst [vmem:[#allocation24_spill] sm:$0xff] %v9455_v25  ;;  %v9469_v27 = vmul.f32 %v9271_v15, %v11109_v48  ;;  %v9487_v49 = vmul.f32 %v9271_v15, %v9101_v42  ;;  %v5138_v48 = vmul.f32 %v9284_v30, %v5053_v16  ;;  %v11122_v42 = vld [vmem:[#allocation15_spill] sm:$0xff] }
 0xb13   :  { %11107 = vst [vmem:[#allocation25_spill] sm:$0xff] %v9459_v63  ;;  %11108 = vst [vmem:[#allocation27_spill] sm:$0xff] %v9463_v43  ;;  %v5105_v63 = vmul.f32 %v9271_v15, %v11113_v17  ;;  %v9483_v43 = vmul.f32 %v9271_v15, %v11114_v61  ;;  %v5142_v9 = vmul.f32 %v9284_v30, %v5057_v21  ;;  %v11119_v17 = vld [vmem:[#allocation12_spill] sm:$0xff]  ;;  %v11121_v61 = vld [vmem:[#allocation13_spill] sm:$0xff] }
 0xb14   :  { %11110 = vst [vmem:[#allocation31_spill] sm:$0xff] %v9469_v27  ;;  %11111 = vst [vmem:[#allocation26_spill] sm:$0xff] %v9473_v38  ;;  %v9493_v38 = vmul.f32 %v9271_v15, %v9105_v0  ;;  %v9499_v27 = vmul.f32 %v9271_v15, %v11119_v17  ;;  %v9507_v16 = vmul.f32 %v9271_v15, %v11122_v42  ;;  %v11124_v21 = vld [vmem:[#allocation10_spill] sm:$0xff]  ;;  %v11127_v17 = vld [vmem:[#allocation16_spill] sm:$0xff] }
 0xb15   :  { %11112 = vst [vmem:[#allocation28_spill] sm:$0xff] %v9477_v4  ;;  %11115 = vst [vmem:[#allocation29_spill] sm:$0xff] %v9483_v43  ;;  %v5109_v4 = vmul.f32 %v9271_v15, %v11118_v10  ;;  %v9503_v43 = vmul.f32 %v9271_v15, %v11121_v61  ;;  %v5170_v0 = vmul.f32 %v9284_v30, %v5085_v51  ;;  %v11125_v10 = vld [vmem:[#allocation14_spill] sm:$0xff] }
 0xb16   :  { %11116 = vst [vmem:[#allocation30_spill] sm:$0xff] %v9487_v49  ;;  %11117 = vst [vmem:[#allocation32_spill] sm:$0xff] %v9493_v38  ;;  %v5113_v49 = vmul.f32 %v9271_v15, %v11124_v21  ;;  %v5174_v38 = vmul.f32 %v9284_v30, %v5089_v44  ;;  %v9515_v25 = vmul.f32 %v9271_v15, %v11125_v10 }
 0xb17   :  { %11120 = vst [vmem:[#allocation4_spill] sm:$0xff] %v9499_v27  ;;  %11123 = vst [vmem:[#allocation35_spill] sm:$0xff] %v9507_v16  ;;  %v9519_v27 = vmul.f32 %v9271_v15, %v11127_v17  ;;  %v5146_v61 = vmul.f32 %v9284_v30, %v5061_v2  ;;  %v5150_v42 = vmul.f32 %v9284_v30, %v5065_v29 }
 0xb18   :  { %11126 = vst [vmem:[#allocation33_spill] sm:$0xff] %v9515_v25  ;;  %v5154_v16 = vmul.f32 %v9284_v30, %v5069_v36  ;;  %v5178_v21 = vmul.f32 %v9284_v30, %v5093_v60  ;;  %v9526_v51 = vadd.f32 %v9287_v14, %v5138_v48  ;;  %v9529_v44 = vadd.f32 %v9287_v14, %v5142_v9 }
 0xb19   :  { %v5158_v10 = vmul.f32 %v9284_v30, %v5073_v8  ;;  %v5162_v25 = vmul.f32 %v9284_v30, %v5077_v53  ;;  %v5166_v15 = vmul.f32 %v9284_v30, %v5081_v32  ;;  %v5182_v2 = vmul.f32 %v9284_v30, %v5097_v46 }
 0xb1a   :  { %11128 = vst [vmem:[#allocation36_spill] sm:$0xff] %v9526_v51  ;;  %11129 = vst [vmem:[#allocation37_spill] sm:$0xff] %v9529_v44  ;;  %v5186_v29 = vmul.f32 %v9284_v30, %v5101_v62  ;;  %v5190_v36 = vmul.f32 %v9284_v30, %v5105_v63  ;;  %v9538_v60 = vadd.f32 %v9287_v14, %v5170_v0 }
 0xb1b   :  { %v9541_v48 = vadd.f32 %v9287_v14, %v5174_v38  ;;  %v5194_v9 = vmul.f32 %v9284_v30, %v5109_v4  ;;  %v5198_v8 = vmul.f32 %v9284_v30, %v5113_v49  ;;  %v9546_v53 = vadd.f32 %v9287_v14, %v5146_v61 }
 0xb1c   :  { %11130 = vst [vmem:[#allocation38_spill] sm:$0xff] %v9538_v60  ;;  %v9549_v32 = vadd.f32 %v9287_v14, %v5150_v42  ;;  %v9552_v46 = vadd.f32 %v9287_v14, %v5154_v16  ;;  %v9555_v63 = vadd.f32 %v9287_v14, %v5178_v21  ;;  %v5299_v62 = vadd.f32 %v9529_v44, %v9526_v51 }
 0xb1d   :  { %11131 = vst [vmem:[#allocation34_spill] sm:$0xff] %v9541_v48  ;;  %11132 = vst [vmem:[#allocation39_spill] sm:$0xff] %v9546_v53  ;;  %v5351_v38 = vadd.f32 %v9541_v48, %v9538_v60  ;;  %v9562_v30 = vadd.f32 %v9287_v14, %v5158_v10  ;;  %v9565_v4 = vadd.f32 %v9287_v14, %v5162_v25  ;;  %v11151_v48 = vld [vmem:[#allocation26_spill] sm:$0xff]  ;;  %v11152_v60 = vld [vmem:[#allocation28_spill] sm:$0xff] }
 0xb1e   :  { %11133 = vst [vmem:[#allocation40_spill] sm:$0xff] %v9549_v32  ;;  %11134 = vst [vmem:[#allocation41_spill] sm:$0xff] %v9552_v46  ;;  %v9568_v49 = vadd.f32 %v9287_v14, %v5166_v15  ;;  %v9571_v16 = vadd.f32 %v9287_v14, %v5182_v2  ;;  %v9574_v0 = vadd.f32 %v9287_v14, %v5186_v29 }
 0xb1f   :  { %11135 = vst [vmem:[#allocation42_spill] sm:$0xff] %v9555_v63  ;;  %11136 = vst [vmem:[#allocation43_spill] sm:$0xff] %v9562_v30  ;;  %v9577_v17 = vadd.f32 %v9287_v14, %v5190_v36  ;;  %v5300_v61 = vadd.f32 %v5299_v62, %v9546_v53  ;;  %v5352_v42 = vadd.f32 %v5351_v38, %v9555_v63 }
 0xb20   :  { %11137 = vst [vmem:[#allocation44_spill] sm:$0xff] %v9565_v4  ;;  %11138 = vst [vmem:[#allocation45_spill] sm:$0xff] %v9568_v49  ;;  %v9582_v21 = vadd.f32 %v9287_v14, %v5194_v9  ;;  %v9585_v25 = vadd.f32 %v9287_v14, %v5198_v8  ;;  %v5137_v10 = vmul.f32 %v9274_v50, %v9295_v24 }
 0xb21   :  { %11139 = vst [vmem:[#allocation46_spill] sm:$0xff] %v9571_v16  ;;  %11140 = vst [vmem:[#allocation47_spill] sm:$0xff] %v9574_v0  ;;  %v9591_v15 = vmul.f32 %v9279_v47, %v9301_v6  ;;  %v5301_v2 = vadd.f32 %v5300_v61, %v9549_v32  ;;  %v5353_v29 = vadd.f32 %v5352_v42, %v9571_v16 }
 0xb22   :  { %11141 = vst [vmem:[#allocation48_spill] sm:$0xff] %v9577_v17  ;;  %11142 = vst [vmem:[#allocation7_spill] sm:$0xff] %v9582_v21  ;;  %v9597_v36 = vmul.f32 %v9289_v58, %v9305_v5  ;;  %v5141_v9 = vmul.f32 %v9274_v50, %v9309_v52  ;;  %v9603_v14 = vmul.f32 %v9279_v47, %v9315_v20 }
 0xb23   :  { %11143 = vst [vmem:[#allocation6_spill] sm:$0xff] %v9585_v25  ;;  %v9607_v24 = vmul.f32 %v9289_v58, %v9319_v56  ;;  %v5145_v6 = vmul.f32 %v9274_v50, %v9323_v59  ;;  %v9613_v8 = vmul.f32 %v9279_v47, %v9329_v18  ;;  %v5302_v5 = vadd.f32 %v5301_v2, %v9552_v46 }
 0xb24   :  { %v5354_v62 = vadd.f32 %v5353_v29, %v9574_v0  ;;  %v9619_v52 = vmul.f32 %v9289_v58, %v9333_v22  ;;  %v9623_v20 = vmul.f32 %v9274_v50, %v9337_v7  ;;  %v9627_v56 = vmul.f32 %v9279_v47, %v9343_v3  ;;  %v11150_v0 = vld [vmem:[#allocation31_spill] sm:$0xff] }
 0xb25   :  { %v9631_v59 = vmul.f32 %v9289_v58, %v9347_v19  ;;  %v5153_v18 = vmul.f32 %v9274_v50, %v9351_v37  ;;  %v9637_v38 = vmul.f32 %v9279_v47, %v9357_v45  ;;  %v5303_v22 = vadd.f32 %v5302_v5, %v9562_v30  ;;  %v11155_v30 = vld [vmem:[#allocation19_spill] sm:$0xff] }
 0xb26   :  { %v5355_v7 = vadd.f32 %v5354_v62, %v9577_v17  ;;  %v9643_v61 = vmul.f32 %v9289_v58, %v9361_v40  ;;  %v5157_v3 = vmul.f32 %v9274_v50, %v9365_v33  ;;  %v9649_v19 = vmul.f32 %v9279_v47, %v9371_v34  ;;  %v11144_v33 = vld [vmem:[#allocation21_spill] sm:$0xff]  ;;  %v11149_v17 = vld [vmem:[#allocation27_spill] sm:$0xff] }
 0xb27   :  { %v9653_v37 = vmul.f32 %v9289_v58, %v9375_v35  ;;  %v5161_v45 = vmul.f32 %v9274_v50, %v9379_v12  ;;  %v9659_v42 = vmul.f32 %v9279_v47, %v9385_v41  ;;  %v5304_v40 = vadd.f32 %v5303_v22, %v9565_v4  ;;  %v11145_v12 = vld [vmem:[#allocation23_spill] sm:$0xff]  ;;  %v11154_v4 = vld [vmem:[#allocation30_spill] sm:$0xff] }
 0xb28   :  { %v5356_v2 = vadd.f32 %v5355_v7, %v9582_v21  ;;  %v9665_v29 = vmul.f32 %v9289_v58, %v11144_v33  ;;  %v5165_v34 = vmul.f32 %v9274_v50, %v9393_v31  ;;  %v9671_v35 = vmul.f32 %v9279_v47, %v9399_v39  ;;  %v11148_v21 = vld [vmem:[#allocation25_spill] sm:$0xff] }
 0xb29   :  { %v9675_v5 = vmul.f32 %v9289_v58, %v11145_v12  ;;  %v5169_v41 = vmul.f32 %v9274_v50, %v9407_v23  ;;  %v9681_v62 = vmul.f32 %v9279_v47, %v9413_v1  ;;  %v5305_v22 = vadd.f32 %v5304_v40, %v9568_v49  ;;  %v11146_v12 = vld [vmem:[#allocation22_spill] sm:$0xff]  ;;  %v11153_v49 = vld [vmem:[#allocation29_spill] sm:$0xff] }
 0xb2a   :  { %v5357_v7 = vadd.f32 %v5356_v2, %v9585_v25  ;;  %v9687_v31 = vmul.f32 %v9289_v58, %v9417_v55  ;;  %v5173_v39 = vmul.f32 %v9274_v50, %v9421_v54  ;;  %v9693_v33 = vmul.f32 %v9279_v47, %v9427_v28  ;;  %v11147_v25 = vld [vmem:[#allocation24_spill] sm:$0xff] }
 0xb2b   :  { %v9697_v23 = vmul.f32 %v9289_v58, %v9431_v13  ;;  %v5177_v1 = vmul.f32 %v9274_v50, %v9435_v26  ;;  %v9703_v40 = vmul.f32 %v9279_v47, %v9441_v11  ;;  %v5306_v55 = vrot.slane %v5305_v22, 4 }
 0xb2c   :  { %v5358_v2 = vrot.slane %v5357_v7, 4  ;;  %v9707_v54 = vmul.f32 %v9289_v58, %v9445_v57  ;;  %v5181_v28 = vmul.f32 %v9274_v50, %v11146_v12  ;;  %v9713_v13 = vmul.f32 %v9279_v47, %v11147_v25 }
 0xb2d   :  { %v9717_v26 = vmul.f32 %v9289_v58, %v11148_v21  ;;  %v5185_v11 = vmul.f32 %v9274_v50, %v11149_v17  ;;  %v9723_v16 = vmul.f32 %v9279_v47, %v11150_v0  ;;  %v5307_v57 = vadd.f32 %v5306_v55, %v5305_v22  ;;  %v11156_v55 = vld [vmem:[#allocation32_spill] sm:$0xff] }
 0xb2e   :  { %v5359_v63 = vadd.f32 %v5358_v2, %v5357_v7  ;;  %v9727_v12 = vmul.f32 %v9289_v58, %v11151_v48  ;;  %v5189_v25 = vmul.f32 %v9274_v50, %v11152_v60  ;;  %v9733_v21 = vmul.f32 %v9279_v47, %v11153_v49  ;;  %v11157_v60 = vld [vmem:[#allocation4_spill] sm:$0xff] }
 0xb2f   :  { %v9737_v17 = vmul.f32 %v9289_v58, %v11154_v4  ;;  %v9740_v0 = vadd.f32 %v11155_v30, %v5137_v10  ;;  %v9743_v22 = vadd.f32 %v11155_v30, %v5141_v9  ;;  %v5308_v7 = vrot.slane %v5307_v57, 2  ;;  %v11158_v4 = vld [vmem:[#allocation35_spill] sm:$0xff] }
 0xb30   :  { %v5360_v48 = vrot.slane %v5359_v63, 2  ;;  %v5193_v2 = vmul.f32 %v9274_v50, %v11156_v55  ;;  %v9749_v46 = vmul.f32 %v9279_v47, %v11157_v60  ;;  %v9753_v49 = vmul.f32 %v9289_v58, %v9503_v43  ;;  %v11159_v55 = vld [vmem:[#allocation33_spill] sm:$0xff] }
 0xb31   :  { %v5197_v10 = vmul.f32 %v9274_v50, %v11158_v4  ;;  %v9758_v32 = vadd.f32 %v11155_v30, %v5169_v41  ;;  %v9761_v9 = vadd.f32 %v11155_v30, %v5173_v39  ;;  %v5309_v53 = vadd.f32 %v5308_v7, %v5307_v57 }
 0xb32   :  { %v5361_v44 = vadd.f32 %v5360_v48, %v5359_v63  ;;  %v9765_v51 = vmul.f32 %v9279_v47, %v11159_v55  ;;  %v9769_v60 = vmul.f32 %v9289_v58, %v9519_v27  ;;  %v9772_v43 = vadd.f32 %v11155_v30, %v5145_v6 }
 0xb33   :  { %v9775_v50 = vadd.f32 %v11155_v30, %v5177_v1  ;;  %v5286_v41 = vadd.f32 %v9743_v22, %v9740_v0  ;;  %v5338_v63 = vadd.f32 %v9761_v9, %v9758_v32  ;;  %v5310_v39 = vrot.slane %v5309_v53, 1 }
 0xb34   :  { %v5362_v57 = vrot.slane %v5361_v44, 1  ;;  %v9783_v47 = vadd.f32 %v11155_v30, %v9623_v20  ;;  %v9786_v58 = vadd.f32 %v11155_v30, %v5153_v18  ;;  %v9789_v27 = vadd.f32 %v11155_v30, %v5157_v3 }
 0xb35   :  { %v9792_v6 = vadd.f32 %v11155_v30, %v5181_v28  ;;  %v5287_v1 = vadd.f32 %v5286_v41, %v9772_v43  ;;  %v5339_v7 = vadd.f32 %v5338_v63, %v9775_v50  ;;  %v5311_v48 = vadd.f32 %v5310_v39, %v5309_v53  ;;  %v11166_v39 = vld [vmem:[#allocation20_spill] sm:$0xff] }
 0xb36   :  { %v5363_v4 = vadd.f32 %v5362_v57, %v5361_v44  ;;  %v9797_v55 = vadd.f32 %v11155_v30, %v5161_v45  ;;  %v9800_v20 = vadd.f32 %v11155_v30, %v5165_v34  ;;  %v9803_v18 = vadd.f32 %v11155_v30, %v5185_v11  ;;  %v11165_v45 = vld [vmem:[#allocation18_spill] sm:$0xff] }
 0xb37   :  { %11160 = vst [vmem:[#allocation8_spill] sm:$0xff] %v9792_v6  ;;  %v9806_v3 = vadd.f32 %v11155_v30, %v5189_v25  ;;  %v5288_v28 = vadd.f32 %v5287_v1, %v9783_v47  ;;  %v5340_v41 = vadd.f32 %v5339_v7, %v9792_v6  ;;  %v9814_v44 = vadd.f32 %v11155_v30, %v5193_v2 }
 0xb38   :  { %11161 = vst [vmem:[#allocation9_spill] sm:$0xff] %v9803_v18  ;;  %v9811_v63 = vsel %vm1136_vm12, %v5311_v48, %v5363_v4  ;;  %v9817_v53 = vadd.f32 %v11155_v30, %v5197_v10  ;;  %v9821_v34 = vadd.f32 %v11165_v45, %v9591_v15  ;;  %v9829_v57 = vadd.f32 %v11166_v39, %v9597_v36 }
 0xb39   :  { %11162 = vst [vmem:[#allocation11_spill] sm:$0xff] %v9806_v3  ;;  %11163 = vst [vmem:[#allocation12_spill] sm:$0xff] %v9814_v44  ;;  %5402 = vrot.lane.b32.xlu1 %v9811_v63, %s6913_s23  ;;  %v5289_v11 = vadd.f32 %v5288_v28, %v9786_v58  ;;  %v5341_v25 = vadd.f32 %v5340_v41, %v9803_v18  ;;  %v9833_v2 = vadd.f32 %v11165_v45, %v9603_v14  ;;  %v5425_v18 = vld [vmem:[%s10893_s10 + $0x30] sm:$0xff] }
 0xb3a   :  { %11164 = vst [vmem:[#allocation13_spill] sm:$0xff] %v9817_v53  ;;  %v9837_v30 = vadd.f32 %v11166_v39, %v9607_v24  ;;  %v9841_v15 = vadd.f32 %v11165_v45, %v9613_v8  ;;  %v9845_v10 = vadd.f32 %v11166_v39, %v9619_v52  ;;  %v9849_v36 = vadd.f32 %v11165_v45, %v9627_v56 }
 0xb3b   :  { %v5290_v1 = vadd.f32 %v5289_v11, %v9789_v27  ;;  %v5342_v14 = vadd.f32 %v5341_v25, %v9806_v3  ;;  %v9855_v24 = vadd.f32 %v11166_v39, %v9631_v59  ;;  %v9859_v8 = vadd.f32 %v11165_v45, %v9637_v38 }
 0xb3c   :  { %v9863_v52 = vadd.f32 %v11166_v39, %v9643_v61  ;;  %v9867_v56 = vadd.f32 %v11165_v45, %v9649_v19  ;;  %v9871_v7 = vadd.f32 %v11166_v39, %v9687_v31  ;;  %v9875_v59 = vadd.f32 %v11166_v39, %v9697_v23 }
 0xb3d   :  { %v5291_v48 = vadd.f32 %v5290_v1, %v9797_v55  ;;  %v5343_v38 = vadd.f32 %v5342_v14, %v9814_v44  ;;  %v9881_v61 = vadd.f32 %v11165_v45, %v9681_v62  ;;  %v9885_v19 = vadd.f32 %v11165_v45, %v9693_v33 }
 0xb3e   :  { %v9889_v31 = vadd.f32 %v11166_v39, %v9653_v37  ;;  %v9893_v23 = vadd.f32 %v11165_v45, %v9659_v42  ;;  %v9897_v4 = vadd.f32 %v11166_v39, %v9665_v29  ;;  %v9901_v62 = vadd.f32 %v11165_v45, %v9671_v35 }
 0xb3f   :  { %v5292_v28 = vadd.f32 %v5291_v48, %v9800_v20  ;;  %v5344_v33 = vadd.f32 %v5343_v38, %v9817_v53  ;;  %v9907_v37 = vadd.f32 %v11166_v39, %v9675_v5  ;;  %v9911_v42 = vadd.f32 %v11165_v45, %v9703_v40 }
 0xb40   :  { %v9915_v29 = vadd.f32 %v11166_v39, %v9707_v54  ;;  %v5325_v35 = vadd.f32 %v9837_v30, %v9829_v57  ;;  %v5377_v41 = vadd.f32 %v9875_v59, %v9871_v7  ;;  %v5312_v11 = vadd.f32 %v9833_v2, %v9821_v34 }
 0xb41   :  { %v5293_v25 = vrot.slane %v5292_v28, 4  ;;  %v5345_v5 = vrot.slane %v5344_v33, 4  ;;  %v9925_v1 = vadd.f32 %v11165_v45, %v9713_v13  ;;  %v5364_v40 = vadd.f32 %v9885_v19, %v9881_v61 }
 0xb42   :  { %v9931_v54 = vadd.f32 %v11166_v39, %v9717_v26  ;;  %v5326_v14 = vadd.f32 %v5325_v35, %v9845_v10  ;;  %v5378_v48 = vadd.f32 %v5377_v41, %v9915_v29  ;;  %v5313_v38 = vadd.f32 %v5312_v11, %v9841_v15  ;;  %v5426_v26 = vld [vmem:[%s10893_s10 + $0x38] sm:$0xff] }
 0xb43   :  { %v5294_v53 = vadd.f32 %v5293_v25, %v5292_v28  ;;  %v5346_v44 = vadd.f32 %v5345_v5, %v5344_v33  ;;  %v9938_v3 = vadd.f32 %v11166_v39, %v9727_v12  ;;  %v5365_v13 = vadd.f32 %v5364_v40, %v9911_v42 }
 0xb44   :  { %v5327_v35 = vadd.f32 %v5326_v14, %v9855_v24  ;;  %v5379_v41 = vadd.f32 %v5378_v48, %v9931_v54  ;;  %v5314_v28 = vadd.f32 %v5313_v38, %v9849_v36  ;;  %v6712_v33 = vpack.c.bf16 %v5426_v26, %v5425_v18 }
 0xb45   :  { %v5295_v11 = vrot.slane %v5294_v53, 2  ;;  %v5347_v12 = vrot.slane %v5346_v44, 2  ;;  %v9952_v25 = vadd.f32 %v11165_v45, %v9723_v16  ;;  %v5366_v5 = vadd.f32 %v5365_v13, %v9925_v1 }
 0xb46   :  { %v9957_v40 = vadd.f32 %v11166_v39, %v9737_v17  ;;  %v5328_v6 = vadd.f32 %v5327_v35, %v9863_v52  ;;  %v5380_v14 = vadd.f32 %v5379_v41, %v9938_v3  ;;  %v5315_v48 = vadd.f32 %v5314_v28, %v9859_v8  ;;  %6713 = vmatpush3.bf16.msra.mxu1 %v6712_v33 }
 0xb47   :  { %v5296_v18 = vadd.f32 %v5295_v11, %v5294_v53  ;;  %v5348_v38 = vadd.f32 %v5347_v12, %v5346_v44  ;;  %v9964_v26 = vadd.f32 %v11165_v45, %v9733_v21  ;;  %v5367_v16 = vadd.f32 %v5366_v5, %v9952_v25 }
 0xb48   :  { %11167 = vst [vmem:[#allocation15_spill] sm:$0xff] %v9957_v40  ;;  %v9969_v13 = vadd.f32 %v11166_v39, %v9753_v49  ;;  %v5329_v17 = vadd.f32 %v5328_v6, %v9889_v31  ;;  %v5381_v35 = vadd.f32 %v5380_v14, %v9957_v40  ;;  %v5316_v41 = vadd.f32 %v5315_v48, %v9867_v56 }
 0xb49   :  { %v5297_v28 = vrot.slane %v5296_v18, 1  ;;  %v5349_v33 = vrot.slane %v5348_v38, 1  ;;  %v9976_v44 = vadd.f32 %v11165_v45, %v9749_v46  ;;  %v5368_v21 = vadd.f32 %v5367_v16, %v9964_v26 }
 0xb4a   :  { %11168 = vst [vmem:[#allocation10_spill] sm:$0xff] %v9969_v13  ;;  %v9981_v53 = vadd.f32 %v11166_v39, %v9769_v60  ;;  %v5330_v49 = vadd.f32 %v5329_v17, %v9897_v4  ;;  %v5382_v6 = vadd.f32 %v5381_v35, %v9969_v13  ;;  %v5317_v11 = vadd.f32 %v5316_v41, %v9893_v23 }
 0xb4b   :  { %11169 = vst [vmem:[#allocation14_spill] sm:$0xff] %v9976_v44  ;;  %v5298_v12 = vadd.f32 %v5297_v28, %v5296_v18  ;;  %v5350_v5 = vadd.f32 %v5349_v33, %v5348_v38  ;;  %v9988_v14 = vadd.f32 %v11165_v45, %v9765_v51  ;;  %v5369_v46 = vadd.f32 %v5368_v21, %v9976_v44 }
 0xb4c   :  { %11170 = vst [vmem:[#allocation16_spill] sm:$0xff] %v9981_v53  ;;  %v5331_v48 = vadd.f32 %v5330_v49, %v9907_v37  ;;  %v5383_v16 = vadd.f32 %v5382_v6, %v9981_v53  ;;  %v5318_v60 = vadd.f32 %v5317_v11, %v9901_v62  ;;  %v6921_v40 = vmov 0.0  }
 0xb4d   :  { %11171 = vst [vmem:[#allocation21_spill] sm:$0xff] %v9988_v14  ;;  %v5391_v39 = vsel %vm1136_vm12, %v5298_v12, %v5350_v5  ;;  %v5370_v17 = vadd.f32 %v5369_v46, %v9988_v14  ;;  %6694 = vmatprep.mubr.msk.f32.mxu1 %vm6920_vm0, %v6921_v40  ;;  %6697 = vmatprep.subr.mxu1 %v6921_v40 }
 0xb4e   :  { %5396 = vrot.lane.b32.xlu0 %v5391_v39, %s6913_s23  ;;  %v5332_v18 = vrot.slane %v5331_v48, 4  ;;  %v5384_v38 = vrot.slane %v5383_v16, 4  ;;  %v5319_v35 = vrot.slane %v5318_v60, 4 }
 0xb4f   :  { %v5371_v41 = vrot.slane %v5370_v17, 4 }
 0xb50   :  { %v5333_v51 = vadd.f32 %v5332_v18, %v5331_v48  ;;  %v5385_v45 = vadd.f32 %v5384_v38, %v5383_v16  ;;  %v5320_v28 = vadd.f32 %v5319_v35, %v5318_v60 }
 0xb51   :  { %v5372_v33 = vadd.f32 %v5371_v41, %v5370_v17 }
 0xb52   :  { %v5334_v21 = vrot.slane %v5333_v51, 2  ;;  %v5386_v49 = vrot.slane %v5385_v45, 2  ;;  %v5321_v13 = vrot.slane %v5320_v28, 2 }
 0xb53   :  { %v5373_v6 = vrot.slane %v5372_v33, 2 }
 0xb54   :  { %v5335_v53 = vadd.f32 %v5334_v21, %v5333_v51  ;;  %v5387_v11 = vadd.f32 %v5386_v49, %v5385_v45  ;;  %v5322_v44 = vadd.f32 %v5321_v13, %v5320_v28 }
 0xb55   :  { %v5374_v12 = vadd.f32 %v5373_v6, %v5372_v33 }
 0xb56   :  { %v5336_v5 = vrot.slane %v5335_v53, 1  ;;  %v5388_v46 = vrot.slane %v5387_v11, 1  ;;  %v5323_v14 = vrot.slane %v5322_v44, 1 }
 0xb57   :  { %v5375_v48 = vrot.slane %v5374_v12, 1 }
 0xb58   :  { %v5337_v16 = vadd.f32 %v5336_v5, %v5335_v53  ;;  %v5389_v60 = vadd.f32 %v5388_v46, %v5387_v11  ;;  %v5324_v17 = vadd.f32 %v5323_v14, %v5322_v44  ;;  %v5508_v11 = vld [vmem:[%s10896_s12] sm:$0xf] }
 0xb59   :  { %v5376_v18 = vadd.f32 %v5375_v48, %v5374_v12 }
 0xb5a   :  { %v5394_v38 = vsel %vm1136_vm12, %v5337_v16, %v5389_v60 }
 0xb5b   :  { %5414 = vrot.lane.b32.xlu1 %v5394_v38, %s6913_s23  ;;  %v5393_v13 = vsel %vm1136_vm12, %v5324_v17, %v5376_v18 }
 0xb5c   :  { %5408 = vrot.lane.b32.xlu0 %v5393_v13, %s6913_s23 }
 0xbab   :  { %v5403_v45 = vpop.permute.xlu1 %5402 }
 0xbc0   :  { %v5397_v35 = vpop.permute.xlu0 %5396 }
 0xbc1   :  { %v5399_v41 = vadd.f32 %v5397_v35, %v5391_v39 }
 0xbc3   :  { %v5400_v51 = vadd.f32 %v5399_v41, %v9811_v63  ;;  %v6213_v63 = vld [vmem:[%s10897_s11] ss:$0 sm:$0xff] }
 0xbc5   :  { %v5405_v28 = vadd.f32 %v5403_v45, %v5400_v51  ;;  %v11172_v51 = vld [vmem:[#allocation5_spill] sm:$0xff] }
 0xbc7   :  { %v5406_v33 = vadd.f32 %v5405_v28, %v5393_v13  ;;  %v11173_v28 = vld [vmem:[#allocation17_spill] sm:$0xff] }
 0xbcd   :  { %v5415_v44 = vpop.permute.xlu1 %5414 }
 0xbce   :  { %v5409_v21 = vpop.permute.xlu0 %5408 }
 0xbcf   :  { %v5411_v53 = vadd.f32 %v5409_v21, %v5406_v33 }
 0xbd1   :  { %v5412_v49 = vadd.f32 %v5411_v53, %v5394_v38  ;;  %v11174_v53 = vld [vmem:[#allocation36_spill] sm:$0xff] }
 0xbd3   :  { %v5417_v14 = vadd.f32 %v5415_v44, %v5412_v49 }
 0xbd5   :  { %v5418_v6 = vmul.f32 0.001953125, %v5417_v14 }
 0xbd7   :  { %6695 = vmatmul.mubr.msk.f32.vlgmr.msra.gmra.mrb[128].mxu1 %vm675_vm3, %v5418_v6 }
 0xbd8   :  { %6699 = vmatprep.mubr.msk.f32.mxu1 %vm6920_vm0, %v6921_v40  ;;  %6698 = vmatpush3.msk.msra.mxu1 %vm1130_vm10, %v5508_v11  ;;  %v6215_v40 = vld [vmem:[%s10898_s13] ss:$0 sm:$0xff]  ;;  %v11175_v11 = vld [vmem:[#allocation37_spill] sm:$0xff] }
 0xcaa   :  { %v5503_v39 = vpop.f32.mrb[128].mxu1 }
 0xcab   :  { %v5504_v12 = vadd.f32 %v6213_v63, %v5503_v39  ;;  %v6696_v5 = vpop.f32.mrb[129].mxu1 }
 0xcad   :  { %v5507_v46 = vmax.f32 %v5504_v12, 0.0 }
 0xcaf   :  { %6700 = vmatmul.mubr.msk.f32.vlgmr.msra.gmra.mrb[130].mxu1 %vm5516_vm1, %v5507_v46 }
 0xd82   :  { %v5590_v48 = vpop.f32.mrb[130].mxu1 }
 0xd83   :  { %v5591_v16 = vadd.f32 %v6215_v40, %v5590_v48  ;;  %v6701_v60 = vpop.f32.mrb[131].mxu1 }
 0xd85   :  { %v6218_v17 = vmul.f32 -1.442695, %v5591_v16 }
 0xd87   :  { %6907 = vpow2.f32 %v6218_v17 }
 0xd91   :  { %v6908_v18 = vpop.eup %6907 }
 0xd92   :  { %v5597_v38 = vadd.f32 1.0, %v6908_v18 }
 0xd94   :  { %6909 = vrcp.f32 %v5597_v38 }
 0xd9e   :  { %v6910_v13 = vpop.eup %6909 }
 0xd9f   :  { %5601 = vrot.lane.b32.xlu0 %v6910_v13, %s6913_s23 }
 0xe11   :  { %v5602_v35 = vpop.permute.xlu0 %5601 }
 0xe12   :  { %v5604_v41 = vsel %vm675_vm3, %v6910_v13, %v5602_v35 }
 0xe13   :  { %v5608_v45 = vrot.slane %v5604_v41, %v11172_v51  ;;  %v10019_v33 = vrot.slane %v5604_v41, %v11173_v28  ;;  %v11191_v28 = vld [vmem:[#allocation42_spill] sm:$0xff] }
 0xe15   :  { %v10022_v21 = vmul.f32 %v5608_v45, %v9740_v0  ;;  %v10025_v49 = vmul.f32 %v5608_v45, %v11174_v53  ;;  %v10028_v44 = vmul.f32 %v5608_v45, %v9821_v34  ;;  %v10031_v14 = vmul.f32 %v5608_v45, %v9829_v57  ;;  %v11176_v34 = vld [vmem:[#allocation39_spill] sm:$0xff] }
 0xe16   :  { %v10034_v6 = vmul.f32 %v5608_v45, %v9743_v22  ;;  %v10037_v63 = vmul.f32 %v5608_v45, %v11175_v11  ;;  %v10040_v39 = vmul.f32 %v5608_v45, %v9833_v2  ;;  %v10043_v0 = vmul.f32 %v5608_v45, %v9837_v30  ;;  %v11177_v2 = vld [vmem:[#allocation40_spill] sm:$0xff]  ;;  %v5679_v11 = vld [vmem:[%s10886_s0 + $0x10] sm:$0xff] }
 0xe17   :  { %v10046_v12 = vmul.f32 %v5608_v45, %v9772_v43  ;;  %v10049_v5 = vmul.f32 %v5608_v45, %v11176_v34  ;;  %v10052_v57 = vmul.f32 %v5608_v45, %v9841_v15  ;;  %v10055_v22 = vmul.f32 %v5608_v45, %v9845_v10  ;;  %v11178_v15 = vld [vmem:[#allocation41_spill] sm:$0xff]  ;;  %v11195_v34 = vld [vmem:[#allocation8_spill] sm:$0xff] }
 0xe18   :  { %v10058_v46 = vmul.f32 %v5608_v45, %v9783_v47  ;;  %v10061_v40 = vmul.f32 %v5608_v45, %v11177_v2  ;;  %v10064_v30 = vmul.f32 %v5608_v45, %v9849_v36  ;;  %v10067_v43 = vmul.f32 %v5608_v45, %v9855_v24  ;;  %v11179_v36 = vld [vmem:[#allocation43_spill] sm:$0xff]  ;;  %v11197_v2 = vld [vmem:[#allocation46_spill] sm:$0xff] }
 0xe19   :  { %v10070_v48 = vmul.f32 %v5608_v45, %v9786_v58  ;;  %v10073_v16 = vmul.f32 %v5608_v45, %v11178_v15  ;;  %v10076_v10 = vmul.f32 %v5608_v45, %v9859_v8  ;;  %v10079_v47 = vmul.f32 %v5608_v45, %v9863_v52  ;;  %v11180_v8 = vld [vmem:[#allocation44_spill] sm:$0xff] }
 0xe1a   :  { %v10082_v60 = vmul.f32 %v5608_v45, %v9789_v27  ;;  %v10085_v17 = vmul.f32 %v5608_v45, %v11179_v36  ;;  %v10088_v24 = vmul.f32 %v5608_v45, %v9867_v56  ;;  %v10091_v58 = vmul.f32 %v5608_v45, %v9889_v31  ;;  %v11181_v56 = vld [vmem:[#allocation45_spill] sm:$0xff] }
 0xe1b   :  { %v10094_v18 = vmul.f32 %v5608_v45, %v9797_v55  ;;  %v10097_v38 = vmul.f32 %v5608_v45, %v11180_v8  ;;  %v10100_v52 = vmul.f32 %v5608_v45, %v9893_v23  ;;  %v10103_v27 = vmul.f32 %v5608_v45, %v9897_v4  ;;  %v11182_v23 = vld [vmem:[#allocation38_spill] sm:$0xff] }
 0xe1c   :  { %v10106_v13 = vmul.f32 %v5608_v45, %v9800_v20  ;;  %v10109_v35 = vmul.f32 %v5608_v45, %v11181_v56  ;;  %v10112_v31 = vmul.f32 %v5608_v45, %v9901_v62  ;;  %v10115_v55 = vmul.f32 %v5608_v45, %v9907_v37  ;;  %v11186_v37 = vld [vmem:[#allocation34_spill] sm:$0xff]  ;;  %v5681_v56 = vld [vmem:[%s10886_s0 + $0x20] sm:$0xff] }
 0xe1d   :  { %v10119_v41 = vmul.f32 %v10019_v33, %v9758_v32  ;;  %v10123_v4 = vmul.f32 %v10019_v33, %v11182_v23  ;;  %v10127_v20 = vmul.f32 %v10019_v33, %v9881_v61  ;;  %v10131_v51 = vmul.f32 %v10019_v33, %v9871_v7  ;;  %v5682_v23 = vld [vmem:[%s10886_s0 + $0x28] sm:$0xff] }
 0xe1e   :  { %v10135_v62 = vmul.f32 %v10019_v33, %v9761_v9  ;;  %v10139_v32 = vmul.f32 %v10019_v33, %v11186_v37  ;;  %v10143_v45 = vmul.f32 %v10019_v33, %v9885_v19  ;;  %v10147_v61 = vmul.f32 %v10019_v33, %v9875_v59  ;;  %v5677_v59 = vld [vmem:[%s10886_s0] sm:$0xff]  ;;  %v5683_v37 = vld [vmem:[%s10886_s0 + $0x30] sm:$0xff] }
 0xe1f   :  { %11183 = vst [vmem:[#allocation23_spill] sm:$0xff] %v10127_v20  ;;  %11184 = vst [vmem:[#allocation22_spill] sm:$0xff] %v10131_v51  ;;  %v10151_v7 = vmul.f32 %v10019_v33, %v9775_v50  ;;  %v10155_v9 = vmul.f32 %v10019_v33, %v11191_v28  ;;  %v10159_v53 = vmul.f32 %v10019_v33, %v9911_v42  ;;  %v5678_v50 = vld [vmem:[%s10886_s0 + $0x8] sm:$0xff]  ;;  %v5680_v42 = vld [vmem:[%s10886_s0 + $0x18] sm:$0xff] }
 0xe20   :  { %11185 = vst [vmem:[#allocation24_spill] sm:$0xff] %v10135_v62  ;;  %11187 = vst [vmem:[#allocation25_spill] sm:$0xff] %v10139_v32  ;;  %v10163_v19 = vmul.f32 %v10019_v33, %v9915_v29  ;;  %v10179_v29 = vmul.f32 %v10019_v33, %v11195_v34  ;;  %v10183_v15 = vmul.f32 %v10019_v33, %v11197_v2  ;;  %v11201_v28 = vld [vmem:[#allocation9_spill] sm:$0xff]  ;;  %v11203_v34 = vld [vmem:[#allocation47_spill] sm:$0xff] }
 0xe21   :  { %11188 = vst [vmem:[#allocation27_spill] sm:$0xff] %v10143_v45  ;;  %11189 = vst [vmem:[#allocation31_spill] sm:$0xff] %v10147_v61  ;;  %v10187_v36 = vmul.f32 %v10019_v33, %v9925_v1  ;;  %v10191_v8 = vmul.f32 %v10019_v33, %v9931_v54  ;;  %v5684_v1 = vld [vmem:[%s10886_s0 + $0x38] sm:$0xff]  ;;  %v10207_v54 = vmul.f32 %v10019_v33, %v11201_v28  ;;  %v5686_v28 = vld [vmem:[%s10886_s0 + $0x48] sm:$0xff] }
 0xe22   :  { %11190 = vst [vmem:[#allocation26_spill] sm:$0xff] %v10151_v7  ;;  %11192 = vst [vmem:[#allocation28_spill] sm:$0xff] %v10155_v9  ;;  %v10211_v2 = vmul.f32 %v10019_v33, %v11203_v34  ;;  %v5687_v34 = vld [vmem:[%s10886_s0 + $0x50] sm:$0xff]  ;;  %v5693_v45 = vld [vmem:[%s10886_s0 + $0x80] sm:$0xff] }
 0xe23   :  { %11193 = vst [vmem:[#allocation29_spill] sm:$0xff] %v10159_v53  ;;  %11194 = vst [vmem:[#allocation30_spill] sm:$0xff] %v10163_v19  ;;  %v5689_v53 = vld [vmem:[%s10886_s0 + $0x60] sm:$0xff]  ;;  %v11220_v7 = vld [vmem:[#allocation10_spill] sm:$0xff] }
 0xe24   :  { %11196 = vst [vmem:[#allocation19_spill] sm:$0xff] %v10179_v29  ;;  %11198 = vst [vmem:[#allocation32_spill] sm:$0xff] %v10183_v15  ;;  %v5685_v15 = vld [vmem:[%s10886_s0 + $0x40] sm:$0xff]  ;;  %v11212_v29 = vld [vmem:[#allocation15_spill] sm:$0xff]  ;;  %v10275_v61 = vmul.f32 %v10019_v33, %v11220_v7 }
 0xe25   :  { %11199 = vst [vmem:[#allocation4_spill] sm:$0xff] %v10187_v36  ;;  %11200 = vst [vmem:[#allocation35_spill] sm:$0xff] %v10191_v8  ;;  %v10215_v8 = vmul.f32 %v10019_v33, %v9952_v25  ;;  %v10219_v36 = vmul.f32 %v10019_v33, %v9938_v3  ;;  %v5688_v25 = vld [vmem:[%s10886_s0 + $0x58] sm:$0xff]  ;;  %v10247_v19 = vmul.f32 %v10019_v33, %v11212_v29  ;;  %v11228_v62 = vld [vmem:[#allocation16_spill] sm:$0xff] }
 0xe26   :  { %11202 = vst [vmem:[#allocation33_spill] sm:$0xff] %v10207_v54  ;;  %11204 = vst [vmem:[#allocation18_spill] sm:$0xff] %v10211_v2  ;;  %v10243_v54 = vmul.f32 %v10019_v33, %v9964_v26  ;;  %v5692_v26 = vld [vmem:[%s10886_s0 + $0x78] sm:$0xff]  ;;  %v10303_v51 = vmul.f32 %v10019_v33, %v11228_v62  ;;  %v5697_v20 = vld [vmem:[%s10886_s0 + $0xa0] sm:$0xff]  ;;  %v10324_v62 = vadd.f32 %v5679_v11, %v10028_v44 }
 0xe27   :  { %11205 = vst [vmem:[#allocation20_spill] sm:$0xff] %v10215_v8  ;;  %11206 = vst [vmem:[#allocation5_spill] sm:$0xff] %v10219_v36  ;;  %v11207_v8 = vld [vmem:[#allocation11_spill] sm:$0xff]  ;;  %v11209_v36 = vld [vmem:[#allocation48_spill] sm:$0xff]  ;;  %v10342_v44 = vadd.f32 %v5681_v56, %v10034_v6  ;;  %v10372_v56 = vadd.f32 %v5687_v34, %v10052_v57  ;;  %v10390_v57 = vadd.f32 %v5689_v53, %v10058_v46 }
 0xe28   :  { %v10235_v3 = vmul.f32 %v10019_v33, %v11207_v8  ;;  %v10239_v2 = vmul.f32 %v10019_v33, %v11209_v36  ;;  %11211 = vst [vmem:[#allocation37_spill] sm:$0xff] %v10243_v54  ;;  %11213 = vst [vmem:[#allocation39_spill] sm:$0xff] %v10247_v19  ;;  %v5690_v8 = vld [vmem:[%s10886_s0 + $0x68] sm:$0xff]  ;;  %v5691_v36 = vld [vmem:[%s10886_s0 + $0x70] sm:$0xff] }
 0xe29   :  { %v11214_v54 = vld [vmem:[#allocation12_spill] sm:$0xff]  ;;  %v11216_v19 = vld [vmem:[#allocation7_spill] sm:$0xff]  ;;  %11221 = vst [vmem:[#allocation44_spill] sm:$0xff] %v10275_v61  ;;  %v11224_v61 = vld [vmem:[#allocation6_spill] sm:$0xff] }
 0xe2a   :  { %11208 = vst [vmem:[#allocation17_spill] sm:$0xff] %v10235_v3  ;;  %11210 = vst [vmem:[#allocation36_spill] sm:$0xff] %v10239_v2  ;;  %v10263_v29 = vmul.f32 %v10019_v33, %v11214_v54  ;;  %v10267_v2 = vmul.f32 %v10019_v33, %v11216_v19  ;;  %v11218_v3 = vld [vmem:[#allocation14_spill] sm:$0xff]  ;;  %v5694_v54 = vld [vmem:[%s10886_s0 + $0x88] sm:$0xff] }
 0xe2b   :  { %v10271_v9 = vmul.f32 %v10019_v33, %v11218_v3  ;;  %v5695_v19 = vld [vmem:[%s10886_s0 + $0x90] sm:$0xff]  ;;  %v5696_v3 = vld [vmem:[%s10886_s0 + $0x98] sm:$0xff]  ;;  %11229 = vst [vmem:[#allocation42_spill] sm:$0xff] %v10303_v51  ;;  %v10327_v51 = vadd.f32 %v5680_v42, %v10031_v14  ;;  %v10345_v14 = vadd.f32 %v5682_v23, %v10037_v63  ;;  %v5705_v11 = vld [vmem:[%s10886_s0 + $0xe0] sm:$0xff]  ;;  %v10375_v23 = vadd.f32 %v5688_v25, %v10055_v22 }
 0xe2c   :  { %11215 = vst [vmem:[#allocation40_spill] sm:$0xff] %v10263_v29  ;;  %11217 = vst [vmem:[#allocation41_spill] sm:$0xff] %v10267_v2  ;;  %v10295_v2 = vmul.f32 %v10019_v33, %v11224_v61  ;;  %v11226_v29 = vld [vmem:[#allocation21_spill] sm:$0xff]  ;;  %v5699_v61 = vld [vmem:[%s10886_s0 + $0xb0] sm:$0xff]  ;;  %v10393_v22 = vadd.f32 %v5690_v8, %v10061_v40  ;;  %v10420_v53 = vadd.f32 %v5695_v19, %v10076_v10 }
 0xe2d   :  { %11219 = vst [vmem:[#allocation43_spill] sm:$0xff] %v10271_v9  ;;  %v11222_v9 = vld [vmem:[#allocation13_spill] sm:$0xff]  ;;  %v10299_v32 = vmul.f32 %v10019_v33, %v11226_v29  ;;  %v5700_v29 = vld [vmem:[%s10886_s0 + $0xb8] sm:$0xff]  ;;  %v5707_v6 = vld [vmem:[%s10886_s0 + $0xf0] sm:$0xff]  ;;  %v10423_v8 = vadd.f32 %v5696_v3, %v10079_v47  ;;  %v10441_v47 = vadd.f32 %v5699_v61, %v10088_v24 }
 0xe2e   :  { %v10291_v7 = vmul.f32 %v10019_v33, %v11222_v9  ;;  %11225 = vst [vmem:[#allocation38_spill] sm:$0xff] %v10295_v2  ;;  %v5698_v9 = vld [vmem:[%s10886_s0 + $0xa8] sm:$0xff]  ;;  %v10321_v33 = vadd.f32 %v5678_v50, %v10025_v49  ;;  %v5701_v2 = vld [vmem:[%s10886_s0 + $0xc0] sm:$0xff]  ;;  %v5704_v49 = vld [vmem:[%s10886_s0 + $0xd8] sm:$0xff]  ;;  %v10351_v50 = vadd.f32 %v5684_v1, %v10043_v0  ;;  %v10369_v0 = vadd.f32 %v5686_v28, %v10049_v5 }
 0xe2f   :  { %11227 = vst [vmem:[#allocation34_spill] sm:$0xff] %v10299_v32  ;;  %v10318_v32 = vadd.f32 %v5677_v59, %v10022_v21  ;;  %v5703_v21 = vld [vmem:[%s10886_s0 + $0xd0] sm:$0xff]  ;;  %v10348_v59 = vadd.f32 %v5683_v37, %v10040_v39  ;;  %v5706_v42 = vld [vmem:[%s10886_s0 + $0xe8] sm:$0xff]  ;;  %v5708_v63 = vld [vmem:[%s10886_s0 + $0xf8] sm:$0xff]  ;;  %v10366_v39 = vadd.f32 %v5685_v15, %v10046_v12  ;;  %v10396_v15 = vadd.f32 %v5691_v36, %v10064_v30 }
 0xe30   :  { %11223 = vst [vmem:[#allocation45_spill] sm:$0xff] %v10291_v7  ;;  %v5702_v7 = vld [vmem:[%s10886_s0 + $0xc8] sm:$0xff]  ;;  %v5709_v37 = vld [vmem:[%s10886_s0 + $0x100] sm:$0xff]  ;;  %v5711_v12 = vld [vmem:[%s10886_s0 + $0x110] sm:$0xff]  ;;  %v10399_v28 = vadd.f32 %v5692_v26, %v10067_v43  ;;  %v10414_v30 = vadd.f32 %v5693_v45, %v10070_v48  ;;  %v10417_v43 = vadd.f32 %v5694_v54, %v10073_v16  ;;  %v10435_v16 = vadd.f32 %v5697_v20, %v10082_v60 }
 0xe31   :  { %v5710_v1 = vld [vmem:[%s10886_s0 + $0x108] sm:$0xff]  ;;  %v5712_v5 = vld [vmem:[%s10886_s0 + $0x118] sm:$0xff]  ;;  %v5713_v34 = vld [vmem:[%s10886_s0 + $0x120] sm:$0xff]  ;;  %v10438_v10 = vadd.f32 %v5698_v9, %v10085_v17  ;;  %v10444_v45 = vadd.f32 %v5700_v29, %v10091_v58  ;;  %v10456_v17 = vadd.f32 %v5701_v2, %v10094_v18  ;;  %v10459_v24 = vadd.f32 %v5702_v7, %v10097_v38 }
 0xe32   :  { %v5714_v25 = vld [vmem:[%s10886_s0 + $0x128] sm:$0xff]  ;;  %v5715_v46 = vld [vmem:[%s10886_s0 + $0x130] sm:$0xff]  ;;  %v5716_v40 = vld [vmem:[%s10886_s0 + $0x138] sm:$0xff]  ;;  %v10462_v58 = vadd.f32 %v5703_v21, %v10100_v52  ;;  %v10465_v20 = vadd.f32 %v5704_v49, %v10103_v27  ;;  %v10477_v38 = vadd.f32 %v5705_v11, %v10106_v13  ;;  %v10480_v52 = vadd.f32 %v5706_v42, %v10109_v35 }
 0xe33   :  { %v5717_v36 = vld [vmem:[%s10886_s0 + $0x140] sm:$0xff]  ;;  %v5718_v26 = vld [vmem:[%s10886_s0 + $0x148] sm:$0xff]  ;;  %v5719_v48 = vld [vmem:[%s10886_s0 + $0x150] sm:$0xff]  ;;  %v10483_v27 = vadd.f32 %v5707_v6, %v10112_v31  ;;  %v10486_v2 = vadd.f32 %v5708_v63, %v10115_v55  ;;  %v10498_v35 = vadd.f32 %v5709_v37, %v10119_v41  ;;  %v10501_v31 = vadd.f32 %v5710_v1, %v10123_v4 }
 0xe34   :  { %v5720_v54 = vld [vmem:[%s10886_s0 + $0x158] sm:$0xff]  ;;  %v5721_v19 = vld [vmem:[%s10886_s0 + $0x160] sm:$0xff]  ;;  %v5722_v60 = vld [vmem:[%s10886_s0 + $0x168] sm:$0xff] }
 0xe35   :  { %v5723_v3 = vld [vmem:[%s10886_s0 + $0x170] sm:$0xff]  ;;  %v5724_v9 = vld [vmem:[%s10886_s0 + $0x178] sm:$0xff]  ;;  %v5725_v18 = vld [vmem:[%s10886_s0 + $0x180] sm:$0xff] }
 0xe36   :  { %v5726_v7 = vld [vmem:[%s10886_s0 + $0x188] sm:$0xff]  ;;  %v5727_v61 = vld [vmem:[%s10886_s0 + $0x190] sm:$0xff]  ;;  %v5728_v13 = vld [vmem:[%s10886_s0 + $0x198] sm:$0xff] }
 0xe37   :  { %v11230_v55 = vld [vmem:[#allocation23_spill] sm:$0xff]  ;;  %v11232_v21 = vld [vmem:[#allocation22_spill] sm:$0xff]  ;;  %v5729_v11 = vld [vmem:[%s10886_s0 + $0x1a0] sm:$0xff] }
 0xe38   :  { %v10504_v29 = vadd.f32 %v5711_v12, %v11230_v55  ;;  %v10507_v49 = vadd.f32 %v5712_v5, %v11232_v21  ;;  %v5730_v42 = vld [vmem:[%s10886_s0 + $0x1a8] sm:$0xff]  ;;  %v5731_v41 = vld [vmem:[%s10886_s0 + $0x1b0] sm:$0xff]  ;;  %v11234_v4 = vld [vmem:[#allocation24_spill] sm:$0xff] }
 0xe39   :  { %v10519_v6 = vadd.f32 %v5713_v34, %v11234_v4  ;;  %v11236_v63 = vld [vmem:[#allocation25_spill] sm:$0xff]  ;;  %v11238_v1 = vld [vmem:[#allocation27_spill] sm:$0xff] }
 0xe3a   :  { %11231 = vst [vmem:[#allocation8_spill] sm:$0xff] %v10504_v29  ;;  %11233 = vst [vmem:[#allocation46_spill] sm:$0xff] %v10507_v49  ;;  %v10522_v37 = vadd.f32 %v5714_v25, %v11236_v63  ;;  %v10525_v12 = vadd.f32 %v5715_v46, %v11238_v1  ;;  %v11240_v5 = vld [vmem:[#allocation31_spill] sm:$0xff]  ;;  %v5733_v49 = vld [vmem:[%s10886_s0 + $0x1c0] sm:$0xff] }
 0xe3b   :  { %11235 = vst [vmem:[#allocation9_spill] sm:$0xff] %v10519_v6  ;;  %v10528_v55 = vadd.f32 %v5716_v40, %v11240_v5  ;;  %v5732_v21 = vld [vmem:[%s10886_s0 + $0x1b8] sm:$0xff]  ;;  %v5734_v34 = vld [vmem:[%s10886_s0 + $0x1c8] sm:$0xff]  ;;  %v11242_v25 = vld [vmem:[#allocation26_spill] sm:$0xff] }
 0xe3c   :  { %11237 = vst [vmem:[#allocation47_spill] sm:$0xff] %v10522_v37  ;;  %11239 = vst [vmem:[#allocation11_spill] sm:$0xff] %v10525_v12  ;;  %v10540_v4 = vadd.f32 %v5717_v36, %v11242_v25  ;;  %v11244_v46 = vld [vmem:[#allocation28_spill] sm:$0xff]  ;;  %v11246_v40 = vld [vmem:[#allocation29_spill] sm:$0xff] }
 0xe3d   :  { %11241 = vst [vmem:[#allocation48_spill] sm:$0xff] %v10528_v55  ;;  %v10543_v63 = vadd.f32 %v5718_v26, %v11244_v46  ;;  %v10546_v1 = vadd.f32 %v5719_v48, %v11246_v40  ;;  %v11248_v5 = vld [vmem:[#allocation30_spill] sm:$0xff]  ;;  %v5736_v37 = vld [vmem:[%s10886_s0 + $0x1d8] sm:$0xff]  ;;  %v5737_v36 = vld [vmem:[%s10886_s0 + $0x1e0] sm:$0xff] }
 0xe3e   :  { %11243 = vst [vmem:[#allocation15_spill] sm:$0xff] %v10540_v4  ;;  %v10549_v55 = vadd.f32 %v5720_v54, %v11248_v5  ;;  %v5735_v12 = vld [vmem:[%s10886_s0 + $0x1d0] sm:$0xff]  ;;  %v11250_v26 = vld [vmem:[#allocation19_spill] sm:$0xff]  ;;  %v11252_v48 = vld [vmem:[#allocation32_spill] sm:$0xff] }
 0xe3f   :  { %11245 = vst [vmem:[#allocation12_spill] sm:$0xff] %v10543_v63  ;;  %11247 = vst [vmem:[#allocation7_spill] sm:$0xff] %v10546_v1  ;;  %v10561_v25 = vadd.f32 %v5721_v19, %v11250_v26  ;;  %v10564_v46 = vadd.f32 %v5722_v60, %v11252_v48  ;;  %v11254_v54 = vld [vmem:[#allocation4_spill] sm:$0xff]  ;;  %v11256_v5 = vld [vmem:[#allocation35_spill] sm:$0xff] }
 0xe40   :  { %11249 = vst [vmem:[#allocation14_spill] sm:$0xff] %v10549_v55  ;;  %v10567_v40 = vadd.f32 %v5723_v3, %v11254_v54  ;;  %v10570_v55 = vadd.f32 %v5724_v9, %v11256_v5  ;;  %v5738_v1 = vld [vmem:[%s10886_s0 + $0x1e8] sm:$0xff]  ;;  %v5739_v63 = vld [vmem:[%s10886_s0 + $0x1f0] sm:$0xff]  ;;  %v5740_v19 = vld [vmem:[%s10886_s0 + $0x1f8] sm:$0xff] }
 0xe41   :  { %11251 = vst [vmem:[#allocation10_spill] sm:$0xff] %v10561_v25  ;;  %11253 = vst [vmem:[#allocation13_spill] sm:$0xff] %v10564_v46  ;;  %v11258_v60 = vld [vmem:[#allocation33_spill] sm:$0xff]  ;;  %v11259_v3 = vld [vmem:[#allocation18_spill] sm:$0xff] }
 0xe42   :  { %11255 = vst [vmem:[#allocation6_spill] sm:$0xff] %v10567_v40  ;;  %11257 = vst [vmem:[#allocation21_spill] sm:$0xff] %v10570_v55  ;;  %v10582_v26 = vadd.f32 %v5725_v18, %v11258_v60  ;;  %v10585_v48 = vadd.f32 %v5726_v7, %v11259_v3  ;;  %v11260_v9 = vld [vmem:[#allocation20_spill] sm:$0xff]  ;;  %v11261_v5 = vld [vmem:[#allocation5_spill] sm:$0xff] }
 0xe43   :  { %v10588_v54 = vadd.f32 %v5727_v61, %v11260_v9  ;;  %v10591_v55 = vadd.f32 %v5728_v13, %v11261_v5  ;;  %v11262_v40 = vld [vmem:[#allocation17_spill] sm:$0xff]  ;;  %v11263_v25 = vld [vmem:[#allocation36_spill] sm:$0xff]  ;;  %v11265_v18 = vld [vmem:[#allocation39_spill] sm:$0xff] }
 0xe44   :  { %v10594_v46 = vadd.f32 %v5729_v11, %v11262_v40  ;;  %v10597_v4 = vadd.f32 %v5730_v42, %v11263_v25  ;;  %v11264_v6 = vld [vmem:[#allocation37_spill] sm:$0xff]  ;;  %v10603_v60 = vadd.f32 %v5732_v21, %v11265_v18  ;;  %v11266_v7 = vld [vmem:[#allocation40_spill] sm:$0xff]  ;;  %v11268_v13 = vld [vmem:[#allocation43_spill] sm:$0xff] }
 0xe45   :  { %v10600_v29 = vadd.f32 %v5731_v41, %v11264_v6  ;;  %v10606_v3 = vadd.f32 %v5733_v49, %v11266_v7  ;;  %v11267_v61 = vld [vmem:[#allocation41_spill] sm:$0xff]  ;;  %v10612_v5 = vadd.f32 %v5735_v12, %v11268_v13  ;;  %v11269_v11 = vld [vmem:[#allocation44_spill] sm:$0xff]  ;;  %v11271_v41 = vld [vmem:[#allocation38_spill] sm:$0xff]  ;;  %v5806_v12 = vmax.f32 %v10321_v33, 0.0 }
 0xe46   :  { %v10609_v9 = vadd.f32 %v5734_v34, %v11267_v61  ;;  %v10615_v40 = vadd.f32 %v5736_v37, %v11269_v11  ;;  %v11270_v42 = vld [vmem:[#allocation45_spill] sm:$0xff]  ;;  %v10621_v6 = vadd.f32 %v5738_v1, %v11271_v41  ;;  %v11272_v21 = vld [vmem:[#allocation34_spill] sm:$0xff]  ;;  %v5805_v34 = vmax.f32 %v10318_v32, 0.0 }
 0xe47   :  { %v10618_v25 = vadd.f32 %v5737_v36, %v11270_v42  ;;  %v10624_v18 = vadd.f32 %v5739_v63, %v11272_v21  ;;  %v11273_v49 = vld [vmem:[#allocation42_spill] sm:$0xff]  ;;  %v5807_v61 = vmax.f32 %v10324_v62, 0.0  ;;  %v5808_v37 = vmax.f32 %v10327_v51, 0.0  ;;  %5870 = vst [vmem:[%s10899_s14 + $0x8] sm:$0xff] %v5806_v12  ;;  %v11279_v42 = vld [vmem:[#allocation48_spill] sm:$0xff]  ;;  %v11280_v21 = vld [vmem:[#allocation15_spill] sm:$0xff] }
 0xe48   :  { %v10627_v7 = vadd.f32 %v5740_v19, %v11273_v49  ;;  %v5809_v36 = vmax.f32 %v10342_v44, 0.0  ;;  %v5810_v13 = vmax.f32 %v10345_v14, 0.0  ;;  %v5811_v1 = vmax.f32 %v10348_v59, 0.0  ;;  %5869 = vst [vmem:[%s10899_s14] sm:$0xff] %v5805_v34  ;;  %v11281_v34 = vld [vmem:[#allocation12_spill] sm:$0xff] }
 0xe49   :  { %v5812_v63 = vmax.f32 %v10351_v50, 0.0  ;;  %v5813_v11 = vmax.f32 %v10366_v39, 0.0  ;;  %v5814_v19 = vmax.f32 %v10369_v0, 0.0  ;;  %v5815_v32 = vmax.f32 %v10372_v56, 0.0  ;;  %5871 = vst [vmem:[%s10899_s14 + $0x10] sm:$0xff] %v5807_v61  ;;  %5872 = vst [vmem:[%s10899_s14 + $0x18] sm:$0xff] %v5808_v37 }
 0xe4a   :  { %v5816_v33 = vmax.f32 %v10375_v23, 0.0  ;;  %v5817_v51 = vmax.f32 %v10390_v57, 0.0  ;;  %v5818_v62 = vmax.f32 %v10393_v22, 0.0  ;;  %v5819_v44 = vmax.f32 %v10396_v15, 0.0  ;;  %5873 = vst [vmem:[%s10899_s14 + $0x20] sm:$0xff] %v5809_v36  ;;  %5874 = vst [vmem:[%s10899_s14 + $0x28] sm:$0xff] %v5810_v13 }
 0xe4b   :  { %v5820_v14 = vmax.f32 %v10399_v28, 0.0  ;;  %5875 = vst [vmem:[%s10899_s14 + $0x30] sm:$0xff] %v5811_v1  ;;  %5876 = vst [vmem:[%s10899_s14 + $0x38] sm:$0xff] %v5812_v63  ;;  %v5821_v59 = vmax.f32 %v10414_v30, 0.0  ;;  %v5822_v50 = vmax.f32 %v10417_v43, 0.0  ;;  %v5823_v39 = vmax.f32 %v10420_v53, 0.0 }
 0xe4c   :  { %v5824_v0 = vmax.f32 %v10423_v8, 0.0  ;;  %5877 = vst [vmem:[%s10899_s14 + $0x40] sm:$0xff] %v5813_v11  ;;  %5878 = vst [vmem:[%s10899_s14 + $0x48] sm:$0xff] %v5814_v19  ;;  %v5825_v56 = vmax.f32 %v10435_v16, 0.0  ;;  %v5826_v23 = vmax.f32 %v10438_v10, 0.0  ;;  %v5827_v57 = vmax.f32 %v10441_v47, 0.0 }
 0xe4d   :  { %5879 = vst [vmem:[%s10899_s14 + $0x50] sm:$0xff] %v5815_v32  ;;  %5880 = vst [vmem:[%s10899_s14 + $0x58] sm:$0xff] %v5816_v33  ;;  %v5828_v22 = vmax.f32 %v10444_v45, 0.0  ;;  %v5829_v15 = vmax.f32 %v10456_v17, 0.0  ;;  %v5830_v28 = vmax.f32 %v10459_v24, 0.0  ;;  %v5831_v30 = vmax.f32 %v10462_v58, 0.0 }
 0xe4e   :  { %5881 = vst [vmem:[%s10899_s14 + $0x60] sm:$0xff] %v5817_v51  ;;  %5882 = vst [vmem:[%s10899_s14 + $0x68] sm:$0xff] %v5818_v62  ;;  %v5832_v43 = vmax.f32 %v10465_v20, 0.0  ;;  %v5833_v53 = vmax.f32 %v10477_v38, 0.0  ;;  %v5834_v8 = vmax.f32 %v10480_v52, 0.0  ;;  %v5835_v16 = vmax.f32 %v10483_v27, 0.0 }
 0xe4f   :  { %5883 = vst [vmem:[%s10899_s14 + $0x70] sm:$0xff] %v5819_v44  ;;  %5884 = vst [vmem:[%s10899_s14 + $0x78] sm:$0xff] %v5820_v14  ;;  %v5836_v10 = vmax.f32 %v10486_v2, 0.0  ;;  %v5837_v47 = vmax.f32 %v10498_v35, 0.0  ;;  %v5838_v45 = vmax.f32 %v10501_v31, 0.0  ;;  %v11274_v17 = vld [vmem:[#allocation8_spill] sm:$0xff] }
 0xe50   :  { %5885 = vst [vmem:[%s10899_s14 + $0x80] sm:$0xff] %v5821_v59  ;;  %5886 = vst [vmem:[%s10899_s14 + $0x88] sm:$0xff] %v5822_v50  ;;  %v5839_v24 = vmax.f32 %v11274_v17, 0.0  ;;  %v11275_v58 = vld [vmem:[#allocation46_spill] sm:$0xff]  ;;  %v11276_v38 = vld [vmem:[#allocation9_spill] sm:$0xff]  ;;  %v5844_v41 = vmax.f32 %v11279_v42, 0.0 }
 0xe51   :  { %5887 = vst [vmem:[%s10899_s14 + $0x90] sm:$0xff] %v5823_v39  ;;  %5888 = vst [vmem:[%s10899_s14 + $0x98] sm:$0xff] %v5824_v0  ;;  %v5840_v20 = vmax.f32 %v11275_v58, 0.0  ;;  %v5841_v52 = vmax.f32 %v11276_v38, 0.0  ;;  %v11277_v27 = vld [vmem:[#allocation47_spill] sm:$0xff]  ;;  %v5845_v49 = vmax.f32 %v11280_v21, 0.0 }
 0xe52   :  { %5889 = vst [vmem:[%s10899_s14 + $0xa0] sm:$0xff] %v5825_v56  ;;  %5890 = vst [vmem:[%s10899_s14 + $0xa8] sm:$0xff] %v5826_v23  ;;  %v5842_v2 = vmax.f32 %v11277_v27, 0.0  ;;  %v11278_v35 = vld [vmem:[#allocation11_spill] sm:$0xff]  ;;  %v5846_v12 = vmax.f32 %v11281_v34, 0.0  ;;  %v11283_v36 = vld [vmem:[#allocation14_spill] sm:$0xff] }
 0xe53   :  { %5891 = vst [vmem:[%s10899_s14 + $0xb0] sm:$0xff] %v5827_v57  ;;  %5892 = vst [vmem:[%s10899_s14 + $0xb8] sm:$0xff] %v5828_v22  ;;  %v5843_v31 = vmax.f32 %v11278_v35, 0.0  ;;  %v11282_v61 = vld [vmem:[#allocation7_spill] sm:$0xff]  ;;  %v5848_v13 = vmax.f32 %v11283_v36, 0.0  ;;  %v11284_v1 = vld [vmem:[#allocation10_spill] sm:$0xff] }
 0xe54   :  { %5893 = vst [vmem:[%s10899_s14 + $0xc0] sm:$0xff] %v5829_v15  ;;  %5894 = vst [vmem:[%s10899_s14 + $0xc8] sm:$0xff] %v5830_v28  ;;  %v5847_v37 = vmax.f32 %v11282_v61, 0.0  ;;  %v5849_v63 = vmax.f32 %v11284_v1, 0.0  ;;  %v11285_v11 = vld [vmem:[#allocation13_spill] sm:$0xff]  ;;  %v11286_v32 = vld [vmem:[#allocation6_spill] sm:$0xff] }
 0xe55   :  { %5895 = vst [vmem:[%s10899_s14 + $0xd0] sm:$0xff] %v5831_v30  ;;  %5896 = vst [vmem:[%s10899_s14 + $0xd8] sm:$0xff] %v5832_v43  ;;  %v5850_v19 = vmax.f32 %v11285_v11, 0.0  ;;  %v5851_v33 = vmax.f32 %v11286_v32, 0.0  ;;  %v11287_v51 = vld [vmem:[#allocation21_spill] sm:$0xff]  ;;  %v5853_v44 = vmax.f32 %v10582_v26, 0.0 }
 0xe56   :  { %5897 = vst [vmem:[%s10899_s14 + $0xe0] sm:$0xff] %v5833_v53  ;;  %5898 = vst [vmem:[%s10899_s14 + $0xe8] sm:$0xff] %v5834_v8  ;;  %v5852_v62 = vmax.f32 %v11287_v51, 0.0  ;;  %v5854_v14 = vmax.f32 %v10585_v48, 0.0  ;;  %v5855_v59 = vmax.f32 %v10588_v54, 0.0  ;;  %v5856_v50 = vmax.f32 %v10591_v55, 0.0 }
 0xe57   :  { %5899 = vst [vmem:[%s10899_s14 + $0xf0] sm:$0xff] %v5835_v16  ;;  %5900 = vst [vmem:[%s10899_s14 + $0xf8] sm:$0xff] %v5836_v10  ;;  %v5857_v26 = vmax.f32 %v10594_v46, 0.0  ;;  %v5858_v55 = vmax.f32 %v10597_v4, 0.0  ;;  %v5859_v48 = vmax.f32 %v10600_v29, 0.0  ;;  %v5860_v54 = vmax.f32 %v10603_v60, 0.0 }
 0xe58   :  { %5901 = vst [vmem:[%s10899_s14 + $0x100] sm:$0xff] %v5837_v47  ;;  %5902 = vst [vmem:[%s10899_s14 + $0x108] sm:$0xff] %v5838_v45  ;;  %v5861_v29 = vmax.f32 %v10606_v3, 0.0  ;;  %v5862_v4 = vmax.f32 %v10609_v9, 0.0  ;;  %v5863_v46 = vmax.f32 %v10612_v5, 0.0  ;;  %v5864_v60 = vmax.f32 %v10615_v40, 0.0 }
 0xe59   :  { %5903 = vst [vmem:[%s10899_s14 + $0x110] sm:$0xff] %v5839_v24  ;;  %5904 = vst [vmem:[%s10899_s14 + $0x118] sm:$0xff] %v5840_v20  ;;  %v5865_v3 = vmax.f32 %v10618_v25, 0.0  ;;  %v5866_v9 = vmax.f32 %v10621_v6, 0.0  ;;  %v5867_v5 = vmax.f32 %v10624_v18, 0.0  ;;  %v5868_v40 = vmax.f32 %v10627_v7, 0.0 }
 0xe5a   :  { %5905 = vst [vmem:[%s10899_s14 + $0x120] sm:$0xff] %v5841_v52  ;;  %5906 = vst [vmem:[%s10899_s14 + $0x128] sm:$0xff] %v5842_v2 }
 0xe5b   :  { %5907 = vst [vmem:[%s10899_s14 + $0x130] sm:$0xff] %v5843_v31  ;;  %5908 = vst [vmem:[%s10899_s14 + $0x138] sm:$0xff] %v5844_v41 }
 0xe5c   :  { %5909 = vst [vmem:[%s10899_s14 + $0x140] sm:$0xff] %v5845_v49  ;;  %5910 = vst [vmem:[%s10899_s14 + $0x148] sm:$0xff] %v5846_v12 }
 0xe5d   :  { %5911 = vst [vmem:[%s10899_s14 + $0x150] sm:$0xff] %v5847_v37  ;;  %5912 = vst [vmem:[%s10899_s14 + $0x158] sm:$0xff] %v5848_v13 }
 0xe5e   :  { %5913 = vst [vmem:[%s10899_s14 + $0x160] sm:$0xff] %v5849_v63  ;;  %5914 = vst [vmem:[%s10899_s14 + $0x168] sm:$0xff] %v5850_v19 }
 0xe5f   :  { %5915 = vst [vmem:[%s10899_s14 + $0x170] sm:$0xff] %v5851_v33  ;;  %5916 = vst [vmem:[%s10899_s14 + $0x178] sm:$0xff] %v5852_v62 }
 0xe60   :  { %5917 = vst [vmem:[%s10899_s14 + $0x180] sm:$0xff] %v5853_v44  ;;  %5918 = vst [vmem:[%s10899_s14 + $0x188] sm:$0xff] %v5854_v14 }
 0xe61   :  { %5919 = vst [vmem:[%s10899_s14 + $0x190] sm:$0xff] %v5855_v59  ;;  %5920 = vst [vmem:[%s10899_s14 + $0x198] sm:$0xff] %v5856_v50 }
 0xe62   :  { %5921 = vst [vmem:[%s10899_s14 + $0x1a0] sm:$0xff] %v5857_v26  ;;  %5922 = vst [vmem:[%s10899_s14 + $0x1a8] sm:$0xff] %v5858_v55 }
 0xe63   :  { %5923 = vst [vmem:[%s10899_s14 + $0x1b0] sm:$0xff] %v5859_v48  ;;  %5924 = vst [vmem:[%s10899_s14 + $0x1b8] sm:$0xff] %v5860_v54 }
 0xe64   :  { %5925 = vst [vmem:[%s10899_s14 + $0x1c0] sm:$0xff] %v5861_v29  ;;  %5926 = vst [vmem:[%s10899_s14 + $0x1c8] sm:$0xff] %v5862_v4 }
 0xe65   :  { %5927 = vst [vmem:[%s10899_s14 + $0x1d0] sm:$0xff] %v5863_v46  ;;  %5928 = vst [vmem:[%s10899_s14 + $0x1d8] sm:$0xff] %v5864_v60 }
 0xe66   :  { %5929 = vst [vmem:[%s10899_s14 + $0x1e0] sm:$0xff] %v5865_v3  ;;  %5930 = vst [vmem:[%s10899_s14 + $0x1e8] sm:$0xff] %v5866_v9 }
 0xe67   :  { %5931 = vst [vmem:[%s10899_s14 + $0x1f0] sm:$0xff] %v5867_v5  ;;  %5932 = vst [vmem:[%s10899_s14 + $0x1f8] sm:$0xff] %v5868_v40 }

</bundles_post_ra>
